<compile_context>
chip_gen: v7x
topology: tpu7x:2x2x1
jax: 0.10.0
libtpu: 0.0.40
codegen_flags: <defaults>
</compile_context>

<pallas_src>
import functools

import jax
import jax.numpy as jnp
from jax.experimental import pallas as pl
from jax.experimental.pallas import tpu as pltpu


# ----------------------------------------------------------------------------
# Small helpers
# ----------------------------------------------------------------------------
_TM_MAX = 512                      # max M tile (fits easily with resident weights)
_VMEM_LIMIT = 32 * 1024 * 1024     # portable across v5e/v6e/v7x scoped-VMEM defaults


def _round_up(x, m):
    return (x + m - 1) // m * m


def _choose_tm(m):
    """M tile: multiple of 16 (bf16 sublane packing), capped at _TM_MAX, and sized so
    the M grid has >= 2 points whenever m is big enough (v7x has 2 TensorCores)."""
    mp16 = _round_up(m, 16)
    if mp16 <= 16:
        return mp16
    tm = _round_up((mp16 + 1) // 2, 16)
    return min(_TM_MAX, tm)


# ----------------------------------------------------------------------------
# Pallas kernels
# ----------------------------------------------------------------------------
def _matmul_bias_relu_kernel(a_ref, b_ref, bias_ref, o_ref):
    # a: (tm, Kp) bf16, b: (Kp, Np) bf16 (VMEM-resident), bias: (1, Np) f32.
    acc = jnp.dot(a_ref[...], b_ref[...], preferred_element_type=jnp.float32)
    o_ref[...] = jnp.maximum(acc + bias_ref[...], 0.0).astype(o_ref.dtype)


def matmul_bias_relu(a, b, bias, tm, out_dtype):
    """relu(a @ b + bias) on the MXU; weights/bias resident in VMEM, grid over M only.

    a: (Mp, Kp) bf16, b: (Kp, Np) bf16, bias: (1, Np) f32. All dims pre-padded:
    Mp % tm == 0, Kp % 128 == 0, Np % 128 == 0.
    """
    mp, kp = a.shape
    kp2, np_ = b.shape
    assert kp == kp2 and mp % tm == 0 and kp % 128 == 0 and np_ % 128 == 0

    grid = (mp // tm,)
    return pl.pallas_call(
        _matmul_bias_relu_kernel,
        out_shape=jax.ShapeDtypeStruct((mp, np_), out_dtype),
        grid_spec=pltpu.PrefetchScalarGridSpec(
            num_scalar_prefetch=0,
            grid=grid,
            in_specs=[
                pl.BlockSpec((tm, kp), lambda i: (i, 0)),
                pl.BlockSpec((kp, np_), lambda i: (0, 0)),   # resident weights
                pl.BlockSpec((1, np_), lambda i: (0, 0)),    # resident bias
            ],
            out_specs=pl.BlockSpec((tm, np_), lambda i: (i, 0)),
        ),
        compiler_params=pltpu.CompilerParams(
            dimension_semantics=("parallel",),
            vmem_limit_bytes=_VMEM_LIMIT,
        ),
    )(a, b, bias)


def _maxpool_kernel(x_ref, o_ref, s1_ref, s2_ref, *, ksize, stride):
    # x: (1, H, W, ct) bf16/f32, o: (1, OH, OW, ct); separable max over ksize x ksize.
    _, oh, ow, _ = o_ref.shape
    _, h, w, _ = x_ref.shape
    wslide = w - ksize + 1

    # Pass 1: single contiguous load, sliding max along W at every column (f32 VPU).
    x = x_ref[...].astype(jnp.float32)
    m = x[:, :, 0:wslide, :]
    for j in range(1, ksize):
        m = jnp.maximum(m, x[:, :, j:j + wslide, :])
    s1_ref[...] = m                                     # (1, H, W-k+1, ct) f32

    # Pass 2: stride-`stride` subsample along W (sublane-strided f32 ref read).
    wi = pl.ds(0, ow, stride) if ow > 1 else pl.ds(0, 1)
    s2_ref[...] = s1_ref[:, :, wi, :]                   # (1, H, OW, ct) f32

    # Pass 3: max over the H window (major-dim strided reads).
    acc = None
    for i in range(ksize):
        hi = pl.ds(i, oh, stride) if oh > 1 else pl.ds(i, 1)
        v = s2_ref[:, hi, :, :]
        acc = v if acc is None else jnp.maximum(acc, v)
    o_ref[...] = acc.astype(o_ref.dtype)


def maxpool2d(x_nhwc, ksize=3, stride=2):
    n, h, w, c = x_nhwc.shape
    oh = (h - ksize) // stride + 1
    ow = (w - ksize) // stride + 1
    ct = 128 if c % 128 == 0 else c            # lane-dense channel tile
    wslide = w - ksize + 1
    grid = (n, c // ct)
    return pl.pallas_call(
        functools.partial(_maxpool_kernel, ksize=ksize, stride=stride),
        out_shape=jax.ShapeDtypeStruct((n, oh, ow, c), x_nhwc.dtype),
        grid_spec=pltpu.PrefetchScalarGridSpec(
            num_scalar_prefetch=0,
            grid=grid,
            in_specs=[pl.BlockSpec((1, h, w, ct), lambda b, cc: (b, 0, 0, cc))],
            out_specs=pl.BlockSpec((1, oh, ow, ct), lambda b, cc: (b, 0, 0, cc)),
            scratch_shapes=[
                pltpu.VMEM((1, h, wslide, ct), jnp.float32),
                pltpu.VMEM((1, h, ow, ct), jnp.float32),
            ],
        ),
        compiler_params=pltpu.CompilerParams(
            dimension_semantics=("parallel", "parallel"),
            vmem_limit_bytes=_VMEM_LIMIT,
        ),
    )(x_nhwc)


# ----------------------------------------------------------------------------
# Plain-JAX glue: im2col matching PyTorch Conv2d semantics (runs in bf16)
# ----------------------------------------------------------------------------
def _im2col(x_nhwc, kh, kw, stride, pad):
    if pad:
        x_nhwc = jnp.pad(x_nhwc, ((0, 0), (pad, pad), (pad, pad), (0, 0)))
    n, h, w, c = x_nhwc.shape
    oh = (h - kh) // stride + 1
    ow = (w - kw) // stride + 1
    cols = []
    for i in range(kh):
        for j in range(kw):
            cols.append(
                x_nhwc[:, i:i + stride * (oh - 1) + 1:stride,
                          j:j + stride * (ow - 1) + 1:stride, :])
    patches = jnp.stack(cols, axis=3)              # (n, oh, ow, kh*kw, c)
    return patches.reshape(n * oh * ow, kh * kw * c), oh, ow


def conv2d_relu(x_nhwc, w_mat, bias_mat, cfg, out_dtype=jnp.bfloat16):
    """PyTorch Conv2d + ReLU via bf16 im2col + resident-weight Pallas MXU matmul."""
    cin, cout, k, stride, pad = cfg
    n = x_nhwc.shape[0]
    kdim = k * k * cin
    kp, np_ = w_mat.shape                           # pre-padded weight layout

    # Drop any carried channel padding; the slice fuses into the im2col gather copy.
    a, oh, ow = _im2col(x_nhwc[..., :cin], k, k, stride, pad)   # (M, kdim) bf16
    m = a.shape[0]
    tm = _choose_tm(m)
    mp = _round_up(m, tm)
    a = jnp.pad(a, ((0, mp - m), (0, kp - kdim)))   # zero-pad M (tile) and K (128)

    y = matmul_bias_relu(a, w_mat, bias_mat, tm=tm, out_dtype=out_dtype)  # (Mp, Np)
    # Keep the padded Np channels (lane-dense) for the downstream pool / next conv.
    return y[:m].reshape(n, oh, ow, np_)


# ----------------------------------------------------------------------------
# AlexNetFc forward (== torchvision AlexNet `features`)
# ----------------------------------------------------------------------------
ALEXNET_FEATURE_CFG = [
    # (cin, cout, kernel, stride, pad)
    (3, 64, 11, 4, 2),
    (64, 192, 5, 1, 2),
    (192, 384, 3, 1, 1),
    (384, 256, 3, 1, 1),
    (256, 256, 3, 1, 1),
]
POOL_AFTER = {0, 1, 4}   # MaxPool2d(3, 2) follows these conv indices


def init_params(key):
    # TODO(synk): pretrained torchvision AlexNet weights are not loadable here; use
    # deterministic synthetic normal weights with the correct shapes instead.
    params = []
    for (cin, cout, k, _s, _p) in ALEXNET_FEATURE_CFG:
        key, wk = jax.random.split(key)
        w = 0.01 * jax.random.normal(wk, (cout, cin, k, k), dtype=jnp.float32)
        b = jnp.zeros((cout,), dtype=jnp.float32)
        params.append((w, b))
    return params


def prepare_params(params):
    """One-time weight relayout: (Cout,Cin,kh,kw) -> zero-padded (Kp, Np) bf16 matrix."""
    prepped = []
    for (w, b), (cin, cout, k, _s, _p) in zip(params, ALEXNET_FEATURE_CFG):
        kdim = k * k * cin
        kp = _round_up(kdim, 128)                   # lane-multiple only (no TK rounding)
        np_ = _round_up(cout, 128)
        # im2col K ordering is (kh, kw, cin) -> reorder weight accordingly.
        wm = jnp.transpose(w, (2, 3, 1, 0)).reshape(kdim, cout)
        wm = jnp.pad(wm, ((0, kp - kdim), (0, np_ - cout))).astype(jnp.bfloat16)
        bm = jnp.pad(b, (0, np_ - cout)).reshape(1, np_).astype(jnp.float32)
        prepped.append((wm, bm))
    return prepped


def alexnet_fc_forward(prepped, x_nchw):
    # AlexNetFc.forward(x): x = self.feature_layers(x); return x  (NCHW features)
    x = jnp.transpose(x_nchw, (0, 2, 3, 1)).astype(jnp.bfloat16)   # NCHW -> NHWC bf16
    for idx, ((wm, bm), cfg) in enumerate(zip(prepped, ALEXNET_FEATURE_CFG)):
        x = conv2d_relu(x, wm, bm, cfg)
        if idx in POOL_AFTER:
            x = maxpool2d(x, ksize=3, stride=2)
    x = x[..., :ALEXNET_FEATURE_CFG[-1][1]]          # drop channel padding (no-op: 256)
    return jnp.transpose(x, (0, 3, 1, 2)).astype(jnp.float32)      # NCHW f32


if __name__ == "__main__":
    key = jax.random.PRNGKey(0)
    pkey, xkey = jax.random.split(key)
    params = init_params(pkey)
    prepped = prepare_params(params)                 # weight relayout done once

    # Smallest spatial size that survives the AlexNet feature stack: 63x63.
    x = jax.random.normal(xkey, (2, 3, 63, 63), dtype=jnp.float32)

    fwd = jax.jit(alexnet_fc_forward)
    out = jax.block_until_ready(fwd(prepped, x))

    assert out.shape == (2, 256, 1, 1), out.shape
    assert out.dtype == jnp.float32
    assert bool(jnp.all(jnp.isfinite(out)))
    print("KERNEL_OK")
</pallas_src>

<mosaic_0001>
module attributes {stable_mosaic.version = 11 : i64} {
  func.func @_matmul_bias_relu_kernel(%arg0: i32, %arg1: memref<240x384xbf16, #tpu.memory_space<vmem>>, %arg2: memref<384x128xbf16, #tpu.memory_space<vmem>>, %arg3: memref<1x128xf32, #tpu.memory_space<vmem>>, %arg4: memref<240x128xbf16, #tpu.memory_space<vmem>>) attributes {dimension_semantics = [#tpu.dimension_semantics<parallel>], iteration_bounds = array<i64: 2>, scalar_prefetch = 0 : i64, scratch_operands = 0 : i64, tpu.core_type = #tpu.core_type<tc>, window_params = [{transform_indices = @transform_0, window_bounds = array<i64: 240, 384>}, {pipeline_mode = #tpu.pipeline_mode<synchronous>, transform_indices = @transform_1, window_bounds = array<i64: 384, 128>}, {pipeline_mode = #tpu.pipeline_mode<synchronous>, transform_indices = @transform_2, window_bounds = array<i64: 1, 128>}, {transform_indices = @transform_3, window_bounds = array<i64: 240, 128>}]} {
    %c0 = arith.constant 0 : index
    %c0_0 = arith.constant 0 : index
    %0 = vector.load %arg1[%c0, %c0_0] : memref<240x384xbf16, #tpu.memory_space<vmem>>, vector<240x384xbf16>
    %c0_1 = arith.constant 0 : index
    %c0_2 = arith.constant 0 : index
    %1 = vector.load %arg2[%c0_1, %c0_2] : memref<384x128xbf16, #tpu.memory_space<vmem>>, vector<384x128xbf16>
    %cst = arith.constant dense<0.000000e+00> : vector<240x128xf32>
    %2 = tpu.matmul %0, %1, %cst {dimension_numbers = #tpu.dot_dimension_numbers<[1], [0], [0], [1], [0, 0, 1, 1], [], []>} : vector<240x384xbf16>, vector<384x128xbf16>, vector<240x128xf32> -> vector<240x128xf32>
    %c0_3 = arith.constant 0 : index
    %c0_4 = arith.constant 0 : index
    %3 = vector.load %arg3[%c0_3, %c0_4] : memref<1x128xf32, #tpu.memory_space<vmem>>, vector<1x128xf32>
    %4 = vector.broadcast %3 : vector<1x128xf32> to vector<240x128xf32>
    %5 = arith.addf %2, %4 : vector<240x128xf32>
    %cst_5 = arith.constant 0.000000e+00 : f32
    %6 = vector.broadcast %cst_5 : f32 to vector<240x128xf32>
    %7 = arith.maximumf %5, %6 : vector<240x128xf32>
    %8 = arith.truncf %7 : vector<240x128xf32> to vector<240x128xbf16>
    %c0_6 = arith.constant 0 : index
    %c0_7 = arith.constant 0 : index
    %9 = vector.load %arg4[%c0_6, %c0_7] : memref<240x128xbf16, #tpu.memory_space<vmem>>, vector<240x128xbf16>
    tpu.vector_store %arg4[%c0_6, %c0_7], %8 {strides = array<i32>} : memref<240x128xbf16, #tpu.memory_space<vmem>>, vector<240x128xbf16>,
    return
  }
  func.func @transform_0(%arg0: i32) -> (i32, i32) {
    %c0_i32 = arith.constant 0 : i32
    %c0_i32_0 = arith.constant 0 : i32
    return %arg0, %c0_i32 : i32, i32
  }
  func.func @transform_1(%arg0: i32) -> (i32, i32) {
    %c0_i32 = arith.constant 0 : i32
    %c0_i32_0 = arith.constant 0 : i32
    %c0_i32_1 = arith.constant 0 : i32
    return %c0_i32, %c0_i32_0 : i32, i32
  }
  func.func @transform_2(%arg0: i32) -> (i32, i32) {
    %c0_i32 = arith.constant 0 : i32
    %c0_i32_0 = arith.constant 0 : i32
    %c0_i32_1 = arith.constant 0 : i32
    return %c0_i32, %c0_i32_0 : i32, i32
  }
  func.func @transform_3(%arg0: i32) -> (i32, i32) {
    %c0_i32 = arith.constant 0 : i32
    %c0_i32_0 = arith.constant 0 : i32
    return %arg0, %c0_i32 : i32, i32
  }
}

module attributes {stable_mosaic.version = 11 : i64} {
  func.func @_maxpool_kernel(%arg0: i32, %arg1: i32, %arg2: memref<1x15x15x128xbf16, #tpu.memory_space<vmem>>, %arg3: memref<1x7x7x128xbf16, #tpu.memory_space<vmem>>, %arg4: memref<1x15x13x128xf32, #tpu.memory_space<vmem>>, %arg5: memref<1x15x7x128xf32, #tpu.memory_space<vmem>>) attributes {dimension_semantics = [#tpu.dimension_semantics<parallel>, #tpu.dimension_semantics<parallel>], iteration_bounds = array<i64: 2, 1>, scalar_prefetch = 0 : i64, scratch_operands = 2 : i64, tpu.core_type = #tpu.core_type<tc>, window_params = [{transform_indices = @transform_0, window_bounds = array<i64: 1, 15, 15, 128>}, {transform_indices = @transform_1, window_bounds = array<i64: 1, 7, 7, 128>}]} {
    %c0 = arith.constant 0 : index
    %c0_0 = arith.constant 0 : index
    %c0_1 = arith.constant 0 : index
    %c0_2 = arith.constant 0 : index
    %0 = vector.load %arg2[%c0, %c0_0, %c0_1, %c0_2] : memref<1x15x15x128xbf16, #tpu.memory_space<vmem>>, vector<1x15x15x128xbf16>
    %1 = arith.extf %0 : vector<1x15x15x128xbf16> to vector<1x15x15x128xf32>
    %2 = vector.extract_strided_slice %1 {offsets = [0, 0, 0, 0], sizes = [1, 15, 13, 128], strides = [1, 1, 1, 1]} : vector<1x15x15x128xf32> to vector<1x15x13x128xf32>
    %3 = vector.extract_strided_slice %1 {offsets = [0, 0, 1, 0], sizes = [1, 15, 13, 128], strides = [1, 1, 1, 1]} : vector<1x15x15x128xf32> to vector<1x15x13x128xf32>
    %4 = arith.maximumf %2, %3 : vector<1x15x13x128xf32>
    %5 = vector.extract_strided_slice %1 {offsets = [0, 0, 2, 0], sizes = [1, 15, 13, 128], strides = [1, 1, 1, 1]} : vector<1x15x15x128xf32> to vector<1x15x13x128xf32>
    %6 = arith.maximumf %4, %5 : vector<1x15x13x128xf32>
    %c0_3 = arith.constant 0 : index
    %c0_4 = arith.constant 0 : index
    %c0_5 = arith.constant 0 : index
    %c0_6 = arith.constant 0 : index
    %7 = vector.load %arg4[%c0_3, %c0_4, %c0_5, %c0_6] : memref<1x15x13x128xf32, #tpu.memory_space<vmem>>, vector<1x15x13x128xf32>
    tpu.vector_store %arg4[%c0_3, %c0_4, %c0_5, %c0_6], %6 {strides = array<i32>} : memref<1x15x13x128xf32, #tpu.memory_space<vmem>>, vector<1x15x13x128xf32>,
    %c0_7 = arith.constant 0 : index
    %c0_8 = arith.constant 0 : index
    %c0_9 = arith.constant 0 : index
    %c0_10 = arith.constant 0 : index
    %8 = tpu.strided_load %arg4[%c0_7, %c0_8, %c0_9, %c0_10] {strides = array<i32: 1, 1, 2, 1>} : memref<1x15x13x128xf32, #tpu.memory_space<vmem>>, vector<1x15x7x128xf32>
    %c0_11 = arith.constant 0 : index
    %c0_12 = arith.constant 0 : index
    %c0_13 = arith.constant 0 : index
    %c0_14 = arith.constant 0 : index
    %9 = vector.load %arg5[%c0_11, %c0_12, %c0_13, %c0_14] : memref<1x15x7x128xf32, #tpu.memory_space<vmem>>, vector<1x15x7x128xf32>
    tpu.vector_store %arg5[%c0_11, %c0_12, %c0_13, %c0_14], %8 {strides = array<i32>} : memref<1x15x7x128xf32, #tpu.memory_space<vmem>>, vector<1x15x7x128xf32>,
    %c0_15 = arith.constant 0 : index
    %c0_16 = arith.constant 0 : index
    %c0_17 = arith.constant 0 : index
    %c0_18 = arith.constant 0 : index
    %10 = tpu.strided_load %arg5[%c0_15, %c0_16, %c0_17, %c0_18] {strides = array<i32: 1, 2, 1, 1>} : memref<1x15x7x128xf32, #tpu.memory_space<vmem>>, vector<1x7x7x128xf32>
    %c0_19 = arith.constant 0 : index
    %c1 = arith.constant 1 : index
    %c0_20 = arith.constant 0 : index
    %c0_21 = arith.constant 0 : index
    %11 = tpu.strided_load %arg5[%c0_19, %c1, %c0_20, %c0_21] {strides = array<i32: 1, 2, 1, 1>} : memref<1x15x7x128xf32, #tpu.memory_space<vmem>>, vector<1x7x7x128xf32>
    %12 = arith.maximumf %10, %11 : vector<1x7x7x128xf32>
    %c0_22 = arith.constant 0 : index
    %c2 = arith.constant 2 : index
    %c0_23 = arith.constant 0 : index
    %c0_24 = arith.constant 0 : index
    %13 = tpu.strided_load %arg5[%c0_22, %c2, %c0_23, %c0_24] {strides = array<i32: 1, 2, 1, 1>} : memref<1x15x7x128xf32, #tpu.memory_space<vmem>>, vector<1x7x7x128xf32>
    %14 = arith.maximumf %12, %13 : vector<1x7x7x128xf32>
    %15 = arith.truncf %14 : vector<1x7x7x128xf32> to vector<1x7x7x128xbf16>
    %c0_25 = arith.constant 0 : index
    %c0_26 = arith.constant 0 : index
    %c0_27 = arith.constant 0 : index
    %c0_28 = arith.constant 0 : index
    %16 = vector.load %arg3[%c0_25, %c0_26, %c0_27, %c0_28] : memref<1x7x7x128xbf16, #tpu.memory_space<vmem>>, vector<1x7x7x128xbf16>
    tpu.vector_store %arg3[%c0_25, %c0_26, %c0_27, %c0_28], %15 {strides = array<i32>} : memref<1x7x7x128xbf16, #tpu.memory_space<vmem>>, vector<1x7x7x128xbf16>,
    return
  }
  func.func @transform_0(%arg0: i32, %arg1: i32) -> (i32, i32, i32, i32) {
    %c0_i32 = arith.constant 0 : i32
    %c0_i32_0 = arith.constant 0 : i32
    %c0_i32_1 = arith.constant 0 : i32
    return %arg0, %c0_i32, %c0_i32_0, %arg1 : i32, i32, i32, i32
  }
  func.func @transform_1(%arg0: i32, %arg1: i32) -> (i32, i32, i32, i32) {
    %c0_i32 = arith.constant 0 : i32
    %c0_i32_0 = arith.constant 0 : i32
    %c0_i32_1 = arith.constant 0 : i32
    return %arg0, %c0_i32, %c0_i32_0, %arg1 : i32, i32, i32, i32
  }
}

module attributes {stable_mosaic.version = 11 : i64} {
  func.func @_matmul_bias_relu_kernel(%arg0: i32, %arg1: memref<64x1664xbf16, #tpu.memory_space<vmem>>, %arg2: memref<1664x256xbf16, #tpu.memory_space<vmem>>, %arg3: memref<1x256xf32, #tpu.memory_space<vmem>>, %arg4: memref<64x256xbf16, #tpu.memory_space<vmem>>) attributes {dimension_semantics = [#tpu.dimension_semantics<parallel>], iteration_bounds = array<i64: 2>, scalar_prefetch = 0 : i64, scratch_operands = 0 : i64, tpu.core_type = #tpu.core_type<tc>, window_params = [{transform_indices = @transform_0, window_bounds = array<i64: 64, 1664>}, {pipeline_mode = #tpu.pipeline_mode<synchronous>, transform_indices = @transform_1, window_bounds = array<i64: 1664, 256>}, {pipeline_mode = #tpu.pipeline_mode<synchronous>, transform_indices = @transform_2, window_bounds = array<i64: 1, 256>}, {transform_indices = @transform_3, window_bounds = array<i64: 64, 256>}]} {
    %c0 = arith.constant 0 : index
    %c0_0 = arith.constant 0 : index
    %0 = vector.load %arg1[%c0, %c0_0] : memref<64x1664xbf16, #tpu.memory_space<vmem>>, vector<64x1664xbf16>
    %c0_1 = arith.constant 0 : index
    %c0_2 = arith.constant 0 : index
    %1 = vector.load %arg2[%c0_1, %c0_2] : memref<1664x256xbf16, #tpu.memory_space<vmem>>, vector<1664x256xbf16>
    %cst = arith.constant dense<0.000000e+00> : vector<64x256xf32>
    %2 = tpu.matmul %0, %1, %cst {dimension_numbers = #tpu.dot_dimension_numbers<[1], [0], [0], [1], [0, 0, 1, 1], [], []>} : vector<64x1664xbf16>, vector<1664x256xbf16>, vector<64x256xf32> -> vector<64x256xf32>
    %c0_3 = arith.constant 0 : index
    %c0_4 = arith.constant 0 : index
    %3 = vector.load %arg3[%c0_3, %c0_4] : memref<1x256xf32, #tpu.memory_space<vmem>>, vector<1x256xf32>
    %4 = vector.broadcast %3 : vector<1x256xf32> to vector<64x256xf32>
    %5 = arith.addf %2, %4 : vector<64x256xf32>
    %cst_5 = arith.constant 0.000000e+00 : f32
    %6 = vector.broadcast %cst_5 : f32 to vector<64x256xf32>
    %7 = arith.maximumf %5, %6 : vector<64x256xf32>
    %8 = arith.truncf %7 : vector<64x256xf32> to vector<64x256xbf16>
    %c0_6 = arith.constant 0 : index
    %c0_7 = arith.constant 0 : index
    %9 = vector.load %arg4[%c0_6, %c0_7] : memref<64x256xbf16, #tpu.memory_space<vmem>>, vector<64x256xbf16>
    tpu.vector_store %arg4[%c0_6, %c0_7], %8 {strides = array<i32>} : memref<64x256xbf16, #tpu.memory_space<vmem>>, vector<64x256xbf16>,
    return
  }
  func.func @transform_0(%arg0: i32) -> (i32, i32) {
    %c0_i32 = arith.constant 0 : i32
    %c0_i32_0 = arith.constant 0 : i32
    return %arg0, %c0_i32 : i32, i32
  }
  func.func @transform_1(%arg0: i32) -> (i32, i32) {
    %c0_i32 = arith.constant 0 : i32
    %c0_i32_0 = arith.constant 0 : i32
    %c0_i32_1 = arith.constant 0 : i32
    return %c0_i32, %c0_i32_0 : i32, i32
  }
  func.func @transform_2(%arg0: i32) -> (i32, i32) {
    %c0_i32 = arith.constant 0 : i32
    %c0_i32_0 = arith.constant 0 : i32
    %c0_i32_1 = arith.constant 0 : i32
    return %c0_i32, %c0_i32_0 : i32, i32
  }
  func.func @transform_3(%arg0: i32) -> (i32, i32) {
    %c0_i32 = arith.constant 0 : i32
    %c0_i32_0 = arith.constant 0 : i32
    return %arg0, %c0_i32 : i32, i32
  }
}

module attributes {stable_mosaic.version = 11 : i64} {
  func.func @_maxpool_kernel(%arg0: i32, %arg1: i32, %arg2: memref<1x7x7x128xbf16, #tpu.memory_space<vmem>>, %arg3: memref<1x3x3x128xbf16, #tpu.memory_space<vmem>>, %arg4: memref<1x7x5x128xf32, #tpu.memory_space<vmem>>, %arg5: memref<1x7x3x128xf32, #tpu.memory_space<vmem>>) attributes {dimension_semantics = [#tpu.dimension_semantics<parallel>, #tpu.dimension_semantics<parallel>], iteration_bounds = array<i64: 2, 2>, scalar_prefetch = 0 : i64, scratch_operands = 2 : i64, tpu.core_type = #tpu.core_type<tc>, window_params = [{transform_indices = @transform_0, window_bounds = array<i64: 1, 7, 7, 128>}, {transform_indices = @transform_1, window_bounds = array<i64: 1, 3, 3, 128>}]} {
    %c0 = arith.constant 0 : index
    %c0_0 = arith.constant 0 : index
    %c0_1 = arith.constant 0 : index
    %c0_2 = arith.constant 0 : index
    %0 = vector.load %arg2[%c0, %c0_0, %c0_1, %c0_2] : memref<1x7x7x128xbf16, #tpu.memory_space<vmem>>, vector<1x7x7x128xbf16>
    %1 = arith.extf %0 : vector<1x7x7x128xbf16> to vector<1x7x7x128xf32>
    %2 = vector.extract_strided_slice %1 {offsets = [0, 0, 0, 0], sizes = [1, 7, 5, 128], strides = [1, 1, 1, 1]} : vector<1x7x7x128xf32> to vector<1x7x5x128xf32>
    %3 = vector.extract_strided_slice %1 {offsets = [0, 0, 1, 0], sizes = [1, 7, 5, 128], strides = [1, 1, 1, 1]} : vector<1x7x7x128xf32> to vector<1x7x5x128xf32>
    %4 = arith.maximumf %2, %3 : vector<1x7x5x128xf32>
    %5 = vector.extract_strided_slice %1 {offsets = [0, 0, 2, 0], sizes = [1, 7, 5, 128], strides = [1, 1, 1, 1]} : vector<1x7x7x128xf32> to vector<1x7x5x128xf32>
    %6 = arith.maximumf %4, %5 : vector<1x7x5x128xf32>
    %c0_3 = arith.constant 0 : index
    %c0_4 = arith.constant 0 : index
    %c0_5 = arith.constant 0 : index
    %c0_6 = arith.constant 0 : index
    %7 = vector.load %arg4[%c0_3, %c0_4, %c0_5, %c0_6] : memref<1x7x5x128xf32, #tpu.memory_space<vmem>>, vector<1x7x5x128xf32>
    tpu.vector_store %arg4[%c0_3, %c0_4, %c0_5, %c0_6], %6 {strides = array<i32>} : memref<1x7x5x128xf32, #tpu.memory_space<vmem>>, vector<1x7x5x128xf32>,
    %c0_7 = arith.constant 0 : index
    %c0_8 = arith.constant 0 : index
    %c0_9 = arith.constant 0 : index
    %c0_10 = arith.constant 0 : index
    %8 = tpu.strided_load %arg4[%c0_7, %c0_8, %c0_9, %c0_10] {strides = array<i32: 1, 1, 2, 1>} : memref<1x7x5x128xf32, #tpu.memory_space<vmem>>, vector<1x7x3x128xf32>
    %c0_11 = arith.constant 0 : index
    %c0_12 = arith.constant 0 : index
    %c0_13 = arith.constant 0 : index
    %c0_14 = arith.constant 0 : index
    %9 = vector.load %arg5[%c0_11, %c0_12, %c0_13, %c0_14] : memref<1x7x3x128xf32, #tpu.memory_space<vmem>>, vector<1x7x3x128xf32>
    tpu.vector_store %arg5[%c0_11, %c0_12, %c0_13, %c0_14], %8 {strides = array<i32>} : memref<1x7x3x128xf32, #tpu.memory_space<vmem>>, vector<1x7x3x128xf32>,
    %c0_15 = arith.constant 0 : index
    %c0_16 = arith.constant 0 : index
    %c0_17 = arith.constant 0 : index
    %c0_18 = arith.constant 0 : index
    %10 = tpu.strided_load %arg5[%c0_15, %c0_16, %c0_17, %c0_18] {strides = array<i32: 1, 2, 1, 1>} : memref<1x7x3x128xf32, #tpu.memory_space<vmem>>, vector<1x3x3x128xf32>
    %c0_19 = arith.constant 0 : index
    %c1 = arith.constant 1 : index
    %c0_20 = arith.constant 0 : index
    %c0_21 = arith.constant 0 : index
    %11 = tpu.strided_load %arg5[%c0_19, %c1, %c0_20, %c0_21] {strides = array<i32: 1, 2, 1, 1>} : memref<1x7x3x128xf32, #tpu.memory_space<vmem>>, vector<1x3x3x128xf32>
    %12 = arith.maximumf %10, %11 : vector<1x3x3x128xf32>
    %c0_22 = arith.constant 0 : index
    %c2 = arith.constant 2 : index
    %c0_23 = arith.constant 0 : index
    %c0_24 = arith.constant 0 : index
    %13 = tpu.strided_load %arg5[%c0_22, %c2, %c0_23, %c0_24] {strides = array<i32: 1, 2, 1, 1>} : memref<1x7x3x128xf32, #tpu.memory_space<vmem>>, vector<1x3x3x128xf32>
    %14 = arith.maximumf %12, %13 : vector<1x3x3x128xf32>
    %15 = arith.truncf %14 : vector<1x3x3x128xf32> to vector<1x3x3x128xbf16>
    %c0_25 = arith.constant 0 : index
    %c0_26 = arith.constant 0 : index
    %c0_27 = arith.constant 0 : index
    %c0_28 = arith.constant 0 : index
    %16 = vector.load %arg3[%c0_25, %c0_26, %c0_27, %c0_28] : memref<1x3x3x128xbf16, #tpu.memory_space<vmem>>, vector<1x3x3x128xbf16>
    tpu.vector_store %arg3[%c0_25, %c0_26, %c0_27, %c0_28], %15 {strides = array<i32>} : memref<1x3x3x128xbf16, #tpu.memory_space<vmem>>, vector<1x3x3x128xbf16>,
    return
  }
  func.func @transform_0(%arg0: i32, %arg1: i32) -> (i32, i32, i32, i32) {
    %c0_i32 = arith.constant 0 : i32
    %c0_i32_0 = arith.constant 0 : i32
    %c0_i32_1 = arith.constant 0 : i32
    return %arg0, %c0_i32, %c0_i32_0, %arg1 : i32, i32, i32, i32
  }
  func.func @transform_1(%arg0: i32, %arg1: i32) -> (i32, i32, i32, i32) {
    %c0_i32 = arith.constant 0 : i32
    %c0_i32_0 = arith.constant 0 : i32
    %c0_i32_1 = arith.constant 0 : i32
    return %arg0, %c0_i32, %c0_i32_0, %arg1 : i32, i32, i32, i32
  }
}

module attributes {stable_mosaic.version = 11 : i64} {
  func.func @_matmul_bias_relu_kernel(%arg0: i32, %arg1: memref<16x1792xbf16, #tpu.memory_space<vmem>>, %arg2: memref<1792x384xbf16, #tpu.memory_space<vmem>>, %arg3: memref<1x384xf32, #tpu.memory_space<vmem>>, %arg4: memref<16x384xbf16, #tpu.memory_space<vmem>>) attributes {dimension_semantics = [#tpu.dimension_semantics<parallel>], iteration_bounds = array<i64: 2>, scalar_prefetch = 0 : i64, scratch_operands = 0 : i64, tpu.core_type = #tpu.core_type<tc>, window_params = [{transform_indices = @transform_0, window_bounds = array<i64: 16, 1792>}, {pipeline_mode = #tpu.pipeline_mode<synchronous>, transform_indices = @transform_1, window_bounds = array<i64: 1792, 384>}, {pipeline_mode = #tpu.pipeline_mode<synchronous>, transform_indices = @transform_2, window_bounds = array<i64: 1, 384>}, {transform_indices = @transform_3, window_bounds = array<i64: 16, 384>}]} {
    %c0 = arith.constant 0 : index
    %c0_0 = arith.constant 0 : index
    %0 = vector.load %arg1[%c0, %c0_0] : memref<16x1792xbf16, #tpu.memory_space<vmem>>, vector<16x1792xbf16>
    %c0_1 = arith.constant 0 : index
    %c0_2 = arith.constant 0 : index
    %1 = vector.load %arg2[%c0_1, %c0_2] : memref<1792x384xbf16, #tpu.memory_space<vmem>>, vector<1792x384xbf16>
    %cst = arith.constant dense<0.000000e+00> : vector<16x384xf32>
    %2 = tpu.matmul %0, %1, %cst {dimension_numbers = #tpu.dot_dimension_numbers<[1], [0], [0], [1], [0, 0, 1, 1], [], []>} : vector<16x1792xbf16>, vector<1792x384xbf16>, vector<16x384xf32> -> vector<16x384xf32>
    %c0_3 = arith.constant 0 : index
    %c0_4 = arith.constant 0 : index
    %3 = vector.load %arg3[%c0_3, %c0_4] : memref<1x384xf32, #tpu.memory_space<vmem>>, vector<1x384xf32>
    %4 = vector.broadcast %3 : vector<1x384xf32> to vector<16x384xf32>
    %5 = arith.addf %2, %4 : vector<16x384xf32>
    %cst_5 = arith.constant 0.000000e+00 : f32
    %6 = vector.broadcast %cst_5 : f32 to vector<16x384xf32>
    %7 = arith.maximumf %5, %6 : vector<16x384xf32>
    %8 = arith.truncf %7 : vector<16x384xf32> to vector<16x384xbf16>
    %c0_6 = arith.constant 0 : index
    %c0_7 = arith.constant 0 : index
    %9 = vector.load %arg4[%c0_6, %c0_7] : memref<16x384xbf16, #tpu.memory_space<vmem>>, vector<16x384xbf16>
    tpu.vector_store %arg4[%c0_6, %c0_7], %8 {strides = array<i32>} : memref<16x384xbf16, #tpu.memory_space<vmem>>, vector<16x384xbf16>,
    return
  }
  func.func @transform_0(%arg0: i32) -> (i32, i32) {
    %c0_i32 = arith.constant 0 : i32
    %c0_i32_0 = arith.constant 0 : i32
    return %arg0, %c0_i32 : i32, i32
  }
  func.func @transform_1(%arg0: i32) -> (i32, i32) {
    %c0_i32 = arith.constant 0 : i32
    %c0_i32_0 = arith.constant 0 : i32
    %c0_i32_1 = arith.constant 0 : i32
    return %c0_i32, %c0_i32_0 : i32, i32
  }
  func.func @transform_2(%arg0: i32) -> (i32, i32) {
    %c0_i32 = arith.constant 0 : i32
    %c0_i32_0 = arith.constant 0 : i32
    %c0_i32_1 = arith.constant 0 : i32
    return %c0_i32, %c0_i32_0 : i32, i32
  }
  func.func @transform_3(%arg0: i32) -> (i32, i32) {
    %c0_i32 = arith.constant 0 : i32
    %c0_i32_0 = arith.constant 0 : i32
    return %arg0, %c0_i32 : i32, i32
  }
}

module attributes {stable_mosaic.version = 11 : i64} {
  func.func @_matmul_bias_relu_kernel(%arg0: i32, %arg1: memref<16x3456xbf16, #tpu.memory_space<vmem>>, %arg2: memref<3456x256xbf16, #tpu.memory_space<vmem>>, %arg3: memref<1x256xf32, #tpu.memory_space<vmem>>, %arg4: memref<16x256xbf16, #tpu.memory_space<vmem>>) attributes {dimension_semantics = [#tpu.dimension_semantics<parallel>], iteration_bounds = array<i64: 2>, scalar_prefetch = 0 : i64, scratch_operands = 0 : i64, tpu.core_type = #tpu.core_type<tc>, window_params = [{transform_indices = @transform_0, window_bounds = array<i64: 16, 3456>}, {pipeline_mode = #tpu.pipeline_mode<synchronous>, transform_indices = @transform_1, window_bounds = array<i64: 3456, 256>}, {pipeline_mode = #tpu.pipeline_mode<synchronous>, transform_indices = @transform_2, window_bounds = array<i64: 1, 256>}, {transform_indices = @transform_3, window_bounds = array<i64: 16, 256>}]} {
    %c0 = arith.constant 0 : index
    %c0_0 = arith.constant 0 : index
    %0 = vector.load %arg1[%c0, %c0_0] : memref<16x3456xbf16, #tpu.memory_space<vmem>>, vector<16x3456xbf16>
    %c0_1 = arith.constant 0 : index
    %c0_2 = arith.constant 0 : index
    %1 = vector.load %arg2[%c0_1, %c0_2] : memref<3456x256xbf16, #tpu.memory_space<vmem>>, vector<3456x256xbf16>
    %cst = arith.constant dense<0.000000e+00> : vector<16x256xf32>
    %2 = tpu.matmul %0, %1, %cst {dimension_numbers = #tpu.dot_dimension_numbers<[1], [0], [0], [1], [0, 0, 1, 1], [], []>} : vector<16x3456xbf16>, vector<3456x256xbf16>, vector<16x256xf32> -> vector<16x256xf32>
    %c0_3 = arith.constant 0 : index
    %c0_4 = arith.constant 0 : index
    %3 = vector.load %arg3[%c0_3, %c0_4] : memref<1x256xf32, #tpu.memory_space<vmem>>, vector<1x256xf32>
    %4 = vector.broadcast %3 : vector<1x256xf32> to vector<16x256xf32>
    %5 = arith.addf %2, %4 : vector<16x256xf32>
    %cst_5 = arith.constant 0.000000e+00 : f32
    %6 = vector.broadcast %cst_5 : f32 to vector<16x256xf32>
    %7 = arith.maximumf %5, %6 : vector<16x256xf32>
    %8 = arith.truncf %7 : vector<16x256xf32> to vector<16x256xbf16>
    %c0_6 = arith.constant 0 : index
    %c0_7 = arith.constant 0 : index
    %9 = vector.load %arg4[%c0_6, %c0_7] : memref<16x256xbf16, #tpu.memory_space<vmem>>, vector<16x256xbf16>
    tpu.vector_store %arg4[%c0_6, %c0_7], %8 {strides = array<i32>} : memref<16x256xbf16, #tpu.memory_space<vmem>>, vector<16x256xbf16>,
    return
  }
  func.func @transform_0(%arg0: i32) -> (i32, i32) {
    %c0_i32 = arith.constant 0 : i32
    %c0_i32_0 = arith.constant 0 : i32
    return %arg0, %c0_i32 : i32, i32
  }
  func.func @transform_1(%arg0: i32) -> (i32, i32) {
    %c0_i32 = arith.constant 0 : i32
    %c0_i32_0 = arith.constant 0 : i32
    %c0_i32_1 = arith.constant 0 : i32
    return %c0_i32, %c0_i32_0 : i32, i32
  }
  func.func @transform_2(%arg0: i32) -> (i32, i32) {
    %c0_i32 = arith.constant 0 : i32
    %c0_i32_0 = arith.constant 0 : i32
    %c0_i32_1 = arith.constant 0 : i32
    return %c0_i32, %c0_i32_0 : i32, i32
  }
  func.func @transform_3(%arg0: i32) -> (i32, i32) {
    %c0_i32 = arith.constant 0 : i32
    %c0_i32_0 = arith.constant 0 : i32
    return %arg0, %c0_i32 : i32, i32
  }
}

module attributes {stable_mosaic.version = 11 : i64} {
  func.func @_matmul_bias_relu_kernel(%arg0: i32, %arg1: memref<16x2304xbf16, #tpu.memory_space<vmem>>, %arg2: memref<2304x256xbf16, #tpu.memory_space<vmem>>, %arg3: memref<1x256xf32, #tpu.memory_space<vmem>>, %arg4: memref<16x256xbf16, #tpu.memory_space<vmem>>) attributes {dimension_semantics = [#tpu.dimension_semantics<parallel>], iteration_bounds = array<i64: 2>, scalar_prefetch = 0 : i64, scratch_operands = 0 : i64, tpu.core_type = #tpu.core_type<tc>, window_params = [{transform_indices = @transform_0, window_bounds = array<i64: 16, 2304>}, {pipeline_mode = #tpu.pipeline_mode<synchronous>, transform_indices = @transform_1, window_bounds = array<i64: 2304, 256>}, {pipeline_mode = #tpu.pipeline_mode<synchronous>, transform_indices = @transform_2, window_bounds = array<i64: 1, 256>}, {transform_indices = @transform_3, window_bounds = array<i64: 16, 256>}]} {
    %c0 = arith.constant 0 : index
    %c0_0 = arith.constant 0 : index
    %0 = vector.load %arg1[%c0, %c0_0] : memref<16x2304xbf16, #tpu.memory_space<vmem>>, vector<16x2304xbf16>
    %c0_1 = arith.constant 0 : index
    %c0_2 = arith.constant 0 : index
    %1 = vector.load %arg2[%c0_1, %c0_2] : memref<2304x256xbf16, #tpu.memory_space<vmem>>, vector<2304x256xbf16>
    %cst = arith.constant dense<0.000000e+00> : vector<16x256xf32>
    %2 = tpu.matmul %0, %1, %cst {dimension_numbers = #tpu.dot_dimension_numbers<[1], [0], [0], [1], [0, 0, 1, 1], [], []>} : vector<16x2304xbf16>, vector<2304x256xbf16>, vector<16x256xf32> -> vector<16x256xf32>
    %c0_3 = arith.constant 0 : index
    %c0_4 = arith.constant 0 : index
    %3 = vector.load %arg3[%c0_3, %c0_4] : memref<1x256xf32, #tpu.memory_space<vmem>>, vector<1x256xf32>
    %4 = vector.broadcast %3 : vector<1x256xf32> to vector<16x256xf32>
    %5 = arith.addf %2, %4 : vector<16x256xf32>
    %cst_5 = arith.constant 0.000000e+00 : f32
    %6 = vector.broadcast %cst_5 : f32 to vector<16x256xf32>
    %7 = arith.maximumf %5, %6 : vector<16x256xf32>
    %8 = arith.truncf %7 : vector<16x256xf32> to vector<16x256xbf16>
    %c0_6 = arith.constant 0 : index
    %c0_7 = arith.constant 0 : index
    %9 = vector.load %arg4[%c0_6, %c0_7] : memref<16x256xbf16, #tpu.memory_space<vmem>>, vector<16x256xbf16>
    tpu.vector_store %arg4[%c0_6, %c0_7], %8 {strides = array<i32>} : memref<16x256xbf16, #tpu.memory_space<vmem>>, vector<16x256xbf16>,
    return
  }
  func.func @transform_0(%arg0: i32) -> (i32, i32) {
    %c0_i32 = arith.constant 0 : i32
    %c0_i32_0 = arith.constant 0 : i32
    return %arg0, %c0_i32 : i32, i32
  }
  func.func @transform_1(%arg0: i32) -> (i32, i32) {
    %c0_i32 = arith.constant 0 : i32
    %c0_i32_0 = arith.constant 0 : i32
    %c0_i32_1 = arith.constant 0 : i32
    return %c0_i32, %c0_i32_0 : i32, i32
  }
  func.func @transform_2(%arg0: i32) -> (i32, i32) {
    %c0_i32 = arith.constant 0 : i32
    %c0_i32_0 = arith.constant 0 : i32
    %c0_i32_1 = arith.constant 0 : i32
    return %c0_i32, %c0_i32_0 : i32, i32
  }
  func.func @transform_3(%arg0: i32) -> (i32, i32) {
    %c0_i32 = arith.constant 0 : i32
    %c0_i32_0 = arith.constant 0 : i32
    return %arg0, %c0_i32 : i32, i32
  }
}

module attributes {stable_mosaic.version = 11 : i64} {
  func.func @_maxpool_kernel(%arg0: i32, %arg1: i32, %arg2: memref<1x3x3x128xbf16, #tpu.memory_space<vmem>>, %arg3: memref<1x1x1x128xbf16, #tpu.memory_space<vmem>>, %arg4: memref<1x3x1x128xf32, #tpu.memory_space<vmem>>, %arg5: memref<1x3x1x128xf32, #tpu.memory_space<vmem>>) attributes {dimension_semantics = [#tpu.dimension_semantics<parallel>, #tpu.dimension_semantics<parallel>], iteration_bounds = array<i64: 2, 2>, scalar_prefetch = 0 : i64, scratch_operands = 2 : i64, tpu.core_type = #tpu.core_type<tc>, window_params = [{transform_indices = @transform_0, window_bounds = array<i64: 1, 3, 3, 128>}, {transform_indices = @transform_1, window_bounds = array<i64: 1, 1, 1, 128>}]} {
    %c0 = arith.constant 0 : index
    %c0_0 = arith.constant 0 : index
    %c0_1 = arith.constant 0 : index
    %c0_2 = arith.constant 0 : index
    %0 = vector.load %arg2[%c0, %c0_0, %c0_1, %c0_2] : memref<1x3x3x128xbf16, #tpu.memory_space<vmem>>, vector<1x3x3x128xbf16>
    %1 = arith.extf %0 : vector<1x3x3x128xbf16> to vector<1x3x3x128xf32>
    %2 = vector.extract_strided_slice %1 {offsets = [0, 0, 0, 0], sizes = [1, 3, 1, 128], strides = [1, 1, 1, 1]} : vector<1x3x3x128xf32> to vector<1x3x1x128xf32>
    %3 = vector.extract_strided_slice %1 {offsets = [0, 0, 1, 0], sizes = [1, 3, 1, 128], strides = [1, 1, 1, 1]} : vector<1x3x3x128xf32> to vector<1x3x1x128xf32>
    %4 = arith.maximumf %2, %3 : vector<1x3x1x128xf32>
    %5 = vector.extract_strided_slice %1 {offsets = [0, 0, 2, 0], sizes = [1, 3, 1, 128], strides = [1, 1, 1, 1]} : vector<1x3x3x128xf32> to vector<1x3x1x128xf32>
    %6 = arith.maximumf %4, %5 : vector<1x3x1x128xf32>
    %c0_3 = arith.constant 0 : index
    %c0_4 = arith.constant 0 : index
    %c0_5 = arith.constant 0 : index
    %c0_6 = arith.constant 0 : index
    %7 = vector.load %arg4[%c0_3, %c0_4, %c0_5, %c0_6] : memref<1x3x1x128xf32, #tpu.memory_space<vmem>>, vector<1x3x1x128xf32>
    tpu.vector_store %arg4[%c0_3, %c0_4, %c0_5, %c0_6], %6 {strides = array<i32>} : memref<1x3x1x128xf32, #tpu.memory_space<vmem>>, vector<1x3x1x128xf32>,
    %c0_7 = arith.constant 0 : index
    %c0_8 = arith.constant 0 : index
    %c0_9 = arith.constant 0 : index
    %c0_10 = arith.constant 0 : index
    %8 = vector.load %arg4[%c0_7, %c0_8, %c0_9, %c0_10] : memref<1x3x1x128xf32, #tpu.memory_space<vmem>>, vector<1x3x1x128xf32>
    %c0_11 = arith.constant 0 : index
    %c0_12 = arith.constant 0 : index
    %c0_13 = arith.constant 0 : index
    %c0_14 = arith.constant 0 : index
    %9 = vector.load %arg5[%c0_11, %c0_12, %c0_13, %c0_14] : memref<1x3x1x128xf32, #tpu.memory_space<vmem>>, vector<1x3x1x128xf32>
    tpu.vector_store %arg5[%c0_11, %c0_12, %c0_13, %c0_14], %8 {strides = array<i32>} : memref<1x3x1x128xf32, #tpu.memory_space<vmem>>, vector<1x3x1x128xf32>,
    %c0_15 = arith.constant 0 : index
    %c0_16 = arith.constant 0 : index
    %c0_17 = arith.constant 0 : index
    %c0_18 = arith.constant 0 : index
    %10 = vector.load %arg5[%c0_15, %c0_16, %c0_17, %c0_18] : memref<1x3x1x128xf32, #tpu.memory_space<vmem>>, vector<1x1x1x128xf32>
    %c0_19 = arith.constant 0 : index
    %c1 = arith.constant 1 : index
    %c0_20 = arith.constant 0 : index
    %c0_21 = arith.constant 0 : index
    %11 = vector.load %arg5[%c0_19, %c1, %c0_20, %c0_21] : memref<1x3x1x128xf32, #tpu.memory_space<vmem>>, vector<1x1x1x128xf32>
    %12 = arith.maximumf %10, %11 : vector<1x1x1x128xf32>
    %c0_22 = arith.constant 0 : index
    %c2 = arith.constant 2 : index
    %c0_23 = arith.constant 0 : index
    %c0_24 = arith.constant 0 : index
    %13 = vector.load %arg5[%c0_22, %c2, %c0_23, %c0_24] : memref<1x3x1x128xf32, #tpu.memory_space<vmem>>, vector<1x1x1x128xf32>
    %14 = arith.maximumf %12, %13 : vector<1x1x1x128xf32>
    %15 = arith.truncf %14 : vector<1x1x1x128xf32> to vector<1x1x1x128xbf16>
    %c0_25 = arith.constant 0 : index
    %c0_26 = arith.constant 0 : index
    %c0_27 = arith.constant 0 : index
    %c0_28 = arith.constant 0 : index
    %16 = vector.load %arg3[%c0_25, %c0_26, %c0_27, %c0_28] : memref<1x1x1x128xbf16, #tpu.memory_space<vmem>>, vector<1x1x1x128xbf16>
    tpu.vector_store %arg3[%c0_25, %c0_26, %c0_27, %c0_28], %15 {strides = array<i32>} : memref<1x1x1x128xbf16, #tpu.memory_space<vmem>>, vector<1x1x1x128xbf16>,
    return
  }
  func.func @transform_0(%arg0: i32, %arg1: i32) -> (i32, i32, i32, i32) {
    %c0_i32 = arith.constant 0 : i32
    %c0_i32_0 = arith.constant 0 : i32
    %c0_i32_1 = arith.constant 0 : i32
    return %arg0, %c0_i32, %c0_i32_0, %arg1 : i32, i32, i32, i32
  }
  func.func @transform_1(%arg0: i32, %arg1: i32) -> (i32, i32, i32, i32) {
    %c0_i32 = arith.constant 0 : i32
    %c0_i32_0 = arith.constant 0 : i32
    %c0_i32_1 = arith.constant 0 : i32
    return %arg0, %c0_i32, %c0_i32_0, %arg1 : i32, i32, i32, i32
  }
}

</mosaic_0001>

<bundles_post_ra>
// kernel: alexnet_fc_forward.8
= control target key start
LH: loop header
LB: loop body
LE: loop exit
PB: predicated region body
PF: predicated region fallthrough
CT: control target
= control target key end

     0   :  { %s1777_s12 = smov 0   ;;  %s2007_s0 = inlined_call_operand.vmem [shape: bf16[480,384], index: 0, kind: input, shape index: {}]   ;;  %s2008_s1 = inlined_call_operand.vmem [shape: bf16[384,128], index: 1, kind: input, shape index: {}]   ;;  %s2009_s2 = inlined_call_operand.vmem [shape: f32[1,128], index: 2, kind: input, shape index: {}]   ;;  %s2010_s3 = inlined_call_operand.vmem [shape: bf16[480,128], index: 3, kind: output, shape index: {}]  }
   0x1 LB: > { %s1219_s13 = sadd.s32 4294967295, %s1753_s12   ;;  %p1223_p0 = scmp.ge.s32.totalorder %s1753_s12, 1  ;;  %s1753_s12 = sphi %s1777_s12, %s13_s12  }
   0x2   : > { %p139_p1 = scmp.lt.s32.totalorder %s1753_s12, 3 }
   0x4   : > { %p140_p2 = pnand %p1223_p0, %p139_p1 }
   0x5   : > { %v1663_v0 = vld [vmem:[%s2008_s1 + $0x40] sm:$0xff] (!%p140_p2)   ;;  %v1755_v2 = vmov (!%p140_p2), 0.0   ;;  %v1666_v4 = vld [vmem:[%s2008_s1 + $0x48] sm:$0xff] (!%p140_p2)   ;;  %vm1756_vm0 = vmmov (!%p140_p2), 0   ;;  %s164_s26 = smul.u32 (!%p140_p2), 30, %s1219_s13  ;;  %v1669_v7 = vld [vmem:[%s2008_s1 + $0x50] sm:$0xff] (!%p140_p2)  }
   0x6   : > { %143 = sbr.rel (%p140_p2) target bundleno = 376 (0x178), region = 32  ;;  %v1664_v1 = vld [vmem:[%s2008_s1] sm:$0xff] (!%p140_p2)   ;;  %1576 = vmatprep.subr.bf16.mxu1 (!%p140_p2), %v1755_v2  ;;  %1447 = vmatprep.subr.bf16.mxu0 (!%p140_p2), %v1663_v0  ;;  %v1667_v5 = vld [vmem:[%s2008_s1 + $0x8] sm:$0xff] (!%p140_p2)   ;;  %v1670_v8 = vld [vmem:[%s2008_s1 + $0x10] sm:$0xff] (!%p140_p2)  }
   0x7   : > { %v1665_v3 = vld [vmem:[%s2008_s1 + $0x80] sm:$0xff] (!%p140_p2)   ;;  %1448 = vmatpush3.bf16.msra.mxu0 (!%p140_p2), %v1664_v1  ;;  %1592 = vmatprep.mubr.msk.bf16.mxu1 (!%p140_p2), %vm1756_vm0, %v1755_v2  ;;  %v1668_v6 = vld [vmem:[%s2008_s1 + $0x88] sm:$0xff] (!%p140_p2)   ;;  %v1671_v9 = vld [vmem:[%s2008_s1 + $0x90] sm:$0xff] (!%p140_p2)   ;;  %p165_p3 = scmp.lt.s32.totalorder (!%p140_p2), %s164_s26, 59 }
   0x8   : > { %1577 = vmatpush3.bf16.msra.mxu1 (!%p140_p2), %v1665_v3  ;;  %1449 = vmatprep.subr.bf16.mxu0 (!%p140_p2), %v1666_v4  ;;  %v1672_v10 = vld [vmem:[%s2008_s1 + $0x58] sm:$0xff] (!%p140_p2)   ;;  %v1675_v13 = vld [vmem:[%s2008_s1 + $0x60] sm:$0xff] (!%p140_p2)   ;;  %v1678_v16 = vld [vmem:[%s2008_s1 + $0x68] sm:$0xff] (!%p140_p2)  }
   0x9   : > { %1578 = vmatprep.subr.bf16.mxu1 (!%p140_p2), %v1755_v2  ;;  %v1673_v11 = vld [vmem:[%s2008_s1 + $0x18] sm:$0xff] (!%p140_p2)   ;;  %v1676_v14 = vld [vmem:[%s2008_s1 + $0x20] sm:$0xff] (!%p140_p2)   ;;  %v1679_v17 = vld [vmem:[%s2008_s1 + $0x28] sm:$0xff] (!%p140_p2)  }
   0xa   : > { %v1674_v12 = vld [vmem:[%s2008_s1 + $0x98] sm:$0xff] (!%p140_p2)   ;;  %v1677_v15 = vld [vmem:[%s2008_s1 + $0xa0] sm:$0xff] (!%p140_p2)   ;;  %v1680_v18 = vld [vmem:[%s2008_s1 + $0xa8] sm:$0xff] (!%p140_p2)  }
   0xb   : > { %1450 = vmatpush3.bf16.msra.mxu0 (!%p140_p2), %v1667_v5  ;;  %v1681_v19 = vld [vmem:[%s2008_s1 + $0x70] sm:$0xff] (!%p140_p2)   ;;  %v1684_v22 = vld [vmem:[%s2008_s1 + $0x78] sm:$0xff] (!%p140_p2)  }
   0xc   : > { %1579 = vmatpush3.bf16.msra.mxu1 (!%p140_p2), %v1668_v6  ;;  %1451 = vmatprep.subr.bf16.mxu0 (!%p140_p2), %v1669_v7  ;;  %v1682_v20 = vld [vmem:[%s2008_s1 + $0x30] sm:$0xff] (!%p140_p2)   ;;  %v1685_v24 = vld [vmem:[%s2008_s1 + $0x38] sm:$0xff] (!%p140_p2)  }
   0xd   : > { %1580 = vmatprep.subr.bf16.mxu1 %v1755_v2  ;;  %s2012_s26 = smov (!%p165_p3, %s164_s26), 59  ;;  %v1683_v21 = vld [vmem:[%s2008_s1 + $0xb0] sm:$0xff]   ;;  %v1689_v25 = vld [vmem:[%s2008_s1 + $0xb8] sm:$0xff]  }
   0xe   : > { %s1652_s21 = smul.u32 12, %s2012_s26  ;;  %s1225_s18 = sshll.u32 %s2012_s26, 2 }
   0xf   : > { %1452 = vmatpush3.bf16.msra.mxu0 %v1670_v8 }
  0x10   : > { %1581 = vmatpush3.bf16.msra.mxu1 %v1671_v9  ;;  %1453 = vmatprep.subr.bf16.mxu0 %v1672_v10  ;;  %s1859_s6 = scalar_lea.vmem %s2007_s0, %s1652_s21  ;;  %v1951_v9 = vld [vmem:[%s2009_s2] ss:$0 sm:$0xff]  ;;  %s1959_s21 = scalar_lea.vmem %s2010_s3, %s1225_s18 }
  0x11   : > { %1582 = vmatprep.subr.bf16.mxu1 %v1755_v2  ;;  %v1688_v23 = vld [vmem:[%s1859_s6 + $0x4] ss:$12 sps:$4 sm:$0xff]   ;;  %v1686_v26 = vld [vmem:[%s1859_s6] ss:$12 sps:$4 sm:$0xff]   ;;  %v1690_v27 = vld [vmem:[%s1859_s6 + $0x8] ss:$12 sps:$4 sm:$0xff]  }
  0x12   : > { %709 = vmatprep.mubr.bf16.mxu0 %v1688_v23  ;;  %v1691_v28 = vld [vmem:[%s1859_s6 + $0x1c] ss:$12 sps:$4 sm:$0xff]   ;;  %v1693_v29 = vld [vmem:[%s1859_s6 + $0x18] ss:$12 sps:$4 sm:$0xff]   ;;  %v1694_v30 = vld [vmem:[%s1859_s6 + $0x20] ss:$12 sps:$4 sm:$0xff]  }
  0x13   : > { %1454 = vmatpush3.bf16.msra.mxu0 %v1673_v11  ;;  %v1695_v31 = vld [vmem:[%s1859_s6 + $0x34] ss:$12 sps:$4 sm:$0xff]   ;;  %v1697_v32 = vld [vmem:[%s1859_s6 + $0x30] ss:$12 sps:$4 sm:$0xff]   ;;  %v1698_v33 = vld [vmem:[%s1859_s6 + $0x38] ss:$12 sps:$4 sm:$0xff]  }
  0x14   : > { %1583 = vmatpush3.bf16.msra.mxu1 %v1674_v12  ;;  %1455 = vmatprep.subr.bf16.mxu0 %v1675_v13  ;;  %v1699_v34 = vld [vmem:[%s1859_s6 + $0x4c] ss:$12 sps:$4 sm:$0xff]   ;;  %v1701_v35 = vld [vmem:[%s1859_s6 + $0x48] ss:$12 sps:$4 sm:$0xff]   ;;  %v1702_v36 = vld [vmem:[%s1859_s6 + $0x50] ss:$12 sps:$4 sm:$0xff]  }
  0x15   : > { %1584 = vmatprep.subr.bf16.mxu1 %v1755_v2  ;;  %v1703_v37 = vld [vmem:[%s1859_s6 + $0x64] ss:$12 sps:$4 sm:$0xff]   ;;  %v1705_v38 = vld [vmem:[%s1859_s6 + $0x60] ss:$12 sps:$4 sm:$0xff]   ;;  %v1706_v39 = vld [vmem:[%s1859_s6 + $0x68] ss:$12 sps:$4 sm:$0xff]  }
  0x16   : > { %v1707_v40 = vld [vmem:[%s1859_s6 + $0x7c] ss:$12 sps:$4 sm:$0xff]   ;;  %v1709_v41 = vld [vmem:[%s1859_s6 + $0x78] ss:$12 sps:$4 sm:$0xff]   ;;  %v1710_v42 = vld [vmem:[%s1859_s6 + $0x80] ss:$12 sps:$4 sm:$0xff]  }
  0x17   : > { %1456 = vmatpush3.bf16.msra.mxu0 %v1676_v14  ;;  %v1711_v43 = vld [vmem:[%s1859_s6 + $0x94] ss:$12 sps:$4 sm:$0xff]   ;;  %v1713_v44 = vld [vmem:[%s1859_s6 + $0x90] ss:$12 sps:$4 sm:$0xff]   ;;  %v1714_v45 = vld [vmem:[%s1859_s6 + $0x98] ss:$12 sps:$4 sm:$0xff]  }
  0x18   : > { %1585 = vmatpush3.bf16.msra.mxu1 %v1677_v15  ;;  %1457 = vmatprep.subr.bf16.mxu0 %v1678_v16  ;;  %v1715_v46 = vld [vmem:[%s1859_s6 + $0xac] ss:$12 sps:$4 sm:$0xff]   ;;  %v1717_v47 = vld [vmem:[%s1859_s6 + $0xa8] ss:$12 sps:$4 sm:$0xff]   ;;  %v1718_v48 = vld [vmem:[%s1859_s6 + $0xb0] ss:$12 sps:$4 sm:$0xff]  }
  0x19   : > { %1586 = vmatprep.subr.bf16.mxu1 %v1755_v2  ;;  %v1719_v49 = vld [vmem:[%s1859_s6 + $0xc4] ss:$12 sps:$4 sm:$0xff]   ;;  %v1721_v50 = vld [vmem:[%s1859_s6 + $0xc0] ss:$12 sps:$4 sm:$0xff]   ;;  %v1722_v51 = vld [vmem:[%s1859_s6 + $0xc8] ss:$12 sps:$4 sm:$0xff]  }
  0x1a   : > { %v1723_v52 = vld [vmem:[%s1859_s6 + $0xdc] ss:$12 sps:$4 sm:$0xff]   ;;  %v1725_v53 = vld [vmem:[%s1859_s6 + $0xd8] ss:$12 sps:$4 sm:$0xff]   ;;  %v1726_v54 = vld [vmem:[%s1859_s6 + $0xe0] ss:$12 sps:$4 sm:$0xff]  }
  0x1b   : > { %1458 = vmatpush3.bf16.msra.mxu0 %v1679_v17  ;;  %v1727_v55 = vld [vmem:[%s1859_s6 + $0xf4] ss:$12 sps:$4 sm:$0xff]   ;;  %v1729_v56 = vld [vmem:[%s1859_s6 + $0xf0] ss:$12 sps:$4 sm:$0xff]   ;;  %v1730_v57 = vld [vmem:[%s1859_s6 + $0xf8] ss:$12 sps:$4 sm:$0xff]  }
  0x1c   : > { %1587 = vmatpush3.bf16.msra.mxu1 %v1680_v18  ;;  %1459 = vmatprep.subr.bf16.mxu0 %v1681_v19  ;;  %v1731_v58 = vld [vmem:[%s1859_s6 + $0x10c] ss:$12 sps:$4 sm:$0xff]   ;;  %v1733_v59 = vld [vmem:[%s1859_s6 + $0x108] ss:$12 sps:$4 sm:$0xff]   ;;  %v1734_v60 = vld [vmem:[%s1859_s6 + $0x110] ss:$12 sps:$4 sm:$0xff]  }
  0x1d   : > { %1588 = vmatprep.subr.bf16.mxu1 %v1755_v2  ;;  %v1735_v61 = vld [vmem:[%s1859_s6 + $0x124] ss:$12 sps:$4 sm:$0xff]   ;;  %v1737_v62 = vld [vmem:[%s1859_s6 + $0x120] ss:$12 sps:$4 sm:$0xff]   ;;  %v1738_v63 = vld [vmem:[%s1859_s6 + $0x128] ss:$12 sps:$4 sm:$0xff]  }
  0x1e   : > { %v1739_v0 = vld [vmem:[%s1859_s6 + $0x13c] ss:$12 sps:$4 sm:$0xff]   ;;  %v1741_v1 = vld [vmem:[%s1859_s6 + $0x138] ss:$12 sps:$4 sm:$0xff]   ;;  %v1742_v3 = vld [vmem:[%s1859_s6 + $0x140] ss:$12 sps:$4 sm:$0xff]  }
  0x1f   : > { %1460 = vmatpush3.bf16.msra.mxu0 %v1682_v20  ;;  %v1743_v4 = vld [vmem:[%s1859_s6 + $0x154] ss:$12 sps:$4 sm:$0xff]   ;;  %v1745_v5 = vld [vmem:[%s1859_s6 + $0x150] ss:$12 sps:$4 sm:$0xff]   ;;  %v1746_v6 = vld [vmem:[%s1859_s6 + $0x158] ss:$12 sps:$4 sm:$0xff]  }
  0x20   : > { %1589 = vmatpush3.bf16.msra.mxu1 %v1683_v21  ;;  %1461 = vmatprep.subr.bf16.mxu0 %v1684_v22 }
  0x21   : > { %1590 = vmatprep.subr.bf16.mxu1 %v1755_v2 }
  0x23   : > { %1462 = vmatpush3.bf16.msra.mxu0 %v1685_v24 }
  0x24   : > { %1591 = vmatpush3.bf16.msra.mxu1 %v1689_v25 }
  0x26   : > { %710 = vmatmul.mubr.bf16.vlgmr.msra.gmra.mrb[0].mxu0 %v1686_v26 }
  0x27   : > { %1593 = vmatmul.mubr.bf16.vlgmr.msra.gmra.mrb[0].mxu1 %v1690_v27  ;;  %717 = vmatprep.mubr.bf16.mxu0 %v1691_v28 }
  0x28   : > { %1596 = vmatprep.mubr.msk.bf16.mxu1 %vm1756_vm0, %v1755_v2 }
  0x2e   : > { %718 = vmatmul.mubr.bf16.gmra.mrb[4].mxu0 %v1693_v29 }
  0x2f   : > { %1597 = vmatmul.mubr.bf16.gmra.mrb[4].mxu1 %v1694_v30  ;;  %725 = vmatprep.mubr.bf16.mxu0 %v1695_v31 }
  0x30   : > { %1600 = vmatprep.mubr.msk.bf16.mxu1 %vm1756_vm0, %v1755_v2 }
  0x36   : > { %726 = vmatmul.mubr.bf16.gmra.mrb[8].mxu0 %v1697_v32 }
  0x37   : > { %1601 = vmatmul.mubr.bf16.gmra.mrb[8].mxu1 %v1698_v33  ;;  %733 = vmatprep.mubr.bf16.mxu0 %v1699_v34 }
  0x38   : > { %1604 = vmatprep.mubr.msk.bf16.mxu1 %vm1756_vm0, %v1755_v2 }
  0x3e   : > { %734 = vmatmul.mubr.bf16.gmra.mrb[12].mxu0 %v1701_v35 }
  0x3f   : > { %1605 = vmatmul.mubr.bf16.gmra.mrb[12].mxu1 %v1702_v36  ;;  %741 = vmatprep.mubr.bf16.mxu0 %v1703_v37 }
  0x40   : > { %1608 = vmatprep.mubr.msk.bf16.mxu1 %vm1756_vm0, %v1755_v2 }
  0x46   : > { %742 = vmatmul.mubr.bf16.gmra.mrb[16].mxu0 %v1705_v38 }
  0x47   : > { %1609 = vmatmul.mubr.bf16.gmra.mrb[16].mxu1 %v1706_v39  ;;  %749 = vmatprep.mubr.bf16.mxu0 %v1707_v40 }
  0x48   : > { %1612 = vmatprep.mubr.msk.bf16.mxu1 %vm1756_vm0, %v1755_v2 }
  0x4e   : > { %750 = vmatmul.mubr.bf16.gmra.mrb[20].mxu0 %v1709_v41 }
  0x4f   : > { %1613 = vmatmul.mubr.bf16.gmra.mrb[20].mxu1 %v1710_v42  ;;  %757 = vmatprep.mubr.bf16.mxu0 %v1711_v43 }
  0x50   : > { %1616 = vmatprep.mubr.msk.bf16.mxu1 %vm1756_vm0, %v1755_v2 }
  0x56   : > { %758 = vmatmul.mubr.bf16.gmra.mrb[24].mxu0 %v1713_v44 }
  0x57   : > { %1617 = vmatmul.mubr.bf16.gmra.mrb[24].mxu1 %v1714_v45  ;;  %765 = vmatprep.mubr.bf16.mxu0 %v1715_v46 }
  0x58   : > { %1620 = vmatprep.mubr.msk.bf16.mxu1 %vm1756_vm0, %v1755_v2 }
  0x5e   : > { %766 = vmatmul.mubr.bf16.gmra.mrb[28].mxu0 %v1717_v47 }
  0x5f   : > { %1621 = vmatmul.mubr.bf16.gmra.mrb[28].mxu1 %v1718_v48  ;;  %773 = vmatprep.mubr.bf16.mxu0 %v1719_v49 }
  0x60   : > { %1624 = vmatprep.mubr.msk.bf16.mxu1 %vm1756_vm0, %v1755_v2 }
  0x66   : > { %774 = vmatmul.mubr.bf16.gmra.mrb[32].mxu0 %v1721_v50 }
  0x67   : > { %1625 = vmatmul.mubr.bf16.gmra.mrb[32].mxu1 %v1722_v51  ;;  %781 = vmatprep.mubr.bf16.mxu0 %v1723_v52 }
  0x68   : > { %1628 = vmatprep.mubr.msk.bf16.mxu1 %vm1756_vm0, %v1755_v2 }
  0x6e   : > { %782 = vmatmul.mubr.bf16.gmra.mrb[36].mxu0 %v1725_v53 }
  0x6f   : > { %1629 = vmatmul.mubr.bf16.gmra.mrb[36].mxu1 %v1726_v54  ;;  %789 = vmatprep.mubr.bf16.mxu0 %v1727_v55 }
  0x70   : > { %1632 = vmatprep.mubr.msk.bf16.mxu1 %vm1756_vm0, %v1755_v2 }
  0x76   : > { %790 = vmatmul.mubr.bf16.gmra.mrb[40].mxu0 %v1729_v56 }
  0x77   : > { %1633 = vmatmul.mubr.bf16.gmra.mrb[40].mxu1 %v1730_v57  ;;  %797 = vmatprep.mubr.bf16.mxu0 %v1731_v58 }
  0x78   : > { %1636 = vmatprep.mubr.msk.bf16.mxu1 %vm1756_vm0, %v1755_v2 }
  0x7e   : > { %798 = vmatmul.mubr.bf16.gmra.mrb[44].mxu0 %v1733_v59 }
  0x7f   : > { %1637 = vmatmul.mubr.bf16.gmra.mrb[44].mxu1 %v1734_v60  ;;  %805 = vmatprep.mubr.bf16.mxu0 %v1735_v61 }
  0x80   : > { %1640 = vmatprep.mubr.msk.bf16.mxu1 %vm1756_vm0, %v1755_v2 }
  0x86   : > { %806 = vmatmul.mubr.bf16.gmra.mrb[48].mxu0 %v1737_v62 }
  0x87   : > { %1641 = vmatmul.mubr.bf16.gmra.mrb[48].mxu1 %v1738_v63  ;;  %813 = vmatprep.mubr.bf16.mxu0 %v1739_v0 }
  0x88   : > { %1644 = vmatprep.mubr.msk.bf16.mxu1 %vm1756_vm0, %v1755_v2 }
  0x8e   : > { %814 = vmatmul.mubr.bf16.gmra.mrb[52].mxu0 %v1741_v1 }
  0x8f   : > { %1645 = vmatmul.mubr.bf16.gmra.mrb[52].mxu1 %v1742_v3  ;;  %821 = vmatprep.mubr.bf16.mxu0 %v1743_v4 }
  0x90   : > { %1648 = vmatprep.mubr.msk.bf16.mxu1 %vm1756_vm0, %v1755_v2 }
  0x96   : > { %822 = vmatmul.mubr.bf16.gmra.mrb[56].mxu0 %v1745_v5 }
  0x97   : > { %1649 = vmatmul.mubr.bf16.gmra.mrb[56].mxu1 %v1746_v6 }
  0xf9   : > { %v1463_v7 = vpop.f32.mrb[0].mxu0 }
  0xfa   : > { %v1464_v8 = vpop.f32.mrb[1].mxu0  ;;  %v864_v10 = vpop.f32.mrb[0].mxu1 }
  0xfb   : > { %v1465_v11 = vadd.f32 %v1464_v8, %v1463_v7  ;;  %v1466_v12 = vpop.f32.mrb[2].mxu0  ;;  %v1594_v13 = vpop.f32.mrb[1].mxu1 }
  0xfc   : > { %v1467_v14 = vpop.f32.mrb[3].mxu0  ;;  %v867_v15 = vpop.f32.mrb[2].mxu1 }
  0xfd   : > { %v712_v2 = vadd.f32 %v1465_v11, %v1951_v9  ;;  %v1468_v16 = vadd.f32 %v1467_v14, %v1466_v12  ;;  %v1595_v17 = vpop.f32.mrb[3].mxu1 }
  0xff   : > { %v865_v18 = vadd.f32 %v864_v10, %v712_v2  ;;  %v715_v19 = vadd.f32 %v1468_v16, %v1951_v9 }
 0x101   : > { %v868_v20 = vadd.f32 %v867_v15, %v715_v19  ;;  %v1469_v21 = vpop.f32.mrb[4].mxu0  ;;  %v983_v24 = vmax.f32 %v865_v18, 0.0 }
 0x102   : > { %v1470_v22 = vpop.f32.mrb[5].mxu0  ;;  %v872_v23 = vpop.f32.mrb[4].mxu1 }
 0x103   : > { %v984_v25 = vmax.f32 %v868_v20, 0.0  ;;  %v1471_v26 = vadd.f32 %v1470_v22, %v1469_v21  ;;  %v1472_v27 = vpop.f32.mrb[6].mxu0  ;;  %v1598_v28 = vpop.f32.mrb[5].mxu1 }
 0x104   : > { %v1473_v29 = vpop.f32.mrb[7].mxu0  ;;  %v875_v30 = vpop.f32.mrb[6].mxu1 }
 0x105   : > { %v1361_v31 = vpack.c.bf16 %v984_v25, %v983_v24  ;;  %v720_v32 = vadd.f32 %v1471_v26, %v1951_v9  ;;  %v1474_v33 = vadd.f32 %v1473_v29, %v1472_v27  ;;  %v1599_v34 = vpop.f32.mrb[7].mxu1 }
 0x107   : > { %1362 = vst [vmem:[%s1959_s21] sm:$0xff] %v1361_v31   ;;  %v873_v35 = vadd.f32 %v872_v23, %v720_v32  ;;  %v723_v36 = vadd.f32 %v1474_v33, %v1951_v9 }
 0x109   : > { %v876_v37 = vadd.f32 %v875_v30, %v723_v36  ;;  %v1475_v38 = vpop.f32.mrb[8].mxu0  ;;  %v985_v41 = vmax.f32 %v873_v35, 0.0 }
 0x10a   : > { %v1476_v39 = vpop.f32.mrb[9].mxu0  ;;  %v880_v40 = vpop.f32.mrb[8].mxu1 }
 0x10b   : > { %v986_v42 = vmax.f32 %v876_v37, 0.0  ;;  %v1477_v43 = vadd.f32 %v1476_v39, %v1475_v38  ;;  %v1478_v44 = vpop.f32.mrb[10].mxu0  ;;  %v1602_v45 = vpop.f32.mrb[9].mxu1 }
 0x10c   : > { %v1479_v46 = vpop.f32.mrb[11].mxu0  ;;  %v883_v47 = vpop.f32.mrb[10].mxu1 }
 0x10d   : > { %v1366_v48 = vpack.c.bf16 %v986_v42, %v985_v41  ;;  %v728_v49 = vadd.f32 %v1477_v43, %v1951_v9  ;;  %v1480_v50 = vadd.f32 %v1479_v46, %v1478_v44  ;;  %v1603_v51 = vpop.f32.mrb[11].mxu1 }
 0x10f   : > { %1433 = vst [vmem:[%s1959_s21 + $0x8] sm:$0xff] %v1366_v48   ;;  %v881_v52 = vadd.f32 %v880_v40, %v728_v49  ;;  %v731_v53 = vadd.f32 %v1480_v50, %v1951_v9 }
 0x111   : > { %v884_v54 = vadd.f32 %v883_v47, %v731_v53  ;;  %v1481_v55 = vpop.f32.mrb[12].mxu0  ;;  %v987_v58 = vmax.f32 %v881_v52, 0.0 }
 0x112   : > { %v1482_v56 = vpop.f32.mrb[13].mxu0  ;;  %v888_v57 = vpop.f32.mrb[12].mxu1 }
 0x113   : > { %v988_v59 = vmax.f32 %v884_v54, 0.0  ;;  %v1483_v60 = vadd.f32 %v1482_v56, %v1481_v55  ;;  %v1484_v61 = vpop.f32.mrb[14].mxu0  ;;  %v1606_v62 = vpop.f32.mrb[13].mxu1 }
 0x114   : > { %v1485_v63 = vpop.f32.mrb[15].mxu0  ;;  %v891_v0 = vpop.f32.mrb[14].mxu1 }
 0x115   : > { %v1371_v1 = vpack.c.bf16 %v988_v59, %v987_v58  ;;  %v736_v3 = vadd.f32 %v1483_v60, %v1951_v9  ;;  %v1486_v4 = vadd.f32 %v1485_v63, %v1484_v61  ;;  %v1607_v5 = vpop.f32.mrb[15].mxu1 }
 0x117   : > { %1434 = vst [vmem:[%s1959_s21 + $0x10] sm:$0xff] %v1371_v1   ;;  %v889_v6 = vadd.f32 %v888_v57, %v736_v3  ;;  %v739_v7 = vadd.f32 %v1486_v4, %v1951_v9 }
 0x119   : > { %v892_v8 = vadd.f32 %v891_v0, %v739_v7  ;;  %v1487_v10 = vpop.f32.mrb[16].mxu0  ;;  %v989_v13 = vmax.f32 %v889_v6, 0.0 }
 0x11a   : > { %v1488_v11 = vpop.f32.mrb[17].mxu0  ;;  %v896_v12 = vpop.f32.mrb[16].mxu1 }
 0x11b   : > { %v990_v14 = vmax.f32 %v892_v8, 0.0  ;;  %v1489_v15 = vadd.f32 %v1488_v11, %v1487_v10  ;;  %v1490_v2 = vpop.f32.mrb[18].mxu0  ;;  %v1610_v16 = vpop.f32.mrb[17].mxu1 }
 0x11c   : > { %v1491_v17 = vpop.f32.mrb[19].mxu0  ;;  %v899_v18 = vpop.f32.mrb[18].mxu1 }
 0x11d   : > { %v1376_v19 = vpack.c.bf16 %v990_v14, %v989_v13  ;;  %v744_v20 = vadd.f32 %v1489_v15, %v1951_v9  ;;  %v1492_v21 = vadd.f32 %v1491_v17, %v1490_v2  ;;  %v1611_v22 = vpop.f32.mrb[19].mxu1 }
 0x11f   : > { %1435 = vst [vmem:[%s1959_s21 + $0x18] sm:$0xff] %v1376_v19   ;;  %v897_v23 = vadd.f32 %v896_v12, %v744_v20  ;;  %v747_v24 = vadd.f32 %v1492_v21, %v1951_v9 }
 0x121   : > { %v900_v25 = vadd.f32 %v899_v18, %v747_v24  ;;  %v1493_v26 = vpop.f32.mrb[20].mxu0  ;;  %v991_v29 = vmax.f32 %v897_v23, 0.0 }
 0x122   : > { %v1494_v27 = vpop.f32.mrb[21].mxu0  ;;  %v904_v28 = vpop.f32.mrb[20].mxu1 }
 0x123   : > { %v992_v30 = vmax.f32 %v900_v25, 0.0  ;;  %v1495_v31 = vadd.f32 %v1494_v27, %v1493_v26  ;;  %v1496_v32 = vpop.f32.mrb[22].mxu0  ;;  %v1614_v33 = vpop.f32.mrb[21].mxu1 }
 0x124   : > { %v1497_v34 = vpop.f32.mrb[23].mxu0  ;;  %v907_v35 = vpop.f32.mrb[22].mxu1 }
 0x125   : > { %v1381_v36 = vpack.c.bf16 %v992_v30, %v991_v29  ;;  %v752_v37 = vadd.f32 %v1495_v31, %v1951_v9  ;;  %v1498_v38 = vadd.f32 %v1497_v34, %v1496_v32  ;;  %v1615_v39 = vpop.f32.mrb[23].mxu1 }
 0x127   : > { %1436 = vst [vmem:[%s1959_s21 + $0x20] sm:$0xff] %v1381_v36   ;;  %v905_v40 = vadd.f32 %v904_v28, %v752_v37  ;;  %v755_v41 = vadd.f32 %v1498_v38, %v1951_v9 }
 0x129   : > { %v908_v42 = vadd.f32 %v907_v35, %v755_v41  ;;  %v1499_v43 = vpop.f32.mrb[24].mxu0  ;;  %v993_v46 = vmax.f32 %v905_v40, 0.0 }
 0x12a   : > { %v1500_v44 = vpop.f32.mrb[25].mxu0  ;;  %v912_v45 = vpop.f32.mrb[24].mxu1 }
 0x12b   : > { %v994_v47 = vmax.f32 %v908_v42, 0.0  ;;  %v1501_v48 = vadd.f32 %v1500_v44, %v1499_v43  ;;  %v1502_v49 = vpop.f32.mrb[26].mxu0  ;;  %v1618_v50 = vpop.f32.mrb[25].mxu1 }
 0x12c   : > { %v1503_v51 = vpop.f32.mrb[27].mxu0  ;;  %v915_v52 = vpop.f32.mrb[26].mxu1 }
 0x12d   : > { %v1386_v53 = vpack.c.bf16 %v994_v47, %v993_v46  ;;  %v760_v54 = vadd.f32 %v1501_v48, %v1951_v9  ;;  %v1504_v55 = vadd.f32 %v1503_v51, %v1502_v49  ;;  %v1619_v56 = vpop.f32.mrb[27].mxu1 }
 0x12f   : > { %1437 = vst [vmem:[%s1959_s21 + $0x28] sm:$0xff] %v1386_v53   ;;  %v913_v57 = vadd.f32 %v912_v45, %v760_v54  ;;  %v763_v58 = vadd.f32 %v1504_v55, %v1951_v9 }
 0x131   : > { %v916_v59 = vadd.f32 %v915_v52, %v763_v58  ;;  %v1505_v60 = vpop.f32.mrb[28].mxu0  ;;  %v995_v63 = vmax.f32 %v913_v57, 0.0 }
 0x132   : > { %v1506_v61 = vpop.f32.mrb[29].mxu0  ;;  %v920_v62 = vpop.f32.mrb[28].mxu1 }
 0x133   : > { %v996_v0 = vmax.f32 %v916_v59, 0.0  ;;  %v1507_v1 = vadd.f32 %v1506_v61, %v1505_v60  ;;  %v1508_v3 = vpop.f32.mrb[30].mxu0  ;;  %v1622_v4 = vpop.f32.mrb[29].mxu1 }
 0x134   : > { %v1509_v5 = vpop.f32.mrb[31].mxu0  ;;  %v923_v6 = vpop.f32.mrb[30].mxu1 }
 0x135   : > { %v1391_v7 = vpack.c.bf16 %v996_v0, %v995_v63  ;;  %v768_v8 = vadd.f32 %v1507_v1, %v1951_v9  ;;  %v1510_v10 = vadd.f32 %v1509_v5, %v1508_v3  ;;  %v1623_v11 = vpop.f32.mrb[31].mxu1 }
 0x137   : > { %1438 = vst [vmem:[%s1959_s21 + $0x30] sm:$0xff] %v1391_v7   ;;  %v921_v12 = vadd.f32 %v920_v62, %v768_v8  ;;  %v771_v13 = vadd.f32 %v1510_v10, %v1951_v9 }
 0x139   : > { %v924_v14 = vadd.f32 %v923_v6, %v771_v13  ;;  %v1511_v15 = vpop.f32.mrb[32].mxu0  ;;  %v997_v17 = vmax.f32 %v921_v12, 0.0 }
 0x13a   : > { %v1512_v2 = vpop.f32.mrb[33].mxu0  ;;  %v928_v16 = vpop.f32.mrb[32].mxu1 }
 0x13b   : > { %v998_v18 = vmax.f32 %v924_v14, 0.0  ;;  %v1513_v19 = vadd.f32 %v1512_v2, %v1511_v15  ;;  %v1514_v20 = vpop.f32.mrb[34].mxu0  ;;  %v1626_v21 = vpop.f32.mrb[33].mxu1 }
 0x13c   : > { %v1515_v22 = vpop.f32.mrb[35].mxu0  ;;  %v931_v23 = vpop.f32.mrb[34].mxu1 }
 0x13d   : > { %v1396_v24 = vpack.c.bf16 %v998_v18, %v997_v17  ;;  %v776_v25 = vadd.f32 %v1513_v19, %v1951_v9  ;;  %v1516_v26 = vadd.f32 %v1515_v22, %v1514_v20  ;;  %v1627_v27 = vpop.f32.mrb[35].mxu1 }
 0x13f   : > { %1439 = vst [vmem:[%s1959_s21 + $0x38] sm:$0xff] %v1396_v24   ;;  %v929_v28 = vadd.f32 %v928_v16, %v776_v25  ;;  %v779_v29 = vadd.f32 %v1516_v26, %v1951_v9 }
 0x141   : > { %v932_v30 = vadd.f32 %v931_v23, %v779_v29  ;;  %v1517_v31 = vpop.f32.mrb[36].mxu0  ;;  %v999_v34 = vmax.f32 %v929_v28, 0.0 }
 0x142   : > { %v1518_v32 = vpop.f32.mrb[37].mxu0  ;;  %v936_v33 = vpop.f32.mrb[36].mxu1 }
 0x143   : > { %v1000_v35 = vmax.f32 %v932_v30, 0.0  ;;  %v1519_v36 = vadd.f32 %v1518_v32, %v1517_v31  ;;  %v1520_v37 = vpop.f32.mrb[38].mxu0  ;;  %v1630_v38 = vpop.f32.mrb[37].mxu1 }
 0x144   : > { %v1521_v39 = vpop.f32.mrb[39].mxu0  ;;  %v939_v40 = vpop.f32.mrb[38].mxu1 }
 0x145   : > { %v1401_v41 = vpack.c.bf16 %v1000_v35, %v999_v34  ;;  %v784_v42 = vadd.f32 %v1519_v36, %v1951_v9  ;;  %v1522_v43 = vadd.f32 %v1521_v39, %v1520_v37  ;;  %v1631_v44 = vpop.f32.mrb[39].mxu1 }
 0x147   : > { %1440 = vst [vmem:[%s1959_s21 + $0x40] sm:$0xff] %v1401_v41   ;;  %v937_v45 = vadd.f32 %v936_v33, %v784_v42  ;;  %v787_v46 = vadd.f32 %v1522_v43, %v1951_v9 }
 0x149   : > { %v940_v47 = vadd.f32 %v939_v40, %v787_v46  ;;  %v1523_v48 = vpop.f32.mrb[40].mxu0  ;;  %v1001_v51 = vmax.f32 %v937_v45, 0.0 }
 0x14a   : > { %v1524_v49 = vpop.f32.mrb[41].mxu0  ;;  %v944_v50 = vpop.f32.mrb[40].mxu1 }
 0x14b   : > { %v1002_v52 = vmax.f32 %v940_v47, 0.0  ;;  %v1525_v53 = vadd.f32 %v1524_v49, %v1523_v48  ;;  %v1526_v54 = vpop.f32.mrb[42].mxu0  ;;  %v1634_v55 = vpop.f32.mrb[41].mxu1 }
 0x14c   : > { %v1527_v56 = vpop.f32.mrb[43].mxu0  ;;  %v947_v57 = vpop.f32.mrb[42].mxu1 }
 0x14d   : > { %v1406_v58 = vpack.c.bf16 %v1002_v52, %v1001_v51  ;;  %v792_v59 = vadd.f32 %v1525_v53, %v1951_v9  ;;  %v1528_v60 = vadd.f32 %v1527_v56, %v1526_v54  ;;  %v1635_v61 = vpop.f32.mrb[43].mxu1 }
 0x14f   : > { %1441 = vst [vmem:[%s1959_s21 + $0x48] sm:$0xff] %v1406_v58   ;;  %v945_v62 = vadd.f32 %v944_v50, %v792_v59  ;;  %v795_v63 = vadd.f32 %v1528_v60, %v1951_v9 }
 0x151   : > { %v948_v0 = vadd.f32 %v947_v57, %v795_v63  ;;  %v1529_v1 = vpop.f32.mrb[44].mxu0  ;;  %v1003_v5 = vmax.f32 %v945_v62, 0.0 }
 0x152   : > { %v1530_v3 = vpop.f32.mrb[45].mxu0  ;;  %v952_v4 = vpop.f32.mrb[44].mxu1 }
 0x153   : > { %v1004_v6 = vmax.f32 %v948_v0, 0.0  ;;  %v1531_v7 = vadd.f32 %v1530_v3, %v1529_v1  ;;  %v1532_v8 = vpop.f32.mrb[46].mxu0  ;;  %v1638_v10 = vpop.f32.mrb[45].mxu1 }
 0x154   : > { %v1533_v11 = vpop.f32.mrb[47].mxu0  ;;  %v955_v12 = vpop.f32.mrb[46].mxu1 }
 0x155   : > { %v1411_v13 = vpack.c.bf16 %v1004_v6, %v1003_v5  ;;  %v800_v14 = vadd.f32 %v1531_v7, %v1951_v9  ;;  %v1534_v15 = vadd.f32 %v1533_v11, %v1532_v8  ;;  %v1639_v2 = vpop.f32.mrb[47].mxu1 }
 0x157   : > { %1442 = vst [vmem:[%s1959_s21 + $0x50] sm:$0xff] %v1411_v13   ;;  %v953_v16 = vadd.f32 %v952_v4, %v800_v14  ;;  %v803_v17 = vadd.f32 %v1534_v15, %v1951_v9 }
 0x159   : > { %v956_v18 = vadd.f32 %v955_v12, %v803_v17  ;;  %v1535_v19 = vpop.f32.mrb[48].mxu0  ;;  %v1005_v22 = vmax.f32 %v953_v16, 0.0 }
 0x15a   : > { %v1536_v20 = vpop.f32.mrb[49].mxu0  ;;  %v960_v21 = vpop.f32.mrb[48].mxu1 }
 0x15b   : > { %v1006_v23 = vmax.f32 %v956_v18, 0.0  ;;  %v1537_v24 = vadd.f32 %v1536_v20, %v1535_v19  ;;  %v1538_v25 = vpop.f32.mrb[50].mxu0  ;;  %v1642_v26 = vpop.f32.mrb[49].mxu1 }
 0x15c   : > { %v1539_v27 = vpop.f32.mrb[51].mxu0  ;;  %v963_v28 = vpop.f32.mrb[50].mxu1 }
 0x15d   : > { %v1416_v29 = vpack.c.bf16 %v1006_v23, %v1005_v22  ;;  %v808_v30 = vadd.f32 %v1537_v24, %v1951_v9  ;;  %v1540_v31 = vadd.f32 %v1539_v27, %v1538_v25  ;;  %v1643_v32 = vpop.f32.mrb[51].mxu1 }
 0x15f   : > { %1443 = vst [vmem:[%s1959_s21 + $0x58] sm:$0xff] %v1416_v29   ;;  %v961_v33 = vadd.f32 %v960_v21, %v808_v30  ;;  %v811_v34 = vadd.f32 %v1540_v31, %v1951_v9 }
 0x161   : > { %v964_v35 = vadd.f32 %v963_v28, %v811_v34  ;;  %v1541_v36 = vpop.f32.mrb[52].mxu0  ;;  %v1007_v39 = vmax.f32 %v961_v33, 0.0 }
 0x162   : > { %v1542_v37 = vpop.f32.mrb[53].mxu0  ;;  %v968_v38 = vpop.f32.mrb[52].mxu1 }
 0x163   : > { %v1008_v40 = vmax.f32 %v964_v35, 0.0  ;;  %v1543_v41 = vadd.f32 %v1542_v37, %v1541_v36  ;;  %v1544_v42 = vpop.f32.mrb[54].mxu0  ;;  %v1646_v43 = vpop.f32.mrb[53].mxu1 }
 0x164   : > { %v1545_v44 = vpop.f32.mrb[55].mxu0  ;;  %v971_v45 = vpop.f32.mrb[54].mxu1 }
 0x165   : > { %v1421_v46 = vpack.c.bf16 %v1008_v40, %v1007_v39  ;;  %v816_v47 = vadd.f32 %v1543_v41, %v1951_v9  ;;  %v1546_v48 = vadd.f32 %v1545_v44, %v1544_v42  ;;  %v1647_v49 = vpop.f32.mrb[55].mxu1 }
 0x167   : > { %1444 = vst [vmem:[%s1959_s21 + $0x60] sm:$0xff] %v1421_v46   ;;  %v969_v50 = vadd.f32 %v968_v38, %v816_v47  ;;  %v819_v51 = vadd.f32 %v1546_v48, %v1951_v9 }
 0x169   : > { %v972_v52 = vadd.f32 %v971_v45, %v819_v51  ;;  %v1547_v53 = vpop.f32.mrb[56].mxu0  ;;  %v1009_v56 = vmax.f32 %v969_v50, 0.0 }
 0x16a   : > { %v1548_v54 = vpop.f32.mrb[57].mxu0  ;;  %v976_v55 = vpop.f32.mrb[56].mxu1 }
 0x16b   : > { %v1010_v57 = vmax.f32 %v972_v52, 0.0  ;;  %v1549_v58 = vadd.f32 %v1548_v54, %v1547_v53  ;;  %v1550_v59 = vpop.f32.mrb[58].mxu0  ;;  %v1650_v60 = vpop.f32.mrb[57].mxu1 }
 0x16c   : > { %v1551_v61 = vpop.f32.mrb[59].mxu0  ;;  %v979_v62 = vpop.f32.mrb[58].mxu1 }
 0x16d   : > { %v1426_v63 = vpack.c.bf16 %v1010_v57, %v1009_v56  ;;  %v824_v0 = vadd.f32 %v1549_v58, %v1951_v9  ;;  %v1552_v1 = vadd.f32 %v1551_v61, %v1550_v59  ;;  %v1651_v3 = vpop.f32.mrb[59].mxu1 }
 0x16f   : > { %1445 = vst [vmem:[%s1959_s21 + $0x68] sm:$0xff] %v1426_v63   ;;  %v977_v4 = vadd.f32 %v976_v55, %v824_v0  ;;  %v827_v5 = vadd.f32 %v1552_v1, %v1951_v9 }
 0x171   : > { %v980_v6 = vadd.f32 %v979_v62, %v827_v5  ;;  %v1011_v7 = vmax.f32 %v977_v4, 0.0 }
 0x173   : > { %v1012_v8 = vmax.f32 %v980_v6, 0.0 }
 0x175   : > { %v1431_v10 = vpack.c.bf16 %v1012_v8, %v1011_v7 }
 0x177   : > { %1446 = vst [vmem:[%s1959_s21 + $0x70] sm:$0xff] %v1431_v10  }
 0x178 PF: > { %s13_s12 = sadd.s32 1, %s1753_s12  }
 0x179   : > { %p10_p4 = scmp.ge.s32.totalorder %s13_s12, 4  }
 0x17b   :  { %12 = sbr.rel (!%p10_p4) target bundleno = 1 (0x1), region = 62 }

// kernel: alexnet_fc_forward.9
= control target key start
LH: loop header
LB: loop body
LE: loop exit
PB: predicated region body
PF: predicated region fallthrough
CT: control target
= control target key end

     0   :  { %s818_s6 = smov 0   ;;  %s820_s7 = smov 0   ;;  %s938_s0 = inlined_call_operand.vmem [shape: bf16[2,15,15,128], index: 0, kind: input, shape index: {}]   ;;  %s939_s1 = inlined_call_operand.vmem [shape: bf16[2,7,7,128], index: 1, kind: output, shape index: {}]  }
   0x1   :  { %s822_s8 = smov 0  }
   0x2 LB: > { %s23_s9 = sadd.s32 1, %s802_s7  ;;  %p679_p0 = scmp.ge.s32.totalorder %s806_s8, 1  ;;  %s806_s8 = sphi %s822_s8, %s11_s8   ;;  %s802_s7 = sphi %s820_s7, %s943_s7   ;;  %s798_s6 = sphi %s818_s6, %s942_s6  }
   0x3   : > { %p25_p1 = scmp.ge.s32.totalorder %s23_s9, 2  ;;  %p106_p2 = scmp.lt.s32.totalorder %s806_s8, 3 }
   0x5   : > { %s945_s9 = smov (%p25_p1, %s23_s9), 0  ;;  %p107_p3 = pnand %p679_p0, %p106_p2 }
   0x6   : > { %p132_p4 = scmp.lt.s32.totalorder (!%p107_p3), %s798_s6, 1  ;;  %vm238_vm0 = vcmask (!%p107_p3), 1046528   ;;  %vm344_vm1 = vcmask (!%p107_p3), 1045504   ;;  %vm568_vm2 = vcmask (!%p107_p3), 1043456   ;;  %vm569_vm3 = vsmask.f32 (!%p107_p3), 3328 }
   0x7   : > { %110 = sbr.rel (%p107_p3) target bundleno = 90 (0x5a), region = 24  ;;  %vm898_vm4 = vmand (!%p107_p3), %vm568_vm2, %vm569_vm3 }
   0xe   : > { %s947_s6 = smov (!%p132_p4, %s798_s6), 1 }
   0xf   : > { %s758_s10 = smul.u32 120, %s947_s6 }
  0x10   : > { %s759_s14 = smul.u32 28, %s947_s6 }
  0x11   : > { %s842_s13 = scalar_lea.vmem %s938_s0, %s758_s10 }
  0x12   : > { %v685_v0 = vld [vmem:[%s842_s13] sm:$0xff]   ;;  %v744_v1 = vld [vmem:[%s842_s13 + $0x8] sm:$0xff]   ;;  %v745_v2 = vld [vmem:[%s842_s13 + $0x10] sm:$0xff]   ;;  %s892_s17 = scalar_lea.vmem %s939_s1, %s759_s14 }
  0x13   : > { %v686_v3 = vunpack.c.l.bf16 %v685_v0  ;;  %v687_v4 = vunpack.c.h.bf16 %v685_v0  ;;  %v690_v5 = vunpack.c.l.bf16 %v744_v1  ;;  %v691_v6 = vunpack.c.h.bf16 %v744_v1  ;;  %v746_v7 = vld [vmem:[%s842_s13 + $0x18] sm:$0xff]   ;;  %v747_v36 = vld [vmem:[%s842_s13 + $0x20] sm:$0xff]   ;;  %v748_v45 = vld [vmem:[%s842_s13 + $0x28] sm:$0xff]  }
  0x14   : > { %v694_v8 = vunpack.c.l.bf16 %v745_v2  ;;  %v695_v9 = vunpack.c.h.bf16 %v745_v2  ;;  %v698_v10 = vunpack.c.l.bf16 %v746_v7  ;;  %v699_v11 = vunpack.c.h.bf16 %v746_v7  ;;  %v749_v54 = vld [vmem:[%s842_s13 + $0x30] sm:$0xff]  }
  0x15   : > { %v239_v12 = vrot.slane %v686_v3, 1  ;;  %v240_v13 = vrot.slane %v687_v4, 1  ;;  %v345_v14 = vrot.slane %v686_v3, 2  ;;  %v346_v15 = vrot.slane %v687_v4, 2 }
  0x16   : > { %v242_v16 = vrot.slane %v690_v5, 1  ;;  %v243_v17 = vrot.slane %v691_v6, 1  ;;  %v348_v18 = vrot.slane %v690_v5, 2  ;;  %v349_v19 = vrot.slane %v691_v6, 2 }
  0x17   : > { %v241_v20 = vsel %vm238_vm0, %v239_v12, %v240_v13  ;;  %v347_v21 = vsel %vm344_vm1, %v345_v14, %v346_v15  ;;  %v315_v22 = vmax.f32 %v687_v4, %v240_v13  ;;  %v245_v23 = vrot.slane %v694_v8, 1 }
  0x18   : > { %v314_v24 = vmax.f32 %v686_v3, %v241_v20  ;;  %v244_v25 = vsel %vm238_vm0, %v242_v16, %v243_v17  ;;  %v350_v26 = vsel %vm344_vm1, %v348_v18, %v349_v19  ;;  %v317_v27 = vmax.f32 %v691_v6, %v243_v17  ;;  %v750_v16 = vld [vmem:[%s842_s13 + $0x38] sm:$0xff]   ;;  %v751_v17 = vld [vmem:[%s842_s13 + $0x40] sm:$0xff]  }
  0x19   : > { %v421_v28 = vmax.f32 %v315_v22, %v346_v15  ;;  %v316_v29 = vmax.f32 %v690_v5, %v244_v25  ;;  %v246_v30 = vrot.slane %v695_v9, 1  ;;  %v351_v31 = vrot.slane %v694_v8, 2 }
  0x1a   : > { %v420_v32 = vmax.f32 %v314_v24, %v347_v21  ;;  %v423_v33 = vmax.f32 %v317_v27, %v349_v19  ;;  %v352_v34 = vrot.slane %v695_v9, 2  ;;  %v248_v35 = vrot.slane %v698_v10, 1 }
  0x1b   : > { %451 = vst [vmem:[#allocation2 + $0x8] sm:$0x1f] %v421_v28  ;;  %v422_v37 = vmax.f32 %v316_v29, %v350_v26  ;;  %v247_v38 = vsel %vm238_vm0, %v245_v23, %v246_v30  ;;  %v319_v39 = vmax.f32 %v695_v9, %v246_v30  ;;  %v249_v40 = vrot.slane %v699_v11, 1  ;;  %v752_v23 = vld [vmem:[%s842_s13 + $0x48] sm:$0xff]  }
  0x1c   : > { %450 = vst [vmem:[#allocation2] sm:$0xff] %v420_v32  ;;  %453 = vst [vmem:[#allocation2 + $0x18] sm:$0x1f] %v423_v33  ;;  %v318_v41 = vmax.f32 %v694_v8, %v247_v38  ;;  %v353_v42 = vsel %vm344_vm1, %v351_v31, %v352_v34  ;;  %v354_v43 = vrot.slane %v698_v10, 2  ;;  %v355_v44 = vrot.slane %v699_v11, 2 }
  0x1d   : > { %452 = vst [vmem:[#allocation2 + $0x10] sm:$0xff] %v422_v37  ;;  %v425_v46 = vmax.f32 %v319_v39, %v352_v34  ;;  %v250_v47 = vsel %vm238_vm0, %v248_v35, %v249_v40  ;;  %v321_v48 = vmax.f32 %v699_v11, %v249_v40  ;;  %v702_v49 = vunpack.c.l.bf16 %v747_v36 }
  0x1e   : > { %v424_v50 = vmax.f32 %v318_v41, %v353_v42  ;;  %v320_v51 = vmax.f32 %v698_v10, %v250_v47  ;;  %v356_v52 = vsel %vm344_vm1, %v354_v43, %v355_v44  ;;  %v703_v53 = vunpack.c.h.bf16 %v747_v36 }
  0x1f   : > { %455 = vst [vmem:[#allocation2 + $0x28] sm:$0x1f] %v425_v46  ;;  %v427_v55 = vmax.f32 %v321_v48, %v355_v44  ;;  %v251_v56 = vrot.slane %v702_v49, 1  ;;  %v357_v57 = vrot.slane %v702_v49, 2  ;;  %v706_v58 = vunpack.c.l.bf16 %v748_v45 }
  0x20   : > { %454 = vst [vmem:[#allocation2 + $0x20] sm:$0xff] %v424_v50  ;;  %v426_v59 = vmax.f32 %v320_v51, %v356_v52  ;;  %v252_v60 = vrot.slane %v703_v53, 1  ;;  %v358_v61 = vrot.slane %v703_v53, 2  ;;  %v707_v62 = vunpack.c.h.bf16 %v748_v45 }
  0x21   : > { %457 = vst [vmem:[#allocation2 + $0x38] sm:$0x1f] %v427_v55  ;;  %v254_v63 = vrot.slane %v706_v58, 1  ;;  %v360_v0 = vrot.slane %v706_v58, 2  ;;  %v710_v1 = vunpack.c.l.bf16 %v749_v54  ;;  %v711_v2 = vunpack.c.h.bf16 %v749_v54  ;;  %v753_v54 = vld [vmem:[%s842_s13 + $0x50] sm:$0xff]  }
  0x22   : > { %456 = vst [vmem:[#allocation2 + $0x30] sm:$0xff] %v426_v59  ;;  %v253_v3 = vsel %vm238_vm0, %v251_v56, %v252_v60  ;;  %v359_v4 = vsel %vm344_vm1, %v357_v57, %v358_v61  ;;  %v323_v5 = vmax.f32 %v703_v53, %v252_v60  ;;  %v255_v6 = vrot.slane %v707_v62, 1  ;;  %v754_v59 = vld [vmem:[%s842_s13 + $0x58] sm:$0xff]  }
  0x23   : > { %v322_v7 = vmax.f32 %v702_v49, %v253_v3  ;;  %v361_v8 = vrot.slane %v707_v62, 2  ;;  %v257_v9 = vrot.slane %v710_v1, 1  ;;  %v258_v10 = vrot.slane %v711_v2, 1  ;;  %v480_v11 = vld [vmem:[#allocation2] ss:$2 sm:$0x7f] }
  0x24   : > { %v429_v12 = vmax.f32 %v323_v5, %v358_v61  ;;  %v256_v13 = vsel %vm238_vm0, %v254_v63, %v255_v6  ;;  %v325_v14 = vmax.f32 %v707_v62, %v255_v6  ;;  %v363_v15 = vrot.slane %v710_v1, 2  ;;  %509 = vst [vmem:[#allocation3] sm:$0x7f] %v480_v11  ;;  %v482_v18 = vld [vmem:[#allocation2 + $0x10] ss:$2 sm:$0x7f] }
  0x25   : > { %v428_v19 = vmax.f32 %v322_v7, %v359_v4  ;;  %v324_v20 = vmax.f32 %v706_v58, %v256_v13  ;;  %v362_v21 = vsel %vm344_vm1, %v360_v0, %v361_v8  ;;  %v259_v22 = vsel %vm238_vm0, %v257_v9, %v258_v10  ;;  %510 = vst [vmem:[#allocation3 + $0x8] sm:$0x7f] %v482_v18 }
  0x26   : > { %459 = vst [vmem:[#allocation2 + $0x48] sm:$0x1f] %v429_v12  ;;  %v431_v24 = vmax.f32 %v325_v14, %v361_v8  ;;  %v326_v25 = vmax.f32 %v710_v1, %v259_v22  ;;  %v364_v26 = vrot.slane %v711_v2, 2  ;;  %v327_v27 = vmax.f32 %v711_v2, %v258_v10  ;;  %v755_v14 = vld [vmem:[%s842_s13 + $0x60] sm:$0xff]  }
  0x27   : > { %458 = vst [vmem:[#allocation2 + $0x40] sm:$0xff] %v428_v19  ;;  %v430_v28 = vmax.f32 %v324_v20, %v362_v21  ;;  %v714_v29 = vunpack.c.l.bf16 %v750_v16  ;;  %v715_v30 = vunpack.c.h.bf16 %v750_v16  ;;  %v718_v31 = vunpack.c.l.bf16 %v751_v17  ;;  %v484_v32 = vld [vmem:[#allocation2 + $0x20] ss:$2 sm:$0x7f] }
  0x28   : > { %461 = vst [vmem:[#allocation2 + $0x58] sm:$0x1f] %v431_v24  ;;  %v365_v33 = vsel %vm344_vm1, %v363_v15, %v364_v26  ;;  %v433_v34 = vmax.f32 %v327_v27, %v364_v26  ;;  %v719_v35 = vunpack.c.h.bf16 %v751_v17  ;;  %v722_v36 = vunpack.c.l.bf16 %v752_v23  ;;  %511 = vst [vmem:[#allocation3 + $0x10] sm:$0x7f] %v484_v32 }
  0x29   : > { %460 = vst [vmem:[#allocation2 + $0x50] sm:$0xff] %v430_v28  ;;  %v432_v37 = vmax.f32 %v326_v25, %v365_v33  ;;  %v260_v38 = vrot.slane %v714_v29, 1  ;;  %v261_v39 = vrot.slane %v715_v30, 1  ;;  %v366_v40 = vrot.slane %v714_v29, 2  ;;  %v756_v28 = vld [vmem:[%s842_s13 + $0x68] sm:$0xff]  }
  0x2a   : > { %v486_v41 = vld [vmem:[#allocation2 + $0x30] ss:$2 sm:$0x7f]  ;;  %463 = vst [vmem:[#allocation2 + $0x68] sm:$0x1f] %v433_v34  ;;  %v367_v42 = vrot.slane %v715_v30, 2  ;;  %v723_v49 = vunpack.c.h.bf16 %v752_v23  ;;  %v726_v3 = vunpack.c.l.bf16 %v753_v54  ;;  %v727_v4 = vunpack.c.h.bf16 %v753_v54 }
  0x2b   : > { %v263_v43 = vrot.slane %v718_v31, 1  ;;  %v264_v44 = vrot.slane %v719_v35, 1  ;;  %v369_v45 = vrot.slane %v718_v31, 2  ;;  %512 = vst [vmem:[#allocation3 + $0x18] sm:$0x7f] %v486_v41  ;;  %462 = vst [vmem:[#allocation2 + $0x60] sm:$0xff] %v432_v37  ;;  %v262_v46 = vsel %vm238_vm0, %v260_v38, %v261_v39 }
  0x2c   : > { %v329_v47 = vmax.f32 %v715_v30, %v261_v39  ;;  %v370_v48 = vrot.slane %v719_v35, 2  ;;  %v328_v50 = vmax.f32 %v714_v29, %v262_v46  ;;  %v368_v51 = vsel %vm344_vm1, %v366_v40, %v367_v42  ;;  %v757_v37 = vld [vmem:[%s842_s13 + $0x70] sm:$0xff]  }
  0x2d   : > { %v265_v52 = vsel %vm238_vm0, %v263_v43, %v264_v44  ;;  %v331_v53 = vmax.f32 %v719_v35, %v264_v44  ;;  %v266_v58 = vrot.slane %v722_v36, 1  ;;  %v267_v62 = vrot.slane %v723_v49, 1 }
  0x2e   : > { %v435_v55 = vmax.f32 %v329_v47, %v367_v42  ;;  %v330_v56 = vmax.f32 %v718_v31, %v265_v52  ;;  %v371_v57 = vsel %vm344_vm1, %v369_v45, %v370_v48  ;;  %v434_v60 = vmax.f32 %v328_v50, %v368_v51  ;;  %v488_v0 = vld [vmem:[#allocation2 + $0x40] ss:$2 sm:$0x7f] }
  0x2f   : > { %v437_v61 = vmax.f32 %v331_v53, %v370_v48  ;;  %v372_v63 = vrot.slane %v722_v36, 2  ;;  %v373_v2 = vrot.slane %v723_v49, 2  ;;  %513 = vst [vmem:[#allocation3 + $0x20] sm:$0x7f] %v488_v0  ;;  %v268_v5 = vsel %vm238_vm0, %v266_v58, %v267_v62  ;;  %v525_v58 = vld [vmem:[#allocation3 + $0x10] sm:$0x7f] }
  0x30   : > { %465 = vst [vmem:[#allocation2 + $0x78] sm:$0x1f] %v435_v55  ;;  %v436_v1 = vmax.f32 %v330_v56, %v371_v57  ;;  %464 = vst [vmem:[#allocation2 + $0x70] sm:$0xff] %v434_v60  ;;  %v333_v6 = vmax.f32 %v723_v49, %v267_v62  ;;  %v730_v7 = vunpack.c.l.bf16 %v754_v59  ;;  %v731_v8 = vunpack.c.h.bf16 %v754_v59  ;;  %v490_v9 = vld [vmem:[#allocation2 + $0x50] ss:$2 sm:$0x7f] }
  0x31   : > { %467 = vst [vmem:[#allocation2 + $0x88] sm:$0x1f] %v437_v61  ;;  %v332_v10 = vmax.f32 %v722_v36, %v268_v5  ;;  %v374_v11 = vsel %vm344_vm1, %v372_v63, %v373_v2  ;;  %v269_v12 = vrot.slane %v726_v3, 1  ;;  %v270_v13 = vrot.slane %v727_v4, 1  ;;  %514 = vst [vmem:[#allocation3 + $0x28] sm:$0x7f] %v490_v9 }
  0x32   : > { %466 = vst [vmem:[#allocation2 + $0x80] sm:$0xff] %v436_v1  ;;  %v439_v15 = vmax.f32 %v333_v6, %v373_v2  ;;  %v375_v16 = vrot.slane %v726_v3, 2  ;;  %v376_v17 = vrot.slane %v727_v4, 2  ;;  %v272_v18 = vrot.slane %v730_v7, 1  ;;  %v524_v56 = vld [vmem:[#allocation3] sm:$0x7f] }
  0x33   : > { %v492_v19 = vld [vmem:[#allocation2 + $0x60] ss:$2 sm:$0x7f]  ;;  %v438_v20 = vmax.f32 %v332_v10, %v374_v11  ;;  %v271_v21 = vsel %vm238_vm0, %v269_v12, %v270_v13  ;;  %v335_v22 = vmax.f32 %v727_v4, %v270_v13  ;;  %v273_v23 = vrot.slane %v731_v8, 1  ;;  %v532_v57 = vld [vmem:[#allocation3 + $0x8] sm:$0x7f] }
  0x34   : > { %515 = vst [vmem:[#allocation3 + $0x30] sm:$0x7f] %v492_v19  ;;  %469 = vst [vmem:[#allocation2 + $0x98] sm:$0x1f] %v439_v15  ;;  %v334_v24 = vmax.f32 %v726_v3, %v271_v21  ;;  %v377_v25 = vsel %vm344_vm1, %v375_v16, %v376_v17  ;;  %v378_v26 = vrot.slane %v730_v7, 2  ;;  %v379_v27 = vrot.slane %v731_v8, 2 }
  0x35   : > { %468 = vst [vmem:[#allocation2 + $0x90] sm:$0xff] %v438_v20  ;;  %v441_v29 = vmax.f32 %v335_v22, %v376_v17  ;;  %v274_v30 = vsel %vm238_vm0, %v272_v18, %v273_v23  ;;  %v337_v31 = vmax.f32 %v731_v8, %v273_v23  ;;  %v734_v32 = vunpack.c.l.bf16 %v755_v14  ;;  %v533_v59 = vld [vmem:[#allocation3 + $0x18] sm:$0x7f] }
  0x36   : > { %v440_v33 = vmax.f32 %v334_v24, %v377_v25  ;;  %v336_v34 = vmax.f32 %v730_v7, %v274_v30  ;;  %v380_v35 = vsel %vm344_vm1, %v378_v26, %v379_v27  ;;  %v735_v36 = vunpack.c.h.bf16 %v755_v14  ;;  %v526_v0 = vld [vmem:[#allocation3 + $0x20] sm:$0x7f]  ;;  %v547_v24 = vld [vmem:[#allocation3 + $0x10] sm:$0x7f] }
  0x37   : > { %471 = vst [vmem:[#allocation2 + $0xa8] sm:$0x1f] %v441_v29  ;;  %v443_v38 = vmax.f32 %v337_v31, %v379_v27  ;;  %v275_v39 = vrot.slane %v734_v32, 1  ;;  %v381_v40 = vrot.slane %v734_v32, 2  ;;  %v738_v41 = vunpack.c.l.bf16 %v756_v28  ;;  %v571_v25 = vld [vmem:[%s892_s17] sm:$0xf] }
  0x38   : > { %v494_v42 = vld [vmem:[#allocation2 + $0x70] ss:$2 sm:$0x7f]  ;;  %470 = vst [vmem:[#allocation2 + $0xa0] sm:$0xff] %v440_v33  ;;  %v442_v43 = vmax.f32 %v336_v34, %v380_v35  ;;  %v276_v44 = vrot.slane %v735_v36, 1  ;;  %v382_v45 = vrot.slane %v735_v36, 2  ;;  %v739_v46 = vunpack.c.h.bf16 %v756_v28 }
  0x39   : > { %516 = vst [vmem:[#allocation3 + $0x38] sm:$0x7f] %v494_v42  ;;  %v496_v47 = vld [vmem:[#allocation2 + $0x80] ss:$2 sm:$0x7f]  ;;  %v278_v48 = vrot.slane %v738_v41, 1  ;;  %v742_v50 = vunpack.c.l.bf16 %v757_v37  ;;  %v743_v51 = vunpack.c.h.bf16 %v757_v37  ;;  %v539_v18 = vmax.f32 %v524_v56, %v532_v57 }
  0x3a   : > { %473 = vst [vmem:[#allocation2 + $0xb8] sm:$0x1f] %v443_v38  ;;  %v384_v49 = vrot.slane %v738_v41, 2  ;;  %517 = vst [vmem:[#allocation3 + $0x40] sm:$0x7f] %v496_v47  ;;  %v277_v52 = vsel %vm238_vm0, %v275_v39, %v276_v44  ;;  %v383_v53 = vsel %vm344_vm1, %v381_v40, %v382_v45  ;;  %v339_v54 = vmax.f32 %v735_v36, %v276_v44 }
  0x3b   : > { %472 = vst [vmem:[#allocation2 + $0xb0] sm:$0xff] %v442_v43  ;;  %v279_v55 = vrot.slane %v739_v46, 1  ;;  %v338_v60 = vmax.f32 %v734_v32, %v277_v52  ;;  %v385_v61 = vrot.slane %v739_v46, 2  ;;  %v281_v62 = vrot.slane %v742_v50, 1  ;;  %v534_v6 = vld [vmem:[#allocation3 + $0x28] sm:$0x7f] }
  0x3c   : > { %v282_v63 = vrot.slane %v743_v51, 1  ;;  %v445_v1 = vmax.f32 %v339_v54, %v382_v45  ;;  %v387_v4 = vrot.slane %v742_v50, 2  ;;  %v498_v5 = vld [vmem:[#allocation2 + $0x90] ss:$2 sm:$0x7f]  ;;  %v388_v14 = vrot.slane %v743_v51, 2 }
  0x3d   : > { %v280_v2 = vsel %vm238_vm0, %v278_v48, %v279_v55  ;;  %v341_v3 = vmax.f32 %v739_v46, %v279_v55  ;;  %v444_v7 = vmax.f32 %v338_v60, %v383_v53  ;;  %v386_v9 = vsel %vm344_vm1, %v384_v49, %v385_v61  ;;  %518 = vst [vmem:[#allocation3 + $0x48] sm:$0x7f] %v498_v5  ;;  %v527_v11 = vld [vmem:[#allocation3 + $0x30] sm:$0x7f]  ;;  %v548_v26 = vld [vmem:[#allocation3 + $0x20] sm:$0x7f] }
  0x3e   : > { %v340_v8 = vmax.f32 %v738_v41, %v280_v2  ;;  %v283_v10 = vsel %vm238_vm0, %v281_v62, %v282_v63  ;;  %475 = vst [vmem:[#allocation2 + $0xc8] sm:$0x1f] %v445_v1  ;;  %v343_v15 = vmax.f32 %v743_v51, %v282_v63  ;;  %v540_v19 = vmax.f32 %v525_v58, %v533_v59  ;;  %v549_v27 = vld [vmem:[#allocation3 + $0x30] sm:$0x7f]  ;;  %v577_v37 = vld [vmem:[%s892_s17 + $0x8] sm:$0xf] }
  0x3f   : > { %v447_v12 = vmax.f32 %v341_v3, %v385_v61  ;;  %v342_v13 = vmax.f32 %v742_v50, %v283_v10  ;;  %474 = vst [vmem:[#allocation2 + $0xc0] sm:$0xff] %v444_v7  ;;  %v500_v17 = vld [vmem:[#allocation2 + $0xa0] ss:$2 sm:$0x7f]  ;;  %v541_v20 = vmax.f32 %v526_v0, %v534_v6  ;;  %v389_v22 = vsel %vm344_vm1, %v387_v4, %v388_v14  ;;  %v583_v56 = vld [vmem:[%s892_s17 + $0x10] sm:$0xf] }
  0x40   : > { %v446_v16 = vmax.f32 %v340_v8, %v386_v9  ;;  %v535_v21 = vld [vmem:[#allocation3 + $0x38] sm:$0x7f]  ;;  %v449_v23 = vmax.f32 %v343_v15, %v388_v14  ;;  %519 = vst [vmem:[#allocation3 + $0x50] sm:$0x7f] %v500_v17  ;;  %v554_v31 = vmax.f32 %v539_v18, %v547_v24  ;;  %v555_v33 = vmax.f32 %v540_v19, %v548_v26  ;;  %v574_v36 = vld [vmem:[%s892_s17 + $0x4] sm:$0xf] }
  0x41   : > { %477 = vst [vmem:[#allocation2 + $0xd8] sm:$0x1f] %v447_v12  ;;  %v542_v28 = vmax.f32 %v527_v11, %v535_v21  ;;  %v448_v29 = vmax.f32 %v342_v13, %v389_v22  ;;  %v556_v34 = vmax.f32 %v541_v20, %v549_v27  ;;  %v550_v35 = vld [vmem:[#allocation3 + $0x40] sm:$0x7f]  ;;  %v580_v43 = vld [vmem:[%s892_s17 + $0xc] sm:$0xf] }
  0x42   : > { %476 = vst [vmem:[#allocation2 + $0xd0] sm:$0xff] %v446_v16  ;;  %v502_v30 = vld [vmem:[#allocation2 + $0xb0] ss:$2 sm:$0x7f]  ;;  %479 = vst [vmem:[#allocation2 + $0xe8] sm:$0x1f] %v449_v23  ;;  %v561_v40 = vpack.c.bf16 %v554_v31, %v554_v31  ;;  %v562_v41 = vpack.c.bf16 %v555_v33, %v555_v33 }
  0x43   : > { %520 = vst [vmem:[#allocation3 + $0x58] sm:$0x7f] %v502_v30  ;;  %v557_v38 = vmax.f32 %v542_v28, %v550_v35  ;;  %v528_v39 = vld [vmem:[#allocation3 + $0x40] sm:$0x7f]  ;;  %478 = vst [vmem:[#allocation2 + $0xe0] sm:$0xff] %v448_v29  ;;  %v563_v42 = vpack.c.bf16 %v556_v34, %v556_v34 }
  0x44   : > { %v536_v45 = vld [vmem:[#allocation3 + $0x48] sm:$0x7f]  ;;  %v572_v46 = vsel %vm898_vm4, %v561_v40, %v571_v25  ;;  %v575_v47 = vsel %vm898_vm4, %v562_v41, %v574_v36  ;;  %v586_v1 = vld [vmem:[%s892_s17 + $0x14] sm:$0xf] }
  0x45   : > { %v564_v44 = vpack.c.bf16 %v557_v38, %v557_v38  ;;  %v578_v48 = vsel %vm898_vm4, %v563_v42, %v577_v37  ;;  %v543_v49 = vmax.f32 %v528_v39, %v536_v45  ;;  %573 = vst [vmem:[%s892_s17] sm:$0xf] %v572_v46  ;;  %576 = vst [vmem:[%s892_s17 + $0x4] sm:$0xf] %v575_v47  ;;  %v589_v8 = vld [vmem:[%s892_s17 + $0x18] sm:$0xf] }
  0x46   : > { %v504_v50 = vld [vmem:[#allocation2 + $0xc0] ss:$2 sm:$0x7f]  ;;  %579 = vst [vmem:[%s892_s17 + $0x8] sm:$0xf] %v578_v48 }
  0x47   : > { %v581_v51 = vsel %vm898_vm4, %v564_v44, %v580_v43  ;;  %521 = vst [vmem:[#allocation3 + $0x60] sm:$0x7f] %v504_v50  ;;  %v551_v52 = vld [vmem:[#allocation3 + $0x50] sm:$0x7f] }
  0x48   : > { %582 = vst [vmem:[%s892_s17 + $0xc] sm:$0xf] %v581_v51  ;;  %v558_v54 = vmax.f32 %v543_v49, %v551_v52  ;;  %v529_v55 = vld [vmem:[#allocation3 + $0x50] sm:$0x7f] }
  0x49   : > { %v506_v53 = vld [vmem:[#allocation2 + $0xd0] ss:$2 sm:$0x7f] }
  0x4a   : > { %522 = vst [vmem:[#allocation3 + $0x68] sm:$0x7f] %v506_v53  ;;  %v537_v57 = vld [vmem:[#allocation3 + $0x58] sm:$0x7f]  ;;  %v565_v59 = vpack.c.bf16 %v558_v54, %v558_v54 }
  0x4b   : > { %v508_v58 = vld [vmem:[#allocation2 + $0xe0] ss:$2 sm:$0x7f]  ;;  %v544_v60 = vmax.f32 %v529_v55, %v537_v57 }
  0x4c   : > { %523 = vst [vmem:[#allocation3 + $0x70] sm:$0x7f] %v508_v58  ;;  %v584_v61 = vsel %vm898_vm4, %v565_v59, %v583_v56 }
  0x4d   : > { %585 = vst [vmem:[%s892_s17 + $0x10] sm:$0xf] %v584_v61 }
  0x4e   : > { %v552_v62 = vld [vmem:[#allocation3 + $0x60] sm:$0x7f] }
  0x4f   : > { %v530_v63 = vld [vmem:[#allocation3 + $0x60] sm:$0x7f]  ;;  %v559_v0 = vmax.f32 %v544_v60, %v552_v62 }
  0x51   : > { %v538_v2 = vld [vmem:[#allocation3 + $0x68] sm:$0x7f]  ;;  %v566_v3 = vpack.c.bf16 %v559_v0, %v559_v0 }
  0x52   : > { %v545_v4 = vmax.f32 %v530_v63, %v538_v2 }
  0x53   : > { %v553_v5 = vld [vmem:[#allocation3 + $0x70] sm:$0x7f]  ;;  %v587_v6 = vsel %vm898_vm4, %v566_v3, %v586_v1 }
  0x54   : > { %v560_v7 = vmax.f32 %v545_v4, %v553_v5  ;;  %588 = vst [vmem:[%s892_s17 + $0x14] sm:$0xf] %v587_v6 }
  0x56   : > { %v567_v9 = vpack.c.bf16 %v560_v7, %v560_v7 }
  0x58   : > { %v590_v10 = vsel %vm898_vm4, %v567_v9, %v589_v8 }
  0x59   : > { %591 = vst [vmem:[%s892_s17 + $0x18] sm:$0xf] %v590_v10 }
  0x5a PF: > { %s11_s8 = sadd.s32 1, %s806_s8   ;;  %s942_s6 = smov %s802_s7 }
  0x5b   : > { %p8_p5 = scmp.ge.s32.totalorder %s11_s8, 4   ;;  %s943_s7 = smov %s945_s9 }
  0x5d   :  { %10 = sbr.rel (!%p8_p5) target bundleno = 2 (0x2), region = 70 }

// kernel: alexnet_fc_forward.11
= control target key start
LH: loop header
LB: loop body
LE: loop exit
PB: predicated region body
PF: predicated region fallthrough
CT: control target
= control target key end

     0   :  { %s588_s6 = smov 0   ;;  %s590_s7 = smov 0   ;;  %s698_s0 = inlined_call_operand.vmem [shape: bf16[2,7,7,256], index: 0, kind: input, shape index: {}]   ;;  %s699_s1 = inlined_call_operand.vmem [shape: bf16[2,3,3,256], index: 1, kind: output, shape index: {}]  }
   0x1   :  { %s592_s8 = smov 0   ;;  %s594_s9 = smov 0  }
   0x2   :  { %s596_s10 = smov 0   ;;  %s598_s11 = smov 0  }
   0x3   :  { %s600_s12 = smov 0  }
   0x4 LB: > { %s20_s13 = sadd.s32 1, %s568_s10  ;;  %s23_s14 = sadd.s32 1, %s572_s11  ;;  %s576_s12 = sphi %s600_s12, %s11_s12   ;;  %s572_s11 = sphi %s598_s11, %s708_s11   ;;  %s568_s10 = sphi %s596_s10, %s707_s10   ;;  %s564_s9 = sphi %s594_s9, %s706_s9   ;;  %s560_s8 = sphi %s592_s8, %s705_s8   ;;  %s556_s7 = sphi %s590_s7, %s704_s7   ;;  %s552_s6 = sphi %s588_s6, %s703_s6  }
   0x5   : > { %p21_p0 = scmp.ge.s32.totalorder %s20_s13, 2  ;;  %s438_s15 = sadd.s32 4294967295, %s576_s12  }
   0x6   : > { %p39_p1 = scmp.ne.s32.totalorder %s556_s7, %s552_s6  ;;  %p40_p2 = scmp.eq.s32.totalorder %s576_s12, 0 }
   0x7   : > { %s710_s13 = smov (%p21_p0, %s20_s13), 0  ;;  %s712_s14 = smov (!%p21_p0, %s23_s14), %s572_s11 }
   0x8   : > { %p25_p3 = scmp.ge.s32.totalorder %s712_s14, 2  ;;  %p71_p4 = scmp.eq.s32.totalorder %s438_s15, 3 }
   0x9   : > { %s28_s16 = ssub.s32 %s568_s10, %s710_s13  ;;  %p41_p5 = por %p40_p2, %p39_p1 }
   0xa   : > { %s714_s14 = smov (%p25_p3, %s712_s14), 0  ;;  %p636_p6 = por %p71_p4, %p39_p1 }
   0xb   : > { %s27_s18 = ssub.s32 %s572_s11, %s714_s14  ;;  %s32_s20 = sadd.s32 1, %s556_s7 }
   0xc   : > { %s29_s19 = sor.u32 %s28_s16, %s27_s18  ;;  %p441_p8 = scmp.ge.s32.totalorder %s576_s12, 4 }
   0xd   : > { %p30_p7 = scmp.eq.s32.totalorder %s29_s19, 0 }
   0xe   : > { %93 = sbr.rel (%p441_p8) target bundleno = 32 (0x20), region = 16 }
   0xf   : > { %s644_s21 = scalar_select %p30_p7, %s556_s7, %s32_s20  }
  0x15   : > { %96 = sbr.rel (!%p41_p5) target bundleno = 32 (0x20), region = 20  ;;  %s98_s22 = sand.u32 (%p41_p5), 1, %s556_s7  }
  0x16   : > { %s462_s23 = smul.u32 (%p41_p5), 14, %s572_s11 }
  0x17   : > { %s461_s24 = smul.u32 (%p41_p5), 28, %s98_s22 }
  0x18   : > { %s102_s25 = sadd.s32 (%p41_p5), %s568_s10, %s462_s23 }
  0x19   : > { %s442_s26 = sshll.u32 (%p41_p5), %s102_s25, 2  ;;  %s100_s30 = scalar_lea.vmem (%p41_p5), [#allocation4], %s461_s24 }
  0x1a   : > { %s104_s29 = scalar_lea.vmem (%p41_p5), %s698_s0, %s442_s26 }
  0x1b   : > { %v120_v0 = vld [vmem:[%s104_s29] sm:$0xf] (%p41_p5)  ;;  %v122_v1 = vld [vmem:[%s104_s29 + $0x8] sm:$0xf] (%p41_p5)  ;;  %v124_v2 = vld [vmem:[%s104_s29 + $0x10] sm:$0xf] (%p41_p5) }
  0x1c   : > { %121 = vst [vmem:[%s100_s30] sm:$0xf] %v120_v0  ;;  %123 = vst [vmem:[%s100_s30 + $0x4] sm:$0xf] %v122_v1  ;;  %v126_v3 = vld [vmem:[%s104_s29 + $0x18] sm:$0xf] }
  0x1d   : > { %125 = vst [vmem:[%s100_s30 + $0x8] sm:$0xf] %v124_v2  ;;  %v128_v4 = vld [vmem:[%s104_s29 + $0x20] sm:$0xf]  ;;  %v130_v5 = vld [vmem:[%s104_s29 + $0x28] sm:$0xf] }
  0x1e   : > { %127 = vst [vmem:[%s100_s30 + $0xc] sm:$0xf] %v126_v3  ;;  %129 = vst [vmem:[%s100_s30 + $0x10] sm:$0xf] %v128_v4  ;;  %v132_v6 = vld [vmem:[%s104_s29 + $0x30] sm:$0xf] }
  0x1f   : > { %131 = vst [vmem:[%s100_s30 + $0x14] sm:$0xf] %v130_v5  ;;  %133 = vst [vmem:[%s100_s30 + $0x18] sm:$0xf] %v132_v6 }
  0x20 PF: > { %p443_p9 = scmp.ge.s32.totalorder %s576_s12, 1  ;;  %p169_p10 = scmp.lt.s32.totalorder %s576_s12, 5 }
  0x22   : > { %p170_p11 = pnand %p443_p9, %p169_p10 }
  0x23   : > { %s176_s2 = sand.u32 (!%p170_p11), 1, %s552_s6   ;;  %vm305_vm0 = vsmask.f32 (!%p170_p11), 1280  ;;  %vm304_vm1 = vcmask (!%p170_p11), 1041408  }
  0x24   : > { %173 = sbr.rel (%p170_p11) target bundleno = 85 (0x55), region = 61  ;;  %vm660_vm2 = vmand (!%p170_p11), %vm304_vm1, %vm305_vm0 }
  0x25   : > { %s463_s3 = smul.u32 (!%p170_p11), 28, %s176_s2 }
  0x26   : > { %s464_s5 = smul.u32 (!%p170_p11), 6, %s176_s2 }
  0x27   : > { %s178_s4 = scalar_lea.vmem (!%p170_p11), [#allocation4], %s463_s3 }
  0x28   : > { %v448_v7 = vld [vmem:[%s178_s4] sm:$0xff] (!%p170_p11)   ;;  %v459_v8 = vld [vmem:[%s178_s4 + $0x8] sm:$0xff] (!%p170_p11)   ;;  %v460_v9 = vld [vmem:[%s178_s4 + $0x10] sm:$0xff] (!%p170_p11)   ;;  %s193_s15 = scalar_lea.vmem (!%p170_p11), [#allocation5], %s464_s5 }
  0x29   : > { %v449_v10 = vunpack.c.l.bf16 (!%p170_p11), %v448_v7  ;;  %v450_v11 = vunpack.c.h.bf16 (!%p170_p11), %v448_v7  ;;  %v453_v12 = vunpack.c.l.bf16 (!%p170_p11), %v459_v8  ;;  %v454_v13 = vunpack.c.h.bf16 (!%p170_p11), %v459_v8  ;;  %v200_v14 = vld [vmem:[%s178_s4 + $0x18] sm:$0xf] (!%p170_p11) }
  0x2a   : > { %v457_v15 = vunpack.c.l.bf16 (!%p170_p11), %v460_v9  ;;  %v458_v16 = vunpack.c.h.bf16 (!%p170_p11), %v460_v9  ;;  %v207_v17 = vunpack.c.l.bf16 (!%p170_p11), %v200_v14  ;;  %v307_v1 = vld [vmem:[%s193_s15] sm:$0x3] (!%p170_p11)  ;;  %v310_v6 = vld [vmem:[%s193_s15 + $0x2] sm:$0x3] (!%p170_p11) }
  0x2b   : > { %v215_v18 = vrot.slane %v449_v10, 1  ;;  %v236_v19 = vrot.slane %v449_v10, 2  ;;  %v216_v20 = vrot.slane %v450_v11, 1  ;;  %v237_v21 = vrot.slane %v450_v11, 2  ;;  %s465_s6 = smul.u32 (%p636_p6), 6, %s564_s9 }
  0x2c   : > { %v217_v22 = vrot.slane %v453_v12, 1  ;;  %v238_v23 = vrot.slane %v453_v12, 2  ;;  %v218_v24 = vrot.slane %v454_v13, 1  ;;  %v239_v25 = vrot.slane %v454_v13, 2 }
  0x2d   : > { %v229_v26 = vmax.f32 %v449_v10, %v215_v18  ;;  %v230_v27 = vmax.f32 %v450_v11, %v216_v20  ;;  %v219_v28 = vrot.slane %v457_v15, 1  ;;  %v240_v29 = vrot.slane %v457_v15, 2  ;;  %v313_v10 = vld [vmem:[%s193_s15 + $0x4] sm:$0x3]  ;;  %s324_s16 = sadd.s32 (%p636_p6), %s560_s8, %s465_s6 }
  0x2e   : > { %v231_v30 = vmax.f32 %v453_v12, %v217_v22  ;;  %v232_v31 = vmax.f32 %v454_v13, %v218_v24  ;;  %v220_v32 = vrot.slane %v458_v16, 1  ;;  %v241_v33 = vrot.slane %v458_v16, 2  ;;  %s444_s18 = sshll.u32 (%p636_p6), %s324_s16, 1 }
  0x2f   : > { %v250_v34 = vmax.f32 %v229_v26, %v236_v19  ;;  %v251_v35 = vmax.f32 %v230_v27, %v237_v21  ;;  %v233_v36 = vmax.f32 %v457_v15, %v219_v28  ;;  %v221_v37 = vrot.slane %v207_v17, 1  ;;  %s326_s22 = scalar_lea.vmem (%p636_p6), %s699_s1, %s444_s18 }
  0x30   : > { %v252_v38 = vmax.f32 %v231_v30, %v238_v23  ;;  %v253_v39 = vmax.f32 %v232_v31, %v239_v25  ;;  %v234_v40 = vmax.f32 %v458_v16, %v220_v32  ;;  %v242_v41 = vrot.slane %v207_v17, 2 }
  0x31   : > { %257 = vst [vmem:[#allocation2] sm:$0x1f] %v250_v34  ;;  %258 = vst [vmem:[#allocation2 + $0x8] sm:$0x1f] %v251_v35  ;;  %v254_v42 = vmax.f32 %v233_v36, %v240_v29  ;;  %v235_v43 = vmax.f32 %v207_v17, %v221_v37 }
  0x32   : > { %259 = vst [vmem:[#allocation2 + $0x10] sm:$0x1f] %v252_v38  ;;  %260 = vst [vmem:[#allocation2 + $0x18] sm:$0x1f] %v253_v39  ;;  %v255_v44 = vmax.f32 %v234_v40, %v241_v33 }
  0x33   : > { %261 = vst [vmem:[#allocation2 + $0x20] sm:$0x1f] %v254_v42  ;;  %v256_v45 = vmax.f32 %v235_v43, %v242_v41 }
  0x34   : > { %262 = vst [vmem:[#allocation2 + $0x28] sm:$0x1f] %v255_v44 }
  0x35   : > { %263 = vst [vmem:[#allocation2 + $0x30] sm:$0x1f] %v256_v45 }
  0x38   : > { %v264_v46 = vld [vmem:[#allocation2] ss:$2 sm:$0x7]  ;;  %v266_v47 = vld [vmem:[#allocation2 + $0x8] ss:$2 sm:$0x7] }
  0x39   : > { %277 = vst [vmem:[#allocation3] sm:$0x7] %v264_v46  ;;  %278 = vst [vmem:[#allocation3 + $0x4] sm:$0x7] %v266_v47 }
  0x3a   : > { %v268_v48 = vld [vmem:[#allocation2 + $0x10] ss:$2 sm:$0x7]  ;;  %v270_v49 = vld [vmem:[#allocation2 + $0x18] ss:$2 sm:$0x7] }
  0x3b   : > { %279 = vst [vmem:[#allocation3 + $0x8] sm:$0x7] %v268_v48  ;;  %280 = vst [vmem:[#allocation3 + $0xc] sm:$0x7] %v270_v49 }
  0x3c   : > { %v272_v50 = vld [vmem:[#allocation2 + $0x20] ss:$2 sm:$0x7]  ;;  %v274_v51 = vld [vmem:[#allocation2 + $0x28] ss:$2 sm:$0x7] }
  0x3d   : > { %281 = vst [vmem:[#allocation3 + $0x10] sm:$0x7] %v272_v50  ;;  %282 = vst [vmem:[#allocation3 + $0x14] sm:$0x7] %v274_v51 }
  0x3e   : > { %v276_v52 = vld [vmem:[#allocation2 + $0x30] ss:$2 sm:$0x7] }
  0x3f   : > { %283 = vst [vmem:[#allocation3 + $0x18] sm:$0x7] %v276_v52 }
  0x40   : > { %v284_v53 = vld [vmem:[#allocation3] sm:$0x7]  ;;  %v288_v54 = vld [vmem:[#allocation3 + $0x4] sm:$0x7] }
  0x41   : > { %v291_v55 = vmax.f32 %v284_v53, %v288_v54 }
  0x42   : > { %v285_v56 = vld [vmem:[#allocation3 + $0x8] sm:$0x7]  ;;  %v289_v57 = vld [vmem:[#allocation3 + $0xc] sm:$0x7] }
  0x43   : > { %v295_v58 = vld [vmem:[#allocation3 + $0x8] sm:$0x7]  ;;  %v292_v59 = vmax.f32 %v285_v56, %v289_v57 }
  0x44   : > { %v286_v60 = vld [vmem:[#allocation3 + $0x10] sm:$0x7]  ;;  %v298_v61 = vmax.f32 %v291_v55, %v295_v58  ;;  %v290_v63 = vld [vmem:[#allocation3 + $0x14] sm:$0x7] }
  0x45   : > { %v296_v62 = vld [vmem:[#allocation3 + $0x10] sm:$0x7]  ;;  %v293_v3 = vmax.f32 %v286_v60, %v290_v63 }
  0x46   : > { %v299_v2 = vmax.f32 %v292_v59, %v296_v62  ;;  %v297_v4 = vld [vmem:[#allocation3 + $0x18] sm:$0x7]  ;;  %v301_v5 = vpack.c.bf16 %v298_v61, %v298_v61  ;;  %322 = sbr.rel (!%p636_p6) target bundleno = 85 (0x55), region = 69 }
  0x47   : > { %v300_v8 = vmax.f32 %v293_v3, %v297_v4 }
  0x48   : > { %v302_v7 = vpack.c.bf16 %v299_v2, %v299_v2  ;;  %v308_v9 = vsel %vm660_vm2, %v301_v5, %v307_v1 }
  0x49   : > { %309 = vst [vmem:[%s193_s15] sm:$0x3] %v308_v9  ;;  %v303_v12 = vpack.c.bf16 %v300_v8, %v300_v8 }
  0x4a   : > { %v311_v11 = vsel %vm660_vm2, %v302_v7, %v310_v6 }
  0x4b   : > { %312 = vst [vmem:[%s193_s15 + $0x2] sm:$0x3] %v311_v11  ;;  %v314_v13 = vsel %vm660_vm2, %v303_v12, %v313_v10 }
  0x4c   : > { %315 = vst [vmem:[%s193_s15 + $0x4] sm:$0x3] %v314_v13 }
  0x50   : > { %v342_v14 = vld [vmem:[%s193_s15] sm:$0x3] }
  0x51   : > { %343 = vst [vmem:[%s326_s22] sm:$0x3] %v342_v14 }
  0x52   : > { %v344_v15 = vld [vmem:[%s193_s15 + $0x2] sm:$0x3] }
  0x53   : > { %v346_v16 = vld [vmem:[%s193_s15 + $0x4] sm:$0x3]  ;;  %345 = vst [vmem:[%s326_s22 + $0x4] sm:$0x3] %v344_v15 }
  0x54   : > { %347 = vst [vmem:[%s326_s22 + $0x8] sm:$0x3] %v346_v16 }
  0x55 PF: > { %s11_s12 = sadd.s32 1, %s576_s12   ;;  %s703_s6 = smov %s556_s7 }
  0x56   : > { %p8_p12 = scmp.ge.s32.totalorder %s11_s12, 6   ;;  %s704_s7 = smov %s644_s21 }
  0x57   : > { %s705_s8 = smov %s568_s10  ;;  %s706_s9 = smov %s572_s11 }
  0x58   : > { %s707_s10 = smov %s710_s13  ;;  %s708_s11 = smov %s714_s14 }
  0x59   :  { %10 = sbr.rel (!%p8_p12) target bundleno = 4 (0x4), region = 142 }

// kernel: alexnet_fc_forward.10
= control target key start
LH: loop header
LB: loop body
LE: loop exit
PB: predicated region body
PF: predicated region fallthrough
CT: control target
= control target key end

     0   :  { %s3245_s12 = smov 0   ;;  %s3991_s0 = inlined_call_operand.vmem [shape: bf16[128,1664], index: 0, kind: input, shape index: {}]   ;;  %s3992_s1 = inlined_call_operand.vmem [shape: bf16[1664,256], index: 1, kind: input, shape index: {}]   ;;  %s3993_s2 = inlined_call_operand.vmem [shape: f32[1,256], index: 2, kind: input, shape index: {}]   ;;  %s3994_s3 = inlined_call_operand.vmem [shape: bf16[128,256], index: 3, kind: output, shape index: {}]  }
   0x1 LB: > { %s2401_s13 = sadd.s32 4294967295, %s3222_s12   ;;  %p2405_p0 = scmp.ge.s32.totalorder %s3222_s12, 1  ;;  %s3222_s12 = sphi %s3245_s12, %s13_s12  }
   0x2   : > { %p139_p1 = scmp.lt.s32.totalorder %s3222_s12, 3 }
   0x4   : > { %p140_p2 = pnand %p2405_p0, %p139_p1 }
   0x5   : > { %v2828_v0 = vld [vmem:[%s3992_s1 + $0x4] ss:$8 sps:$4 sm:$0xff] (!%p140_p2)   ;;  %v2832_v2 = vld [vmem:[%s3992_s1] ss:$8 sps:$4 sm:$0xff] (!%p140_p2)   ;;  %v2834_v4 = vld [vmem:[%s3992_s1 + $0x14] ss:$8 sps:$4 sm:$0xff] (!%p140_p2)  }
   0x6   : > { %143 = sbr.rel (%p140_p2) target bundleno = 461 (0x1cd), region = 32  ;;  %v2830_v1 = vld [vmem:[%s3992_s1 + $0x304] ss:$8 sps:$4 sm:$0xff] (!%p140_p2)   ;;  %1760 = vmatprep.subr.bf16.mxu1 (!%p140_p2), %v2828_v0  ;;  %v2833_v3 = vld [vmem:[%s3992_s1 + $0x300] ss:$8 sps:$4 sm:$0xff] (!%p140_p2)   ;;  %s2406_s24 = sshll.u32 (!%p140_p2), %s2401_s13, 3 }
   0x7   : > { %1979 = vmatprep.subr.bf16.mxu0 (!%p140_p2), %v2830_v1  ;;  %1761 = vmatpush1.bf16.msra.mxu1 (!%p140_p2), %v2832_v2  ;;  %v2836_v5 = vld [vmem:[%s3992_s1 + $0x314] ss:$8 sps:$4 sm:$0xff] (!%p140_p2)   ;;  %v2838_v6 = vld [vmem:[%s3992_s1 + $0x10] ss:$8 sps:$4 sm:$0xff] (!%p140_p2)   ;;  %v2840_v8 = vld [vmem:[%s3992_s1 + $0x24] ss:$8 sps:$4 sm:$0xff] (!%p140_p2)  }
   0x8   : > { %1980 = vmatpush1.bf16.msra.mxu0 (!%p140_p2), %v2833_v3  ;;  %1762 = vmatprep.subr.bf16.mxu1 (!%p140_p2), %v2834_v4  ;;  %v2839_v7 = vld [vmem:[%s3992_s1 + $0x310] ss:$8 sps:$4 sm:$0xff] (!%p140_p2)   ;;  %v2842_v9 = vld [vmem:[%s3992_s1 + $0x324] ss:$8 sps:$4 sm:$0xff] (!%p140_p2)   ;;  %v2844_v10 = vld [vmem:[%s3992_s1 + $0x20] ss:$8 sps:$4 sm:$0xff] (!%p140_p2)  }
   0x9   : > { %1981 = vmatprep.subr.bf16.mxu0 (!%p140_p2), %v2836_v5  ;;  %v2845_v11 = vld [vmem:[%s3992_s1 + $0x320] ss:$8 sps:$4 sm:$0xff] (!%p140_p2)   ;;  %v2846_v12 = vld [vmem:[%s3992_s1 + $0x34] ss:$8 sps:$4 sm:$0xff] (!%p140_p2)   ;;  %v2850_v14 = vld [vmem:[%s3992_s1 + $0x30] ss:$8 sps:$4 sm:$0xff] (!%p140_p2)  }
   0xa   : > { %v2848_v13 = vld [vmem:[%s3992_s1 + $0x334] ss:$8 sps:$4 sm:$0xff] (!%p140_p2)   ;;  %v2851_v15 = vld [vmem:[%s3992_s1 + $0x330] ss:$8 sps:$4 sm:$0xff] (!%p140_p2)   ;;  %v2852_v16 = vld [vmem:[%s3992_s1 + $0x44] ss:$8 sps:$4 sm:$0xff] (!%p140_p2)  }
   0xb   : > { %1763 = vmatpush1.bf16.msra.mxu1 (!%p140_p2), %v2838_v6  ;;  %v2854_v17 = vld [vmem:[%s3992_s1 + $0x344] ss:$8 sps:$4 sm:$0xff] (!%p140_p2)   ;;  %v2856_v18 = vld [vmem:[%s3992_s1 + $0x40] ss:$8 sps:$4 sm:$0xff] (!%p140_p2)   ;;  %v2858_v20 = vld [vmem:[%s3992_s1 + $0x54] ss:$8 sps:$4 sm:$0xff] (!%p140_p2)  }
   0xc   : > { %1982 = vmatpush1.bf16.msra.mxu0 (!%p140_p2), %v2839_v7  ;;  %1764 = vmatprep.subr.bf16.mxu1 (!%p140_p2), %v2840_v8  ;;  %v2857_v19 = vld [vmem:[%s3992_s1 + $0x340] ss:$8 sps:$4 sm:$0xff] (!%p140_p2)   ;;  %v2860_v21 = vld [vmem:[%s3992_s1 + $0x354] ss:$8 sps:$4 sm:$0xff] (!%p140_p2)   ;;  %v2862_v22 = vld [vmem:[%s3992_s1 + $0x50] ss:$8 sps:$4 sm:$0xff] (!%p140_p2)  }
   0xd   : > { %1983 = vmatprep.subr.bf16.mxu0 %v2842_v9  ;;  %v2863_v23 = vld [vmem:[%s3992_s1 + $0x350] ss:$8 sps:$4 sm:$0xff]   ;;  %v2864_v24 = vld [vmem:[%s3992_s1 + $0x64] ss:$8 sps:$4 sm:$0xff]   ;;  %v2868_v26 = vld [vmem:[%s3992_s1 + $0x60] ss:$8 sps:$4 sm:$0xff]  }
   0xe   : > { %v2866_v25 = vld [vmem:[%s3992_s1 + $0x364] ss:$8 sps:$4 sm:$0xff]   ;;  %v2869_v27 = vld [vmem:[%s3992_s1 + $0x360] ss:$8 sps:$4 sm:$0xff]   ;;  %v2870_v28 = vld [vmem:[%s3992_s1 + $0x74] ss:$8 sps:$4 sm:$0xff]  }
   0xf   : > { %1765 = vmatpush1.bf16.msra.mxu1 %v2844_v10  ;;  %v2872_v29 = vld [vmem:[%s3992_s1 + $0x374] ss:$8 sps:$4 sm:$0xff]   ;;  %v2874_v30 = vld [vmem:[%s3992_s1 + $0x70] ss:$8 sps:$4 sm:$0xff]   ;;  %v2876_v32 = vld [vmem:[%s3992_s1 + $0x84] ss:$8 sps:$4 sm:$0xff]  }
  0x10   : > { %1984 = vmatpush1.bf16.msra.mxu0 %v2845_v11  ;;  %1766 = vmatprep.subr.bf16.mxu1 %v2846_v12  ;;  %v2875_v31 = vld [vmem:[%s3992_s1 + $0x370] ss:$8 sps:$4 sm:$0xff]   ;;  %p166_p3 = scmp.lt.s32.totalorder %s2406_s24, 15  ;;  %v2878_v33 = vld [vmem:[%s3992_s1 + $0x384] ss:$8 sps:$4 sm:$0xff]  }
  0x11   : > { %1985 = vmatprep.subr.bf16.mxu0 %v2848_v13  ;;  %v2880_v34 = vld [vmem:[%s3992_s1 + $0x80] ss:$8 sps:$4 sm:$0xff]   ;;  %v2882_v36 = vld [vmem:[%s3992_s1 + $0x94] ss:$8 sps:$4 sm:$0xff]   ;;  %v2886_v38 = vld [vmem:[%s3992_s1 + $0x90] ss:$8 sps:$4 sm:$0xff]  }
  0x12   : > { %v2881_v35 = vld [vmem:[%s3992_s1 + $0x380] ss:$8 sps:$4 sm:$0xff]   ;;  %s3996_s24 = smov (!%p166_p3, %s2406_s24), 15  ;;  %v2884_v37 = vld [vmem:[%s3992_s1 + $0x394] ss:$8 sps:$4 sm:$0xff]  }
  0x13   : > { %1767 = vmatpush1.bf16.msra.mxu1 %v2850_v14  ;;  %v2887_v39 = vld [vmem:[%s3992_s1 + $0x390] ss:$8 sps:$4 sm:$0xff]   ;;  %v2888_v40 = vld [vmem:[%s3992_s1 + $0xa4] ss:$8 sps:$4 sm:$0xff]   ;;  %s2818_s21 = smul.u32 52, %s3996_s24 }
  0x14   : > { %1986 = vmatpush1.bf16.msra.mxu0 %v2851_v15  ;;  %1768 = vmatprep.subr.bf16.mxu1 %v2852_v16  ;;  %v2890_v41 = vld [vmem:[%s3992_s1 + $0x3a4] ss:$8 sps:$4 sm:$0xff]   ;;  %v2892_v42 = vld [vmem:[%s3992_s1 + $0xa0] ss:$8 sps:$4 sm:$0xff]   ;;  %v2894_v44 = vld [vmem:[%s3992_s1 + $0xb4] ss:$8 sps:$4 sm:$0xff]  }
  0x15   : > { %1987 = vmatprep.subr.bf16.mxu0 %v2854_v17  ;;  %v2893_v43 = vld [vmem:[%s3992_s1 + $0x3a0] ss:$8 sps:$4 sm:$0xff]   ;;  %s3396_s13 = scalar_lea.vmem %s3991_s0, %s2818_s21  ;;  %v2896_v45 = vld [vmem:[%s3992_s1 + $0x3b4] ss:$8 sps:$4 sm:$0xff]   ;;  %v2898_v46 = vld [vmem:[%s3992_s1 + $0xb0] ss:$8 sps:$4 sm:$0xff]  }
  0x16   : > { %v2899_v47 = vld [vmem:[%s3992_s1 + $0x3b0] ss:$8 sps:$4 sm:$0xff]   ;;  %v2900_v49 = vld [vmem:[%s3992_s1 + $0xc4] ss:$8 sps:$4 sm:$0xff]   ;;  %v2904_v52 = vld [vmem:[%s3992_s1 + $0xc0] ss:$8 sps:$4 sm:$0xff]  }
  0x17   : > { %1769 = vmatpush1.bf16.msra.mxu1 %v2856_v18  ;;  %v2926_v48 = vld [vmem:[%s3396_s13 + $0x4] ss:$52 sps:$4 sm:$0xff]   ;;  %v2932_v51 = vld [vmem:[%s3396_s13 + $0x1c] ss:$52 sps:$4 sm:$0xff]   ;;  %v2905_v53 = vld [vmem:[%s3992_s1 + $0x3c0] ss:$8 sps:$4 sm:$0xff]  }
  0x18   : > { %1988 = vmatpush1.bf16.msra.mxu0 %v2857_v19  ;;  %1770 = vmatprep.subr.bf16.mxu1 %v2858_v20  ;;  %v2902_v50 = vld [vmem:[%s3992_s1 + $0x3c4] ss:$8 sps:$4 sm:$0xff]   ;;  %v2906_v54 = vld [vmem:[%s3992_s1 + $0xd4] ss:$8 sps:$4 sm:$0xff]   ;;  %v2910_v56 = vld [vmem:[%s3992_s1 + $0xd0] ss:$8 sps:$4 sm:$0xff]  }
  0x19   : > { %1989 = vmatprep.subr.bf16.mxu0 %v2860_v21  ;;  %1792 = vmatprep.mubr.bf16.mxu1 %v2926_v48  ;;  %v2908_v55 = vld [vmem:[%s3992_s1 + $0x3d4] ss:$8 sps:$4 sm:$0xff]   ;;  %v2911_v57 = vld [vmem:[%s3992_s1 + $0x3d0] ss:$8 sps:$4 sm:$0xff]   ;;  %v2912_v58 = vld [vmem:[%s3992_s1 + $0xe4] ss:$8 sps:$4 sm:$0xff]  }
  0x1a   : > { %2011 = vmatprep.mubr.bf16.mxu0 %v2932_v51  ;;  %v2914_v59 = vld [vmem:[%s3992_s1 + $0x3e4] ss:$8 sps:$4 sm:$0xff]   ;;  %v2916_v60 = vld [vmem:[%s3992_s1 + $0xe0] ss:$8 sps:$4 sm:$0xff]   ;;  %v2918_v62 = vld [vmem:[%s3992_s1 + $0xf4] ss:$8 sps:$4 sm:$0xff]  }
  0x1b   : > { %1771 = vmatpush1.bf16.msra.mxu1 %v2862_v22  ;;  %v2917_v61 = vld [vmem:[%s3992_s1 + $0x3e0] ss:$8 sps:$4 sm:$0xff]   ;;  %v2920_v63 = vld [vmem:[%s3992_s1 + $0x3f4] ss:$8 sps:$4 sm:$0xff]   ;;  %v2922_v0 = vld [vmem:[%s3992_s1 + $0xf0] ss:$8 sps:$4 sm:$0xff]  }
  0x1c   : > { %1990 = vmatpush1.bf16.msra.mxu0 %v2863_v23  ;;  %1772 = vmatprep.subr.bf16.mxu1 %v2864_v24  ;;  %v2923_v1 = vld [vmem:[%s3992_s1 + $0x3f0] ss:$8 sps:$4 sm:$0xff]   ;;  %v2929_v2 = vld [vmem:[%s3992_s1 + $0x104] ss:$8 sps:$4 sm:$0xff]   ;;  %v2924_v4 = vld [vmem:[%s3396_s13] ss:$52 sps:$4 sm:$0xff]  }
  0x1d   : > { %1991 = vmatprep.subr.bf16.mxu0 %v2866_v25  ;;  %v2935_v3 = vld [vmem:[%s3992_s1 + $0x404] ss:$8 sps:$4 sm:$0xff]   ;;  %v2927_v5 = vld [vmem:[%s3992_s1 + $0x100] ss:$8 sps:$4 sm:$0xff]   ;;  %v2938_v8 = vld [vmem:[%s3992_s1 + $0x114] ss:$8 sps:$4 sm:$0xff]  }
  0x1e   : > { %v2930_v6 = vld [vmem:[%s3396_s13 + $0x18] ss:$52 sps:$4 sm:$0xff]   ;;  %v2933_v7 = vld [vmem:[%s3992_s1 + $0x400] ss:$8 sps:$4 sm:$0xff]   ;;  %v2941_v9 = vld [vmem:[%s3992_s1 + $0x414] ss:$8 sps:$4 sm:$0xff]  }
  0x1f   : > { %1773 = vmatpush1.bf16.msra.mxu1 %v2868_v26  ;;  %v2936_v10 = vld [vmem:[%s3992_s1 + $0x110] ss:$8 sps:$4 sm:$0xff]   ;;  %v2944_v12 = vld [vmem:[%s3992_s1 + $0x124] ss:$8 sps:$4 sm:$0xff]   ;;  %v2942_v14 = vld [vmem:[%s3992_s1 + $0x120] ss:$8 sps:$4 sm:$0xff]  }
  0x20   : > { %1992 = vmatpush1.bf16.msra.mxu0 %v2869_v27  ;;  %1774 = vmatprep.subr.bf16.mxu1 %v2870_v28  ;;  %v2939_v11 = vld [vmem:[%s3992_s1 + $0x410] ss:$8 sps:$4 sm:$0xff]   ;;  %v2947_v13 = vld [vmem:[%s3992_s1 + $0x424] ss:$8 sps:$4 sm:$0xff]   ;;  %v2945_v15 = vld [vmem:[%s3992_s1 + $0x420] ss:$8 sps:$4 sm:$0xff]  }
  0x21   : > { %1993 = vmatprep.subr.bf16.mxu0 %v2872_v29  ;;  %v2950_v16 = vld [vmem:[%s3992_s1 + $0x134] ss:$8 sps:$4 sm:$0xff]   ;;  %v2990_v17 = vld [vmem:[%s3396_s13 + $0x6c] ss:$52 sps:$4 sm:$0xff]   ;;  %v2948_v19 = vld [vmem:[%s3992_s1 + $0x130] ss:$8 sps:$4 sm:$0xff]  }
  0x22   : > { %v2953_v18 = vld [vmem:[%s3992_s1 + $0x434] ss:$8 sps:$4 sm:$0xff]   ;;  %v2951_v20 = vld [vmem:[%s3992_s1 + $0x430] ss:$8 sps:$4 sm:$0xff]   ;;  %v2956_v22 = vld [vmem:[%s3992_s1 + $0x144] ss:$8 sps:$4 sm:$0xff]  }
  0x23   : > { %1775 = vmatpush1.bf16.msra.mxu1 %v2874_v30  ;;  %v2995_v21 = vld [vmem:[%s3396_s13 + $0x84] ss:$52 sps:$4 sm:$0xff]   ;;  %v3000_v24 = vld [vmem:[%s3396_s13 + $0x68] ss:$52 sps:$4 sm:$0xff]   ;;  %v3001_v25 = vld [vmem:[%s3396_s13 + $0x80] ss:$52 sps:$4 sm:$0xff]  }
  0x24   : > { %1994 = vmatpush1.bf16.msra.mxu0 %v2875_v31  ;;  %1776 = vmatprep.subr.bf16.mxu1 %v2876_v32  ;;  %v2959_v23 = vld [vmem:[%s3992_s1 + $0x444] ss:$8 sps:$4 sm:$0xff]   ;;  %v2954_v26 = vld [vmem:[%s3992_s1 + $0x140] ss:$8 sps:$4 sm:$0xff]   ;;  %v2962_v28 = vld [vmem:[%s3992_s1 + $0x154] ss:$8 sps:$4 sm:$0xff]  }
  0x25   : > { %1995 = vmatprep.subr.bf16.mxu0 %v2878_v33  ;;  %v2957_v27 = vld [vmem:[%s3992_s1 + $0x440] ss:$8 sps:$4 sm:$0xff]   ;;  %v2965_v30 = vld [vmem:[%s3992_s1 + $0x454] ss:$8 sps:$4 sm:$0xff]   ;;  %v2960_v31 = vld [vmem:[%s3992_s1 + $0x150] ss:$8 sps:$4 sm:$0xff]  }
  0x26   : > { %v3008_v29 = vld [vmem:[%s3396_s13 + $0xd4] ss:$52 sps:$4 sm:$0xff]   ;;  %v2963_v32 = vld [vmem:[%s3992_s1 + $0x450] ss:$8 sps:$4 sm:$0xff]   ;;  %v3013_v33 = vld [vmem:[%s3396_s13 + $0xec] ss:$52 sps:$4 sm:$0xff]  }
  0x27   : > { %1777 = vmatpush1.bf16.msra.mxu1 %v2880_v34  ;;  %v2968_v34 = vld [vmem:[%s3992_s1 + $0x164] ss:$8 sps:$4 sm:$0xff]   ;;  %v2981_v51 = vld [vmem:[%s3992_s1 + $0x480] ss:$8 sps:$4 sm:$0xff]  }
  0x28   : > { %1996 = vmatpush1.bf16.msra.mxu0 %v2881_v35  ;;  %1778 = vmatprep.subr.bf16.mxu1 %v2882_v36  ;;  %v2971_v35 = vld [vmem:[%s3992_s1 + $0x464] ss:$8 sps:$4 sm:$0xff]  }
  0x29   : > { %1997 = vmatprep.subr.bf16.mxu0 %v2884_v37  ;;  %v3018_v36 = vld [vmem:[%s3396_s13 + $0xd0] ss:$52 sps:$4 sm:$0xff]   ;;  %v3019_v37 = vld [vmem:[%s3396_s13 + $0xe8] ss:$52 sps:$4 sm:$0xff]   ;;  %v3036_v48 = vld [vmem:[%s3396_s13 + $0x138] ss:$52 sps:$4 sm:$0xff]  }
  0x2b   : > { %1779 = vmatpush1.bf16.msra.mxu1 %v2886_v38  ;;  %v2966_v38 = vld [vmem:[%s3992_s1 + $0x160] ss:$8 sps:$4 sm:$0xff]  }
  0x2c   : > { %1998 = vmatpush1.bf16.msra.mxu0 %v2887_v39  ;;  %1780 = vmatprep.subr.bf16.mxu1 %v2888_v40  ;;  %v2969_v39 = vld [vmem:[%s3992_s1 + $0x460] ss:$8 sps:$4 sm:$0xff]   ;;  %v2974_v40 = vld [vmem:[%s3992_s1 + $0x174] ss:$8 sps:$4 sm:$0xff]  }
  0x2d   : > { %1999 = vmatprep.subr.bf16.mxu0 %v2890_v41  ;;  %v3026_v41 = vld [vmem:[%s3396_s13 + $0x13c] ss:$52 sps:$4 sm:$0xff]  }
  0x2f   : > { %1781 = vmatpush1.bf16.msra.mxu1 %v2892_v42  ;;  %v2977_v42 = vld [vmem:[%s3992_s1 + $0x474] ss:$8 sps:$4 sm:$0xff]  }
  0x30   : > { %2000 = vmatpush1.bf16.msra.mxu0 %v2893_v43  ;;  %1782 = vmatprep.subr.bf16.mxu1 %v2894_v44  ;;  %v2972_v43 = vld [vmem:[%s3992_s1 + $0x170] ss:$8 sps:$4 sm:$0xff]  }
  0x31   : > { %2001 = vmatprep.subr.bf16.mxu0 %v2896_v45  ;;  %v2975_v44 = vld [vmem:[%s3992_s1 + $0x470] ss:$8 sps:$4 sm:$0xff]   ;;  %v3031_v45 = vld [vmem:[%s3396_s13 + $0x154] ss:$52 sps:$4 sm:$0xff]  }
  0x33   : > { %1783 = vmatpush1.bf16.msra.mxu1 %v2898_v46  ;;  %v2980_v46 = vld [vmem:[%s3992_s1 + $0x184] ss:$8 sps:$4 sm:$0xff]  }
  0x34   : > { %2002 = vmatpush1.bf16.msra.mxu0 %v2899_v47  ;;  %1784 = vmatprep.subr.bf16.mxu1 %v2900_v49  ;;  %v2983_v47 = vld [vmem:[%s3992_s1 + $0x484] ss:$8 sps:$4 sm:$0xff]  }
  0x35   : > { %2003 = vmatprep.subr.bf16.mxu0 %v2902_v50  ;;  %v3037_v49 = vld [vmem:[%s3396_s13 + $0x150] ss:$52 sps:$4 sm:$0xff]   ;;  %v2978_v50 = vld [vmem:[%s3992_s1 + $0x180] ss:$8 sps:$4 sm:$0xff]  }
  0x37   : > { %1785 = vmatpush1.bf16.msra.mxu1 %v2904_v52  ;;  %v2986_v52 = vld [vmem:[%s3992_s1 + $0x194] ss:$8 sps:$4 sm:$0xff]  }
  0x38   : > { %2004 = vmatpush1.bf16.msra.mxu0 %v2905_v53  ;;  %1786 = vmatprep.subr.bf16.mxu1 %v2906_v54  ;;  %v2989_v53 = vld [vmem:[%s3992_s1 + $0x494] ss:$8 sps:$4 sm:$0xff]   ;;  %v3046_v54 = vld [vmem:[%s3396_s13 + $0xc] ss:$52 sps:$4 sm:$0xff]  }
  0x39   : > { %2005 = vmatprep.subr.bf16.mxu0 %v2908_v55  ;;  %v2984_v55 = vld [vmem:[%s3992_s1 + $0x190] ss:$8 sps:$4 sm:$0xff]  }
  0x3b   : > { %1787 = vmatpush1.bf16.msra.mxu1 %v2910_v56  ;;  %v2987_v56 = vld [vmem:[%s3992_s1 + $0x490] ss:$8 sps:$4 sm:$0xff]  }
  0x3c   : > { %2006 = vmatpush1.bf16.msra.mxu0 %v2911_v57  ;;  %1788 = vmatprep.subr.bf16.mxu1 %v2912_v58  ;;  %v3052_v57 = vld [vmem:[%s3396_s13 + $0x24] ss:$52 sps:$4 sm:$0xff]  }
  0x3d   : > { %2007 = vmatprep.subr.bf16.mxu0 %v2914_v59  ;;  %v2994_v58 = vld [vmem:[%s3992_s1 + $0x1a4] ss:$8 sps:$4 sm:$0xff]  }
  0x3e   : > { %v2999_v59 = vld [vmem:[%s3992_s1 + $0x4a4] ss:$8 sps:$4 sm:$0xff]  }
  0x3f   : > { %1789 = vmatpush1.bf16.msra.mxu1 %v2916_v60  ;;  %v2992_v60 = vld [vmem:[%s3992_s1 + $0x1a0] ss:$8 sps:$4 sm:$0xff]  }
  0x40   : > { %2008 = vmatpush1.bf16.msra.mxu0 %v2917_v61  ;;  %1790 = vmatprep.subr.bf16.mxu1 %v2918_v62  ;;  %v2997_v61 = vld [vmem:[%s3992_s1 + $0x4a0] ss:$8 sps:$4 sm:$0xff]   ;;  %v3004_v62 = vld [vmem:[%s3992_s1 + $0x1b4] ss:$8 sps:$4 sm:$0xff]  }
  0x41   : > { %2009 = vmatprep.subr.bf16.mxu0 %v2920_v63  ;;  %v3007_v63 = vld [vmem:[%s3992_s1 + $0x4b4] ss:$8 sps:$4 sm:$0xff]  }
  0x43   : > { %1791 = vmatpush1.bf16.msra.mxu1 %v2922_v0  ;;  %v3002_v0 = vld [vmem:[%s3992_s1 + $0x1b0] ss:$8 sps:$4 sm:$0xff]  }
  0x44   : > { %2010 = vmatpush1.bf16.msra.mxu0 %v2923_v1  ;;  %1833 = vmatprep.subr.bf16.mxu1 %v2929_v2  ;;  %v3005_v1 = vld [vmem:[%s3992_s1 + $0x4b0] ss:$8 sps:$4 sm:$0xff]   ;;  %v3012_v2 = vld [vmem:[%s3992_s1 + $0x1c4] ss:$8 sps:$4 sm:$0xff]  }
  0x45   : > { %2052 = vmatprep.subr.bf16.mxu0 %v2935_v3  ;;  %v3017_v3 = vld [vmem:[%s3992_s1 + $0x4c4] ss:$8 sps:$4 sm:$0xff]  }
  0x46   : > { %1793 = vmatmul.mubr.bf16.vlgmr.msra.gmra.mrb[0].mxu1 %v2924_v4  ;;  %v3010_v4 = vld [vmem:[%s3992_s1 + $0x1c0] ss:$8 sps:$4 sm:$0xff]  }
  0x47   : > { %2012 = vmatmul.mubr.bf16.vlgmr.msra.gmra.mrb[0].mxu0 %v2930_v6  ;;  %1834 = vmatpush1.bf16.msra.mxu1 %v2927_v5  ;;  %v3015_v5 = vld [vmem:[%s3992_s1 + $0x4c0] ss:$8 sps:$4 sm:$0xff]   ;;  %v3022_v6 = vld [vmem:[%s3992_s1 + $0x1d4] ss:$8 sps:$4 sm:$0xff]  }
  0x48   : > { %2053 = vmatpush1.bf16.msra.mxu0 %v2933_v7  ;;  %1835 = vmatprep.subr.bf16.mxu1 %v2938_v8  ;;  %v3025_v7 = vld [vmem:[%s3992_s1 + $0x4d4] ss:$8 sps:$4 sm:$0xff]   ;;  %v3020_v8 = vld [vmem:[%s3992_s1 + $0x1d0] ss:$8 sps:$4 sm:$0xff]  }
  0x49   : > { %2054 = vmatprep.subr.bf16.mxu0 %v2941_v9  ;;  %1802 = vmatprep.mubr.bf16.mxu1 %v2990_v17  ;;  %v3023_v9 = vld [vmem:[%s3992_s1 + $0x4d0] ss:$8 sps:$4 sm:$0xff]  }
  0x4a   : > { %2021 = vmatprep.mubr.bf16.mxu0 %v2995_v21  ;;  %v3041_v17 = vld [vmem:[%s3992_s1 + $0x4f0] ss:$8 sps:$4 sm:$0xff]   ;;  %v3047_v21 = vld [vmem:[%s3992_s1 + $0x200] ss:$8 sps:$4 sm:$0xff]  }
  0x4b   : > { %1836 = vmatpush1.bf16.msra.mxu1 %v2936_v10  ;;  %v3030_v10 = vld [vmem:[%s3992_s1 + $0x1e4] ss:$8 sps:$4 sm:$0xff]  }
  0x4c   : > { %2055 = vmatpush1.bf16.msra.mxu0 %v2939_v11  ;;  %1837 = vmatprep.subr.bf16.mxu1 %v2944_v12  ;;  %v3035_v11 = vld [vmem:[%s3992_s1 + $0x4e4] ss:$8 sps:$4 sm:$0xff]   ;;  %v3028_v12 = vld [vmem:[%s3992_s1 + $0x1e0] ss:$8 sps:$4 sm:$0xff]  }
  0x4d   : > { %2056 = vmatprep.subr.bf16.mxu0 %v2947_v13  ;;  %v3033_v13 = vld [vmem:[%s3992_s1 + $0x4e0] ss:$8 sps:$4 sm:$0xff]  }
  0x4e   : > { %1803 = vmatmul.mubr.bf16.gmra.mrb[4].mxu1 %v3000_v24  ;;  %v3058_v24 = vld [vmem:[%s3992_s1 + $0x214] ss:$8 sps:$4 sm:$0xff]  }
  0x4f   : > { %1838 = vmatpush1.bf16.msra.mxu1 %v2942_v14  ;;  %2022 = vmatmul.mubr.bf16.gmra.mrb[4].mxu0 %v3001_v25  ;;  %v3040_v14 = vld [vmem:[%s3992_s1 + $0x1f4] ss:$8 sps:$4 sm:$0xff]  }
  0x50   : > { %2057 = vmatpush1.bf16.msra.mxu0 %v2945_v15  ;;  %1839 = vmatprep.subr.bf16.mxu1 %v2950_v16  ;;  %v3043_v15 = vld [vmem:[%s3992_s1 + $0x4f4] ss:$8 sps:$4 sm:$0xff]   ;;  %v3038_v16 = vld [vmem:[%s3992_s1 + $0x1f0] ss:$8 sps:$4 sm:$0xff]  }
  0x51   : > { %2058 = vmatprep.subr.bf16.mxu0 %v2953_v18  ;;  %1812 = vmatprep.mubr.bf16.mxu1 %v3008_v29  ;;  %v3049_v18 = vld [vmem:[%s3992_s1 + $0x204] ss:$8 sps:$4 sm:$0xff]   ;;  %v3061_v25 = vld [vmem:[%s3992_s1 + $0x514] ss:$8 sps:$4 sm:$0xff]   ;;  %v3059_v29 = vld [vmem:[%s3992_s1 + $0x510] ss:$8 sps:$4 sm:$0xff]  }
  0x52   : > { %2031 = vmatprep.mubr.bf16.mxu0 %v3013_v33  ;;  %v3114_v33 = vld [vmem:[%s3396_s13 + $0x70] ss:$52 sps:$4 sm:$0xff]  }
  0x53   : > { %1840 = vmatpush1.bf16.msra.mxu1 %v2948_v19  ;;  %v3055_v19 = vld [vmem:[%s3992_s1 + $0x504] ss:$8 sps:$4 sm:$0xff]  }
  0x54   : > { %2059 = vmatpush1.bf16.msra.mxu0 %v2951_v20  ;;  %1841 = vmatprep.subr.bf16.mxu1 %v2956_v22  ;;  %v3044_v20 = vld [vmem:[%s3396_s13 + $0x8] ss:$52 sps:$4 sm:$0xff]   ;;  %v3050_v22 = vld [vmem:[%s3396_s13 + $0x20] ss:$52 sps:$4 sm:$0xff]  }
  0x55   : > { %2060 = vmatprep.subr.bf16.mxu0 %v2959_v23  ;;  %v3053_v23 = vld [vmem:[%s3992_s1 + $0x500] ss:$8 sps:$4 sm:$0xff]  }
  0x56   : > { %1813 = vmatmul.mubr.bf16.gmra.mrb[8].mxu1 %v3018_v36  ;;  %v3070_v36 = vld [vmem:[%s3992_s1 + $0x234] ss:$8 sps:$4 sm:$0xff]  }
  0x57   : > { %1842 = vmatpush1.bf16.msra.mxu1 %v2954_v26  ;;  %2032 = vmatmul.mubr.bf16.gmra.mrb[8].mxu0 %v3019_v37  ;;  %v3110_v26 = vld [vmem:[%s3396_s13 + $0x74] ss:$52 sps:$4 sm:$0xff]  }
  0x58   : > { %2061 = vmatpush1.bf16.msra.mxu0 %v2957_v27  ;;  %1843 = vmatprep.subr.bf16.mxu1 %v2962_v28  ;;  %v3112_v27 = vld [vmem:[%s3396_s13 + $0x8c] ss:$52 sps:$4 sm:$0xff]   ;;  %v3056_v28 = vld [vmem:[%s3992_s1 + $0x210] ss:$8 sps:$4 sm:$0xff]   ;;  %v3073_v37 = vld [vmem:[%s3992_s1 + $0x534] ss:$8 sps:$4 sm:$0xff]  }
  0x59   : > { %2062 = vmatprep.subr.bf16.mxu0 %v2965_v30  ;;  %1822 = vmatprep.mubr.bf16.mxu1 %v3026_v41  ;;  %v3064_v30 = vld [vmem:[%s3992_s1 + $0x224] ss:$8 sps:$4 sm:$0xff]   ;;  %v3071_v41 = vld [vmem:[%s3992_s1 + $0x530] ss:$8 sps:$4 sm:$0xff]  }
  0x5a   : > { %2041 = vmatprep.mubr.bf16.mxu0 %v3031_v45  ;;  %v3132_v45 = vld [vmem:[%s3396_s13 + $0xd8] ss:$52 sps:$4 sm:$0xff]  }
  0x5b   : > { %1844 = vmatpush1.bf16.msra.mxu1 %v2960_v31  ;;  %v3067_v31 = vld [vmem:[%s3992_s1 + $0x524] ss:$8 sps:$4 sm:$0xff]  }
  0x5c   : > { %2063 = vmatpush1.bf16.msra.mxu0 %v2963_v32  ;;  %1845 = vmatprep.subr.bf16.mxu1 %v2968_v34  ;;  %v3062_v32 = vld [vmem:[%s3992_s1 + $0x220] ss:$8 sps:$4 sm:$0xff]  }
  0x5d   : > { %2064 = vmatprep.subr.bf16.mxu0 %v2971_v35  ;;  %v3118_v34 = vld [vmem:[%s3396_s13 + $0x88] ss:$52 sps:$4 sm:$0xff]  }
  0x5e   : > { %1823 = vmatmul.mubr.bf16.gmra.mrb[12].mxu1 %v3036_v48  ;;  %v3065_v35 = vld [vmem:[%s3992_s1 + $0x520] ss:$8 sps:$4 sm:$0xff]   ;;  %v3082_v48 = vld [vmem:[%s3992_s1 + $0x254] ss:$8 sps:$4 sm:$0xff]  }
  0x5f   : > { %1846 = vmatpush1.bf16.msra.mxu1 %v2966_v38  ;;  %2042 = vmatmul.mubr.bf16.gmra.mrb[12].mxu0 %v3037_v49  ;;  %v3128_v38 = vld [vmem:[%s3396_s13 + $0xdc] ss:$52 sps:$4 sm:$0xff]  }
  0x60   : > { %2065 = vmatpush1.bf16.msra.mxu0 %v2969_v39  ;;  %1847 = vmatprep.subr.bf16.mxu1 %v2974_v40  ;;  %v3130_v39 = vld [vmem:[%s3396_s13 + $0xf4] ss:$52 sps:$4 sm:$0xff]   ;;  %v3068_v40 = vld [vmem:[%s3992_s1 + $0x230] ss:$8 sps:$4 sm:$0xff]  }
  0x61   : > { %2066 = vmatprep.subr.bf16.mxu0 %v2977_v42  ;;  %1865 = vmatprep.mubr.bf16.mxu1 %v3046_v54  ;;  %v3076_v42 = vld [vmem:[%s3992_s1 + $0x244] ss:$8 sps:$4 sm:$0xff]   ;;  %v3085_v49 = vld [vmem:[%s3992_s1 + $0x554] ss:$8 sps:$4 sm:$0xff]  }
  0x62   : > { %2084 = vmatprep.mubr.bf16.mxu0 %v3052_v57  ;;  %v3088_v54 = vld [vmem:[%s3992_s1 + $0x264] ss:$8 sps:$4 sm:$0xff]   ;;  %v3089_v57 = vld [vmem:[%s3992_s1 + $0x560] ss:$8 sps:$4 sm:$0xff]  }
  0x63   : > { %1848 = vmatpush1.bf16.msra.mxu1 %v2972_v43  ;;  %v3079_v43 = vld [vmem:[%s3992_s1 + $0x544] ss:$8 sps:$4 sm:$0xff]  }
  0x64   : > { %2067 = vmatpush1.bf16.msra.mxu0 %v2975_v44  ;;  %1849 = vmatprep.subr.bf16.mxu1 %v2980_v46  ;;  %v3074_v44 = vld [vmem:[%s3992_s1 + $0x240] ss:$8 sps:$4 sm:$0xff]   ;;  %v3136_v46 = vld [vmem:[%s3396_s13 + $0xf0] ss:$52 sps:$4 sm:$0xff]  }
  0x65   : > { %2068 = vmatprep.subr.bf16.mxu0 %v2983_v47  ;;  %v3077_v47 = vld [vmem:[%s3992_s1 + $0x540] ss:$8 sps:$4 sm:$0xff]  }
  0x67   : > { %1850 = vmatpush1.bf16.msra.mxu1 %v2978_v50  ;;  %v3146_v50 = vld [vmem:[%s3396_s13 + $0x144] ss:$52 sps:$4 sm:$0xff]  }
  0x68   : > { %2069 = vmatpush1.bf16.msra.mxu0 %v2981_v51  ;;  %1851 = vmatprep.subr.bf16.mxu1 %v2986_v52  ;;  %v3148_v51 = vld [vmem:[%s3396_s13 + $0x15c] ss:$52 sps:$4 sm:$0xff]  }
  0x69   : > { %2070 = vmatprep.subr.bf16.mxu0 %v2989_v53  ;;  %v3080_v52 = vld [vmem:[%s3992_s1 + $0x250] ss:$8 sps:$4 sm:$0xff]  }
  0x6a   : > { %v3083_v53 = vld [vmem:[%s3992_s1 + $0x550] ss:$8 sps:$4 sm:$0xff]  }
  0x6b   : > { %1852 = vmatpush1.bf16.msra.mxu1 %v2984_v55  ;;  %v3091_v55 = vld [vmem:[%s3992_s1 + $0x564] ss:$8 sps:$4 sm:$0xff]  }
  0x6c   : > { %2071 = vmatpush1.bf16.msra.mxu0 %v2987_v56  ;;  %1853 = vmatprep.subr.bf16.mxu1 %v2994_v58  ;;  %v3086_v56 = vld [vmem:[%s3992_s1 + $0x260] ss:$8 sps:$4 sm:$0xff]  }
  0x6d   : > { %2072 = vmatprep.subr.bf16.mxu0 %v2999_v59  ;;  %v3150_v58 = vld [vmem:[%s3396_s13 + $0x140] ss:$52 sps:$4 sm:$0xff]   ;;  %v3154_v59 = vld [vmem:[%s3396_s13 + $0x158] ss:$52 sps:$4 sm:$0xff]  }
  0x6f   : > { %1854 = vmatpush1.bf16.msra.mxu1 %v2992_v60  ;;  %v3094_v60 = vld [vmem:[%s3992_s1 + $0x274] ss:$8 sps:$4 sm:$0xff]  }
  0x70   : > { %2073 = vmatpush1.bf16.msra.mxu0 %v2997_v61  ;;  %1855 = vmatprep.subr.bf16.mxu1 %v3004_v62  ;;  %v3097_v61 = vld [vmem:[%s3992_s1 + $0x574] ss:$8 sps:$4 sm:$0xff]  }
  0x71   : > { %2074 = vmatprep.subr.bf16.mxu0 %v3007_v63  ;;  %v3166_v62 = vld [vmem:[%s3396_s13 + $0x14] ss:$52 sps:$4 sm:$0xff]   ;;  %v3169_v63 = vld [vmem:[%s3396_s13 + $0x2c] ss:$52 sps:$4 sm:$0xff]  }
  0x73   : > { %1856 = vmatpush1.bf16.msra.mxu1 %v3002_v0  ;;  %v3092_v0 = vld [vmem:[%s3992_s1 + $0x270] ss:$8 sps:$4 sm:$0xff]  }
  0x74   : > { %2075 = vmatpush1.bf16.msra.mxu0 %v3005_v1  ;;  %1857 = vmatprep.subr.bf16.mxu1 %v3012_v2  ;;  %v3095_v1 = vld [vmem:[%s3992_s1 + $0x570] ss:$8 sps:$4 sm:$0xff]   ;;  %v3100_v2 = vld [vmem:[%s3992_s1 + $0x284] ss:$8 sps:$4 sm:$0xff]  }
  0x75   : > { %2076 = vmatprep.subr.bf16.mxu0 %v3017_v3  ;;  %v3103_v3 = vld [vmem:[%s3992_s1 + $0x584] ss:$8 sps:$4 sm:$0xff]  }
  0x77   : > { %1858 = vmatpush1.bf16.msra.mxu1 %v3010_v4  ;;  %v3098_v4 = vld [vmem:[%s3992_s1 + $0x280] ss:$8 sps:$4 sm:$0xff]  }
  0x78   : > { %2077 = vmatpush1.bf16.msra.mxu0 %v3015_v5  ;;  %1859 = vmatprep.subr.bf16.mxu1 %v3022_v6  ;;  %v3101_v5 = vld [vmem:[%s3992_s1 + $0x580] ss:$8 sps:$4 sm:$0xff]   ;;  %v3106_v6 = vld [vmem:[%s3992_s1 + $0x294] ss:$8 sps:$4 sm:$0xff]  }
  0x79   : > { %2078 = vmatprep.subr.bf16.mxu0 %v3025_v7  ;;  %v3109_v7 = vld [vmem:[%s3992_s1 + $0x594] ss:$8 sps:$4 sm:$0xff]  }
  0x7b   : > { %1860 = vmatpush1.bf16.msra.mxu1 %v3020_v8  ;;  %v3104_v8 = vld [vmem:[%s3992_s1 + $0x290] ss:$8 sps:$4 sm:$0xff]  }
  0x7c   : > { %2079 = vmatpush1.bf16.msra.mxu0 %v3023_v9  ;;  %1861 = vmatprep.subr.bf16.mxu1 %v3030_v10  ;;  %v3107_v9 = vld [vmem:[%s3992_s1 + $0x590] ss:$8 sps:$4 sm:$0xff]   ;;  %v3117_v10 = vld [vmem:[%s3992_s1 + $0x2a4] ss:$8 sps:$4 sm:$0xff]  }
  0x7d   : > { %2080 = vmatprep.subr.bf16.mxu0 %v3035_v11  ;;  %v3121_v11 = vld [vmem:[%s3992_s1 + $0x5a4] ss:$8 sps:$4 sm:$0xff]  }
  0x7f   : > { %1862 = vmatpush1.bf16.msra.mxu1 %v3028_v12  ;;  %v3115_v12 = vld [vmem:[%s3992_s1 + $0x2a0] ss:$8 sps:$4 sm:$0xff]  }
  0x80   : > { %2081 = vmatpush1.bf16.msra.mxu0 %v3033_v13  ;;  %1863 = vmatprep.subr.bf16.mxu1 %v3040_v14  ;;  %v3119_v13 = vld [vmem:[%s3992_s1 + $0x5a0] ss:$8 sps:$4 sm:$0xff]   ;;  %v3124_v14 = vld [vmem:[%s3992_s1 + $0x2b4] ss:$8 sps:$4 sm:$0xff]  }
  0x81   : > { %2082 = vmatprep.subr.bf16.mxu0 %v3043_v15  ;;  %v3127_v15 = vld [vmem:[%s3992_s1 + $0x5b4] ss:$8 sps:$4 sm:$0xff]  }
  0x83   : > { %1864 = vmatpush1.bf16.msra.mxu1 %v3038_v16  ;;  %v3122_v16 = vld [vmem:[%s3992_s1 + $0x2b0] ss:$8 sps:$4 sm:$0xff]  }
  0x84   : > { %2083 = vmatpush1.bf16.msra.mxu0 %v3041_v17  ;;  %1906 = vmatprep.subr.bf16.mxu1 %v3049_v18  ;;  %v3125_v17 = vld [vmem:[%s3992_s1 + $0x5b0] ss:$8 sps:$4 sm:$0xff]   ;;  %v3135_v18 = vld [vmem:[%s3992_s1 + $0x2c4] ss:$8 sps:$4 sm:$0xff]  }
  0x85   : > { %2125 = vmatprep.subr.bf16.mxu0 %v3055_v19  ;;  %v3139_v19 = vld [vmem:[%s3992_s1 + $0x5c4] ss:$8 sps:$4 sm:$0xff]  }
  0x86   : > { %1866 = vmatmul.mubr.bf16.vlgmr.msra.gmra.mrb[0].mxu1 %v3044_v20  ;;  %v3133_v20 = vld [vmem:[%s3992_s1 + $0x2c0] ss:$8 sps:$4 sm:$0xff]  }
  0x87   : > { %2085 = vmatmul.mubr.bf16.vlgmr.msra.gmra.mrb[0].mxu0 %v3050_v22  ;;  %1907 = vmatpush1.bf16.msra.mxu1 %v3047_v21  ;;  %v3137_v21 = vld [vmem:[%s3992_s1 + $0x5c0] ss:$8 sps:$4 sm:$0xff]   ;;  %v3142_v22 = vld [vmem:[%s3992_s1 + $0x2d4] ss:$8 sps:$4 sm:$0xff]  }
  0x88   : > { %2126 = vmatpush1.bf16.msra.mxu0 %v3053_v23  ;;  %1908 = vmatprep.subr.bf16.mxu1 %v3058_v24  ;;  %v3145_v23 = vld [vmem:[%s3992_s1 + $0x5d4] ss:$8 sps:$4 sm:$0xff]   ;;  %v3140_v24 = vld [vmem:[%s3992_s1 + $0x2d0] ss:$8 sps:$4 sm:$0xff]  }
  0x89   : > { %2127 = vmatprep.subr.bf16.mxu0 %v3061_v25  ;;  %1875 = vmatprep.mubr.bf16.mxu1 %v3110_v26  ;;  %v3143_v25 = vld [vmem:[%s3992_s1 + $0x5d0] ss:$8 sps:$4 sm:$0xff]   ;;  %v3153_v26 = vld [vmem:[%s3992_s1 + $0x2e4] ss:$8 sps:$4 sm:$0xff]  }
  0x8a   : > { %2094 = vmatprep.mubr.bf16.mxu0 %v3112_v27  ;;  %v3157_v27 = vld [vmem:[%s3992_s1 + $0x5e4] ss:$8 sps:$4 sm:$0xff]  }
  0x8b   : > { %1909 = vmatpush1.bf16.msra.mxu1 %v3056_v28  ;;  %v3151_v28 = vld [vmem:[%s3992_s1 + $0x2e0] ss:$8 sps:$4 sm:$0xff]  }
  0x8c   : > { %2128 = vmatpush1.bf16.msra.mxu0 %v3059_v29  ;;  %1910 = vmatprep.subr.bf16.mxu1 %v3064_v30  ;;  %v3155_v29 = vld [vmem:[%s3992_s1 + $0x5e0] ss:$8 sps:$4 sm:$0xff]   ;;  %v3160_v30 = vld [vmem:[%s3992_s1 + $0x2f4] ss:$8 sps:$4 sm:$0xff]  }
  0x8d   : > { %2129 = vmatprep.subr.bf16.mxu0 %v3067_v31  ;;  %v3163_v31 = vld [vmem:[%s3992_s1 + $0x5f4] ss:$8 sps:$4 sm:$0xff]  }
  0x8e   : > { %1876 = vmatmul.mubr.bf16.gmra.mrb[4].mxu1 %v3114_v33  ;;  %v3161_v33 = vld [vmem:[%s3992_s1 + $0x5f0] ss:$8 sps:$4 sm:$0xff]  }
  0x8f   : > { %2095 = vmatmul.mubr.bf16.gmra.mrb[4].mxu0 %v3118_v34  ;;  %1911 = vmatpush1.bf16.msra.mxu1 %v3062_v32  ;;  %v3158_v32 = vld [vmem:[%s3992_s1 + $0x2f0] ss:$8 sps:$4 sm:$0xff]   ;;  %v3172_v34 = vld [vmem:[%s3992_s1 + $0x604] ss:$8 sps:$4 sm:$0xff]  }
  0x90   : > { %2130 = vmatpush1.bf16.msra.mxu0 %v3065_v35  ;;  %1912 = vmatprep.subr.bf16.mxu1 %v3070_v36  ;;  %v3164_v35 = vld [vmem:[%s3396_s13 + $0x10] ss:$52 sps:$4 sm:$0xff]   ;;  %v3167_v36 = vld [vmem:[%s3396_s13 + $0x28] ss:$52 sps:$4 sm:$0xff]  }
  0x91   : > { %2131 = vmatprep.subr.bf16.mxu0 %v3073_v37  ;;  %1885 = vmatprep.mubr.bf16.mxu1 %v3128_v38  ;;  %v3170_v37 = vld [vmem:[%s3992_s1 + $0x600] ss:$8 sps:$4 sm:$0xff]   ;;  %v3175_v38 = vld [vmem:[%s3992_s1 + $0x614] ss:$8 sps:$4 sm:$0xff]  }
  0x92   : > { %2104 = vmatprep.mubr.bf16.mxu0 %v3130_v39  ;;  %v3176_v39 = vld [vmem:[%s3396_s13 + $0x7c] ss:$52 sps:$4 sm:$0xff]  }
  0x93   : > { %1913 = vmatpush1.bf16.msra.mxu1 %v3068_v40  ;;  %v3178_v40 = vld [vmem:[%s3396_s13 + $0x94] ss:$52 sps:$4 sm:$0xff]  }
  0x94   : > { %2132 = vmatpush1.bf16.msra.mxu0 %v3071_v41  ;;  %1914 = vmatprep.subr.bf16.mxu1 %v3076_v42  ;;  %v3173_v41 = vld [vmem:[%s3992_s1 + $0x610] ss:$8 sps:$4 sm:$0xff]   ;;  %v3184_v42 = vld [vmem:[%s3992_s1 + $0x624] ss:$8 sps:$4 sm:$0xff]  }
  0x95   : > { %2133 = vmatprep.subr.bf16.mxu0 %v3079_v43  ;;  %v3180_v43 = vld [vmem:[%s3396_s13 + $0x78] ss:$52 sps:$4 sm:$0xff]  }
  0x96   : > { %1886 = vmatmul.mubr.bf16.gmra.mrb[8].mxu1 %v3132_v45  ;;  %v3182_v45 = vld [vmem:[%s3992_s1 + $0x620] ss:$8 sps:$4 sm:$0xff]  }
  0x97   : > { %2105 = vmatmul.mubr.bf16.gmra.mrb[8].mxu0 %v3136_v46  ;;  %1915 = vmatpush1.bf16.msra.mxu1 %v3074_v44  ;;  %v3181_v44 = vld [vmem:[%s3396_s13 + $0x90] ss:$52 sps:$4 sm:$0xff]   ;;  %v3187_v46 = vld [vmem:[%s3992_s1 + $0x634] ss:$8 sps:$4 sm:$0xff]  }
  0x98   : > { %2134 = vmatpush1.bf16.msra.mxu0 %v3077_v47  ;;  %1916 = vmatprep.subr.bf16.mxu1 %v3082_v48  ;;  %v3188_v47 = vld [vmem:[%s3396_s13 + $0xe4] ss:$52 sps:$4 sm:$0xff]   ;;  %v3190_v48 = vld [vmem:[%s3396_s13 + $0xfc] ss:$52 sps:$4 sm:$0xff]  }
  0x99   : > { %2135 = vmatprep.subr.bf16.mxu0 %v3085_v49  ;;  %1895 = vmatprep.mubr.bf16.mxu1 %v3146_v50  ;;  %v3185_v49 = vld [vmem:[%s3992_s1 + $0x630] ss:$8 sps:$4 sm:$0xff]   ;;  %v3196_v50 = vld [vmem:[%s3992_s1 + $0x644] ss:$8 sps:$4 sm:$0xff]  }
  0x9a   : > { %2114 = vmatprep.mubr.bf16.mxu0 %v3148_v51  ;;  %v3192_v51 = vld [vmem:[%s3396_s13 + $0xe0] ss:$52 sps:$4 sm:$0xff]  }
  0x9b   : > { %1917 = vmatpush1.bf16.msra.mxu1 %v3080_v52  ;;  %v3193_v52 = vld [vmem:[%s3396_s13 + $0xf8] ss:$52 sps:$4 sm:$0xff]  }
  0x9c   : > { %2136 = vmatpush1.bf16.msra.mxu0 %v3083_v53  ;;  %1918 = vmatprep.subr.bf16.mxu1 %v3088_v54  ;;  %v3194_v53 = vld [vmem:[%s3992_s1 + $0x640] ss:$8 sps:$4 sm:$0xff]   ;;  %v3199_v54 = vld [vmem:[%s3992_s1 + $0x654] ss:$8 sps:$4 sm:$0xff]  }
  0x9d   : > { %2137 = vmatprep.subr.bf16.mxu0 %v3091_v55  ;;  %v3200_v55 = vld [vmem:[%s3396_s13 + $0x14c] ss:$52 sps:$4 sm:$0xff]  }
  0x9e   : > { %1896 = vmatmul.mubr.bf16.gmra.mrb[12].mxu1 %v3150_v58  ;;  %v3208_v58 = vld [vmem:[%s3992_s1 + $0x664] ss:$8 sps:$4 sm:$0xff]  }
  0x9f   : > { %2115 = vmatmul.mubr.bf16.gmra.mrb[12].mxu0 %v3154_v59  ;;  %1919 = vmatpush1.bf16.msra.mxu1 %v3086_v56  ;;  %v3202_v56 = vld [vmem:[%s3396_s13 + $0x164] ss:$52 sps:$4 sm:$0xff]   ;;  %v3204_v59 = vld [vmem:[%s3396_s13 + $0x148] ss:$52 sps:$4 sm:$0xff]  }
  0xa0   : > { %2138 = vmatpush1.bf16.msra.mxu0 %v3089_v57  ;;  %1920 = vmatprep.subr.bf16.mxu1 %v3094_v60  ;;  %v3197_v57 = vld [vmem:[%s3992_s1 + $0x650] ss:$8 sps:$4 sm:$0xff]   ;;  %v3205_v60 = vld [vmem:[%s3396_s13 + $0x160] ss:$52 sps:$4 sm:$0xff]  }
  0xa1   : > { %2139 = vmatprep.subr.bf16.mxu0 %v3097_v61  ;;  %1938 = vmatprep.mubr.bf16.mxu1 %v3166_v62  ;;  %v3206_v61 = vld [vmem:[%s3992_s1 + $0x660] ss:$8 sps:$4 sm:$0xff]   ;;  %v3211_v62 = vld [vmem:[%s3992_s1 + $0x674] ss:$8 sps:$4 sm:$0xff]  }
  0xa2   : > { %2157 = vmatprep.mubr.bf16.mxu0 %v3169_v63  ;;  %v3209_v63 = vld [vmem:[%s3992_s1 + $0x670] ss:$8 sps:$4 sm:$0xff]  }
  0xa3   : > { %1921 = vmatpush1.bf16.msra.mxu1 %v3092_v0  ;;  %v3224_v0 = vmov 0  }
  0xa4   : > { %2140 = vmatpush1.bf16.msra.mxu0 %v3095_v1  ;;  %1922 = vmatprep.subr.bf16.mxu1 %v3100_v2  ;;  %v3212_v1 = vld [vmem:[%s3396_s13 + $0x30] ss:$52 sps:$4 sm:$0xff]   ;;  %v3213_v2 = vld [vmem:[%s3396_s13 + $0x100] ss:$52 sps:$4 sm:$0xff]  }
  0xa5   : > { %2141 = vmatprep.subr.bf16.mxu0 %v3103_v3  ;;  %v3214_v3 = vld [vmem:[%s3396_s13 + $0x98] ss:$52 sps:$4 sm:$0xff]  }
  0xa7   : > { %1923 = vmatpush1.bf16.msra.mxu1 %v3098_v4  ;;  %v3215_v4 = vld [vmem:[%s3396_s13 + $0x168] ss:$52 sps:$4 sm:$0xff]   ;;  %s2681_s13 = sshll.u32 %s3996_s24, 3 }
  0xa8   : > { %2142 = vmatpush1.bf16.msra.mxu0 %v3101_v5  ;;  %1924 = vmatprep.subr.bf16.mxu1 %v3106_v6  ;;  %s3970_s27 = scalar_lea.vmem %s3994_s3, %s2681_s13 }
  0xa9   : > { %2143 = vmatprep.subr.bf16.mxu0 %v3109_v7 }
  0xab   : > { %1925 = vmatpush1.bf16.msra.mxu1 %v3104_v8  ;;  %v446_v8 = vlaneseq }
  0xac   : > { %2144 = vmatpush1.bf16.msra.mxu0 %v3107_v9  ;;  %1926 = vmatprep.subr.bf16.mxu1 %v3117_v10 }
  0xad   : > { %2145 = vmatprep.subr.bf16.mxu0 %v3121_v11  ;;  %v447_v10 = vshrl.u32 %v446_v8, 7 }
  0xaf   : > { %1927 = vmatpush1.bf16.msra.mxu1 %v3115_v12 }
  0xb0   : > { %2146 = vmatpush1.bf16.msra.mxu0 %v3119_v13  ;;  %1928 = vmatprep.subr.bf16.mxu1 %v3124_v14  ;;  %v448_v14 = vsub.s32 0, %v447_v10 }
  0xb1   : > { %2147 = vmatprep.subr.bf16.mxu0 %v3127_v15 }
  0xb3   : > { %1929 = vmatpush1.bf16.msra.mxu1 %v3122_v16  ;;  %v444_v16 = vld [vmem:[%s3993_s2] sm:$0x3] }
  0xb4   : > { %2148 = vmatpush1.bf16.msra.mxu0 %v3125_v17  ;;  %1930 = vmatprep.subr.bf16.mxu1 %v3135_v18  ;;  %v452_v17 = vsub.s32 1, %v447_v10  ;;  %v3950_v18 = vrot.slane %v444_v16, %v448_v14 }
  0xb5   : > { %2149 = vmatprep.subr.bf16.mxu0 %v3139_v19 }
  0xb6   : > { %v3952_v19 = vrot.slane %v444_v16, %v452_v17 }
  0xb7   : > { %1931 = vmatpush1.bf16.msra.mxu1 %v3133_v20 }
  0xb8   : > { %2150 = vmatpush1.bf16.msra.mxu0 %v3137_v21  ;;  %1932 = vmatprep.subr.bf16.mxu1 %v3142_v22 }
  0xb9   : > { %2151 = vmatprep.subr.bf16.mxu0 %v3145_v23 }
  0xbb   : > { %1933 = vmatpush1.bf16.msra.mxu1 %v3140_v24 }
  0xbc   : > { %2152 = vmatpush1.bf16.msra.mxu0 %v3143_v25  ;;  %1934 = vmatprep.subr.bf16.mxu1 %v3153_v26 }
  0xbd   : > { %2153 = vmatprep.subr.bf16.mxu0 %v3157_v27 }
  0xbf   : > { %1935 = vmatpush1.bf16.msra.mxu1 %v3151_v28 }
  0xc0   : > { %2154 = vmatpush1.bf16.msra.mxu0 %v3155_v29  ;;  %1936 = vmatprep.subr.bf16.mxu1 %v3160_v30 }
  0xc1   : > { %2155 = vmatprep.subr.bf16.mxu0 %v3163_v31 }
  0xc3   : > { %1937 = vmatpush1.bf16.msra.mxu1 %v3158_v32 }
  0xc4   : > { %2156 = vmatpush1.bf16.msra.mxu0 %v3161_v33  ;;  %2690 = vmatprep.subr.bf16.mxu1 %v3172_v34 }
  0xc5   : > { %2198 = vmatprep.subr.bf16.mxu0 %v3172_v34 }
  0xc6   : > { %1939 = vmatmul.mubr.bf16.vlgmr.msra.gmra.mrb[0].mxu1 %v3164_v35 }
  0xc7   : > { %2158 = vmatmul.mubr.bf16.vlgmr.msra.gmra.mrb[0].mxu0 %v3167_v36  ;;  %2698 = vmatpush1.bf16.msra.mxu1 %v3170_v37 }
  0xc8   : > { %2199 = vmatpush1.bf16.msra.mxu0 %v3170_v37  ;;  %2691 = vmatprep.subr.bf16.mxu1 %v3175_v38 }
  0xc9   : > { %2200 = vmatprep.subr.bf16.mxu0 %v3175_v38  ;;  %1948 = vmatprep.mubr.bf16.mxu1 %v3176_v39 }
  0xca   : > { %2167 = vmatprep.mubr.bf16.mxu0 %v3178_v40 }
  0xcb   : > { %2699 = vmatpush1.bf16.msra.mxu1 %v3173_v41 }
  0xcc   : > { %2201 = vmatpush1.bf16.msra.mxu0 %v3173_v41  ;;  %2692 = vmatprep.subr.bf16.mxu1 %v3184_v42 }
  0xcd   : > { %2202 = vmatprep.subr.bf16.mxu0 %v3184_v42 }
  0xce   : > { %1949 = vmatmul.mubr.bf16.gmra.mrb[4].mxu1 %v3180_v43 }
  0xcf   : > { %2168 = vmatmul.mubr.bf16.gmra.mrb[4].mxu0 %v3181_v44  ;;  %2700 = vmatpush1.bf16.msra.mxu1 %v3182_v45 }
  0xd0   : > { %2203 = vmatpush1.bf16.msra.mxu0 %v3182_v45  ;;  %2693 = vmatprep.subr.bf16.mxu1 %v3187_v46 }
  0xd1   : > { %2204 = vmatprep.subr.bf16.mxu0 %v3187_v46  ;;  %1958 = vmatprep.mubr.bf16.mxu1 %v3188_v47 }
  0xd2   : > { %2177 = vmatprep.mubr.bf16.mxu0 %v3190_v48 }
  0xd3   : > { %2701 = vmatpush1.bf16.msra.mxu1 %v3185_v49 }
  0xd4   : > { %2205 = vmatpush1.bf16.msra.mxu0 %v3185_v49  ;;  %2694 = vmatprep.subr.bf16.mxu1 %v3196_v50 }
  0xd5   : > { %2206 = vmatprep.subr.bf16.mxu0 %v3196_v50 }
  0xd6   : > { %1959 = vmatmul.mubr.bf16.gmra.mrb[8].mxu1 %v3192_v51 }
  0xd7   : > { %2178 = vmatmul.mubr.bf16.gmra.mrb[8].mxu0 %v3193_v52  ;;  %2702 = vmatpush1.bf16.msra.mxu1 %v3194_v53 }
  0xd8   : > { %2207 = vmatpush1.bf16.msra.mxu0 %v3194_v53  ;;  %2695 = vmatprep.subr.bf16.mxu1 %v3199_v54 }
  0xd9   : > { %2208 = vmatprep.subr.bf16.mxu0 %v3199_v54  ;;  %1968 = vmatprep.mubr.bf16.mxu1 %v3200_v55 }
  0xda   : > { %2187 = vmatprep.mubr.bf16.mxu0 %v3202_v56 }
  0xdb   : > { %2703 = vmatpush1.bf16.msra.mxu1 %v3197_v57 }
  0xdc   : > { %2209 = vmatpush1.bf16.msra.mxu0 %v3197_v57  ;;  %2696 = vmatprep.subr.bf16.mxu1 %v3208_v58 }
  0xdd   : > { %2210 = vmatprep.subr.bf16.mxu0 %v3208_v58 }
  0xde   : > { %1969 = vmatmul.mubr.bf16.gmra.mrb[12].mxu1 %v3204_v59 }
  0xdf   : > { %2188 = vmatmul.mubr.bf16.gmra.mrb[12].mxu0 %v3205_v60  ;;  %2704 = vmatpush1.bf16.msra.mxu1 %v3206_v61 }
  0xe0   : > { %2211 = vmatpush1.bf16.msra.mxu0 %v3206_v61  ;;  %2697 = vmatprep.subr.bf16.mxu1 %v3211_v62 }
  0xe1   : > { %2212 = vmatprep.subr.bf16.mxu0 %v3211_v62  ;;  %2230 = vmatprep.mubr.bf16.mxu0 %v3224_v0 }
  0xe2   : > { %2250 = vmatprep.mubr.bf16.mxu1 %v3224_v0 }
  0xe3   : > { %2705 = vmatpush1.bf16.msra.mxu1 %v3209_v63 }
  0xe4   : > { %2213 = vmatpush1.bf16.msra.mxu0 %v3209_v63 }
  0xe6   : > { %2251 = vmatmul.mubr.bf16.vlgmr.msra.gmra.mrb[16].mxu1 %v3213_v2 }
  0xe7   : > { %2231 = vmatmul.mubr.bf16.vlgmr.msra.gmra.mrb[0].mxu0 %v3212_v1  ;;  %2260 = vmatprep.mubr.bf16.mxu1 %v3224_v0 }
  0xe8   : > { %2240 = vmatprep.mubr.bf16.mxu0 %v3224_v0 }
  0xee   : > { %2261 = vmatmul.mubr.bf16.gmra.mrb[20].mxu1 %v3215_v4 }
  0xef   : > { %2241 = vmatmul.mubr.bf16.gmra.mrb[4].mxu0 %v3214_v3 }
 0x199   : > { %v1940_v5 = vpop.f32.mrb[0].mxu1 }
 0x19a   : > { %v1942_v6 = vpop.f32.mrb[1].mxu1  ;;  %v2706_v52 = vadd.f32 %v1940_v5, %v3950_v18 }
 0x19b   : > { %v1944_v7 = vpop.f32.mrb[2].mxu1  ;;  %v2708_v53 = vadd.f32 %v1942_v6, %v3952_v19 }
 0x19c   : > { %v1946_v9 = vpop.f32.mrb[3].mxu1  ;;  %v2710_v56 = vadd.f32 %v1944_v7, %v3950_v18 }
 0x19d   : > { %v2712_v61 = vadd.f32 %v1946_v9, %v3952_v19 }
 0x1a1   : > { %v3939_v11 = vpop.f32.mrb[4].mxu1 }
 0x1a2   : > { %v3941_v12 = vpop.f32.mrb[5].mxu1 }
 0x1a3   : > { %v3943_v13 = vpop.f32.mrb[6].mxu1 }
 0x1a4   : > { %v3945_v15 = vpop.f32.mrb[7].mxu1 }
 0x1a9   : > { %v1960_v20 = vpop.f32.mrb[8].mxu1 }
 0x1aa   : > { %v2179_v21 = vpop.f32.mrb[8].mxu0  ;;  %v2722_v22 = vadd.f32 %v1960_v20, %v3950_v18  ;;  %v1962_v23 = vpop.f32.mrb[9].mxu1 }
 0x1ab   : > { %v2181_v24 = vpop.f32.mrb[9].mxu0  ;;  %v2725_v25 = vadd.f32 %v1962_v23, %v3952_v19  ;;  %v1964_v26 = vpop.f32.mrb[10].mxu1 }
 0x1ac   : > { %v2183_v27 = vpop.f32.mrb[10].mxu0  ;;  %v2723_v28 = vadd.f32 %v2722_v22, %v2179_v21  ;;  %v2728_v29 = vadd.f32 %v1964_v26, %v3950_v18  ;;  %v1966_v30 = vpop.f32.mrb[11].mxu1 }
 0x1ad   : > { %v2185_v31 = vpop.f32.mrb[11].mxu0  ;;  %v2726_v32 = vadd.f32 %v2725_v25, %v2181_v24  ;;  %v2731_v33 = vadd.f32 %v1966_v30, %v3952_v19  ;;  %v2714_v24 = vadd.f32 %v3939_v11, %v3950_v18  ;;  %v2716_v25 = vadd.f32 %v3941_v12, %v3952_v19 }
 0x1ae   : > { %v2729_v34 = vadd.f32 %v2728_v29, %v2183_v27  ;;  %v2718_v30 = vadd.f32 %v3943_v13, %v3950_v18 }
 0x1af   : > { %v2732_v35 = vadd.f32 %v2731_v33, %v2185_v31 }
 0x1b1   : > { %v1970_v36 = vpop.f32.mrb[12].mxu1 }
 0x1b2   : > { %v2189_v37 = vpop.f32.mrb[12].mxu0  ;;  %v2734_v38 = vadd.f32 %v1970_v36, %v3950_v18  ;;  %v1972_v39 = vpop.f32.mrb[13].mxu1 }
 0x1b3   : > { %v2191_v40 = vpop.f32.mrb[13].mxu0  ;;  %v2737_v41 = vadd.f32 %v1972_v39, %v3952_v19  ;;  %v1974_v42 = vpop.f32.mrb[14].mxu1 }
 0x1b4   : > { %v2193_v43 = vpop.f32.mrb[14].mxu0  ;;  %v2735_v44 = vadd.f32 %v2734_v38, %v2189_v37  ;;  %v2740_v45 = vadd.f32 %v1974_v42, %v3950_v18  ;;  %v1976_v46 = vpop.f32.mrb[15].mxu1 }
 0x1b5   : > { %v2195_v47 = vpop.f32.mrb[15].mxu0  ;;  %v2738_v48 = vadd.f32 %v2737_v41, %v2191_v40  ;;  %v2743_v49 = vadd.f32 %v1976_v46, %v3952_v19 }
 0x1b6   : > { %v2741_v50 = vadd.f32 %v2740_v45, %v2193_v43 }
 0x1b7   : > { %v2744_v51 = vadd.f32 %v2743_v49, %v2195_v47 }
 0x1b9   : > { %v2252_v55 = vpop.f32.mrb[16].mxu1 }
 0x1ba   : > { %v2232_v54 = vpop.f32.mrb[0].mxu0  ;;  %v2724_v58 = vadd.f32 %v2723_v28, %v2252_v55  ;;  %v2254_v60 = vpop.f32.mrb[17].mxu1 }
 0x1bb   : > { %v2707_v57 = vadd.f32 %v2706_v52, %v2232_v54  ;;  %v2234_v59 = vpop.f32.mrb[1].mxu0  ;;  %v2727_v63 = vadd.f32 %v2726_v32, %v2254_v60  ;;  %v2256_v1 = vpop.f32.mrb[18].mxu1 }
 0x1bc   : > { %v2709_v62 = vadd.f32 %v2708_v53, %v2234_v59  ;;  %v2236_v0 = vpop.f32.mrb[2].mxu0  ;;  %v2279_v3 = vmax.f32 %v2724_v58, 0.0  ;;  %v2730_v5 = vadd.f32 %v2729_v34, %v2256_v1  ;;  %v2258_v8 = vpop.f32.mrb[19].mxu1 }
 0x1bd   : > { %v2271_v2 = vmax.f32 %v2707_v57, 0.0  ;;  %v2711_v4 = vadd.f32 %v2710_v56, %v2236_v0  ;;  %v2238_v6 = vpop.f32.mrb[3].mxu0  ;;  %v2280_v14 = vmax.f32 %v2727_v63, 0.0  ;;  %v2733_v16 = vadd.f32 %v2732_v35, %v2258_v8 }
 0x1be   : > { %v2272_v10 = vmax.f32 %v2709_v62, 0.0  ;;  %v2713_v7 = vadd.f32 %v2712_v61, %v2238_v6  ;;  %v2281_v17 = vmax.f32 %v2730_v5, 0.0  ;;  %v2720_v35 = vadd.f32 %v3945_v15, %v3952_v19 }
 0x1bf   : > { %v2273_v9 = vmax.f32 %v2711_v4, 0.0  ;;  %v2686_v21 = vpack.c.bf16 %v2280_v14, %v2279_v3  ;;  %v2282_v23 = vmax.f32 %v2733_v16, 0.0 }
 0x1c0   : > { %v2682_v20 = vpack.c.bf16 %v2272_v10, %v2271_v2  ;;  %v2274_v22 = vmax.f32 %v2713_v7, 0.0 }
 0x1c1   : > { %2339 = vst [vmem:[%s3970_s27 + $0x20] sm:$0xff] %v2686_v21  ;;  %v2687_v27 = vpack.c.bf16 %v2282_v23, %v2281_v17  ;;  %v2262_v29 = vpop.f32.mrb[20].mxu1 }
 0x1c2   : > { %2335 = vst [vmem:[%s3970_s27] sm:$0xff] %v2682_v20  ;;  %v2683_v26 = vpack.c.bf16 %v2274_v22, %v2273_v9  ;;  %v2242_v28 = vpop.f32.mrb[4].mxu0  ;;  %v2736_v32 = vadd.f32 %v2735_v44, %v2262_v29  ;;  %v2264_v34 = vpop.f32.mrb[21].mxu1 }
 0x1c3   : > { %v2715_v31 = vadd.f32 %v2714_v24, %v2242_v28  ;;  %v2244_v33 = vpop.f32.mrb[5].mxu0  ;;  %2340 = vst [vmem:[%s3970_s27 + $0x28] sm:$0xff] %v2687_v27  ;;  %v2739_v12 = vadd.f32 %v2738_v48, %v2264_v34  ;;  %v2266_v37 = vpop.f32.mrb[22].mxu1 }
 0x1c4   : > { %2336 = vst [vmem:[%s3970_s27 + $0x8] sm:$0xff] %v2683_v26  ;;  %v2717_v11 = vadd.f32 %v2716_v25, %v2244_v33  ;;  %v2246_v36 = vpop.f32.mrb[6].mxu0  ;;  %v2283_v39 = vmax.f32 %v2736_v32, 0.0  ;;  %v2742_v41 = vadd.f32 %v2741_v50, %v2266_v37  ;;  %v2268_v18 = vpop.f32.mrb[23].mxu1 }
 0x1c5   : > { %v2275_v38 = vmax.f32 %v2715_v31, 0.0  ;;  %v2719_v40 = vadd.f32 %v2718_v30, %v2246_v36  ;;  %v2248_v13 = vpop.f32.mrb[7].mxu0  ;;  %v2284_v43 = vmax.f32 %v2739_v12, 0.0  ;;  %v2745_v15 = vadd.f32 %v2744_v51, %v2268_v18 }
 0x1c6   : > { %v2276_v42 = vmax.f32 %v2717_v11, 0.0  ;;  %v2721_v44 = vadd.f32 %v2720_v35, %v2248_v13  ;;  %v2285_v45 = vmax.f32 %v2742_v41, 0.0 }
 0x1c7   : > { %v2277_v19 = vmax.f32 %v2719_v40, 0.0  ;;  %v2688_v47 = vpack.c.bf16 %v2284_v43, %v2283_v39  ;;  %v2286_v49 = vmax.f32 %v2745_v15, 0.0 }
 0x1c8   : > { %v2684_v46 = vpack.c.bf16 %v2276_v42, %v2275_v38  ;;  %v2278_v48 = vmax.f32 %v2721_v44, 0.0 }
 0x1c9   : > { %2341 = vst [vmem:[%s3970_s27 + $0x30] sm:$0xff] %v2688_v47  ;;  %v2689_v53 = vpack.c.bf16 %v2286_v49, %v2285_v45 }
 0x1ca   : > { %2337 = vst [vmem:[%s3970_s27 + $0x10] sm:$0xff] %v2684_v46  ;;  %v2685_v52 = vpack.c.bf16 %v2278_v48, %v2277_v19 }
 0x1cb   : > { %2342 = vst [vmem:[%s3970_s27 + $0x38] sm:$0xff] %v2689_v53 }
 0x1cc   : > { %2338 = vst [vmem:[%s3970_s27 + $0x18] sm:$0xff] %v2685_v52 }
 0x1cd PF: > { %s13_s12 = sadd.s32 1, %s3222_s12  }
 0x1ce   : > { %p10_p4 = scmp.ge.s32.totalorder %s13_s12, 4  }
 0x1d0   :  { %12 = sbr.rel (!%p10_p4) target bundleno = 1 (0x1), region = 62 }

// kernel: alexnet_fc_forward.12
= control target key start
LH: loop header
LB: loop body
LE: loop exit
PB: predicated region body
PF: predicated region fallthrough
CT: control target
= control target key end

     0   :  { %s4259_s12 = smov 0   ;;  %s5355_s0 = inlined_call_operand.vmem [shape: bf16[32,1792], index: 0, kind: input, shape index: {}]   ;;  %s5356_s1 = inlined_call_operand.vmem [shape: bf16[1792,384], index: 1, kind: input, shape index: {}]   ;;  %s5357_s2 = inlined_call_operand.vmem [shape: f32[1,384], index: 2, kind: input, shape index: {}]   ;;  %s5358_s3 = inlined_call_operand.vmem [shape: bf16[32,384], index: 3, kind: output, shape index: {}]  }
   0x1 LB: > { %s3197_s13 = sadd.s32 4294967295, %s4237_s12   ;;  %p3201_p0 = scmp.ge.s32.totalorder %s4237_s12, 1  ;;  %s4237_s12 = sphi %s4259_s12, %s13_s12  }
   0x2   : > { %p139_p1 = scmp.lt.s32.totalorder %s4237_s12, 3 }
   0x4   : > { %p140_p2 = pnand %p3201_p0, %p139_p1 }
   0x5   : > { %v3758_v0 = vld [vmem:[%s5356_s1 + $0x4] ss:$12 sps:$4 sm:$0xff] (!%p140_p2)   ;;  %v3762_v2 = vld [vmem:[%s5356_s1] ss:$12 sps:$4 sm:$0xff] (!%p140_p2)   ;;  %v3764_v4 = vld [vmem:[%s5356_s1 + $0x1c] ss:$12 sps:$4 sm:$0xff] (!%p140_p2)  }
   0x6   : > { %143 = sbr.rel (%p140_p2) target bundleno = 582 (0x246), region = 32  ;;  %v3760_v1 = vld [vmem:[%s5356_s1 + $0x304] ss:$12 sps:$4 sm:$0xff] (!%p140_p2)   ;;  %2521 = vmatprep.subr.bf16.mxu1 (!%p140_p2), %v3758_v0  ;;  %v3763_v3 = vld [vmem:[%s5356_s1 + $0x300] ss:$12 sps:$4 sm:$0xff] (!%p140_p2)   ;;  %s3202_s24 = sshll.u32 (!%p140_p2), %s3197_s13, 1 }
   0x7   : > { %2607 = vmatprep.subr.bf16.mxu0 (!%p140_p2), %v3760_v1  ;;  %2522 = vmatpush1.bf16.msra.mxu1 (!%p140_p2), %v3762_v2  ;;  %v3766_v5 = vld [vmem:[%s5356_s1 + $0x31c] ss:$12 sps:$4 sm:$0xff] (!%p140_p2)   ;;  %v3768_v6 = vld [vmem:[%s5356_s1 + $0x18] ss:$12 sps:$4 sm:$0xff] (!%p140_p2)   ;;  %v3770_v8 = vld [vmem:[%s5356_s1 + $0x34] ss:$12 sps:$4 sm:$0xff] (!%p140_p2)  }
   0x8   : > { %2608 = vmatpush1.bf16.msra.mxu0 (!%p140_p2), %v3763_v3  ;;  %2523 = vmatprep.subr.bf16.mxu1 (!%p140_p2), %v3764_v4  ;;  %v3769_v7 = vld [vmem:[%s5356_s1 + $0x318] ss:$12 sps:$4 sm:$0xff] (!%p140_p2)   ;;  %v3772_v9 = vld [vmem:[%s5356_s1 + $0x334] ss:$12 sps:$4 sm:$0xff] (!%p140_p2)   ;;  %v3774_v10 = vld [vmem:[%s5356_s1 + $0x30] ss:$12 sps:$4 sm:$0xff] (!%p140_p2)  }
   0x9   : > { %2609 = vmatprep.subr.bf16.mxu0 (!%p140_p2), %v3766_v5  ;;  %v3775_v11 = vld [vmem:[%s5356_s1 + $0x330] ss:$12 sps:$4 sm:$0xff] (!%p140_p2)   ;;  %v3776_v12 = vld [vmem:[%s5356_s1 + $0x4c] ss:$12 sps:$4 sm:$0xff] (!%p140_p2)   ;;  %v3780_v14 = vld [vmem:[%s5356_s1 + $0x48] ss:$12 sps:$4 sm:$0xff] (!%p140_p2)  }
   0xa   : > { %v3778_v13 = vld [vmem:[%s5356_s1 + $0x34c] ss:$12 sps:$4 sm:$0xff] (!%p140_p2)   ;;  %v3781_v15 = vld [vmem:[%s5356_s1 + $0x348] ss:$12 sps:$4 sm:$0xff] (!%p140_p2)   ;;  %v3782_v16 = vld [vmem:[%s5356_s1 + $0x64] ss:$12 sps:$4 sm:$0xff] (!%p140_p2)  }
   0xb   : > { %2524 = vmatpush1.bf16.msra.mxu1 (!%p140_p2), %v3768_v6  ;;  %v3784_v17 = vld [vmem:[%s5356_s1 + $0x364] ss:$12 sps:$4 sm:$0xff] (!%p140_p2)   ;;  %v3786_v18 = vld [vmem:[%s5356_s1 + $0x60] ss:$12 sps:$4 sm:$0xff] (!%p140_p2)   ;;  %v3788_v20 = vld [vmem:[%s5356_s1 + $0x7c] ss:$12 sps:$4 sm:$0xff] (!%p140_p2)  }
   0xc   : > { %2610 = vmatpush1.bf16.msra.mxu0 (!%p140_p2), %v3769_v7  ;;  %2525 = vmatprep.subr.bf16.mxu1 (!%p140_p2), %v3770_v8  ;;  %v3787_v19 = vld [vmem:[%s5356_s1 + $0x360] ss:$12 sps:$4 sm:$0xff] (!%p140_p2)   ;;  %v3790_v21 = vld [vmem:[%s5356_s1 + $0x37c] ss:$12 sps:$4 sm:$0xff] (!%p140_p2)   ;;  %v3792_v22 = vld [vmem:[%s5356_s1 + $0x78] ss:$12 sps:$4 sm:$0xff] (!%p140_p2)  }
   0xd   : > { %2611 = vmatprep.subr.bf16.mxu0 %v3772_v9  ;;  %v3793_v23 = vld [vmem:[%s5356_s1 + $0x378] ss:$12 sps:$4 sm:$0xff]   ;;  %v3794_v24 = vld [vmem:[%s5356_s1 + $0x94] ss:$12 sps:$4 sm:$0xff]   ;;  %v3798_v26 = vld [vmem:[%s5356_s1 + $0x90] ss:$12 sps:$4 sm:$0xff]  }
   0xe   : > { %v3796_v25 = vld [vmem:[%s5356_s1 + $0x394] ss:$12 sps:$4 sm:$0xff]   ;;  %v3799_v27 = vld [vmem:[%s5356_s1 + $0x390] ss:$12 sps:$4 sm:$0xff]   ;;  %v3800_v28 = vld [vmem:[%s5356_s1 + $0xac] ss:$12 sps:$4 sm:$0xff]  }
   0xf   : > { %2526 = vmatpush1.bf16.msra.mxu1 %v3774_v10  ;;  %v3802_v29 = vld [vmem:[%s5356_s1 + $0x3ac] ss:$12 sps:$4 sm:$0xff]   ;;  %v3804_v30 = vld [vmem:[%s5356_s1 + $0xa8] ss:$12 sps:$4 sm:$0xff]   ;;  %v3806_v32 = vld [vmem:[%s5356_s1 + $0xc4] ss:$12 sps:$4 sm:$0xff]  }
  0x10   : > { %2612 = vmatpush1.bf16.msra.mxu0 %v3775_v11  ;;  %2527 = vmatprep.subr.bf16.mxu1 %v3776_v12  ;;  %v3805_v31 = vld [vmem:[%s5356_s1 + $0x3a8] ss:$12 sps:$4 sm:$0xff]   ;;  %p166_p3 = scmp.lt.s32.totalorder %s3202_s24, 3  ;;  %v3808_v33 = vld [vmem:[%s5356_s1 + $0x3c4] ss:$12 sps:$4 sm:$0xff]  }
  0x11   : > { %2613 = vmatprep.subr.bf16.mxu0 %v3778_v13  ;;  %v3810_v34 = vld [vmem:[%s5356_s1 + $0xc0] ss:$12 sps:$4 sm:$0xff]   ;;  %v3812_v36 = vld [vmem:[%s5356_s1 + $0xdc] ss:$12 sps:$4 sm:$0xff]   ;;  %v3816_v38 = vld [vmem:[%s5356_s1 + $0xd8] ss:$12 sps:$4 sm:$0xff]  }
  0x12   : > { %v3811_v35 = vld [vmem:[%s5356_s1 + $0x3c0] ss:$12 sps:$4 sm:$0xff]   ;;  %s5360_s24 = smov (!%p166_p3, %s3202_s24), 3  ;;  %v3814_v37 = vld [vmem:[%s5356_s1 + $0x3dc] ss:$12 sps:$4 sm:$0xff]  }
  0x13   : > { %2528 = vmatpush1.bf16.msra.mxu1 %v3780_v14  ;;  %v3817_v39 = vld [vmem:[%s5356_s1 + $0x3d8] ss:$12 sps:$4 sm:$0xff]   ;;  %v3818_v40 = vld [vmem:[%s5356_s1 + $0xf4] ss:$12 sps:$4 sm:$0xff]   ;;  %s3748_s21 = smul.u32 56, %s5360_s24 }
  0x14   : > { %2614 = vmatpush1.bf16.msra.mxu0 %v3781_v15  ;;  %2529 = vmatprep.subr.bf16.mxu1 %v3782_v16  ;;  %v3820_v41 = vld [vmem:[%s5356_s1 + $0x3f4] ss:$12 sps:$4 sm:$0xff]   ;;  %v3822_v42 = vld [vmem:[%s5356_s1 + $0xf0] ss:$12 sps:$4 sm:$0xff]   ;;  %v3824_v44 = vld [vmem:[%s5356_s1 + $0x10c] ss:$12 sps:$4 sm:$0xff]  }
  0x15   : > { %2615 = vmatprep.subr.bf16.mxu0 %v3784_v17  ;;  %v3823_v43 = vld [vmem:[%s5356_s1 + $0x3f0] ss:$12 sps:$4 sm:$0xff]   ;;  %s4410_s13 = scalar_lea.vmem %s5355_s0, %s3748_s21  ;;  %v3826_v45 = vld [vmem:[%s5356_s1 + $0x40c] ss:$12 sps:$4 sm:$0xff]   ;;  %v3828_v46 = vld [vmem:[%s5356_s1 + $0x108] ss:$12 sps:$4 sm:$0xff]  }
  0x16   : > { %v3829_v47 = vld [vmem:[%s5356_s1 + $0x408] ss:$12 sps:$4 sm:$0xff]   ;;  %v4422_v48 = vld [vmem:[%s4410_s13 + $0x4] ss:$56 sps:$4 sm:$0xff]   ;;  %v3834_v52 = vld [vmem:[%s5356_s1 + $0x120] ss:$12 sps:$4 sm:$0xff]  }
  0x17   : > { %2530 = vmatpush1.bf16.msra.mxu1 %v3786_v18  ;;  %v3830_v49 = vld [vmem:[%s5356_s1 + $0x124] ss:$12 sps:$4 sm:$0xff]   ;;  %2553 = vmatprep.mubr.bf16.mxu1 %v4422_v48  ;;  %v3862_v51 = vld [vmem:[%s4410_s13 + $0x14] ss:$56 sps:$4 sm:$0xff]   ;;  %v3836_v54 = vld [vmem:[%s5356_s1 + $0x13c] ss:$12 sps:$4 sm:$0xff]  }
  0x18   : > { %2616 = vmatpush1.bf16.msra.mxu0 %v3787_v19  ;;  %2531 = vmatprep.subr.bf16.mxu1 %v3788_v20  ;;  %v3832_v50 = vld [vmem:[%s5356_s1 + $0x424] ss:$12 sps:$4 sm:$0xff]   ;;  %v3835_v53 = vld [vmem:[%s5356_s1 + $0x420] ss:$12 sps:$4 sm:$0xff]   ;;  %v3838_v55 = vld [vmem:[%s5356_s1 + $0x43c] ss:$12 sps:$4 sm:$0xff]  }
  0x19   : > { %2617 = vmatprep.subr.bf16.mxu0 %v3790_v21  ;;  %2639 = vmatprep.mubr.bf16.mxu0 %v3862_v51  ;;  %v3840_v56 = vld [vmem:[%s5356_s1 + $0x138] ss:$12 sps:$4 sm:$0xff]   ;;  %v3842_v58 = vld [vmem:[%s5356_s1 + $0x154] ss:$12 sps:$4 sm:$0xff]   ;;  %v3846_v60 = vld [vmem:[%s5356_s1 + $0x150] ss:$12 sps:$4 sm:$0xff]  }
  0x1a   : > { %v3841_v57 = vld [vmem:[%s5356_s1 + $0x438] ss:$12 sps:$4 sm:$0xff]   ;;  %v3844_v59 = vld [vmem:[%s5356_s1 + $0x454] ss:$12 sps:$4 sm:$0xff]   ;;  %v3847_v61 = vld [vmem:[%s5356_s1 + $0x450] ss:$12 sps:$4 sm:$0xff]  }
  0x1b   : > { %2532 = vmatpush1.bf16.msra.mxu1 %v3792_v22  ;;  %v3848_v62 = vld [vmem:[%s5356_s1 + $0x16c] ss:$12 sps:$4 sm:$0xff]   ;;  %v3852_v0 = vld [vmem:[%s5356_s1 + $0x168] ss:$12 sps:$4 sm:$0xff]   ;;  %v3859_v2 = vld [vmem:[%s5356_s1 + $0x184] ss:$12 sps:$4 sm:$0xff]  }
  0x1c   : > { %2618 = vmatpush1.bf16.msra.mxu0 %v3793_v23  ;;  %2533 = vmatprep.subr.bf16.mxu1 %v3794_v24  ;;  %v3850_v63 = vld [vmem:[%s5356_s1 + $0x46c] ss:$12 sps:$4 sm:$0xff]   ;;  %v3853_v1 = vld [vmem:[%s5356_s1 + $0x468] ss:$12 sps:$4 sm:$0xff]   ;;  %v3865_v3 = vld [vmem:[%s5356_s1 + $0x484] ss:$12 sps:$4 sm:$0xff]  }
  0x1d   : > { %2619 = vmatprep.subr.bf16.mxu0 %v3796_v25  ;;  %v4481_v4 = vld [vmem:[%s4410_s13] ss:$56 sps:$4 sm:$0xff]   ;;  %v3860_v6 = vld [vmem:[%s4410_s13 + $0x10] ss:$56 sps:$4 sm:$0xff]   ;;  %s3749_s14 = smul.u32 12, %s5360_s24 }
  0x1e   : > { %v3857_v5 = vld [vmem:[%s5356_s1 + $0x180] ss:$12 sps:$4 sm:$0xff]   ;;  %v3868_v8 = vld [vmem:[%s5356_s1 + $0x19c] ss:$12 sps:$4 sm:$0xff]   ;;  %v3866_v10 = vld [vmem:[%s5356_s1 + $0x198] ss:$12 sps:$4 sm:$0xff]  }
  0x1f   : > { %2534 = vmatpush1.bf16.msra.mxu1 %v3798_v26  ;;  %v3863_v7 = vld [vmem:[%s5356_s1 + $0x480] ss:$12 sps:$4 sm:$0xff]   ;;  %v3871_v9 = vld [vmem:[%s5356_s1 + $0x49c] ss:$12 sps:$4 sm:$0xff]   ;;  %v3869_v11 = vld [vmem:[%s5356_s1 + $0x498] ss:$12 sps:$4 sm:$0xff]   ;;  %s177_s24 = scalar_lea.vmem %s5358_s3, %s3749_s14 }
  0x20   : > { %2620 = vmatpush1.bf16.msra.mxu0 %v3799_v27  ;;  %2535 = vmatprep.subr.bf16.mxu1 %v3800_v28  ;;  %v3874_v12 = vld [vmem:[%s5356_s1 + $0x1b4] ss:$12 sps:$4 sm:$0xff]   ;;  %v3872_v14 = vld [vmem:[%s5356_s1 + $0x1b0] ss:$12 sps:$4 sm:$0xff]   ;;  %v3880_v16 = vld [vmem:[%s5356_s1 + $0x1cc] ss:$12 sps:$4 sm:$0xff]  }
  0x21   : > { %2621 = vmatprep.subr.bf16.mxu0 %v3802_v29  ;;  %v3877_v13 = vld [vmem:[%s5356_s1 + $0x4b4] ss:$12 sps:$4 sm:$0xff]   ;;  %v3875_v15 = vld [vmem:[%s5356_s1 + $0x4b0] ss:$12 sps:$4 sm:$0xff]   ;;  %v3883_v17 = vld [vmem:[%s5356_s1 + $0x4cc] ss:$12 sps:$4 sm:$0xff]  }
  0x22   : > { %v3878_v18 = vld [vmem:[%s5356_s1 + $0x1c8] ss:$12 sps:$4 sm:$0xff]   ;;  %v3886_v20 = vld [vmem:[%s5356_s1 + $0x1e4] ss:$12 sps:$4 sm:$0xff]   ;;  %v3884_v22 = vld [vmem:[%s5356_s1 + $0x1e0] ss:$12 sps:$4 sm:$0xff]  }
  0x23   : > { %2536 = vmatpush1.bf16.msra.mxu1 %v3804_v30  ;;  %v3881_v19 = vld [vmem:[%s5356_s1 + $0x4c8] ss:$12 sps:$4 sm:$0xff]   ;;  %v3889_v21 = vld [vmem:[%s5356_s1 + $0x4e4] ss:$12 sps:$4 sm:$0xff]   ;;  %v3887_v23 = vld [vmem:[%s5356_s1 + $0x4e0] ss:$12 sps:$4 sm:$0xff]  }
  0x24   : > { %2622 = vmatpush1.bf16.msra.mxu0 %v3805_v31  ;;  %2537 = vmatprep.subr.bf16.mxu1 %v3806_v32  ;;  %v3892_v24 = vld [vmem:[%s5356_s1 + $0x1fc] ss:$12 sps:$4 sm:$0xff]   ;;  %v3890_v26 = vld [vmem:[%s5356_s1 + $0x1f8] ss:$12 sps:$4 sm:$0xff]   ;;  %v3898_v28 = vld [vmem:[%s5356_s1 + $0x214] ss:$12 sps:$4 sm:$0xff]  }
  0x25   : > { %2623 = vmatprep.subr.bf16.mxu0 %v3808_v33  ;;  %v3895_v25 = vld [vmem:[%s5356_s1 + $0x4fc] ss:$12 sps:$4 sm:$0xff]   ;;  %v3893_v27 = vld [vmem:[%s5356_s1 + $0x4f8] ss:$12 sps:$4 sm:$0xff]   ;;  %v3901_v29 = vld [vmem:[%s5356_s1 + $0x514] ss:$12 sps:$4 sm:$0xff]  }
  0x26   : > { %v3896_v30 = vld [vmem:[%s5356_s1 + $0x210] ss:$12 sps:$4 sm:$0xff]   ;;  %v3904_v32 = vld [vmem:[%s5356_s1 + $0x22c] ss:$12 sps:$4 sm:$0xff]  }
  0x27   : > { %2538 = vmatpush1.bf16.msra.mxu1 %v3810_v34  ;;  %v3899_v31 = vld [vmem:[%s5356_s1 + $0x510] ss:$12 sps:$4 sm:$0xff]   ;;  %v3907_v33 = vld [vmem:[%s5356_s1 + $0x52c] ss:$12 sps:$4 sm:$0xff]  }
  0x28   : > { %2624 = vmatpush1.bf16.msra.mxu0 %v3811_v35  ;;  %2539 = vmatprep.subr.bf16.mxu1 %v3812_v36  ;;  %v4570_v34 = vld [vmem:[%s4410_s13 + $0xc] ss:$56 sps:$4 sm:$0xff]   ;;  %v3961_v35 = vld [vmem:[%s4410_s13 + $0x1c] ss:$56 sps:$4 sm:$0xff]  }
  0x29   : > { %2625 = vmatprep.subr.bf16.mxu0 %v3814_v37  ;;  %v3902_v36 = vld [vmem:[%s5356_s1 + $0x228] ss:$12 sps:$4 sm:$0xff]   ;;  %v3928_v51 = vld [vmem:[%s5356_s1 + $0x28c] ss:$12 sps:$4 sm:$0xff]  }
  0x2a   : > { %v3905_v37 = vld [vmem:[%s5356_s1 + $0x528] ss:$12 sps:$4 sm:$0xff]  }
  0x2b   : > { %2540 = vmatpush1.bf16.msra.mxu1 %v3816_v38  ;;  %v3910_v38 = vld [vmem:[%s5356_s1 + $0x244] ss:$12 sps:$4 sm:$0xff]  }
  0x2c   : > { %2626 = vmatpush1.bf16.msra.mxu0 %v3817_v39  ;;  %2541 = vmatprep.subr.bf16.mxu1 %v3818_v40  ;;  %v3913_v39 = vld [vmem:[%s5356_s1 + $0x544] ss:$12 sps:$4 sm:$0xff]   ;;  %v3908_v40 = vld [vmem:[%s5356_s1 + $0x240] ss:$12 sps:$4 sm:$0xff]  }
  0x2d   : > { %2627 = vmatprep.subr.bf16.mxu0 %v3820_v41  ;;  %v3911_v41 = vld [vmem:[%s5356_s1 + $0x540] ss:$12 sps:$4 sm:$0xff]  }
  0x2f   : > { %2542 = vmatpush1.bf16.msra.mxu1 %v3822_v42  ;;  %v3916_v42 = vld [vmem:[%s5356_s1 + $0x25c] ss:$12 sps:$4 sm:$0xff]  }
  0x30   : > { %2628 = vmatpush1.bf16.msra.mxu0 %v3823_v43  ;;  %2543 = vmatprep.subr.bf16.mxu1 %v3824_v44  ;;  %v3919_v43 = vld [vmem:[%s5356_s1 + $0x55c] ss:$12 sps:$4 sm:$0xff]   ;;  %v3914_v44 = vld [vmem:[%s5356_s1 + $0x258] ss:$12 sps:$4 sm:$0xff]  }
  0x31   : > { %2629 = vmatprep.subr.bf16.mxu0 %v3826_v45  ;;  %v3917_v45 = vld [vmem:[%s5356_s1 + $0x558] ss:$12 sps:$4 sm:$0xff]  }
  0x33   : > { %2544 = vmatpush1.bf16.msra.mxu1 %v3828_v46  ;;  %v3922_v46 = vld [vmem:[%s5356_s1 + $0x274] ss:$12 sps:$4 sm:$0xff]  }
  0x34   : > { %2630 = vmatpush1.bf16.msra.mxu0 %v3829_v47  ;;  %2545 = vmatprep.subr.bf16.mxu1 %v3830_v49  ;;  %v3925_v47 = vld [vmem:[%s5356_s1 + $0x574] ss:$12 sps:$4 sm:$0xff]   ;;  %v3920_v49 = vld [vmem:[%s5356_s1 + $0x270] ss:$12 sps:$4 sm:$0xff]  }
  0x35   : > { %2631 = vmatprep.subr.bf16.mxu0 %v3832_v50  ;;  %v3923_v50 = vld [vmem:[%s5356_s1 + $0x570] ss:$12 sps:$4 sm:$0xff]  }
  0x37   : > { %2546 = vmatpush1.bf16.msra.mxu1 %v3834_v52  ;;  %v3931_v52 = vld [vmem:[%s5356_s1 + $0x58c] ss:$12 sps:$4 sm:$0xff]  }
  0x38   : > { %2632 = vmatpush1.bf16.msra.mxu0 %v3835_v53  ;;  %2547 = vmatprep.subr.bf16.mxu1 %v3836_v54  ;;  %v3926_v53 = vld [vmem:[%s5356_s1 + $0x288] ss:$12 sps:$4 sm:$0xff]  }
  0x39   : > { %2633 = vmatprep.subr.bf16.mxu0 %v3838_v55  ;;  %v3929_v54 = vld [vmem:[%s5356_s1 + $0x588] ss:$12 sps:$4 sm:$0xff]   ;;  %v3934_v55 = vld [vmem:[%s5356_s1 + $0x2a4] ss:$12 sps:$4 sm:$0xff]  }
  0x3b   : > { %2548 = vmatpush1.bf16.msra.mxu1 %v3840_v56  ;;  %v3937_v56 = vld [vmem:[%s5356_s1 + $0x5a4] ss:$12 sps:$4 sm:$0xff]  }
  0x3c   : > { %2634 = vmatpush1.bf16.msra.mxu0 %v3841_v57  ;;  %2549 = vmatprep.subr.bf16.mxu1 %v3842_v58  ;;  %v3932_v57 = vld [vmem:[%s5356_s1 + $0x2a0] ss:$12 sps:$4 sm:$0xff]  }
  0x3d   : > { %2635 = vmatprep.subr.bf16.mxu0 %v3844_v59  ;;  %v3935_v58 = vld [vmem:[%s5356_s1 + $0x5a0] ss:$12 sps:$4 sm:$0xff]   ;;  %v3940_v59 = vld [vmem:[%s5356_s1 + $0x2bc] ss:$12 sps:$4 sm:$0xff]  }
  0x3f   : > { %2550 = vmatpush1.bf16.msra.mxu1 %v3846_v60  ;;  %v3943_v60 = vld [vmem:[%s5356_s1 + $0x5bc] ss:$12 sps:$4 sm:$0xff]  }
  0x40   : > { %2636 = vmatpush1.bf16.msra.mxu0 %v3847_v61  ;;  %2551 = vmatprep.subr.bf16.mxu1 %v3848_v62  ;;  %v3938_v61 = vld [vmem:[%s5356_s1 + $0x2b8] ss:$12 sps:$4 sm:$0xff]  }
  0x41   : > { %2637 = vmatprep.subr.bf16.mxu0 %v3850_v63  ;;  %v3941_v62 = vld [vmem:[%s5356_s1 + $0x5b8] ss:$12 sps:$4 sm:$0xff]   ;;  %v3946_v63 = vld [vmem:[%s5356_s1 + $0x2d4] ss:$12 sps:$4 sm:$0xff]  }
  0x43   : > { %2552 = vmatpush1.bf16.msra.mxu1 %v3852_v0  ;;  %v3949_v0 = vld [vmem:[%s5356_s1 + $0x5d4] ss:$12 sps:$4 sm:$0xff]  }
  0x44   : > { %2638 = vmatpush1.bf16.msra.mxu0 %v3853_v1  ;;  %2564 = vmatprep.subr.bf16.mxu1 %v3859_v2  ;;  %v3944_v1 = vld [vmem:[%s5356_s1 + $0x2d0] ss:$12 sps:$4 sm:$0xff]  }
  0x45   : > { %2650 = vmatprep.subr.bf16.mxu0 %v3865_v3  ;;  %v3947_v2 = vld [vmem:[%s5356_s1 + $0x5d0] ss:$12 sps:$4 sm:$0xff]   ;;  %v3952_v3 = vld [vmem:[%s5356_s1 + $0x2ec] ss:$12 sps:$4 sm:$0xff]  }
  0x46   : > { %2554 = vmatmul.mubr.bf16.vlgmr.msra.gmra.mrb[0].mxu1 %v4481_v4 }
  0x47   : > { %2640 = vmatmul.mubr.bf16.vlgmr.msra.gmra.mrb[0].mxu0 %v3860_v6  ;;  %2565 = vmatpush1.bf16.msra.mxu1 %v3857_v5  ;;  %v3955_v5 = vld [vmem:[%s5356_s1 + $0x5ec] ss:$12 sps:$4 sm:$0xff]   ;;  %v3950_v6 = vld [vmem:[%s5356_s1 + $0x2e8] ss:$12 sps:$4 sm:$0xff]  }
  0x48   : > { %2651 = vmatpush1.bf16.msra.mxu0 %v3863_v7  ;;  %2566 = vmatprep.subr.bf16.mxu1 %v3868_v8  ;;  %v3953_v7 = vld [vmem:[%s5356_s1 + $0x5e8] ss:$12 sps:$4 sm:$0xff]   ;;  %v3964_v8 = vld [vmem:[%s5356_s1 + $0x604] ss:$12 sps:$4 sm:$0xff]  }
  0x49   : > { %2652 = vmatprep.subr.bf16.mxu0 %v3871_v9  ;;  %2596 = vmatprep.mubr.bf16.mxu1 %v4570_v34  ;;  %v4680_v9 = vld [vmem:[%s4410_s13 + $0x8] ss:$56 sps:$4 sm:$0xff]  }
  0x4a   : > { %2682 = vmatprep.mubr.bf16.mxu0 %v3961_v35  ;;  %v3994_v35 = vld [vmem:[%s5356_s1 + $0x694] ss:$12 sps:$4 sm:$0xff]  }
  0x4b   : > { %2567 = vmatpush1.bf16.msra.mxu1 %v3866_v10  ;;  %v3965_v10 = vld [vmem:[%s5356_s1 + $0xc8] ss:$12 sps:$4 sm:$0xff]  }
  0x4c   : > { %2653 = vmatpush1.bf16.msra.mxu0 %v3869_v11  ;;  %2568 = vmatprep.subr.bf16.mxu1 %v3874_v12  ;;  %v3959_v11 = vld [vmem:[%s4410_s13 + $0x18] ss:$56 sps:$4 sm:$0xff]   ;;  %v3962_v12 = vld [vmem:[%s5356_s1 + $0x600] ss:$12 sps:$4 sm:$0xff]  }
  0x4d   : > { %2654 = vmatprep.subr.bf16.mxu0 %v3877_v13  ;;  %v3966_v13 = vld [vmem:[%s5356_s1 + $0x8] ss:$12 sps:$4 sm:$0xff]  }
  0x4f   : > { %2569 = vmatpush1.bf16.msra.mxu1 %v3872_v14  ;;  %v3969_v14 = vld [vmem:[%s5356_s1 + $0x61c] ss:$12 sps:$4 sm:$0xff]  }
  0x50   : > { %2655 = vmatpush1.bf16.msra.mxu0 %v3875_v15  ;;  %2570 = vmatprep.subr.bf16.mxu1 %v3880_v16  ;;  %v3970_v15 = vld [vmem:[%s5356_s1 + $0xe0] ss:$12 sps:$4 sm:$0xff]   ;;  %v3967_v16 = vld [vmem:[%s5356_s1 + $0x618] ss:$12 sps:$4 sm:$0xff]  }
  0x51   : > { %2656 = vmatprep.subr.bf16.mxu0 %v3883_v17  ;;  %v3971_v17 = vld [vmem:[%s5356_s1 + $0x20] ss:$12 sps:$4 sm:$0xff]  }
  0x53   : > { %2571 = vmatpush1.bf16.msra.mxu1 %v3878_v18  ;;  %v3974_v18 = vld [vmem:[%s5356_s1 + $0x634] ss:$12 sps:$4 sm:$0xff]  }
  0x54   : > { %2657 = vmatpush1.bf16.msra.mxu0 %v3881_v19  ;;  %2572 = vmatprep.subr.bf16.mxu1 %v3886_v20  ;;  %v3975_v19 = vld [vmem:[%s5356_s1 + $0xf8] ss:$12 sps:$4 sm:$0xff]   ;;  %v3972_v20 = vld [vmem:[%s5356_s1 + $0x630] ss:$12 sps:$4 sm:$0xff]  }
  0x55   : > { %2658 = vmatprep.subr.bf16.mxu0 %v3889_v21  ;;  %v3976_v21 = vld [vmem:[%s5356_s1 + $0x38] ss:$12 sps:$4 sm:$0xff]  }
  0x57   : > { %2573 = vmatpush1.bf16.msra.mxu1 %v3884_v22  ;;  %v3979_v22 = vld [vmem:[%s5356_s1 + $0x64c] ss:$12 sps:$4 sm:$0xff]  }
  0x58   : > { %2659 = vmatpush1.bf16.msra.mxu0 %v3887_v23  ;;  %2574 = vmatprep.subr.bf16.mxu1 %v3892_v24  ;;  %v3980_v23 = vld [vmem:[%s5356_s1 + $0x110] ss:$12 sps:$4 sm:$0xff]  }
  0x59   : > { %2660 = vmatprep.subr.bf16.mxu0 %v3895_v25  ;;  %v3981_v24 = vld [vmem:[%s5356_s1 + $0x50] ss:$12 sps:$4 sm:$0xff]  }
  0x5a   : > { %v3984_v25 = vld [vmem:[%s5356_s1 + $0x664] ss:$12 sps:$4 sm:$0xff]  }
  0x5b   : > { %2575 = vmatpush1.bf16.msra.mxu1 %v3890_v26  ;;  %v3985_v26 = vld [vmem:[%s5356_s1 + $0x128] ss:$12 sps:$4 sm:$0xff]  }
  0x5c   : > { %2661 = vmatpush1.bf16.msra.mxu0 %v3893_v27  ;;  %2576 = vmatprep.subr.bf16.mxu1 %v3898_v28  ;;  %v3982_v27 = vld [vmem:[%s5356_s1 + $0x660] ss:$12 sps:$4 sm:$0xff]   ;;  %v3986_v28 = vld [vmem:[%s5356_s1 + $0x68] ss:$12 sps:$4 sm:$0xff]  }
  0x5d   : > { %2662 = vmatprep.subr.bf16.mxu0 %v3901_v29  ;;  %v3989_v29 = vld [vmem:[%s5356_s1 + $0x67c] ss:$12 sps:$4 sm:$0xff]  }
  0x5f   : > { %2577 = vmatpush1.bf16.msra.mxu1 %v3896_v30  ;;  %v3990_v30 = vld [vmem:[%s5356_s1 + $0x140] ss:$12 sps:$4 sm:$0xff]  }
  0x60   : > { %2663 = vmatpush1.bf16.msra.mxu0 %v3899_v31  ;;  %2578 = vmatprep.subr.bf16.mxu1 %v3904_v32  ;;  %v4749_v31 = vld [vmem:[%s4410_s13 + $0x24] ss:$56 sps:$4 sm:$0xff]  }
  0x61   : > { %2664 = vmatprep.subr.bf16.mxu0 %v3907_v33  ;;  %v3987_v32 = vld [vmem:[%s5356_s1 + $0x678] ss:$12 sps:$4 sm:$0xff]   ;;  %v3991_v33 = vld [vmem:[%s5356_s1 + $0x80] ss:$12 sps:$4 sm:$0xff]  }
  0x63   : > { %2579 = vmatpush1.bf16.msra.mxu1 %v3902_v36  ;;  %v3995_v36 = vld [vmem:[%s5356_s1 + $0x158] ss:$12 sps:$4 sm:$0xff]  }
  0x64   : > { %2665 = vmatpush1.bf16.msra.mxu0 %v3905_v37  ;;  %2580 = vmatprep.subr.bf16.mxu1 %v3910_v38  ;;  %v3992_v37 = vld [vmem:[%s5356_s1 + $0x690] ss:$12 sps:$4 sm:$0xff]   ;;  %v3996_v38 = vld [vmem:[%s5356_s1 + $0x98] ss:$12 sps:$4 sm:$0xff]  }
  0x65   : > { %2666 = vmatprep.subr.bf16.mxu0 %v3913_v39  ;;  %v3999_v39 = vld [vmem:[%s5356_s1 + $0x6ac] ss:$12 sps:$4 sm:$0xff]  }
  0x67   : > { %2581 = vmatpush1.bf16.msra.mxu1 %v3908_v40  ;;  %v4000_v40 = vld [vmem:[%s5356_s1 + $0x170] ss:$12 sps:$4 sm:$0xff]  }
  0x68   : > { %2667 = vmatpush1.bf16.msra.mxu0 %v3911_v41  ;;  %2582 = vmatprep.subr.bf16.mxu1 %v3916_v42  ;;  %v3997_v41 = vld [vmem:[%s5356_s1 + $0x6a8] ss:$12 sps:$4 sm:$0xff]   ;;  %v4001_v42 = vld [vmem:[%s5356_s1 + $0xb0] ss:$12 sps:$4 sm:$0xff]  }
  0x69   : > { %2668 = vmatprep.subr.bf16.mxu0 %v3919_v43  ;;  %v4004_v43 = vld [vmem:[%s5356_s1 + $0x6c4] ss:$12 sps:$4 sm:$0xff]  }
  0x6b   : > { %2583 = vmatpush1.bf16.msra.mxu1 %v3914_v44  ;;  %v4005_v44 = vld [vmem:[%s5356_s1 + $0x248] ss:$12 sps:$4 sm:$0xff]  }
  0x6c   : > { %2669 = vmatpush1.bf16.msra.mxu0 %v3917_v45  ;;  %2584 = vmatprep.subr.bf16.mxu1 %v3922_v46  ;;  %v4002_v45 = vld [vmem:[%s5356_s1 + $0x6c0] ss:$12 sps:$4 sm:$0xff]   ;;  %v4006_v46 = vld [vmem:[%s5356_s1 + $0x188] ss:$12 sps:$4 sm:$0xff]  }
  0x6d   : > { %2670 = vmatprep.subr.bf16.mxu0 %v3925_v47  ;;  %v4009_v47 = vld [vmem:[%s5356_s1 + $0x6dc] ss:$12 sps:$4 sm:$0xff]  }
  0x6f   : > { %2585 = vmatpush1.bf16.msra.mxu1 %v3920_v49  ;;  %v4010_v49 = vld [vmem:[%s5356_s1 + $0x260] ss:$12 sps:$4 sm:$0xff]  }
  0x70   : > { %2671 = vmatpush1.bf16.msra.mxu0 %v3923_v50  ;;  %2586 = vmatprep.subr.bf16.mxu1 %v3928_v51  ;;  %v4007_v50 = vld [vmem:[%s5356_s1 + $0x6d8] ss:$12 sps:$4 sm:$0xff]   ;;  %v4011_v51 = vld [vmem:[%s5356_s1 + $0x1a0] ss:$12 sps:$4 sm:$0xff]  }
  0x71   : > { %2672 = vmatprep.subr.bf16.mxu0 %v3931_v52  ;;  %v4014_v52 = vld [vmem:[%s5356_s1 + $0x6f4] ss:$12 sps:$4 sm:$0xff]  }
  0x73   : > { %2587 = vmatpush1.bf16.msra.mxu1 %v3926_v53  ;;  %v4015_v53 = vld [vmem:[%s5356_s1 + $0x278] ss:$12 sps:$4 sm:$0xff]  }
  0x74   : > { %2673 = vmatpush1.bf16.msra.mxu0 %v3929_v54  ;;  %2588 = vmatprep.subr.bf16.mxu1 %v3934_v55  ;;  %v4016_v54 = vld [vmem:[%s5356_s1 + $0x1b8] ss:$12 sps:$4 sm:$0xff]  }
  0x75   : > { %2674 = vmatprep.subr.bf16.mxu0 %v3937_v56  ;;  %v4019_v55 = vld [vmem:[%s5356_s1 + $0x70c] ss:$12 sps:$4 sm:$0xff]   ;;  %v4017_v56 = vld [vmem:[%s5356_s1 + $0x708] ss:$12 sps:$4 sm:$0xff]  }
  0x77   : > { %2589 = vmatpush1.bf16.msra.mxu1 %v3932_v57  ;;  %v4021_v57 = vld [vmem:[%s5356_s1 + $0x1d0] ss:$12 sps:$4 sm:$0xff]  }
  0x78   : > { %2675 = vmatpush1.bf16.msra.mxu0 %v3935_v58  ;;  %2590 = vmatprep.subr.bf16.mxu1 %v3940_v59  ;;  %v4024_v58 = vld [vmem:[%s5356_s1 + $0x724] ss:$12 sps:$4 sm:$0xff]   ;;  %v4025_v59 = vld [vmem:[%s5356_s1 + $0x2a8] ss:$12 sps:$4 sm:$0xff]  }
  0x79   : > { %2676 = vmatprep.subr.bf16.mxu0 %v3943_v60  ;;  %v4022_v60 = vld [vmem:[%s5356_s1 + $0x720] ss:$12 sps:$4 sm:$0xff]  }
  0x7b   : > { %2591 = vmatpush1.bf16.msra.mxu1 %v3938_v61  ;;  %v4026_v61 = vld [vmem:[%s5356_s1 + $0x1e8] ss:$12 sps:$4 sm:$0xff]  }
  0x7c   : > { %2677 = vmatpush1.bf16.msra.mxu0 %v3941_v62  ;;  %2592 = vmatprep.subr.bf16.mxu1 %v3946_v63  ;;  %v4029_v62 = vld [vmem:[%s5356_s1 + $0x73c] ss:$12 sps:$4 sm:$0xff]   ;;  %v4030_v63 = vld [vmem:[%s5356_s1 + $0x2c0] ss:$12 sps:$4 sm:$0xff]  }
  0x7d   : > { %2678 = vmatprep.subr.bf16.mxu0 %v3949_v0  ;;  %v4027_v0 = vld [vmem:[%s5356_s1 + $0x738] ss:$12 sps:$4 sm:$0xff]  }
  0x7f   : > { %2593 = vmatpush1.bf16.msra.mxu1 %v3944_v1  ;;  %v4031_v1 = vld [vmem:[%s5356_s1 + $0x200] ss:$12 sps:$4 sm:$0xff]  }
  0x80   : > { %2679 = vmatpush1.bf16.msra.mxu0 %v3947_v2  ;;  %2594 = vmatprep.subr.bf16.mxu1 %v3952_v3  ;;  %v4034_v2 = vld [vmem:[%s5356_s1 + $0x754] ss:$12 sps:$4 sm:$0xff]   ;;  %v4035_v3 = vld [vmem:[%s5356_s1 + $0x2d8] ss:$12 sps:$4 sm:$0xff]  }
  0x81   : > { %2680 = vmatprep.subr.bf16.mxu0 %v3955_v5  ;;  %v4032_v5 = vld [vmem:[%s5356_s1 + $0x750] ss:$12 sps:$4 sm:$0xff]  }
  0x83   : > { %2595 = vmatpush1.bf16.msra.mxu1 %v3950_v6  ;;  %v4036_v6 = vld [vmem:[%s5356_s1 + $0x218] ss:$12 sps:$4 sm:$0xff]  }
  0x84   : > { %2681 = vmatpush1.bf16.msra.mxu0 %v3953_v7  ;;  %3566 = vmatprep.subr.bf16.mxu1 %v3965_v10  ;;  %v4039_v7 = vld [vmem:[%s5356_s1 + $0x76c] ss:$12 sps:$4 sm:$0xff]   ;;  %v4037_v10 = vld [vmem:[%s5356_s1 + $0x768] ss:$12 sps:$4 sm:$0xff]  }
  0x85   : > { %2693 = vmatprep.subr.bf16.mxu0 %v3964_v8  ;;  %v4040_v8 = vld [vmem:[%s5356_s1 + $0x2f0] ss:$12 sps:$4 sm:$0xff]  }
  0x86   : > { %2597 = vmatmul.mubr.bf16.vlgmr.msra.gmra.mrb[0].mxu1 %v4680_v9 }
  0x87   : > { %2683 = vmatmul.mubr.bf16.vlgmr.msra.gmra.mrb[0].mxu0 %v3959_v11  ;;  %3567 = vmatpush3.bf16.msra.mxu1 %v3966_v13  ;;  %v4041_v11 = vld [vmem:[%s5356_s1 + $0x230] ss:$12 sps:$4 sm:$0xff]  }
  0x88   : > { %2694 = vmatpush1.bf16.msra.mxu0 %v3962_v12  ;;  %3568 = vmatprep.subr.bf16.mxu1 %v3970_v15  ;;  %v4881_v12 = vld [vmem:[%s4410_s13 + $0x20] ss:$56 sps:$4 sm:$0xff]   ;;  %v4047_v13 = vld [vmem:[%s5356_s1 + $0x784] ss:$12 sps:$4 sm:$0xff]  }
  0x89   : > { %2695 = vmatprep.subr.bf16.mxu0 %v3969_v14  ;;  %2854 = vmatprep.mubr.bf16.mxu1 %v4422_v48  ;;  %v3977_v48 = vld [vmem:[%s5356_s1 + $0x648] ss:$12 sps:$4 sm:$0xff]   ;;  %v4045_v15 = vld [vmem:[%s5356_s1 + $0x780] ss:$12 sps:$4 sm:$0xff]  }
  0x8a   : > { %2725 = vmatprep.mubr.bf16.mxu0 %v4749_v31  ;;  %v4048_v14 = vld [vmem:[%s5356_s1 + $0x3c8] ss:$12 sps:$4 sm:$0xff]  }
  0x8b   : > { %3569 = vmatpush3.bf16.msra.mxu1 %v3971_v17  ;;  %v4052_v17 = vld [vmem:[%s5356_s1 + $0x79c] ss:$12 sps:$4 sm:$0xff]  }
  0x8c   : > { %2696 = vmatpush1.bf16.msra.mxu0 %v3967_v16  ;;  %3570 = vmatprep.subr.bf16.mxu1 %v3975_v19  ;;  %v4049_v16 = vld [vmem:[%s5356_s1 + $0x308] ss:$12 sps:$4 sm:$0xff]   ;;  %v4050_v19 = vld [vmem:[%s5356_s1 + $0x798] ss:$12 sps:$4 sm:$0xff]  }
  0x8d   : > { %2697 = vmatprep.subr.bf16.mxu0 %v3974_v18  ;;  %v4053_v18 = vld [vmem:[%s5356_s1 + $0x3e0] ss:$12 sps:$4 sm:$0xff]  }
  0x8f   : > { %3571 = vmatpush3.bf16.msra.mxu1 %v3976_v21  ;;  %v4057_v21 = vld [vmem:[%s5356_s1 + $0x7b4] ss:$12 sps:$4 sm:$0xff]  }
  0x90   : > { %2698 = vmatpush1.bf16.msra.mxu0 %v3972_v20  ;;  %3572 = vmatprep.subr.bf16.mxu1 %v3980_v23  ;;  %v4054_v20 = vld [vmem:[%s5356_s1 + $0x320] ss:$12 sps:$4 sm:$0xff]  }
  0x91   : > { %2699 = vmatprep.subr.bf16.mxu0 %v3979_v22  ;;  %v4055_v22 = vld [vmem:[%s5356_s1 + $0x7b0] ss:$12 sps:$4 sm:$0xff]   ;;  %v4227_v23 = vld [vmem:[%s4410_s13 + $0x14] ss:$56 sps:$4 sm:$0xff]  }
  0x93   : > { %3573 = vmatpush3.bf16.msra.mxu1 %v3981_v24  ;;  %v4923_v24 = vld [vmem:[%s4410_s13 + $0x2c] ss:$56 sps:$4 sm:$0xff]  }
  0x94   : > { %2700 = vmatpush1.bf16.msra.mxu0 %v3977_v48  ;;  %3574 = vmatprep.subr.bf16.mxu1 %v3985_v26  ;;  %v4059_v48 = vld [vmem:[%s5356_s1 + $0x338] ss:$12 sps:$4 sm:$0xff]   ;;  %v4063_v26 = vld [vmem:[%s5356_s1 + $0x410] ss:$12 sps:$4 sm:$0xff]  }
  0x95   : > { %2701 = vmatprep.subr.bf16.mxu0 %v3984_v25  ;;  %v4062_v25 = vld [vmem:[%s5356_s1 + $0x7cc] ss:$12 sps:$4 sm:$0xff]  }
  0x97   : > { %3575 = vmatpush3.bf16.msra.mxu1 %v3986_v28  ;;  %v4064_v28 = vld [vmem:[%s5356_s1 + $0x350] ss:$12 sps:$4 sm:$0xff]  }
  0x98   : > { %2702 = vmatpush1.bf16.msra.mxu0 %v3982_v27  ;;  %3576 = vmatprep.subr.bf16.mxu1 %v3990_v30  ;;  %v4060_v27 = vld [vmem:[%s5356_s1 + $0x7c8] ss:$12 sps:$4 sm:$0xff]  }
  0x99   : > { %2703 = vmatprep.subr.bf16.mxu0 %v3989_v29  ;;  %v4067_v29 = vld [vmem:[%s5356_s1 + $0x7e4] ss:$12 sps:$4 sm:$0xff]   ;;  %v4068_v30 = vld [vmem:[%s5356_s1 + $0x428] ss:$12 sps:$4 sm:$0xff]  }
  0x9b   : > { %3577 = vmatpush3.bf16.msra.mxu1 %v3991_v33  ;;  %v4069_v33 = vld [vmem:[%s5356_s1 + $0x368] ss:$12 sps:$4 sm:$0xff]  }
  0x9c   : > { %2704 = vmatpush1.bf16.msra.mxu0 %v3987_v32  ;;  %3578 = vmatprep.subr.bf16.mxu1 %v3995_v36  ;;  %v4065_v32 = vld [vmem:[%s5356_s1 + $0x7e0] ss:$12 sps:$4 sm:$0xff]  }
  0x9d   : > { %2705 = vmatprep.subr.bf16.mxu0 %v3994_v35  ;;  %v4072_v35 = vld [vmem:[%s5356_s1 + $0x7fc] ss:$12 sps:$4 sm:$0xff]   ;;  %v4073_v36 = vld [vmem:[%s5356_s1 + $0x440] ss:$12 sps:$4 sm:$0xff]  }
  0x9f   : > { %3579 = vmatpush3.bf16.msra.mxu1 %v3996_v38  ;;  %v4074_v38 = vld [vmem:[%s5356_s1 + $0x380] ss:$12 sps:$4 sm:$0xff]  }
  0xa0   : > { %2706 = vmatpush1.bf16.msra.mxu0 %v3992_v37  ;;  %3580 = vmatprep.subr.bf16.mxu1 %v4000_v40  ;;  %v4070_v37 = vld [vmem:[%s5356_s1 + $0x7f8] ss:$12 sps:$4 sm:$0xff]  }
  0xa1   : > { %2707 = vmatprep.subr.bf16.mxu0 %v3999_v39  ;;  %v4077_v39 = vld [vmem:[%s5356_s1 + $0x814] ss:$12 sps:$4 sm:$0xff]   ;;  %v4078_v40 = vld [vmem:[%s5356_s1 + $0x458] ss:$12 sps:$4 sm:$0xff]  }
  0xa3   : > { %3581 = vmatpush3.bf16.msra.mxu1 %v4001_v42  ;;  %v4079_v42 = vld [vmem:[%s5356_s1 + $0x398] ss:$12 sps:$4 sm:$0xff]  }
  0xa4   : > { %2708 = vmatpush1.bf16.msra.mxu0 %v3997_v41  ;;  %3588 = vmatprep.subr.bf16.mxu1 %v4005_v44  ;;  %v4075_v41 = vld [vmem:[%s5356_s1 + $0x810] ss:$12 sps:$4 sm:$0xff]  }
  0xa5   : > { %2709 = vmatprep.subr.bf16.mxu0 %v4004_v43  ;;  %v4082_v43 = vld [vmem:[%s5356_s1 + $0x82c] ss:$12 sps:$4 sm:$0xff]   ;;  %v4083_v44 = vld [vmem:[%s5356_s1 + $0x470] ss:$12 sps:$4 sm:$0xff]  }
  0xa6   : > { %2855 = vmatmul.mubr.bf16.vlgmr.msra.gmra.mrb[4].mxu1 %v4481_v4  ;;  %v4012_v4 = vld [vmem:[%s5356_s1 + $0x6f0] ss:$12 sps:$4 sm:$0xff]  }
  0xa7   : > { %3589 = vmatpush3.bf16.msra.mxu1 %v4006_v46  ;;  %2895 = vmatprep.mubr.bf16.mxu1 %v4570_v34  ;;  %v4020_v34 = vld [vmem:[%s5356_s1 + $0x290] ss:$12 sps:$4 sm:$0xff]  }
  0xa8   : > { %2710 = vmatpush1.bf16.msra.mxu0 %v4002_v45  ;;  %3590 = vmatprep.subr.bf16.mxu1 %v4010_v49  ;;  %v4080_v45 = vld [vmem:[%s5356_s1 + $0x828] ss:$12 sps:$4 sm:$0xff]   ;;  %v4084_v46 = vld [vmem:[%s5356_s1 + $0x3b0] ss:$12 sps:$4 sm:$0xff]  }
  0xa9   : > { %2711 = vmatprep.subr.bf16.mxu0 %v4009_v47  ;;  %v4087_v47 = vld [vmem:[%s5356_s1 + $0x844] ss:$12 sps:$4 sm:$0xff]   ;;  %v4088_v49 = vld [vmem:[%s5356_s1 + $0x548] ss:$12 sps:$4 sm:$0xff]  }
  0xab   : > { %3591 = vmatpush3.bf16.msra.mxu1 %v4011_v51  ;;  %v4089_v51 = vld [vmem:[%s5356_s1 + $0x488] ss:$12 sps:$4 sm:$0xff]  }
  0xac   : > { %2712 = vmatpush1.bf16.msra.mxu0 %v4007_v50  ;;  %3592 = vmatprep.subr.bf16.mxu1 %v4015_v53  ;;  %v4085_v50 = vld [vmem:[%s5356_s1 + $0x840] ss:$12 sps:$4 sm:$0xff]  }
  0xad   : > { %2713 = vmatprep.subr.bf16.mxu0 %v4014_v52  ;;  %v4092_v52 = vld [vmem:[%s5356_s1 + $0x85c] ss:$12 sps:$4 sm:$0xff]   ;;  %v4093_v53 = vld [vmem:[%s5356_s1 + $0x560] ss:$12 sps:$4 sm:$0xff]  }
  0xaf   : > { %3593 = vmatpush3.bf16.msra.mxu1 %v4016_v54  ;;  %v4090_v54 = vld [vmem:[%s5356_s1 + $0x858] ss:$12 sps:$4 sm:$0xff]  }
  0xb0   : > { %2714 = vmatpush1.bf16.msra.mxu0 %v4012_v4  ;;  %3594 = vmatprep.subr.bf16.mxu1 %v4020_v34  ;;  %v4228_v4 = vld [vmem:[%s4410_s13 + $0x10] ss:$56 sps:$4 sm:$0xff]   ;;  %v4097_v34 = vld [vmem:[%s5356_s1 + $0x874] ss:$12 sps:$4 sm:$0xff]  }
  0xb1   : > { %2715 = vmatprep.subr.bf16.mxu0 %v4019_v55  ;;  %v4094_v55 = vld [vmem:[%s5356_s1 + $0x4a0] ss:$12 sps:$4 sm:$0xff]  }
  0xb3   : > { %3595 = vmatpush3.bf16.msra.mxu1 %v4021_v57  ;;  %v4095_v57 = vld [vmem:[%s5356_s1 + $0x870] ss:$12 sps:$4 sm:$0xff]  }
  0xb4   : > { %2716 = vmatpush1.bf16.msra.mxu0 %v4017_v56  ;;  %3596 = vmatprep.subr.bf16.mxu1 %v4025_v59  ;;  %v4098_v56 = vld [vmem:[%s5356_s1 + $0x578] ss:$12 sps:$4 sm:$0xff]  }
  0xb5   : > { %2717 = vmatprep.subr.bf16.mxu0 %v4024_v58  ;;  %v4229_v58 = vld [vmem:[%s4410_s13 + $0x1c] ss:$56 sps:$4 sm:$0xff]   ;;  %v4099_v59 = vld [vmem:[%s5356_s1 + $0x4b8] ss:$12 sps:$4 sm:$0xff]  }
  0xb7   : > { %3597 = vmatpush3.bf16.msra.mxu1 %v4026_v61  ;;  %v4103_v61 = vld [vmem:[%s5356_s1 + $0x590] ss:$12 sps:$4 sm:$0xff]  }
  0xb8   : > { %2718 = vmatpush1.bf16.msra.mxu0 %v4022_v60  ;;  %3598 = vmatprep.subr.bf16.mxu1 %v4030_v63  ;;  %v4102_v60 = vld [vmem:[%s5356_s1 + $0x88c] ss:$12 sps:$4 sm:$0xff]   ;;  %v4104_v63 = vld [vmem:[%s5356_s1 + $0x4d0] ss:$12 sps:$4 sm:$0xff]  }
  0xb9   : > { %2719 = vmatprep.subr.bf16.mxu0 %v4029_v62  ;;  %v4100_v62 = vld [vmem:[%s5356_s1 + $0x888] ss:$12 sps:$4 sm:$0xff]  }
  0xbb   : > { %3599 = vmatpush3.bf16.msra.mxu1 %v4031_v1  ;;  %v4108_v1 = vld [vmem:[%s5356_s1 + $0x5a8] ss:$12 sps:$4 sm:$0xff]  }
  0xbc   : > { %2720 = vmatpush1.bf16.msra.mxu0 %v4027_v0  ;;  %3600 = vmatprep.subr.bf16.mxu1 %v4035_v3  ;;  %v4107_v0 = vld [vmem:[%s5356_s1 + $0x8a4] ss:$12 sps:$4 sm:$0xff]   ;;  %v4109_v3 = vld [vmem:[%s5356_s1 + $0x4e8] ss:$12 sps:$4 sm:$0xff]  }
  0xbd   : > { %2721 = vmatprep.subr.bf16.mxu0 %v4034_v2  ;;  %v4105_v2 = vld [vmem:[%s5356_s1 + $0x8a0] ss:$12 sps:$4 sm:$0xff]  }
  0xbf   : > { %3601 = vmatpush3.bf16.msra.mxu1 %v4036_v6  ;;  %v4113_v6 = vld [vmem:[%s5356_s1 + $0x5c0] ss:$12 sps:$4 sm:$0xff]  }
  0xc0   : > { %2722 = vmatpush1.bf16.msra.mxu0 %v4032_v5  ;;  %3602 = vmatprep.subr.bf16.mxu1 %v4040_v8  ;;  %v4112_v5 = vld [vmem:[%s5356_s1 + $0x8bc] ss:$12 sps:$4 sm:$0xff]   ;;  %v4114_v8 = vld [vmem:[%s5356_s1 + $0x500] ss:$12 sps:$4 sm:$0xff]  }
  0xc1   : > { %2723 = vmatprep.subr.bf16.mxu0 %v4039_v7  ;;  %v4110_v7 = vld [vmem:[%s5356_s1 + $0x8b8] ss:$12 sps:$4 sm:$0xff]  }
  0xc3   : > { %3603 = vmatpush3.bf16.msra.mxu1 %v4041_v11  ;;  %v4118_v11 = vld [vmem:[%s5356_s1 + $0x5d8] ss:$12 sps:$4 sm:$0xff]  }
  0xc4   : > { %2724 = vmatpush1.bf16.msra.mxu0 %v4037_v10  ;;  %3610 = vmatprep.subr.bf16.mxu1 %v4048_v14  ;;  %v4117_v10 = vld [vmem:[%s5356_s1 + $0x8d4] ss:$12 sps:$4 sm:$0xff]   ;;  %v4119_v14 = vld [vmem:[%s5356_s1 + $0x518] ss:$12 sps:$4 sm:$0xff]  }
  0xc5   : > { %2736 = vmatprep.subr.bf16.mxu0 %v4047_v13  ;;  %v4115_v13 = vld [vmem:[%s5356_s1 + $0x8d0] ss:$12 sps:$4 sm:$0xff]  }
  0xc6   : > { %2896 = vmatmul.mubr.bf16.vlgmr.msra.gmra.mrb[8].mxu1 %v4680_v9  ;;  %v4058_v9 = vld [vmem:[%s5356_s1 + $0x3f8] ss:$12 sps:$4 sm:$0xff]  }
  0xc7   : > { %2726 = vmatmul.mubr.bf16.vlgmr.msra.gmra.mrb[0].mxu0 %v4881_v12  ;;  %3611 = vmatpush3.bf16.msra.mxu1 %v4049_v16  ;;  %v4123_v16 = vld [vmem:[%s5356_s1 + $0x5f0] ss:$12 sps:$4 sm:$0xff]  }
  0xc8   : > { %2737 = vmatpush1.bf16.msra.mxu0 %v4045_v15  ;;  %3612 = vmatprep.subr.bf16.mxu1 %v4053_v18  ;;  %v4122_v15 = vld [vmem:[%s5356_s1 + $0x8ec] ss:$12 sps:$4 sm:$0xff]   ;;  %v4124_v18 = vld [vmem:[%s5356_s1 + $0x530] ss:$12 sps:$4 sm:$0xff]  }
  0xc9   : > { %2738 = vmatprep.subr.bf16.mxu0 %v4052_v17  ;;  %2936 = vmatprep.mubr.bf16.mxu1 %v4227_v23  ;;  %v4120_v17 = vld [vmem:[%s5356_s1 + $0x8e8] ss:$12 sps:$4 sm:$0xff]  }
  0xca   : > { %2768 = vmatprep.mubr.bf16.mxu0 %v4923_v24  ;;  %v4135_v23 = vld [vmem:[%s5356_s1 + $0x91c] ss:$12 sps:$4 sm:$0xff]  }
  0xcb   : > { %3613 = vmatpush3.bf16.msra.mxu1 %v4054_v20  ;;  %v4131_v20 = vld [vmem:[%s5356_s1 + $0x6c8] ss:$12 sps:$4 sm:$0xff]  }
  0xcc   : > { %2739 = vmatpush1.bf16.msra.mxu0 %v4050_v19  ;;  %3614 = vmatprep.subr.bf16.mxu1 %v4058_v9  ;;  %v4130_v19 = vld [vmem:[%s5356_s1 + $0x904] ss:$12 sps:$4 sm:$0xff]   ;;  %v4128_v9 = vld [vmem:[%s5356_s1 + $0x900] ss:$12 sps:$4 sm:$0xff]  }
  0xcd   : > { %2740 = vmatprep.subr.bf16.mxu0 %v4057_v21  ;;  %v5091_v21 = vld [vmem:[%s4410_s13 + $0x28] ss:$56 sps:$4 sm:$0xff]  }
  0xcf   : > { %3615 = vmatpush3.bf16.msra.mxu1 %v4059_v48  ;;  %v4136_v48 = vld [vmem:[%s5356_s1 + $0x6e0] ss:$12 sps:$4 sm:$0xff]  }
  0xd0   : > { %2741 = vmatpush1.bf16.msra.mxu0 %v4055_v22  ;;  %3616 = vmatprep.subr.bf16.mxu1 %v4063_v26  ;;  %v4132_v22 = vld [vmem:[%s5356_s1 + $0x608] ss:$12 sps:$4 sm:$0xff]  }
  0xd1   : > { %2742 = vmatprep.subr.bf16.mxu0 %v4062_v25  ;;  %v4133_v25 = vld [vmem:[%s5356_s1 + $0x918] ss:$12 sps:$4 sm:$0xff]   ;;  %v5109_v26 = vld [vmem:[%s4410_s13 + $0x34] ss:$56 sps:$4 sm:$0xff]  }
  0xd3   : > { %3617 = vmatpush3.bf16.msra.mxu1 %v4064_v28  ;;  %v4137_v28 = vld [vmem:[%s5356_s1 + $0x620] ss:$12 sps:$4 sm:$0xff]  }
  0xd4   : > { %2743 = vmatpush1.bf16.msra.mxu0 %v4060_v27  ;;  %3618 = vmatprep.subr.bf16.mxu1 %v4068_v30  ;;  %v4230_v27 = vld [vmem:[%s4410_s13 + $0x18] ss:$56 sps:$4 sm:$0xff]  }
  0xd5   : > { %2744 = vmatprep.subr.bf16.mxu0 %v4067_v29  ;;  %v4140_v29 = vld [vmem:[%s5356_s1 + $0x934] ss:$12 sps:$4 sm:$0xff]   ;;  %v4141_v30 = vld [vmem:[%s5356_s1 + $0x6f8] ss:$12 sps:$4 sm:$0xff]  }
  0xd7   : > { %3619 = vmatpush3.bf16.msra.mxu1 %v4069_v33  ;;  %v4142_v33 = vld [vmem:[%s5356_s1 + $0x638] ss:$12 sps:$4 sm:$0xff]  }
  0xd8   : > { %2745 = vmatpush1.bf16.msra.mxu0 %v4065_v32  ;;  %3620 = vmatprep.subr.bf16.mxu1 %v4073_v36  ;;  %v4138_v32 = vld [vmem:[%s5356_s1 + $0x930] ss:$12 sps:$4 sm:$0xff]   ;;  %v4143_v36 = vld [vmem:[%s5356_s1 + $0x948] ss:$12 sps:$4 sm:$0xff]  }
  0xd9   : > { %2746 = vmatprep.subr.bf16.mxu0 %v4072_v35  ;;  %v4145_v35 = vld [vmem:[%s5356_s1 + $0x94c] ss:$12 sps:$4 sm:$0xff]  }
  0xdb   : > { %3621 = vmatpush3.bf16.msra.mxu1 %v4074_v38  ;;  %v4150_v38 = vld [vmem:[%s5356_s1 + $0x964] ss:$12 sps:$4 sm:$0xff]  }
  0xdc   : > { %2747 = vmatpush1.bf16.msra.mxu0 %v4070_v37  ;;  %3622 = vmatprep.subr.bf16.mxu1 %v4078_v40  ;;  %v4147_v37 = vld [vmem:[%s5356_s1 + $0x650] ss:$12 sps:$4 sm:$0xff]   ;;  %v4148_v40 = vld [vmem:[%s5356_s1 + $0x960] ss:$12 sps:$4 sm:$0xff]  }
  0xdd   : > { %2748 = vmatprep.subr.bf16.mxu0 %v4077_v39  ;;  %v4151_v39 = vld [vmem:[%s5356_s1 + $0x728] ss:$12 sps:$4 sm:$0xff]  }
  0xdf   : > { %3623 = vmatpush3.bf16.msra.mxu1 %v4079_v42  ;;  %v4155_v42 = vld [vmem:[%s5356_s1 + $0x97c] ss:$12 sps:$4 sm:$0xff]  }
  0xe0   : > { %2749 = vmatpush1.bf16.msra.mxu0 %v4075_v41  ;;  %3624 = vmatprep.subr.bf16.mxu1 %v4083_v44  ;;  %v4152_v41 = vld [vmem:[%s5356_s1 + $0x668] ss:$12 sps:$4 sm:$0xff]   ;;  %v4153_v44 = vld [vmem:[%s5356_s1 + $0x978] ss:$12 sps:$4 sm:$0xff]  }
  0xe1   : > { %2750 = vmatprep.subr.bf16.mxu0 %v4082_v43  ;;  %v4156_v43 = vld [vmem:[%s5356_s1 + $0x740] ss:$12 sps:$4 sm:$0xff]  }
  0xe3   : > { %3625 = vmatpush3.bf16.msra.mxu1 %v4084_v46  ;;  %v4160_v46 = vld [vmem:[%s5356_s1 + $0x994] ss:$12 sps:$4 sm:$0xff]  }
  0xe4   : > { %2751 = vmatpush1.bf16.msra.mxu0 %v4080_v45  ;;  %3632 = vmatprep.subr.bf16.mxu1 %v4088_v49  ;;  %v4157_v45 = vld [vmem:[%s5356_s1 + $0x680] ss:$12 sps:$4 sm:$0xff]   ;;  %v4158_v49 = vld [vmem:[%s5356_s1 + $0x990] ss:$12 sps:$4 sm:$0xff]  }
  0xe5   : > { %2752 = vmatprep.subr.bf16.mxu0 %v4087_v47  ;;  %v4161_v47 = vld [vmem:[%s5356_s1 + $0x758] ss:$12 sps:$4 sm:$0xff]  }
  0xe6   : > { %2937 = vmatmul.mubr.bf16.vlgmr.msra.gmra.mrb[12].mxu1 %v4228_v4  ;;  %v4167_v4 = vld [vmem:[%s5356_s1 + $0x6b0] ss:$12 sps:$4 sm:$0xff]  }
  0xe7   : > { %3633 = vmatpush3.bf16.msra.mxu1 %v4089_v51  ;;  %2977 = vmatprep.mubr.bf16.mxu1 %v4229_v58  ;;  %v4165_v51 = vld [vmem:[%s5356_s1 + $0x9ac] ss:$12 sps:$4 sm:$0xff]  }
  0xe8   : > { %2753 = vmatpush1.bf16.msra.mxu0 %v4085_v50  ;;  %3634 = vmatprep.subr.bf16.mxu1 %v4093_v53  ;;  %v4162_v50 = vld [vmem:[%s5356_s1 + $0x698] ss:$12 sps:$4 sm:$0xff]   ;;  %v4163_v53 = vld [vmem:[%s5356_s1 + $0x9a8] ss:$12 sps:$4 sm:$0xff]   ;;  %v4176_v58 = vld [vmem:[%s5356_s1 + $0x860] ss:$12 sps:$4 sm:$0xff]  }
  0xe9   : > { %2754 = vmatprep.subr.bf16.mxu0 %v4092_v52  ;;  %v4166_v52 = vld [vmem:[%s5356_s1 + $0x770] ss:$12 sps:$4 sm:$0xff]  }
  0xeb   : > { %3635 = vmatpush3.bf16.msra.mxu1 %v4094_v55  ;;  %v4171_v55 = vld [vmem:[%s5356_s1 + $0x848] ss:$12 sps:$4 sm:$0xff]  }
  0xec   : > { %2755 = vmatpush1.bf16.msra.mxu0 %v4090_v54  ;;  %3636 = vmatprep.subr.bf16.mxu1 %v4098_v56  ;;  %v4170_v54 = vld [vmem:[%s5356_s1 + $0x9c4] ss:$12 sps:$4 sm:$0xff]   ;;  %v4172_v56 = vld [vmem:[%s5356_s1 + $0x788] ss:$12 sps:$4 sm:$0xff]  }
  0xed   : > { %2756 = vmatprep.subr.bf16.mxu0 %v4097_v34  ;;  %v4168_v34 = vld [vmem:[%s5356_s1 + $0x9c0] ss:$12 sps:$4 sm:$0xff]  }
  0xef   : > { %3637 = vmatpush3.bf16.msra.mxu1 %v4099_v59  ;;  %v4173_v59 = vld [vmem:[%s5356_s1 + $0x9d8] ss:$12 sps:$4 sm:$0xff]  }
  0xf0   : > { %2757 = vmatpush1.bf16.msra.mxu0 %v4095_v57  ;;  %3638 = vmatprep.subr.bf16.mxu1 %v4103_v61  ;;  %v4175_v57 = vld [vmem:[%s5356_s1 + $0x9dc] ss:$12 sps:$4 sm:$0xff]   ;;  %v4180_v61 = vld [vmem:[%s5356_s1 + $0x9f4] ss:$12 sps:$4 sm:$0xff]  }
  0xf1   : > { %2758 = vmatprep.subr.bf16.mxu0 %v4102_v60  ;;  %v4177_v60 = vld [vmem:[%s5356_s1 + $0x7a0] ss:$12 sps:$4 sm:$0xff]  }
  0xf3   : > { %3639 = vmatpush3.bf16.msra.mxu1 %v4104_v63  ;;  %v4182_v63 = vld [vmem:[%s5356_s1 + $0x7b8] ss:$12 sps:$4 sm:$0xff]  }
  0xf4   : > { %2759 = vmatpush1.bf16.msra.mxu0 %v4100_v62  ;;  %3640 = vmatprep.subr.bf16.mxu1 %v4108_v1  ;;  %v4178_v62 = vld [vmem:[%s5356_s1 + $0x9f0] ss:$12 sps:$4 sm:$0xff]   ;;  %v4183_v1 = vld [vmem:[%s5356_s1 + $0xa08] ss:$12 sps:$4 sm:$0xff]  }
  0xf5   : > { %2760 = vmatprep.subr.bf16.mxu0 %v4107_v0  ;;  %v4185_v0 = vld [vmem:[%s5356_s1 + $0xa0c] ss:$12 sps:$4 sm:$0xff]  }
  0xf7   : > { %3641 = vmatpush3.bf16.msra.mxu1 %v4109_v3  ;;  %v4190_v3 = vld [vmem:[%s5356_s1 + $0xa24] ss:$12 sps:$4 sm:$0xff]  }
  0xf8   : > { %2761 = vmatpush1.bf16.msra.mxu0 %v4105_v2  ;;  %3642 = vmatprep.subr.bf16.mxu1 %v4113_v6  ;;  %v4187_v2 = vld [vmem:[%s5356_s1 + $0x7d0] ss:$12 sps:$4 sm:$0xff]   ;;  %v4188_v6 = vld [vmem:[%s5356_s1 + $0xa20] ss:$12 sps:$4 sm:$0xff]  }
  0xf9   : > { %2762 = vmatprep.subr.bf16.mxu0 %v4112_v5  ;;  %v4191_v5 = vld [vmem:[%s5356_s1 + $0x8a8] ss:$12 sps:$4 sm:$0xff]  }
  0xfb   : > { %3643 = vmatpush3.bf16.msra.mxu1 %v4114_v8  ;;  %v4195_v8 = vld [vmem:[%s5356_s1 + $0xa3c] ss:$12 sps:$4 sm:$0xff]  }
  0xfc   : > { %2763 = vmatpush1.bf16.msra.mxu0 %v4110_v7  ;;  %3644 = vmatprep.subr.bf16.mxu1 %v4118_v11  ;;  %v4192_v7 = vld [vmem:[%s5356_s1 + $0x7e8] ss:$12 sps:$4 sm:$0xff]   ;;  %v4193_v11 = vld [vmem:[%s5356_s1 + $0xa38] ss:$12 sps:$4 sm:$0xff]  }
  0xfd   : > { %2764 = vmatprep.subr.bf16.mxu0 %v4117_v10  ;;  %v4196_v10 = vld [vmem:[%s5356_s1 + $0x8c0] ss:$12 sps:$4 sm:$0xff]  }
  0xff   : > { %3645 = vmatpush3.bf16.msra.mxu1 %v4119_v14  ;;  %v4200_v14 = vld [vmem:[%s5356_s1 + $0xa54] ss:$12 sps:$4 sm:$0xff]  }
 0x100   : > { %2765 = vmatpush1.bf16.msra.mxu0 %v4115_v13  ;;  %3646 = vmatprep.subr.bf16.mxu1 %v4123_v16  ;;  %v4197_v13 = vld [vmem:[%s5356_s1 + $0x800] ss:$12 sps:$4 sm:$0xff]   ;;  %v4198_v16 = vld [vmem:[%s5356_s1 + $0xa50] ss:$12 sps:$4 sm:$0xff]  }
 0x101   : > { %2766 = vmatprep.subr.bf16.mxu0 %v4122_v15  ;;  %v4201_v15 = vld [vmem:[%s5356_s1 + $0x8d8] ss:$12 sps:$4 sm:$0xff]  }
 0x103   : > { %3647 = vmatpush3.bf16.msra.mxu1 %v4124_v18  ;;  %v4205_v18 = vld [vmem:[%s5356_s1 + $0xa6c] ss:$12 sps:$4 sm:$0xff]  }
 0x104   : > { %2767 = vmatpush1.bf16.msra.mxu0 %v4120_v17  ;;  %3654 = vmatprep.subr.bf16.mxu1 %v4131_v20  ;;  %v4202_v17 = vld [vmem:[%s5356_s1 + $0x818] ss:$12 sps:$4 sm:$0xff]   ;;  %v4203_v20 = vld [vmem:[%s5356_s1 + $0xa68] ss:$12 sps:$4 sm:$0xff]  }
 0x105   : > { %2779 = vmatprep.subr.bf16.mxu0 %v4130_v19  ;;  %v4206_v19 = vld [vmem:[%s5356_s1 + $0x8f0] ss:$12 sps:$4 sm:$0xff]  }
 0x106   : > { %2978 = vmatmul.mubr.bf16.vlgmr.msra.gmra.mrb[16].mxu1 %v4230_v27  ;;  %v4214_v27 = vld [vmem:[%s5356_s1 + $0x920] ss:$12 sps:$4 sm:$0xff]  }
 0x107   : > { %2769 = vmatmul.mubr.bf16.vlgmr.msra.gmra.mrb[0].mxu0 %v5091_v21  ;;  %3655 = vmatpush3.bf16.msra.mxu1 %v4132_v22  ;;  %v4211_v22 = vld [vmem:[%s5356_s1 + $0x9c8] ss:$12 sps:$4 sm:$0xff]  }
 0x108   : > { %2780 = vmatpush1.bf16.msra.mxu0 %v4128_v9  ;;  %3656 = vmatprep.subr.bf16.mxu1 %v4136_v48  ;;  %v4207_v9 = vld [vmem:[%s5356_s1 + $0x830] ss:$12 sps:$4 sm:$0xff]   ;;  %v4212_v48 = vld [vmem:[%s5356_s1 + $0x908] ss:$12 sps:$4 sm:$0xff]  }
 0x109   : > { %2781 = vmatprep.subr.bf16.mxu0 %v4135_v23  ;;  %3018 = vmatprep.mubr.bf16.mxu1 %v4749_v31  ;;  %v4146_v31 = vld [vmem:[%s5356_s1 + $0x710] ss:$12 sps:$4 sm:$0xff]  }
 0x10a   : > { %2811 = vmatprep.mubr.bf16.mxu0 %v5109_v26  ;;  %v4208_v23 = vld [vmem:[%s4410_s13 + $0x30] ss:$56 sps:$4 sm:$0xff]  }
 0x10b   : > { %3657 = vmatpush3.bf16.msra.mxu1 %v4137_v28  ;;  %v4215_v28 = vld [vmem:[%s5356_s1 + $0x9f8] ss:$12 sps:$4 sm:$0xff]  }
 0x10c   : > { %2782 = vmatpush1.bf16.msra.mxu0 %v4133_v25  ;;  %3658 = vmatprep.subr.bf16.mxu1 %v4141_v30  ;;  %v4213_v25 = vld [vmem:[%s5356_s1 + $0x9e0] ss:$12 sps:$4 sm:$0xff]   ;;  %v4219_v30 = vld [vmem:[%s5356_s1 + $0xa28] ss:$12 sps:$4 sm:$0xff]  }
 0x10d   : > { %2783 = vmatprep.subr.bf16.mxu0 %v4140_v29  ;;  %v4216_v29 = vld [vmem:[%s5356_s1 + $0x938] ss:$12 sps:$4 sm:$0xff]  }
 0x10f   : > { %3659 = vmatpush3.bf16.msra.mxu1 %v4142_v33  ;;  %v4221_v33 = vld [vmem:[%s5356_s1 + $0xa40] ss:$12 sps:$4 sm:$0xff]  }
 0x110   : > { %2784 = vmatpush1.bf16.msra.mxu0 %v4138_v32  ;;  %3660 = vmatprep.subr.bf16.mxu1 %v4146_v31  ;;  %v4220_v32 = vld [vmem:[%s5356_s1 + $0x968] ss:$12 sps:$4 sm:$0xff]   ;;  %v4223_v31 = vld [vmem:[%s5356_s1 + $0xa58] ss:$12 sps:$4 sm:$0xff]  }
 0x111   : > { %2785 = vmatprep.subr.bf16.mxu0 %v4145_v35  ;;  %v4222_v35 = vld [vmem:[%s5356_s1 + $0x980] ss:$12 sps:$4 sm:$0xff]  }
 0x113   : > { %3661 = vmatpush3.bf16.msra.mxu1 %v4147_v37 }
 0x114   : > { %2786 = vmatpush1.bf16.msra.mxu0 %v4143_v36  ;;  %3662 = vmatprep.subr.bf16.mxu1 %v4151_v39  ;;  %v4224_v39 = vld [vmem:[%s5356_s1 + $0x998] ss:$12 sps:$4 sm:$0xff]  }
 0x115   : > { %2787 = vmatprep.subr.bf16.mxu0 %v4150_v38 }
 0x117   : > { %3663 = vmatpush3.bf16.msra.mxu1 %v4152_v41  ;;  %v4225_v41 = vld [vmem:[%s5356_s1 + $0xa70] ss:$12 sps:$4 sm:$0xff]  }
 0x118   : > { %2788 = vmatpush1.bf16.msra.mxu0 %v4148_v40  ;;  %3664 = vmatprep.subr.bf16.mxu1 %v4156_v43 }
 0x119   : > { %2789 = vmatprep.subr.bf16.mxu0 %v4155_v42  ;;  %v4226_v42 = vld [vmem:[%s5356_s1 + $0x9b0] ss:$12 sps:$4 sm:$0xff]  }
 0x11b   : > { %3665 = vmatpush3.bf16.msra.mxu1 %v4157_v45 }
 0x11c   : > { %2790 = vmatpush1.bf16.msra.mxu0 %v4153_v44  ;;  %3666 = vmatprep.subr.bf16.mxu1 %v4161_v47 }
 0x11d   : > { %2791 = vmatprep.subr.bf16.mxu0 %v4160_v46 }
 0x11f   : > { %3667 = vmatpush3.bf16.msra.mxu1 %v4162_v50  ;;  %v644_v50 = vlaneseq }
 0x120   : > { %2792 = vmatpush1.bf16.msra.mxu0 %v4158_v49  ;;  %3668 = vmatprep.subr.bf16.mxu1 %v4166_v52 }
 0x121   : > { %2793 = vmatprep.subr.bf16.mxu0 %v4165_v51  ;;  %v645_v51 = vshrl.u32 %v644_v50, 7 }
 0x123   : > { %3669 = vmatpush3.bf16.msra.mxu1 %v4167_v4  ;;  %v654_v52 = vsub.s32 2, %v645_v51 }
 0x124   : > { %2794 = vmatpush1.bf16.msra.mxu0 %v4163_v53  ;;  %3676 = vmatprep.subr.bf16.mxu1 %v4171_v55  ;;  %v642_v53 = vld [vmem:[%s5357_s2] sm:$0x7] }
 0x125   : > { %2795 = vmatprep.subr.bf16.mxu0 %v4170_v54  ;;  %v655_v4 = vrot.slane %v642_v53, %v654_v52 }
 0x126   : > { %3019 = vmatmul.mubr.bf16.vlgmr.msra.gmra.mrb[20].mxu1 %v4881_v12  ;;  %v4181_v12 = vld [vmem:[%s5356_s1 + $0x878] ss:$12 sps:$4 sm:$0xff]  }
 0x127   : > { %3677 = vmatpush3.bf16.msra.mxu1 %v4172_v56  ;;  %3059 = vmatprep.mubr.bf16.mxu1 %v4923_v24  ;;  %v4186_v24 = vld [vmem:[%s5356_s1 + $0x890] ss:$12 sps:$4 sm:$0xff]  }
 0x128   : > { %2796 = vmatpush1.bf16.msra.mxu0 %v4168_v34  ;;  %3678 = vmatprep.subr.bf16.mxu1 %v4176_v58 }
 0x129   : > { %2797 = vmatprep.subr.bf16.mxu0 %v4175_v57 }
 0x12b   : > { %3679 = vmatpush3.bf16.msra.mxu1 %v4177_v60 }
 0x12c   : > { %2798 = vmatpush1.bf16.msra.mxu0 %v4173_v59  ;;  %3680 = vmatprep.subr.bf16.mxu1 %v4181_v12 }
 0x12d   : > { %2799 = vmatprep.subr.bf16.mxu0 %v4180_v61 }
 0x12f   : > { %3681 = vmatpush3.bf16.msra.mxu1 %v4182_v63 }
 0x130   : > { %2800 = vmatpush1.bf16.msra.mxu0 %v4178_v62  ;;  %3682 = vmatprep.subr.bf16.mxu1 %v4186_v24 }
 0x131   : > { %2801 = vmatprep.subr.bf16.mxu0 %v4185_v0 }
 0x133   : > { %3683 = vmatpush3.bf16.msra.mxu1 %v4187_v2 }
 0x134   : > { %2802 = vmatpush1.bf16.msra.mxu0 %v4183_v1  ;;  %3684 = vmatprep.subr.bf16.mxu1 %v4191_v5 }
 0x135   : > { %2803 = vmatprep.subr.bf16.mxu0 %v4190_v3 }
 0x137   : > { %3685 = vmatpush3.bf16.msra.mxu1 %v4192_v7 }
 0x138   : > { %2804 = vmatpush1.bf16.msra.mxu0 %v4188_v6  ;;  %3686 = vmatprep.subr.bf16.mxu1 %v4196_v10 }
 0x139   : > { %2805 = vmatprep.subr.bf16.mxu0 %v4195_v8 }
 0x13b   : > { %3687 = vmatpush3.bf16.msra.mxu1 %v4197_v13 }
 0x13c   : > { %2806 = vmatpush1.bf16.msra.mxu0 %v4193_v11  ;;  %3688 = vmatprep.subr.bf16.mxu1 %v4201_v15 }
 0x13d   : > { %2807 = vmatprep.subr.bf16.mxu0 %v4200_v14 }
 0x13f   : > { %3689 = vmatpush3.bf16.msra.mxu1 %v4202_v17 }
 0x140   : > { %2808 = vmatpush1.bf16.msra.mxu0 %v4198_v16  ;;  %3690 = vmatprep.subr.bf16.mxu1 %v4206_v19 }
 0x141   : > { %2809 = vmatprep.subr.bf16.mxu0 %v4205_v18 }
 0x143   : > { %3691 = vmatpush3.bf16.msra.mxu1 %v4207_v9 }
 0x144   : > { %2810 = vmatpush1.bf16.msra.mxu0 %v4203_v20  ;;  %3698 = vmatprep.subr.bf16.mxu1 %v4211_v22 }
 0x146   : > { %3060 = vmatmul.mubr.bf16.vlgmr.msra.gmra.mrb[24].mxu1 %v5091_v21  ;;  %v4217_v21 = vld [vmem:[%s5356_s1 + $0xa10] ss:$12 sps:$4 sm:$0xff]  }
 0x147   : > { %2812 = vmatmul.mubr.bf16.vlgmr.msra.gmra.mrb[0].mxu0 %v4208_v23  ;;  %3699 = vmatpush3.bf16.msra.mxu1 %v4212_v48  ;;  %v646_v48 = vsub.s32 0, %v645_v51 }
 0x148   : > { %3100 = vmatprep.mubr.bf16.mxu1 %v5109_v26  ;;  %3700 = vmatprep.subr.bf16.mxu1 %v4213_v25  ;;  %v4218_v26 = vld [vmem:[%s5356_s1 + $0x950] ss:$12 sps:$4 sm:$0xff]   ;;  %v650_v25 = vsub.s32 1, %v645_v51 }
 0x14b   : > { %3701 = vmatpush3.bf16.msra.mxu1 %v4214_v27  ;;  %v647_v27 = vrot.slane %v642_v53, %v646_v48 }
 0x14c   : > { %3702 = vmatprep.subr.bf16.mxu1 %v4215_v28  ;;  %v651_v28 = vrot.slane %v642_v53, %v650_v25 }
 0x14f   : > { %3703 = vmatpush3.bf16.msra.mxu1 %v4216_v29 }
 0x150   : > { %3704 = vmatprep.subr.bf16.mxu1 %v4217_v21 }
 0x153   : > { %3705 = vmatpush3.bf16.msra.mxu1 %v4218_v26 }
 0x154   : > { %3706 = vmatprep.subr.bf16.mxu1 %v4219_v30 }
 0x157   : > { %3707 = vmatpush3.bf16.msra.mxu1 %v4220_v32 }
 0x158   : > { %3708 = vmatprep.subr.bf16.mxu1 %v4221_v33 }
 0x159   : > { %v2598_v36 = vpop.f32.mrb[0].mxu1 }
 0x15a   : > { %v2600_v37 = vpop.f32.mrb[1].mxu1  ;;  %v3720_v29 = vadd.f32 %v2598_v36, %v647_v27 }
 0x15b   : > { %v5330_v38 = vpop.f32.mrb[2].mxu1  ;;  %3709 = vmatpush3.bf16.msra.mxu1 %v4222_v35  ;;  %v3722_v21 = vadd.f32 %v2600_v37, %v651_v28 }
 0x15c   : > { %v5335_v40 = vpop.f32.mrb[3].mxu1  ;;  %3710 = vmatprep.subr.bf16.mxu1 %v4223_v31  ;;  %v3724_v32 = vadd.f32 %v5330_v38, %v647_v27 }
 0x15f   : > { %3711 = vmatpush3.bf16.msra.mxu1 %v4224_v39  ;;  %v3726_v39 = vadd.f32 %v5335_v40, %v651_v28 }
 0x160   : > { %3712 = vmatprep.subr.bf16.mxu1 %v4225_v41 }
 0x163   : > { %3713 = vmatpush3.bf16.msra.mxu1 %v4226_v42 }
 0x166   : > { %3101 = vmatmul.mubr.bf16.vlgmr.msra.gmra.mrb[28].mxu1 %v4208_v23 }
 0x179   : > { %v3582_v43 = vpop.f32.mrb[4].mxu1 }
 0x17a   : > { %v3583_v44 = vpop.f32.mrb[5].mxu1 }
 0x17b   : > { %v3584_v45 = vadd.f32 %v3583_v44, %v3582_v43  ;;  %v3585_v46 = vpop.f32.mrb[6].mxu1 }
 0x17c   : > { %v3586_v47 = vpop.f32.mrb[7].mxu1 }
 0x17d   : > { %v3587_v49 = vadd.f32 %v3586_v47, %v3585_v46  ;;  %v2857_v34 = vadd.f32 %v3584_v45, %v655_v4 }
 0x17f   : > { %v2860_v59 = vadd.f32 %v3587_v49, %v655_v4 }
 0x199   : > { %v3604_v54 = vpop.f32.mrb[8].mxu1 }
 0x19a   : > { %v3605_v55 = vpop.f32.mrb[9].mxu1 }
 0x19b   : > { %v3606_v56 = vadd.f32 %v3605_v55, %v3604_v54  ;;  %v3607_v57 = vpop.f32.mrb[10].mxu1 }
 0x19c   : > { %v3608_v58 = vpop.f32.mrb[11].mxu1 }
 0x19d   : > { %v2898_v60 = vadd.f32 %v3606_v56, %v2857_v34  ;;  %v3609_v61 = vadd.f32 %v3608_v58, %v3607_v57 }
 0x19f   : > { %v2901_v12 = vadd.f32 %v3609_v61, %v2860_v59 }
 0x1b9   : > { %v3626_v62 = vpop.f32.mrb[12].mxu1 }
 0x1ba   : > { %v3627_v63 = vpop.f32.mrb[13].mxu1 }
 0x1bb   : > { %v3628_v0 = vadd.f32 %v3627_v63, %v3626_v62  ;;  %v3629_v24 = vpop.f32.mrb[14].mxu1 }
 0x1bc   : > { %v3630_v1 = vpop.f32.mrb[15].mxu1 }
 0x1bd   : > { %v2939_v2 = vadd.f32 %v3628_v0, %v2898_v60  ;;  %v3631_v3 = vadd.f32 %v3630_v1, %v3629_v24 }
 0x1bf   : > { %v2942_v5 = vadd.f32 %v3631_v3, %v2901_v12 }
 0x1d9   : > { %v3648_v6 = vpop.f32.mrb[16].mxu1 }
 0x1da   : > { %v3649_v7 = vpop.f32.mrb[17].mxu1 }
 0x1db   : > { %v3650_v8 = vadd.f32 %v3649_v7, %v3648_v6  ;;  %v3651_v10 = vpop.f32.mrb[18].mxu1 }
 0x1dc   : > { %v3652_v11 = vpop.f32.mrb[19].mxu1 }
 0x1dd   : > { %v2980_v13 = vadd.f32 %v3650_v8, %v2939_v2  ;;  %v3653_v14 = vadd.f32 %v3652_v11, %v3651_v10 }
 0x1df   : > { %v2983_v15 = vadd.f32 %v3653_v14, %v2942_v5 }
 0x1f9   : > { %v3670_v16 = vpop.f32.mrb[20].mxu1 }
 0x1fa   : > { %v3671_v17 = vpop.f32.mrb[21].mxu1 }
 0x1fb   : > { %v3672_v18 = vadd.f32 %v3671_v17, %v3670_v16  ;;  %v3673_v19 = vpop.f32.mrb[22].mxu1 }
 0x1fc   : > { %v3674_v20 = vpop.f32.mrb[23].mxu1 }
 0x1fd   : > { %v3021_v9 = vadd.f32 %v3672_v18, %v2980_v13  ;;  %v3675_v22 = vadd.f32 %v3674_v20, %v3673_v19 }
 0x1ff   : > { %v3024_v23 = vadd.f32 %v3675_v22, %v2983_v15 }
 0x219   : > { %v3692_v30 = vpop.f32.mrb[24].mxu1 }
 0x21a   : > { %v2813_v26 = vpop.f32.mrb[0].mxu0  ;;  %v3693_v31 = vpop.f32.mrb[25].mxu1 }
 0x21b   : > { %v3721_v33 = vadd.f32 %v3720_v29, %v2813_v26  ;;  %v2815_v35 = vpop.f32.mrb[1].mxu0  ;;  %v3694_v42 = vadd.f32 %v3693_v31, %v3692_v30  ;;  %v3695_v44 = vpop.f32.mrb[26].mxu1 }
 0x21c   : > { %v3723_v41 = vadd.f32 %v3722_v21, %v2815_v35  ;;  %v2817_v43 = vpop.f32.mrb[2].mxu0  ;;  %v3696_v49 = vpop.f32.mrb[27].mxu1 }
 0x21d   : > { %v3109_v45 = vmax.f32 %v3721_v33, 0.0  ;;  %v3725_v46 = vadd.f32 %v3724_v32, %v2817_v43  ;;  %v2819_v47 = vpop.f32.mrb[3].mxu0  ;;  %v3062_v37 = vadd.f32 %v3694_v42, %v3021_v9  ;;  %v3697_v51 = vadd.f32 %v3696_v49, %v3695_v44 }
 0x21e   : > { %v3110_v36 = vmax.f32 %v3723_v41, 0.0  ;;  %v3727_v50 = vadd.f32 %v3726_v39, %v2819_v47 }
 0x21f   : > { %v3112_v38 = vmax.f32 %v3725_v46, 0.0  ;;  %v3065_v40 = vadd.f32 %v3697_v51, %v3024_v23 }
 0x220   : > { %v3562_v52 = vpack.c.bf16 %v3110_v36, %v3109_v45  ;;  %v3113_v53 = vmax.f32 %v3727_v50, 0.0 }
 0x222   : > { %3135 = vst [vmem:[%s177_s24] sm:$0xff] %v3562_v52  ;;  %v3564_v4 = vpack.c.bf16 %v3113_v53, %v3112_v38 }
 0x224   : > { %3137 = vst [vmem:[%s177_s24 + $0xc] sm:$0xff] %v3564_v4 }
 0x239   : > { %v3714_v54 = vpop.f32.mrb[28].mxu1 }
 0x23a   : > { %v3715_v55 = vpop.f32.mrb[29].mxu1 }
 0x23b   : > { %v3716_v34 = vadd.f32 %v3715_v55, %v3714_v54  ;;  %v3717_v56 = vpop.f32.mrb[30].mxu1 }
 0x23c   : > { %v3718_v57 = vpop.f32.mrb[31].mxu1 }
 0x23d   : > { %v3103_v58 = vadd.f32 %v3716_v34, %v3062_v37  ;;  %v3719_v59 = vadd.f32 %v3718_v57, %v3717_v56 }
 0x23f   : > { %v3111_v60 = vmax.f32 %v3103_v58, 0.0  ;;  %v3106_v61 = vadd.f32 %v3719_v59, %v3065_v40 }
 0x241   : > { %v3563_v12 = vpack.c.bf16 %v3111_v60, %v3111_v60  ;;  %v3114_v62 = vmax.f32 %v3106_v61, 0.0 }
 0x243   : > { %3136 = vst [vmem:[%s177_s24 + $0x8] sm:$0xf] %v3563_v12  ;;  %v3565_v63 = vpack.c.bf16 %v3114_v62, %v3114_v62 }
 0x245   : > { %3138 = vst [vmem:[%s177_s24 + $0x14] sm:$0xf] %v3565_v63 }
 0x246 PF: > { %s13_s12 = sadd.s32 1, %s4237_s12  }
 0x247   : > { %p10_p4 = scmp.ge.s32.totalorder %s13_s12, 4  }
 0x249   :  { %12 = sbr.rel (!%p10_p4) target bundleno = 1 (0x1), region = 62 }

// kernel: alexnet_fc_forward.13
= control target key start
LH: loop header
LB: loop body
LE: loop exit
PB: predicated region body
PF: predicated region fallthrough
CT: control target
= control target key end

     0   :  { %s4885_s12 = smov 0   ;;  %s6236_s0 = inlined_call_operand.vmem [shape: bf16[32,3456], index: 0, kind: input, shape index: {}]   ;;  %s6237_s1 = inlined_call_operand.vmem [shape: bf16[3456,256], index: 1, kind: input, shape index: {}]   ;;  %s6238_s2 = inlined_call_operand.vmem [shape: f32[1,256], index: 2, kind: input, shape index: {}]   ;;  %s6239_s3 = inlined_call_operand.vmem [shape: bf16[32,256], index: 3, kind: output, shape index: {}]  }
   0x1 LB: > { %s3626_s13 = sadd.s32 4294967295, %s4862_s12   ;;  %p3630_p0 = scmp.ge.s32.totalorder %s4862_s12, 1  ;;  %s4862_s12 = sphi %s4885_s12, %s13_s12  }
   0x2   : > { %p139_p1 = scmp.lt.s32.totalorder %s4862_s12, 3 }
   0x4   : > { %p140_p2 = pnand %p3630_p0, %p139_p1 }
   0x5   : > { %v4168_v0 = vld [vmem:[%s6237_s1 + $0x4] ss:$8 sps:$4 sm:$0xff] (!%p140_p2)   ;;  %v4172_v2 = vld [vmem:[%s6237_s1] ss:$8 sps:$4 sm:$0xff] (!%p140_p2)   ;;  %v4174_v4 = vld [vmem:[%s6237_s1 + $0x14] ss:$8 sps:$4 sm:$0xff] (!%p140_p2)  }
   0x6   : > { %143 = sbr.rel (%p140_p2) target bundleno = 678 (0x2a6), region = 32  ;;  %v4170_v1 = vld [vmem:[%s6237_s1 + $0x704] ss:$8 sps:$4 sm:$0xff] (!%p140_p2)   ;;  %2948 = vmatprep.subr.bf16.mxu1 (!%p140_p2), %v4168_v0  ;;  %v4173_v3 = vld [vmem:[%s6237_s1 + $0x700] ss:$8 sps:$4 sm:$0xff] (!%p140_p2)   ;;  %s3631_s24 = sshll.u32 (!%p140_p2), %s3626_s13, 1 }
   0x7   : > { %3249 = vmatprep.subr.bf16.mxu0 (!%p140_p2), %v4170_v1  ;;  %2949 = vmatpush1.bf16.msra.mxu1 (!%p140_p2), %v4172_v2  ;;  %v4176_v5 = vld [vmem:[%s6237_s1 + $0x714] ss:$8 sps:$4 sm:$0xff] (!%p140_p2)   ;;  %v4178_v6 = vld [vmem:[%s6237_s1 + $0x10] ss:$8 sps:$4 sm:$0xff] (!%p140_p2)   ;;  %v4180_v8 = vld [vmem:[%s6237_s1 + $0x24] ss:$8 sps:$4 sm:$0xff] (!%p140_p2)  }
   0x8   : > { %3250 = vmatpush1.bf16.msra.mxu0 (!%p140_p2), %v4173_v3  ;;  %2950 = vmatprep.subr.bf16.mxu1 (!%p140_p2), %v4174_v4  ;;  %v4179_v7 = vld [vmem:[%s6237_s1 + $0x710] ss:$8 sps:$4 sm:$0xff] (!%p140_p2)   ;;  %v4182_v9 = vld [vmem:[%s6237_s1 + $0x724] ss:$8 sps:$4 sm:$0xff] (!%p140_p2)   ;;  %v4184_v10 = vld [vmem:[%s6237_s1 + $0x20] ss:$8 sps:$4 sm:$0xff] (!%p140_p2)  }
   0x9   : > { %3251 = vmatprep.subr.bf16.mxu0 (!%p140_p2), %v4176_v5  ;;  %v4185_v11 = vld [vmem:[%s6237_s1 + $0x720] ss:$8 sps:$4 sm:$0xff] (!%p140_p2)   ;;  %v4186_v12 = vld [vmem:[%s6237_s1 + $0x34] ss:$8 sps:$4 sm:$0xff] (!%p140_p2)   ;;  %v4190_v14 = vld [vmem:[%s6237_s1 + $0x30] ss:$8 sps:$4 sm:$0xff] (!%p140_p2)  }
   0xa   : > { %v4188_v13 = vld [vmem:[%s6237_s1 + $0x734] ss:$8 sps:$4 sm:$0xff] (!%p140_p2)   ;;  %v4191_v15 = vld [vmem:[%s6237_s1 + $0x730] ss:$8 sps:$4 sm:$0xff] (!%p140_p2)   ;;  %v4192_v16 = vld [vmem:[%s6237_s1 + $0x44] ss:$8 sps:$4 sm:$0xff] (!%p140_p2)  }
   0xb   : > { %2951 = vmatpush1.bf16.msra.mxu1 (!%p140_p2), %v4178_v6  ;;  %v4194_v17 = vld [vmem:[%s6237_s1 + $0x744] ss:$8 sps:$4 sm:$0xff] (!%p140_p2)   ;;  %v4196_v18 = vld [vmem:[%s6237_s1 + $0x40] ss:$8 sps:$4 sm:$0xff] (!%p140_p2)   ;;  %v4198_v20 = vld [vmem:[%s6237_s1 + $0x54] ss:$8 sps:$4 sm:$0xff] (!%p140_p2)  }
   0xc   : > { %3252 = vmatpush1.bf16.msra.mxu0 (!%p140_p2), %v4179_v7  ;;  %2952 = vmatprep.subr.bf16.mxu1 (!%p140_p2), %v4180_v8  ;;  %v4197_v19 = vld [vmem:[%s6237_s1 + $0x740] ss:$8 sps:$4 sm:$0xff] (!%p140_p2)   ;;  %v4200_v21 = vld [vmem:[%s6237_s1 + $0x754] ss:$8 sps:$4 sm:$0xff] (!%p140_p2)   ;;  %v4202_v22 = vld [vmem:[%s6237_s1 + $0x50] ss:$8 sps:$4 sm:$0xff] (!%p140_p2)  }
   0xd   : > { %3253 = vmatprep.subr.bf16.mxu0 %v4182_v9  ;;  %v4203_v23 = vld [vmem:[%s6237_s1 + $0x750] ss:$8 sps:$4 sm:$0xff]   ;;  %v4204_v24 = vld [vmem:[%s6237_s1 + $0x64] ss:$8 sps:$4 sm:$0xff]   ;;  %v4208_v26 = vld [vmem:[%s6237_s1 + $0x60] ss:$8 sps:$4 sm:$0xff]  }
   0xe   : > { %v4206_v25 = vld [vmem:[%s6237_s1 + $0x764] ss:$8 sps:$4 sm:$0xff]   ;;  %v4209_v27 = vld [vmem:[%s6237_s1 + $0x760] ss:$8 sps:$4 sm:$0xff]   ;;  %v4210_v28 = vld [vmem:[%s6237_s1 + $0x74] ss:$8 sps:$4 sm:$0xff]  }
   0xf   : > { %2953 = vmatpush1.bf16.msra.mxu1 %v4184_v10  ;;  %v4212_v29 = vld [vmem:[%s6237_s1 + $0x774] ss:$8 sps:$4 sm:$0xff]   ;;  %v4214_v30 = vld [vmem:[%s6237_s1 + $0x70] ss:$8 sps:$4 sm:$0xff]   ;;  %v4216_v32 = vld [vmem:[%s6237_s1 + $0x84] ss:$8 sps:$4 sm:$0xff]  }
  0x10   : > { %3254 = vmatpush1.bf16.msra.mxu0 %v4185_v11  ;;  %2954 = vmatprep.subr.bf16.mxu1 %v4186_v12  ;;  %v4215_v31 = vld [vmem:[%s6237_s1 + $0x770] ss:$8 sps:$4 sm:$0xff]   ;;  %p166_p3 = scmp.lt.s32.totalorder %s3631_s24, 3  ;;  %v4218_v33 = vld [vmem:[%s6237_s1 + $0x784] ss:$8 sps:$4 sm:$0xff]  }
  0x11   : > { %3255 = vmatprep.subr.bf16.mxu0 %v4188_v13  ;;  %v4220_v34 = vld [vmem:[%s6237_s1 + $0x80] ss:$8 sps:$4 sm:$0xff]   ;;  %v4222_v36 = vld [vmem:[%s6237_s1 + $0x94] ss:$8 sps:$4 sm:$0xff]   ;;  %v4226_v38 = vld [vmem:[%s6237_s1 + $0x90] ss:$8 sps:$4 sm:$0xff]  }
  0x12   : > { %v4221_v35 = vld [vmem:[%s6237_s1 + $0x780] ss:$8 sps:$4 sm:$0xff]   ;;  %s6241_s24 = smov (!%p166_p3, %s3631_s24), 3  ;;  %v4224_v37 = vld [vmem:[%s6237_s1 + $0x794] ss:$8 sps:$4 sm:$0xff]  }
  0x13   : > { %2955 = vmatpush1.bf16.msra.mxu1 %v4190_v14  ;;  %v4227_v39 = vld [vmem:[%s6237_s1 + $0x790] ss:$8 sps:$4 sm:$0xff]   ;;  %v4228_v40 = vld [vmem:[%s6237_s1 + $0xa4] ss:$8 sps:$4 sm:$0xff]   ;;  %s4158_s21 = smul.u32 108, %s6241_s24 }
  0x14   : > { %3256 = vmatpush1.bf16.msra.mxu0 %v4191_v15  ;;  %2956 = vmatprep.subr.bf16.mxu1 %v4192_v16  ;;  %v4230_v41 = vld [vmem:[%s6237_s1 + $0x7a4] ss:$8 sps:$4 sm:$0xff]   ;;  %v4232_v42 = vld [vmem:[%s6237_s1 + $0xa0] ss:$8 sps:$4 sm:$0xff]   ;;  %v4234_v44 = vld [vmem:[%s6237_s1 + $0xb4] ss:$8 sps:$4 sm:$0xff]  }
  0x15   : > { %3257 = vmatprep.subr.bf16.mxu0 %v4194_v17  ;;  %v4233_v43 = vld [vmem:[%s6237_s1 + $0x7a0] ss:$8 sps:$4 sm:$0xff]   ;;  %s5036_s13 = scalar_lea.vmem %s6236_s0, %s4158_s21  ;;  %v4236_v45 = vld [vmem:[%s6237_s1 + $0x7b4] ss:$8 sps:$4 sm:$0xff]   ;;  %v4238_v46 = vld [vmem:[%s6237_s1 + $0xb0] ss:$8 sps:$4 sm:$0xff]  }
  0x16   : > { %v4239_v47 = vld [vmem:[%s6237_s1 + $0x7b0] ss:$8 sps:$4 sm:$0xff]   ;;  %v4240_v49 = vld [vmem:[%s6237_s1 + $0xc4] ss:$8 sps:$4 sm:$0xff]   ;;  %v4272_v51 = vld [vmem:[%s5036_s13 + $0x3c] ss:$108 sps:$4 sm:$0xff]  }
  0x17   : > { %2957 = vmatpush1.bf16.msra.mxu1 %v4196_v18  ;;  %v4266_v48 = vld [vmem:[%s5036_s13 + $0x4] ss:$108 sps:$4 sm:$0xff]   ;;  %v4244_v52 = vld [vmem:[%s6237_s1 + $0xc0] ss:$8 sps:$4 sm:$0xff]   ;;  %v4246_v54 = vld [vmem:[%s6237_s1 + $0xd4] ss:$8 sps:$4 sm:$0xff]   ;;  %3281 = vmatprep.mubr.bf16.mxu0 %v4272_v51 }
  0x18   : > { %3258 = vmatpush1.bf16.msra.mxu0 %v4197_v19  ;;  %2958 = vmatprep.subr.bf16.mxu1 %v4198_v20  ;;  %v4242_v50 = vld [vmem:[%s6237_s1 + $0x7c4] ss:$8 sps:$4 sm:$0xff]   ;;  %v4245_v53 = vld [vmem:[%s6237_s1 + $0x7c0] ss:$8 sps:$4 sm:$0xff]   ;;  %v4248_v55 = vld [vmem:[%s6237_s1 + $0x7d4] ss:$8 sps:$4 sm:$0xff]  }
  0x19   : > { %3259 = vmatprep.subr.bf16.mxu0 %v4200_v21  ;;  %2980 = vmatprep.mubr.bf16.mxu1 %v4266_v48  ;;  %v4250_v56 = vld [vmem:[%s6237_s1 + $0xd0] ss:$8 sps:$4 sm:$0xff]   ;;  %v4252_v58 = vld [vmem:[%s6237_s1 + $0xe4] ss:$8 sps:$4 sm:$0xff]   ;;  %v4256_v60 = vld [vmem:[%s6237_s1 + $0xe0] ss:$8 sps:$4 sm:$0xff]  }
  0x1a   : > { %v4251_v57 = vld [vmem:[%s6237_s1 + $0x7d0] ss:$8 sps:$4 sm:$0xff]   ;;  %v4254_v59 = vld [vmem:[%s6237_s1 + $0x7e4] ss:$8 sps:$4 sm:$0xff]   ;;  %v4257_v61 = vld [vmem:[%s6237_s1 + $0x7e0] ss:$8 sps:$4 sm:$0xff]  }
  0x1b   : > { %2959 = vmatpush1.bf16.msra.mxu1 %v4202_v22  ;;  %v4258_v62 = vld [vmem:[%s6237_s1 + $0xf4] ss:$8 sps:$4 sm:$0xff]   ;;  %v4262_v0 = vld [vmem:[%s6237_s1 + $0xf0] ss:$8 sps:$4 sm:$0xff]   ;;  %v4269_v2 = vld [vmem:[%s6237_s1 + $0x104] ss:$8 sps:$4 sm:$0xff]  }
  0x1c   : > { %3260 = vmatpush1.bf16.msra.mxu0 %v4203_v23  ;;  %2960 = vmatprep.subr.bf16.mxu1 %v4204_v24  ;;  %v4260_v63 = vld [vmem:[%s6237_s1 + $0x7f4] ss:$8 sps:$4 sm:$0xff]   ;;  %v4263_v1 = vld [vmem:[%s6237_s1 + $0x7f0] ss:$8 sps:$4 sm:$0xff]   ;;  %v4275_v3 = vld [vmem:[%s6237_s1 + $0x804] ss:$8 sps:$4 sm:$0xff]  }
  0x1d   : > { %3261 = vmatprep.subr.bf16.mxu0 %v4206_v25  ;;  %v4264_v4 = vld [vmem:[%s5036_s13] ss:$108 sps:$4 sm:$0xff]   ;;  %v4270_v6 = vld [vmem:[%s5036_s13 + $0x38] ss:$108 sps:$4 sm:$0xff]   ;;  %v4278_v8 = vld [vmem:[%s6237_s1 + $0x114] ss:$8 sps:$4 sm:$0xff]  }
  0x1e   : > { %v4267_v5 = vld [vmem:[%s6237_s1 + $0x100] ss:$8 sps:$4 sm:$0xff]   ;;  %v4281_v9 = vld [vmem:[%s6237_s1 + $0x814] ss:$8 sps:$4 sm:$0xff]   ;;  %v4276_v10 = vld [vmem:[%s6237_s1 + $0x110] ss:$8 sps:$4 sm:$0xff]  }
  0x1f   : > { %2961 = vmatpush1.bf16.msra.mxu1 %v4208_v26  ;;  %v4273_v7 = vld [vmem:[%s6237_s1 + $0x800] ss:$8 sps:$4 sm:$0xff]   ;;  %v4279_v11 = vld [vmem:[%s6237_s1 + $0x810] ss:$8 sps:$4 sm:$0xff]   ;;  %v4284_v12 = vld [vmem:[%s6237_s1 + $0x124] ss:$8 sps:$4 sm:$0xff]  }
  0x20   : > { %3262 = vmatpush1.bf16.msra.mxu0 %v4209_v27  ;;  %2962 = vmatprep.subr.bf16.mxu1 %v4210_v28  ;;  %v4287_v13 = vld [vmem:[%s6237_s1 + $0x824] ss:$8 sps:$4 sm:$0xff]   ;;  %v4282_v14 = vld [vmem:[%s6237_s1 + $0x120] ss:$8 sps:$4 sm:$0xff]   ;;  %v4290_v16 = vld [vmem:[%s6237_s1 + $0x134] ss:$8 sps:$4 sm:$0xff]  }
  0x21   : > { %3263 = vmatprep.subr.bf16.mxu0 %v4212_v29  ;;  %v4285_v15 = vld [vmem:[%s6237_s1 + $0x820] ss:$8 sps:$4 sm:$0xff]   ;;  %v4293_v17 = vld [vmem:[%s6237_s1 + $0x834] ss:$8 sps:$4 sm:$0xff]   ;;  %v4288_v18 = vld [vmem:[%s6237_s1 + $0x130] ss:$8 sps:$4 sm:$0xff]  }
  0x22   : > { %v4291_v19 = vld [vmem:[%s6237_s1 + $0x830] ss:$8 sps:$4 sm:$0xff]   ;;  %v4296_v20 = vld [vmem:[%s6237_s1 + $0x144] ss:$8 sps:$4 sm:$0xff]   ;;  %v4294_v22 = vld [vmem:[%s6237_s1 + $0x140] ss:$8 sps:$4 sm:$0xff]  }
  0x23   : > { %2963 = vmatpush1.bf16.msra.mxu1 %v4214_v30  ;;  %v4299_v21 = vld [vmem:[%s6237_s1 + $0x844] ss:$8 sps:$4 sm:$0xff]   ;;  %v4297_v23 = vld [vmem:[%s6237_s1 + $0x840] ss:$8 sps:$4 sm:$0xff]   ;;  %v4302_v24 = vld [vmem:[%s6237_s1 + $0x154] ss:$8 sps:$4 sm:$0xff]  }
  0x24   : > { %3264 = vmatpush1.bf16.msra.mxu0 %v4215_v31  ;;  %2964 = vmatprep.subr.bf16.mxu1 %v4216_v32  ;;  %v4305_v25 = vld [vmem:[%s6237_s1 + $0x854] ss:$8 sps:$4 sm:$0xff]   ;;  %v4300_v26 = vld [vmem:[%s6237_s1 + $0x150] ss:$8 sps:$4 sm:$0xff]   ;;  %v4308_v28 = vld [vmem:[%s6237_s1 + $0x164] ss:$8 sps:$4 sm:$0xff]  }
  0x25   : > { %3265 = vmatprep.subr.bf16.mxu0 %v4218_v33  ;;  %v4303_v27 = vld [vmem:[%s6237_s1 + $0x850] ss:$8 sps:$4 sm:$0xff]   ;;  %v4311_v29 = vld [vmem:[%s6237_s1 + $0x864] ss:$8 sps:$4 sm:$0xff]   ;;  %v4306_v30 = vld [vmem:[%s6237_s1 + $0x160] ss:$8 sps:$4 sm:$0xff]  }
  0x26   : > { %v4309_v31 = vld [vmem:[%s6237_s1 + $0x860] ss:$8 sps:$4 sm:$0xff]   ;;  %v4314_v32 = vld [vmem:[%s6237_s1 + $0x174] ss:$8 sps:$4 sm:$0xff]  }
  0x27   : > { %2965 = vmatpush1.bf16.msra.mxu1 %v4220_v34  ;;  %v4317_v33 = vld [vmem:[%s6237_s1 + $0x874] ss:$8 sps:$4 sm:$0xff]   ;;  %v4368_v34 = vld [vmem:[%s5036_s13 + $0xc] ss:$108 sps:$4 sm:$0xff]   ;;  %v4330_v48 = vld [vmem:[%s6237_s1 + $0x1a0] ss:$8 sps:$4 sm:$0xff]  }
  0x28   : > { %3266 = vmatpush1.bf16.msra.mxu0 %v4221_v35  ;;  %2966 = vmatprep.subr.bf16.mxu1 %v4222_v36  ;;  %v4312_v35 = vld [vmem:[%s6237_s1 + $0x170] ss:$8 sps:$4 sm:$0xff]   ;;  %v4341_v51 = vld [vmem:[%s6237_s1 + $0x8b4] ss:$8 sps:$4 sm:$0xff]  }
  0x29   : > { %3267 = vmatprep.subr.bf16.mxu0 %v4224_v37  ;;  %v4315_v36 = vld [vmem:[%s6237_s1 + $0x870] ss:$8 sps:$4 sm:$0xff]  }
  0x2a   : > { %v4374_v37 = vld [vmem:[%s5036_s13 + $0x44] ss:$108 sps:$4 sm:$0xff]  }
  0x2b   : > { %2967 = vmatpush1.bf16.msra.mxu1 %v4226_v38  ;;  %v4320_v38 = vld [vmem:[%s6237_s1 + $0x184] ss:$8 sps:$4 sm:$0xff]  }
  0x2c   : > { %3268 = vmatpush1.bf16.msra.mxu0 %v4227_v39  ;;  %2968 = vmatprep.subr.bf16.mxu1 %v4228_v40  ;;  %v4323_v39 = vld [vmem:[%s6237_s1 + $0x884] ss:$8 sps:$4 sm:$0xff]   ;;  %v4318_v40 = vld [vmem:[%s6237_s1 + $0x180] ss:$8 sps:$4 sm:$0xff]  }
  0x2d   : > { %3269 = vmatprep.subr.bf16.mxu0 %v4230_v41  ;;  %v4321_v41 = vld [vmem:[%s6237_s1 + $0x880] ss:$8 sps:$4 sm:$0xff]  }
  0x2f   : > { %2969 = vmatpush1.bf16.msra.mxu1 %v4232_v42  ;;  %v4326_v42 = vld [vmem:[%s6237_s1 + $0x194] ss:$8 sps:$4 sm:$0xff]  }
  0x30   : > { %3270 = vmatpush1.bf16.msra.mxu0 %v4233_v43  ;;  %2970 = vmatprep.subr.bf16.mxu1 %v4234_v44  ;;  %v4329_v43 = vld [vmem:[%s6237_s1 + $0x894] ss:$8 sps:$4 sm:$0xff]   ;;  %v4324_v44 = vld [vmem:[%s6237_s1 + $0x190] ss:$8 sps:$4 sm:$0xff]  }
  0x31   : > { %3271 = vmatprep.subr.bf16.mxu0 %v4236_v45  ;;  %v4327_v45 = vld [vmem:[%s6237_s1 + $0x890] ss:$8 sps:$4 sm:$0xff]  }
  0x33   : > { %2971 = vmatpush1.bf16.msra.mxu1 %v4238_v46  ;;  %v4332_v46 = vld [vmem:[%s6237_s1 + $0x1a4] ss:$8 sps:$4 sm:$0xff]  }
  0x34   : > { %3272 = vmatpush1.bf16.msra.mxu0 %v4239_v47  ;;  %2972 = vmatprep.subr.bf16.mxu1 %v4240_v49  ;;  %v4335_v47 = vld [vmem:[%s6237_s1 + $0x8a4] ss:$8 sps:$4 sm:$0xff]   ;;  %v4333_v49 = vld [vmem:[%s6237_s1 + $0x8a0] ss:$8 sps:$4 sm:$0xff]  }
  0x35   : > { %3273 = vmatprep.subr.bf16.mxu0 %v4242_v50  ;;  %v4338_v50 = vld [vmem:[%s6237_s1 + $0x1b4] ss:$8 sps:$4 sm:$0xff]  }
  0x37   : > { %2973 = vmatpush1.bf16.msra.mxu1 %v4244_v52  ;;  %v4336_v52 = vld [vmem:[%s6237_s1 + $0x1b0] ss:$8 sps:$4 sm:$0xff]  }
  0x38   : > { %3274 = vmatpush1.bf16.msra.mxu0 %v4245_v53  ;;  %2974 = vmatprep.subr.bf16.mxu1 %v4246_v54  ;;  %v4339_v53 = vld [vmem:[%s6237_s1 + $0x8b0] ss:$8 sps:$4 sm:$0xff]   ;;  %v4344_v54 = vld [vmem:[%s6237_s1 + $0x1c4] ss:$8 sps:$4 sm:$0xff]  }
  0x39   : > { %3275 = vmatprep.subr.bf16.mxu0 %v4248_v55  ;;  %v4347_v55 = vld [vmem:[%s6237_s1 + $0x8c4] ss:$8 sps:$4 sm:$0xff]  }
  0x3b   : > { %2975 = vmatpush1.bf16.msra.mxu1 %v4250_v56  ;;  %v4342_v56 = vld [vmem:[%s6237_s1 + $0x1c0] ss:$8 sps:$4 sm:$0xff]  }
  0x3c   : > { %3276 = vmatpush1.bf16.msra.mxu0 %v4251_v57  ;;  %2976 = vmatprep.subr.bf16.mxu1 %v4252_v58  ;;  %v4345_v57 = vld [vmem:[%s6237_s1 + $0x8c0] ss:$8 sps:$4 sm:$0xff]   ;;  %v4350_v58 = vld [vmem:[%s6237_s1 + $0x1d4] ss:$8 sps:$4 sm:$0xff]  }
  0x3d   : > { %3277 = vmatprep.subr.bf16.mxu0 %v4254_v59  ;;  %v4353_v59 = vld [vmem:[%s6237_s1 + $0x8d4] ss:$8 sps:$4 sm:$0xff]  }
  0x3f   : > { %2977 = vmatpush1.bf16.msra.mxu1 %v4256_v60  ;;  %v4348_v60 = vld [vmem:[%s6237_s1 + $0x1d0] ss:$8 sps:$4 sm:$0xff]  }
  0x40   : > { %3278 = vmatpush1.bf16.msra.mxu0 %v4257_v61  ;;  %2978 = vmatprep.subr.bf16.mxu1 %v4258_v62  ;;  %v4351_v61 = vld [vmem:[%s6237_s1 + $0x8d0] ss:$8 sps:$4 sm:$0xff]   ;;  %v4356_v62 = vld [vmem:[%s6237_s1 + $0x1e4] ss:$8 sps:$4 sm:$0xff]  }
  0x41   : > { %3279 = vmatprep.subr.bf16.mxu0 %v4260_v63  ;;  %v4359_v63 = vld [vmem:[%s6237_s1 + $0x8e4] ss:$8 sps:$4 sm:$0xff]  }
  0x43   : > { %2979 = vmatpush1.bf16.msra.mxu1 %v4262_v0  ;;  %v4354_v0 = vld [vmem:[%s6237_s1 + $0x1e0] ss:$8 sps:$4 sm:$0xff]  }
  0x44   : > { %3280 = vmatpush1.bf16.msra.mxu0 %v4263_v1  ;;  %2991 = vmatprep.subr.bf16.mxu1 %v4269_v2  ;;  %v4357_v1 = vld [vmem:[%s6237_s1 + $0x8e0] ss:$8 sps:$4 sm:$0xff]   ;;  %v4362_v2 = vld [vmem:[%s6237_s1 + $0x1f4] ss:$8 sps:$4 sm:$0xff]  }
  0x45   : > { %3292 = vmatprep.subr.bf16.mxu0 %v4275_v3  ;;  %v4365_v3 = vld [vmem:[%s6237_s1 + $0x8f4] ss:$8 sps:$4 sm:$0xff]  }
  0x46   : > { %2981 = vmatmul.mubr.bf16.vlgmr.msra.gmra.mrb[0].mxu1 %v4264_v4  ;;  %v4360_v4 = vld [vmem:[%s6237_s1 + $0x1f0] ss:$8 sps:$4 sm:$0xff]  }
  0x47   : > { %3282 = vmatmul.mubr.bf16.vlgmr.msra.gmra.mrb[0].mxu0 %v4270_v6  ;;  %2992 = vmatpush1.bf16.msra.mxu1 %v4267_v5  ;;  %v4363_v5 = vld [vmem:[%s6237_s1 + $0x8f0] ss:$8 sps:$4 sm:$0xff]   ;;  %v4371_v6 = vld [vmem:[%s6237_s1 + $0x204] ss:$8 sps:$4 sm:$0xff]  }
  0x48   : > { %3293 = vmatpush1.bf16.msra.mxu0 %v4273_v7  ;;  %2993 = vmatprep.subr.bf16.mxu1 %v4278_v8  ;;  %v4377_v7 = vld [vmem:[%s6237_s1 + $0x904] ss:$8 sps:$4 sm:$0xff]   ;;  %v4366_v8 = vld [vmem:[%s5036_s13 + $0x8] ss:$108 sps:$4 sm:$0xff]  }
  0x49   : > { %3294 = vmatprep.subr.bf16.mxu0 %v4281_v9  ;;  %3023 = vmatprep.mubr.bf16.mxu1 %v4368_v34  ;;  %v4369_v9 = vld [vmem:[%s6237_s1 + $0x200] ss:$8 sps:$4 sm:$0xff]   ;;  %v4410_v34 = vld [vmem:[%s6237_s1 + $0x264] ss:$8 sps:$4 sm:$0xff]  }
  0x4a   : > { %3324 = vmatprep.mubr.bf16.mxu0 %v4374_v37  ;;  %v4411_v37 = vld [vmem:[%s6237_s1 + $0x960] ss:$8 sps:$4 sm:$0xff]  }
  0x4b   : > { %2994 = vmatpush1.bf16.msra.mxu1 %v4276_v10  ;;  %v4372_v10 = vld [vmem:[%s5036_s13 + $0x40] ss:$108 sps:$4 sm:$0xff]  }
  0x4c   : > { %3295 = vmatpush1.bf16.msra.mxu0 %v4279_v11  ;;  %2995 = vmatprep.subr.bf16.mxu1 %v4284_v12  ;;  %v4375_v11 = vld [vmem:[%s6237_s1 + $0x900] ss:$8 sps:$4 sm:$0xff]   ;;  %v4380_v12 = vld [vmem:[%s6237_s1 + $0x214] ss:$8 sps:$4 sm:$0xff]  }
  0x4d   : > { %3296 = vmatprep.subr.bf16.mxu0 %v4287_v13  ;;  %v4383_v13 = vld [vmem:[%s6237_s1 + $0x914] ss:$8 sps:$4 sm:$0xff]  }
  0x4f   : > { %2996 = vmatpush1.bf16.msra.mxu1 %v4282_v14  ;;  %v4378_v14 = vld [vmem:[%s6237_s1 + $0x210] ss:$8 sps:$4 sm:$0xff]  }
  0x50   : > { %3297 = vmatpush1.bf16.msra.mxu0 %v4285_v15  ;;  %2997 = vmatprep.subr.bf16.mxu1 %v4290_v16  ;;  %v4381_v15 = vld [vmem:[%s6237_s1 + $0x910] ss:$8 sps:$4 sm:$0xff]   ;;  %v4386_v16 = vld [vmem:[%s6237_s1 + $0x224] ss:$8 sps:$4 sm:$0xff]  }
  0x51   : > { %3298 = vmatprep.subr.bf16.mxu0 %v4293_v17  ;;  %v4389_v17 = vld [vmem:[%s6237_s1 + $0x924] ss:$8 sps:$4 sm:$0xff]  }
  0x53   : > { %2998 = vmatpush1.bf16.msra.mxu1 %v4288_v18  ;;  %v4384_v18 = vld [vmem:[%s6237_s1 + $0x220] ss:$8 sps:$4 sm:$0xff]  }
  0x54   : > { %3299 = vmatpush1.bf16.msra.mxu0 %v4291_v19  ;;  %2999 = vmatprep.subr.bf16.mxu1 %v4296_v20  ;;  %v4470_v19 = vld [vmem:[%s5036_s13 + $0x14] ss:$108 sps:$4 sm:$0xff]  }
  0x55   : > { %3300 = vmatprep.subr.bf16.mxu0 %v4299_v21  ;;  %v4387_v20 = vld [vmem:[%s6237_s1 + $0x920] ss:$8 sps:$4 sm:$0xff]   ;;  %v4392_v21 = vld [vmem:[%s6237_s1 + $0x234] ss:$8 sps:$4 sm:$0xff]  }
  0x57   : > { %3000 = vmatpush1.bf16.msra.mxu1 %v4294_v22  ;;  %v4395_v22 = vld [vmem:[%s6237_s1 + $0x934] ss:$8 sps:$4 sm:$0xff]  }
  0x58   : > { %3301 = vmatpush1.bf16.msra.mxu0 %v4297_v23  ;;  %3001 = vmatprep.subr.bf16.mxu1 %v4302_v24  ;;  %v4476_v23 = vld [vmem:[%s5036_s13 + $0x4c] ss:$108 sps:$4 sm:$0xff]  }
  0x59   : > { %3302 = vmatprep.subr.bf16.mxu0 %v4305_v25  ;;  %v4390_v24 = vld [vmem:[%s6237_s1 + $0x230] ss:$8 sps:$4 sm:$0xff]  }
  0x5a   : > { %v4393_v25 = vld [vmem:[%s6237_s1 + $0x930] ss:$8 sps:$4 sm:$0xff]  }
  0x5b   : > { %3002 = vmatpush1.bf16.msra.mxu1 %v4300_v26  ;;  %v4398_v26 = vld [vmem:[%s6237_s1 + $0x244] ss:$8 sps:$4 sm:$0xff]  }
  0x5c   : > { %3303 = vmatpush1.bf16.msra.mxu0 %v4303_v27  ;;  %3003 = vmatprep.subr.bf16.mxu1 %v4308_v28  ;;  %v4401_v27 = vld [vmem:[%s6237_s1 + $0x944] ss:$8 sps:$4 sm:$0xff]   ;;  %v4396_v28 = vld [vmem:[%s6237_s1 + $0x240] ss:$8 sps:$4 sm:$0xff]  }
  0x5d   : > { %3304 = vmatprep.subr.bf16.mxu0 %v4311_v29  ;;  %v4399_v29 = vld [vmem:[%s6237_s1 + $0x940] ss:$8 sps:$4 sm:$0xff]  }
  0x5f   : > { %3004 = vmatpush1.bf16.msra.mxu1 %v4306_v30  ;;  %v4404_v30 = vld [vmem:[%s6237_s1 + $0x254] ss:$8 sps:$4 sm:$0xff]  }
  0x60   : > { %3305 = vmatpush1.bf16.msra.mxu0 %v4309_v31  ;;  %3005 = vmatprep.subr.bf16.mxu1 %v4314_v32  ;;  %v4407_v31 = vld [vmem:[%s6237_s1 + $0x954] ss:$8 sps:$4 sm:$0xff]   ;;  %v4402_v32 = vld [vmem:[%s6237_s1 + $0x250] ss:$8 sps:$4 sm:$0xff]  }
  0x61   : > { %3306 = vmatprep.subr.bf16.mxu0 %v4317_v33  ;;  %v4405_v33 = vld [vmem:[%s6237_s1 + $0x950] ss:$8 sps:$4 sm:$0xff]  }
  0x63   : > { %3006 = vmatpush1.bf16.msra.mxu1 %v4312_v35  ;;  %v4413_v35 = vld [vmem:[%s6237_s1 + $0x964] ss:$8 sps:$4 sm:$0xff]  }
  0x64   : > { %3307 = vmatpush1.bf16.msra.mxu0 %v4315_v36  ;;  %3007 = vmatprep.subr.bf16.mxu1 %v4320_v38  ;;  %v4408_v36 = vld [vmem:[%s6237_s1 + $0x260] ss:$8 sps:$4 sm:$0xff]   ;;  %v4416_v38 = vld [vmem:[%s6237_s1 + $0x274] ss:$8 sps:$4 sm:$0xff]  }
  0x65   : > { %3308 = vmatprep.subr.bf16.mxu0 %v4323_v39  ;;  %v4419_v39 = vld [vmem:[%s6237_s1 + $0x974] ss:$8 sps:$4 sm:$0xff]  }
  0x67   : > { %3008 = vmatpush1.bf16.msra.mxu1 %v4318_v40  ;;  %v4414_v40 = vld [vmem:[%s6237_s1 + $0x270] ss:$8 sps:$4 sm:$0xff]  }
  0x68   : > { %3309 = vmatpush1.bf16.msra.mxu0 %v4321_v41  ;;  %3009 = vmatprep.subr.bf16.mxu1 %v4326_v42  ;;  %v4417_v41 = vld [vmem:[%s6237_s1 + $0x970] ss:$8 sps:$4 sm:$0xff]   ;;  %v4422_v42 = vld [vmem:[%s6237_s1 + $0x284] ss:$8 sps:$4 sm:$0xff]  }
  0x69   : > { %3310 = vmatprep.subr.bf16.mxu0 %v4329_v43  ;;  %v4425_v43 = vld [vmem:[%s6237_s1 + $0x984] ss:$8 sps:$4 sm:$0xff]  }
  0x6b   : > { %3010 = vmatpush1.bf16.msra.mxu1 %v4324_v44  ;;  %v4420_v44 = vld [vmem:[%s6237_s1 + $0x280] ss:$8 sps:$4 sm:$0xff]  }
  0x6c   : > { %3311 = vmatpush1.bf16.msra.mxu0 %v4327_v45  ;;  %3011 = vmatprep.subr.bf16.mxu1 %v4332_v46  ;;  %v4423_v45 = vld [vmem:[%s6237_s1 + $0x980] ss:$8 sps:$4 sm:$0xff]   ;;  %v4428_v46 = vld [vmem:[%s6237_s1 + $0x294] ss:$8 sps:$4 sm:$0xff]  }
  0x6d   : > { %3312 = vmatprep.subr.bf16.mxu0 %v4335_v47  ;;  %v4431_v47 = vld [vmem:[%s6237_s1 + $0x994] ss:$8 sps:$4 sm:$0xff]  }
  0x6f   : > { %3012 = vmatpush1.bf16.msra.mxu1 %v4330_v48  ;;  %v4426_v48 = vld [vmem:[%s6237_s1 + $0x290] ss:$8 sps:$4 sm:$0xff]  }
  0x70   : > { %3313 = vmatpush1.bf16.msra.mxu0 %v4333_v49  ;;  %3013 = vmatprep.subr.bf16.mxu1 %v4338_v50  ;;  %v4429_v49 = vld [vmem:[%s6237_s1 + $0x990] ss:$8 sps:$4 sm:$0xff]   ;;  %v4434_v50 = vld [vmem:[%s6237_s1 + $0x2a4] ss:$8 sps:$4 sm:$0xff]  }
  0x71   : > { %3314 = vmatprep.subr.bf16.mxu0 %v4341_v51  ;;  %v4437_v51 = vld [vmem:[%s6237_s1 + $0x9a4] ss:$8 sps:$4 sm:$0xff]  }
  0x73   : > { %3014 = vmatpush1.bf16.msra.mxu1 %v4336_v52  ;;  %v4432_v52 = vld [vmem:[%s6237_s1 + $0x2a0] ss:$8 sps:$4 sm:$0xff]  }
  0x74   : > { %3315 = vmatpush1.bf16.msra.mxu0 %v4339_v53  ;;  %3015 = vmatprep.subr.bf16.mxu1 %v4344_v54  ;;  %v4435_v53 = vld [vmem:[%s6237_s1 + $0x9a0] ss:$8 sps:$4 sm:$0xff]   ;;  %v4440_v54 = vld [vmem:[%s6237_s1 + $0x2b4] ss:$8 sps:$4 sm:$0xff]  }
  0x75   : > { %3316 = vmatprep.subr.bf16.mxu0 %v4347_v55  ;;  %v4443_v55 = vld [vmem:[%s6237_s1 + $0x9b4] ss:$8 sps:$4 sm:$0xff]  }
  0x77   : > { %3016 = vmatpush1.bf16.msra.mxu1 %v4342_v56  ;;  %v4438_v56 = vld [vmem:[%s6237_s1 + $0x2b0] ss:$8 sps:$4 sm:$0xff]  }
  0x78   : > { %3317 = vmatpush1.bf16.msra.mxu0 %v4345_v57  ;;  %3017 = vmatprep.subr.bf16.mxu1 %v4350_v58  ;;  %v4441_v57 = vld [vmem:[%s6237_s1 + $0x9b0] ss:$8 sps:$4 sm:$0xff]   ;;  %v4446_v58 = vld [vmem:[%s6237_s1 + $0x2c4] ss:$8 sps:$4 sm:$0xff]  }
  0x79   : > { %3318 = vmatprep.subr.bf16.mxu0 %v4353_v59  ;;  %v4449_v59 = vld [vmem:[%s6237_s1 + $0x9c4] ss:$8 sps:$4 sm:$0xff]  }
  0x7b   : > { %3018 = vmatpush1.bf16.msra.mxu1 %v4348_v60  ;;  %v4444_v60 = vld [vmem:[%s6237_s1 + $0x2c0] ss:$8 sps:$4 sm:$0xff]  }
  0x7c   : > { %3319 = vmatpush1.bf16.msra.mxu0 %v4351_v61  ;;  %3019 = vmatprep.subr.bf16.mxu1 %v4356_v62  ;;  %v4447_v61 = vld [vmem:[%s6237_s1 + $0x9c0] ss:$8 sps:$4 sm:$0xff]   ;;  %v4452_v62 = vld [vmem:[%s6237_s1 + $0x2d4] ss:$8 sps:$4 sm:$0xff]  }
  0x7d   : > { %3320 = vmatprep.subr.bf16.mxu0 %v4359_v63  ;;  %v4455_v63 = vld [vmem:[%s6237_s1 + $0x9d4] ss:$8 sps:$4 sm:$0xff]  }
  0x7f   : > { %3020 = vmatpush1.bf16.msra.mxu1 %v4354_v0  ;;  %v4450_v0 = vld [vmem:[%s6237_s1 + $0x2d0] ss:$8 sps:$4 sm:$0xff]  }
  0x80   : > { %3321 = vmatpush1.bf16.msra.mxu0 %v4357_v1  ;;  %3021 = vmatprep.subr.bf16.mxu1 %v4362_v2  ;;  %v4453_v1 = vld [vmem:[%s6237_s1 + $0x9d0] ss:$8 sps:$4 sm:$0xff]   ;;  %v4458_v2 = vld [vmem:[%s6237_s1 + $0x2e4] ss:$8 sps:$4 sm:$0xff]  }
  0x81   : > { %3322 = vmatprep.subr.bf16.mxu0 %v4365_v3  ;;  %v4461_v3 = vld [vmem:[%s6237_s1 + $0x9e4] ss:$8 sps:$4 sm:$0xff]  }
  0x83   : > { %3022 = vmatpush1.bf16.msra.mxu1 %v4360_v4  ;;  %v4456_v4 = vld [vmem:[%s6237_s1 + $0x2e0] ss:$8 sps:$4 sm:$0xff]  }
  0x84   : > { %3323 = vmatpush1.bf16.msra.mxu0 %v4363_v5  ;;  %3034 = vmatprep.subr.bf16.mxu1 %v4371_v6  ;;  %v4459_v5 = vld [vmem:[%s6237_s1 + $0x9e0] ss:$8 sps:$4 sm:$0xff]   ;;  %v4464_v6 = vld [vmem:[%s6237_s1 + $0x2f4] ss:$8 sps:$4 sm:$0xff]  }
  0x85   : > { %3335 = vmatprep.subr.bf16.mxu0 %v4377_v7  ;;  %v4467_v7 = vld [vmem:[%s6237_s1 + $0x9f4] ss:$8 sps:$4 sm:$0xff]  }
  0x86   : > { %3024 = vmatmul.mubr.bf16.vlgmr.msra.gmra.mrb[0].mxu1 %v4366_v8  ;;  %v4462_v8 = vld [vmem:[%s6237_s1 + $0x2f0] ss:$8 sps:$4 sm:$0xff]  }
  0x87   : > { %3325 = vmatmul.mubr.bf16.vlgmr.msra.gmra.mrb[0].mxu0 %v4372_v10  ;;  %3035 = vmatpush1.bf16.msra.mxu1 %v4369_v9  ;;  %v4465_v9 = vld [vmem:[%s6237_s1 + $0x9f0] ss:$8 sps:$4 sm:$0xff]   ;;  %v4473_v10 = vld [vmem:[%s6237_s1 + $0x304] ss:$8 sps:$4 sm:$0xff]  }
  0x88   : > { %3336 = vmatpush1.bf16.msra.mxu0 %v4375_v11  ;;  %3036 = vmatprep.subr.bf16.mxu1 %v4380_v12  ;;  %v4479_v11 = vld [vmem:[%s6237_s1 + $0xa04] ss:$8 sps:$4 sm:$0xff]   ;;  %v4468_v12 = vld [vmem:[%s5036_s13 + $0x10] ss:$108 sps:$4 sm:$0xff]  }
  0x89   : > { %3337 = vmatprep.subr.bf16.mxu0 %v4383_v13  ;;  %3066 = vmatprep.mubr.bf16.mxu1 %v4470_v19  ;;  %v4471_v13 = vld [vmem:[%s6237_s1 + $0x300] ss:$8 sps:$4 sm:$0xff]  }
  0x8a   : > { %3367 = vmatprep.mubr.bf16.mxu0 %v4476_v23  ;;  %v4578_v19 = vld [vmem:[%s5036_s13 + $0x54] ss:$108 sps:$4 sm:$0xff]   ;;  %v4491_v23 = vld [vmem:[%s6237_s1 + $0xa24] ss:$8 sps:$4 sm:$0xff]  }
  0x8b   : > { %3037 = vmatpush1.bf16.msra.mxu1 %v4378_v14  ;;  %v4474_v14 = vld [vmem:[%s5036_s13 + $0x48] ss:$108 sps:$4 sm:$0xff]  }
  0x8c   : > { %3338 = vmatpush1.bf16.msra.mxu0 %v4381_v15  ;;  %3038 = vmatprep.subr.bf16.mxu1 %v4386_v16  ;;  %v4477_v15 = vld [vmem:[%s6237_s1 + $0xa00] ss:$8 sps:$4 sm:$0xff]   ;;  %v4482_v16 = vld [vmem:[%s6237_s1 + $0x314] ss:$8 sps:$4 sm:$0xff]  }
  0x8d   : > { %3339 = vmatprep.subr.bf16.mxu0 %v4389_v17  ;;  %v4485_v17 = vld [vmem:[%s6237_s1 + $0xa14] ss:$8 sps:$4 sm:$0xff]  }
  0x8f   : > { %3039 = vmatpush1.bf16.msra.mxu1 %v4384_v18  ;;  %v4572_v18 = vld [vmem:[%s5036_s13 + $0x1c] ss:$108 sps:$4 sm:$0xff]  }
  0x90   : > { %3340 = vmatpush1.bf16.msra.mxu0 %v4387_v20  ;;  %3040 = vmatprep.subr.bf16.mxu1 %v4392_v21  ;;  %v4480_v20 = vld [vmem:[%s6237_s1 + $0x310] ss:$8 sps:$4 sm:$0xff]  }
  0x91   : > { %3341 = vmatprep.subr.bf16.mxu0 %v4395_v22  ;;  %v4483_v21 = vld [vmem:[%s6237_s1 + $0xa10] ss:$8 sps:$4 sm:$0xff]   ;;  %v4488_v22 = vld [vmem:[%s6237_s1 + $0x324] ss:$8 sps:$4 sm:$0xff]  }
  0x93   : > { %3041 = vmatpush1.bf16.msra.mxu1 %v4390_v24  ;;  %v4486_v24 = vld [vmem:[%s6237_s1 + $0x320] ss:$8 sps:$4 sm:$0xff]  }
  0x94   : > { %3342 = vmatpush1.bf16.msra.mxu0 %v4393_v25  ;;  %3042 = vmatprep.subr.bf16.mxu1 %v4398_v26  ;;  %v4489_v25 = vld [vmem:[%s6237_s1 + $0xa20] ss:$8 sps:$4 sm:$0xff]   ;;  %v4494_v26 = vld [vmem:[%s6237_s1 + $0x334] ss:$8 sps:$4 sm:$0xff]  }
  0x95   : > { %3343 = vmatprep.subr.bf16.mxu0 %v4401_v27  ;;  %v4497_v27 = vld [vmem:[%s6237_s1 + $0xa34] ss:$8 sps:$4 sm:$0xff]  }
  0x97   : > { %3043 = vmatpush1.bf16.msra.mxu1 %v4396_v28  ;;  %v4492_v28 = vld [vmem:[%s6237_s1 + $0x330] ss:$8 sps:$4 sm:$0xff]  }
  0x98   : > { %3344 = vmatpush1.bf16.msra.mxu0 %v4399_v29  ;;  %3044 = vmatprep.subr.bf16.mxu1 %v4404_v30  ;;  %v4495_v29 = vld [vmem:[%s6237_s1 + $0xa30] ss:$8 sps:$4 sm:$0xff]   ;;  %v4500_v30 = vld [vmem:[%s6237_s1 + $0x344] ss:$8 sps:$4 sm:$0xff]  }
  0x99   : > { %3345 = vmatprep.subr.bf16.mxu0 %v4407_v31  ;;  %v4503_v31 = vld [vmem:[%s6237_s1 + $0xa44] ss:$8 sps:$4 sm:$0xff]  }
  0x9b   : > { %3045 = vmatpush1.bf16.msra.mxu1 %v4402_v32  ;;  %v4498_v32 = vld [vmem:[%s6237_s1 + $0x340] ss:$8 sps:$4 sm:$0xff]  }
  0x9c   : > { %3346 = vmatpush1.bf16.msra.mxu0 %v4405_v33  ;;  %3046 = vmatprep.subr.bf16.mxu1 %v4410_v34  ;;  %v4501_v33 = vld [vmem:[%s6237_s1 + $0xa40] ss:$8 sps:$4 sm:$0xff]   ;;  %v4506_v34 = vld [vmem:[%s6237_s1 + $0x354] ss:$8 sps:$4 sm:$0xff]  }
  0x9d   : > { %3347 = vmatprep.subr.bf16.mxu0 %v4413_v35  ;;  %v4509_v35 = vld [vmem:[%s6237_s1 + $0xa54] ss:$8 sps:$4 sm:$0xff]  }
  0x9f   : > { %3047 = vmatpush1.bf16.msra.mxu1 %v4408_v36  ;;  %v4504_v36 = vld [vmem:[%s6237_s1 + $0x350] ss:$8 sps:$4 sm:$0xff]  }
  0xa0   : > { %3348 = vmatpush1.bf16.msra.mxu0 %v4411_v37  ;;  %3048 = vmatprep.subr.bf16.mxu1 %v4416_v38  ;;  %v4507_v37 = vld [vmem:[%s6237_s1 + $0xa50] ss:$8 sps:$4 sm:$0xff]   ;;  %v4512_v38 = vld [vmem:[%s6237_s1 + $0x364] ss:$8 sps:$4 sm:$0xff]  }
  0xa1   : > { %3349 = vmatprep.subr.bf16.mxu0 %v4419_v39  ;;  %v4515_v39 = vld [vmem:[%s6237_s1 + $0xa64] ss:$8 sps:$4 sm:$0xff]  }
  0xa3   : > { %3049 = vmatpush1.bf16.msra.mxu1 %v4414_v40  ;;  %v4510_v40 = vld [vmem:[%s6237_s1 + $0x360] ss:$8 sps:$4 sm:$0xff]  }
  0xa4   : > { %3350 = vmatpush1.bf16.msra.mxu0 %v4417_v41  ;;  %3050 = vmatprep.subr.bf16.mxu1 %v4422_v42  ;;  %v4513_v41 = vld [vmem:[%s6237_s1 + $0xa60] ss:$8 sps:$4 sm:$0xff]   ;;  %v4518_v42 = vld [vmem:[%s6237_s1 + $0x374] ss:$8 sps:$4 sm:$0xff]  }
  0xa5   : > { %3351 = vmatprep.subr.bf16.mxu0 %v4425_v43  ;;  %v4521_v43 = vld [vmem:[%s6237_s1 + $0xa74] ss:$8 sps:$4 sm:$0xff]  }
  0xa7   : > { %3051 = vmatpush1.bf16.msra.mxu1 %v4420_v44  ;;  %v4516_v44 = vld [vmem:[%s6237_s1 + $0x370] ss:$8 sps:$4 sm:$0xff]  }
  0xa8   : > { %3352 = vmatpush1.bf16.msra.mxu0 %v4423_v45  ;;  %3052 = vmatprep.subr.bf16.mxu1 %v4428_v46  ;;  %v4519_v45 = vld [vmem:[%s6237_s1 + $0xa70] ss:$8 sps:$4 sm:$0xff]   ;;  %v4524_v46 = vld [vmem:[%s6237_s1 + $0x384] ss:$8 sps:$4 sm:$0xff]  }
  0xa9   : > { %3353 = vmatprep.subr.bf16.mxu0 %v4431_v47  ;;  %v4527_v47 = vld [vmem:[%s6237_s1 + $0xa84] ss:$8 sps:$4 sm:$0xff]  }
  0xab   : > { %3053 = vmatpush1.bf16.msra.mxu1 %v4426_v48  ;;  %v4522_v48 = vld [vmem:[%s6237_s1 + $0x380] ss:$8 sps:$4 sm:$0xff]  }
  0xac   : > { %3354 = vmatpush1.bf16.msra.mxu0 %v4429_v49  ;;  %3054 = vmatprep.subr.bf16.mxu1 %v4434_v50  ;;  %v4525_v49 = vld [vmem:[%s6237_s1 + $0xa80] ss:$8 sps:$4 sm:$0xff]   ;;  %v4530_v50 = vld [vmem:[%s6237_s1 + $0x394] ss:$8 sps:$4 sm:$0xff]  }
  0xad   : > { %3355 = vmatprep.subr.bf16.mxu0 %v4437_v51  ;;  %v4533_v51 = vld [vmem:[%s6237_s1 + $0xa94] ss:$8 sps:$4 sm:$0xff]  }
  0xaf   : > { %3055 = vmatpush1.bf16.msra.mxu1 %v4432_v52  ;;  %v4528_v52 = vld [vmem:[%s6237_s1 + $0x390] ss:$8 sps:$4 sm:$0xff]  }
  0xb0   : > { %3356 = vmatpush1.bf16.msra.mxu0 %v4435_v53  ;;  %3056 = vmatprep.subr.bf16.mxu1 %v4440_v54  ;;  %v4531_v53 = vld [vmem:[%s6237_s1 + $0xa90] ss:$8 sps:$4 sm:$0xff]   ;;  %v4536_v54 = vld [vmem:[%s6237_s1 + $0x3a4] ss:$8 sps:$4 sm:$0xff]  }
  0xb1   : > { %3357 = vmatprep.subr.bf16.mxu0 %v4443_v55  ;;  %v4539_v55 = vld [vmem:[%s6237_s1 + $0xaa4] ss:$8 sps:$4 sm:$0xff]  }
  0xb3   : > { %3057 = vmatpush1.bf16.msra.mxu1 %v4438_v56  ;;  %v4534_v56 = vld [vmem:[%s6237_s1 + $0x3a0] ss:$8 sps:$4 sm:$0xff]  }
  0xb4   : > { %3358 = vmatpush1.bf16.msra.mxu0 %v4441_v57  ;;  %3058 = vmatprep.subr.bf16.mxu1 %v4446_v58  ;;  %v4537_v57 = vld [vmem:[%s6237_s1 + $0xaa0] ss:$8 sps:$4 sm:$0xff]   ;;  %v4542_v58 = vld [vmem:[%s6237_s1 + $0x3b4] ss:$8 sps:$4 sm:$0xff]  }
  0xb5   : > { %3359 = vmatprep.subr.bf16.mxu0 %v4449_v59  ;;  %v4545_v59 = vld [vmem:[%s6237_s1 + $0xab4] ss:$8 sps:$4 sm:$0xff]  }
  0xb7   : > { %3059 = vmatpush1.bf16.msra.mxu1 %v4444_v60  ;;  %v4540_v60 = vld [vmem:[%s6237_s1 + $0x3b0] ss:$8 sps:$4 sm:$0xff]  }
  0xb8   : > { %3360 = vmatpush1.bf16.msra.mxu0 %v4447_v61  ;;  %3060 = vmatprep.subr.bf16.mxu1 %v4452_v62  ;;  %v4543_v61 = vld [vmem:[%s6237_s1 + $0xab0] ss:$8 sps:$4 sm:$0xff]   ;;  %v4548_v62 = vld [vmem:[%s6237_s1 + $0x3c4] ss:$8 sps:$4 sm:$0xff]  }
  0xb9   : > { %3361 = vmatprep.subr.bf16.mxu0 %v4455_v63  ;;  %v4551_v63 = vld [vmem:[%s6237_s1 + $0xac4] ss:$8 sps:$4 sm:$0xff]  }
  0xbb   : > { %3061 = vmatpush1.bf16.msra.mxu1 %v4450_v0  ;;  %v4546_v0 = vld [vmem:[%s6237_s1 + $0x3c0] ss:$8 sps:$4 sm:$0xff]  }
  0xbc   : > { %3362 = vmatpush1.bf16.msra.mxu0 %v4453_v1  ;;  %3062 = vmatprep.subr.bf16.mxu1 %v4458_v2  ;;  %v4549_v1 = vld [vmem:[%s6237_s1 + $0xac0] ss:$8 sps:$4 sm:$0xff]   ;;  %v4554_v2 = vld [vmem:[%s6237_s1 + $0x3d4] ss:$8 sps:$4 sm:$0xff]  }
  0xbd   : > { %3363 = vmatprep.subr.bf16.mxu0 %v4461_v3  ;;  %v4557_v3 = vld [vmem:[%s6237_s1 + $0xad4] ss:$8 sps:$4 sm:$0xff]  }
  0xbf   : > { %3063 = vmatpush1.bf16.msra.mxu1 %v4456_v4  ;;  %v4552_v4 = vld [vmem:[%s6237_s1 + $0x3d0] ss:$8 sps:$4 sm:$0xff]  }
  0xc0   : > { %3364 = vmatpush1.bf16.msra.mxu0 %v4459_v5  ;;  %3064 = vmatprep.subr.bf16.mxu1 %v4464_v6  ;;  %v4555_v5 = vld [vmem:[%s6237_s1 + $0xad0] ss:$8 sps:$4 sm:$0xff]   ;;  %v4560_v6 = vld [vmem:[%s6237_s1 + $0x3e4] ss:$8 sps:$4 sm:$0xff]  }
  0xc1   : > { %3365 = vmatprep.subr.bf16.mxu0 %v4467_v7  ;;  %v4563_v7 = vld [vmem:[%s6237_s1 + $0xae4] ss:$8 sps:$4 sm:$0xff]  }
  0xc3   : > { %3065 = vmatpush1.bf16.msra.mxu1 %v4462_v8  ;;  %v4558_v8 = vld [vmem:[%s6237_s1 + $0x3e0] ss:$8 sps:$4 sm:$0xff]  }
  0xc4   : > { %3366 = vmatpush1.bf16.msra.mxu0 %v4465_v9  ;;  %3077 = vmatprep.subr.bf16.mxu1 %v4473_v10  ;;  %v4561_v9 = vld [vmem:[%s6237_s1 + $0xae0] ss:$8 sps:$4 sm:$0xff]   ;;  %v4566_v10 = vld [vmem:[%s6237_s1 + $0x3f4] ss:$8 sps:$4 sm:$0xff]  }
  0xc5   : > { %3378 = vmatprep.subr.bf16.mxu0 %v4479_v11  ;;  %v4569_v11 = vld [vmem:[%s6237_s1 + $0xaf4] ss:$8 sps:$4 sm:$0xff]  }
  0xc6   : > { %3067 = vmatmul.mubr.bf16.vlgmr.msra.gmra.mrb[0].mxu1 %v4468_v12  ;;  %v4564_v12 = vld [vmem:[%s6237_s1 + $0x3f0] ss:$8 sps:$4 sm:$0xff]  }
  0xc7   : > { %3368 = vmatmul.mubr.bf16.vlgmr.msra.gmra.mrb[0].mxu0 %v4474_v14  ;;  %3078 = vmatpush1.bf16.msra.mxu1 %v4471_v13  ;;  %v4567_v13 = vld [vmem:[%s6237_s1 + $0xaf0] ss:$8 sps:$4 sm:$0xff]   ;;  %v4575_v14 = vld [vmem:[%s6237_s1 + $0x404] ss:$8 sps:$4 sm:$0xff]  }
  0xc8   : > { %3379 = vmatpush1.bf16.msra.mxu0 %v4477_v15  ;;  %3079 = vmatprep.subr.bf16.mxu1 %v4482_v16  ;;  %v4581_v15 = vld [vmem:[%s6237_s1 + $0xb04] ss:$8 sps:$4 sm:$0xff]  }
  0xc9   : > { %3380 = vmatprep.subr.bf16.mxu0 %v4485_v17  ;;  %3109 = vmatprep.mubr.bf16.mxu1 %v4572_v18  ;;  %v4570_v16 = vld [vmem:[%s5036_s13 + $0x18] ss:$108 sps:$4 sm:$0xff]   ;;  %v4573_v17 = vld [vmem:[%s6237_s1 + $0x400] ss:$8 sps:$4 sm:$0xff]   ;;  %v4576_v18 = vld [vmem:[%s5036_s13 + $0x50] ss:$108 sps:$4 sm:$0xff]  }
  0xca   : > { %3410 = vmatprep.mubr.bf16.mxu0 %v4578_v19  ;;  %v4579_v19 = vld [vmem:[%s6237_s1 + $0xb00] ss:$8 sps:$4 sm:$0xff]  }
  0xcb   : > { %3080 = vmatpush1.bf16.msra.mxu1 %v4480_v20  ;;  %v4584_v20 = vld [vmem:[%s6237_s1 + $0x414] ss:$8 sps:$4 sm:$0xff]  }
  0xcc   : > { %3381 = vmatpush1.bf16.msra.mxu0 %v4483_v21  ;;  %3081 = vmatprep.subr.bf16.mxu1 %v4488_v22  ;;  %v4587_v21 = vld [vmem:[%s6237_s1 + $0xb14] ss:$8 sps:$4 sm:$0xff]   ;;  %v4674_v22 = vld [vmem:[%s5036_s13 + $0x24] ss:$108 sps:$4 sm:$0xff]  }
  0xcd   : > { %3382 = vmatprep.subr.bf16.mxu0 %v4491_v23  ;;  %v4680_v23 = vld [vmem:[%s5036_s13 + $0x5c] ss:$108 sps:$4 sm:$0xff]  }
  0xcf   : > { %3082 = vmatpush1.bf16.msra.mxu1 %v4486_v24  ;;  %v4582_v24 = vld [vmem:[%s6237_s1 + $0x410] ss:$8 sps:$4 sm:$0xff]  }
  0xd0   : > { %3383 = vmatpush1.bf16.msra.mxu0 %v4489_v25  ;;  %3083 = vmatprep.subr.bf16.mxu1 %v4494_v26  ;;  %v4585_v25 = vld [vmem:[%s6237_s1 + $0xb10] ss:$8 sps:$4 sm:$0xff]   ;;  %v4590_v26 = vld [vmem:[%s6237_s1 + $0x424] ss:$8 sps:$4 sm:$0xff]  }
  0xd1   : > { %3384 = vmatprep.subr.bf16.mxu0 %v4497_v27  ;;  %v4593_v27 = vld [vmem:[%s6237_s1 + $0xb24] ss:$8 sps:$4 sm:$0xff]  }
  0xd3   : > { %3084 = vmatpush1.bf16.msra.mxu1 %v4492_v28  ;;  %v4588_v28 = vld [vmem:[%s6237_s1 + $0x420] ss:$8 sps:$4 sm:$0xff]  }
  0xd4   : > { %3385 = vmatpush1.bf16.msra.mxu0 %v4495_v29  ;;  %3085 = vmatprep.subr.bf16.mxu1 %v4500_v30  ;;  %v4591_v29 = vld [vmem:[%s6237_s1 + $0xb20] ss:$8 sps:$4 sm:$0xff]   ;;  %v4596_v30 = vld [vmem:[%s6237_s1 + $0x434] ss:$8 sps:$4 sm:$0xff]  }
  0xd5   : > { %3386 = vmatprep.subr.bf16.mxu0 %v4503_v31  ;;  %v4599_v31 = vld [vmem:[%s6237_s1 + $0xb34] ss:$8 sps:$4 sm:$0xff]  }
  0xd7   : > { %3086 = vmatpush1.bf16.msra.mxu1 %v4498_v32  ;;  %v4594_v32 = vld [vmem:[%s6237_s1 + $0x430] ss:$8 sps:$4 sm:$0xff]  }
  0xd8   : > { %3387 = vmatpush1.bf16.msra.mxu0 %v4501_v33  ;;  %3087 = vmatprep.subr.bf16.mxu1 %v4506_v34  ;;  %v4597_v33 = vld [vmem:[%s6237_s1 + $0xb30] ss:$8 sps:$4 sm:$0xff]   ;;  %v4602_v34 = vld [vmem:[%s6237_s1 + $0x444] ss:$8 sps:$4 sm:$0xff]  }
  0xd9   : > { %3388 = vmatprep.subr.bf16.mxu0 %v4509_v35  ;;  %v4605_v35 = vld [vmem:[%s6237_s1 + $0xb44] ss:$8 sps:$4 sm:$0xff]  }
  0xdb   : > { %3088 = vmatpush1.bf16.msra.mxu1 %v4504_v36  ;;  %v4600_v36 = vld [vmem:[%s6237_s1 + $0x440] ss:$8 sps:$4 sm:$0xff]  }
  0xdc   : > { %3389 = vmatpush1.bf16.msra.mxu0 %v4507_v37  ;;  %3089 = vmatprep.subr.bf16.mxu1 %v4512_v38  ;;  %v4603_v37 = vld [vmem:[%s6237_s1 + $0xb40] ss:$8 sps:$4 sm:$0xff]   ;;  %v4608_v38 = vld [vmem:[%s6237_s1 + $0x454] ss:$8 sps:$4 sm:$0xff]  }
  0xdd   : > { %3390 = vmatprep.subr.bf16.mxu0 %v4515_v39  ;;  %v4611_v39 = vld [vmem:[%s6237_s1 + $0xb54] ss:$8 sps:$4 sm:$0xff]  }
  0xdf   : > { %3090 = vmatpush1.bf16.msra.mxu1 %v4510_v40  ;;  %v4606_v40 = vld [vmem:[%s6237_s1 + $0x450] ss:$8 sps:$4 sm:$0xff]  }
  0xe0   : > { %3391 = vmatpush1.bf16.msra.mxu0 %v4513_v41  ;;  %3091 = vmatprep.subr.bf16.mxu1 %v4518_v42  ;;  %v4609_v41 = vld [vmem:[%s6237_s1 + $0xb50] ss:$8 sps:$4 sm:$0xff]   ;;  %v4614_v42 = vld [vmem:[%s6237_s1 + $0x464] ss:$8 sps:$4 sm:$0xff]  }
  0xe1   : > { %3392 = vmatprep.subr.bf16.mxu0 %v4521_v43  ;;  %v4617_v43 = vld [vmem:[%s6237_s1 + $0xb64] ss:$8 sps:$4 sm:$0xff]  }
  0xe3   : > { %3092 = vmatpush1.bf16.msra.mxu1 %v4516_v44  ;;  %v4612_v44 = vld [vmem:[%s6237_s1 + $0x460] ss:$8 sps:$4 sm:$0xff]  }
  0xe4   : > { %3393 = vmatpush1.bf16.msra.mxu0 %v4519_v45  ;;  %3093 = vmatprep.subr.bf16.mxu1 %v4524_v46  ;;  %v4615_v45 = vld [vmem:[%s6237_s1 + $0xb60] ss:$8 sps:$4 sm:$0xff]   ;;  %v4620_v46 = vld [vmem:[%s6237_s1 + $0x474] ss:$8 sps:$4 sm:$0xff]  }
  0xe5   : > { %3394 = vmatprep.subr.bf16.mxu0 %v4527_v47  ;;  %v4623_v47 = vld [vmem:[%s6237_s1 + $0xb74] ss:$8 sps:$4 sm:$0xff]  }
  0xe7   : > { %3094 = vmatpush1.bf16.msra.mxu1 %v4522_v48  ;;  %v4618_v48 = vld [vmem:[%s6237_s1 + $0x470] ss:$8 sps:$4 sm:$0xff]  }
  0xe8   : > { %3395 = vmatpush1.bf16.msra.mxu0 %v4525_v49  ;;  %3095 = vmatprep.subr.bf16.mxu1 %v4530_v50  ;;  %v4621_v49 = vld [vmem:[%s6237_s1 + $0xb70] ss:$8 sps:$4 sm:$0xff]   ;;  %v4626_v50 = vld [vmem:[%s6237_s1 + $0x484] ss:$8 sps:$4 sm:$0xff]  }
  0xe9   : > { %3396 = vmatprep.subr.bf16.mxu0 %v4533_v51  ;;  %v4629_v51 = vld [vmem:[%s6237_s1 + $0xb84] ss:$8 sps:$4 sm:$0xff]  }
  0xeb   : > { %3096 = vmatpush1.bf16.msra.mxu1 %v4528_v52  ;;  %v4624_v52 = vld [vmem:[%s6237_s1 + $0x480] ss:$8 sps:$4 sm:$0xff]  }
  0xec   : > { %3397 = vmatpush1.bf16.msra.mxu0 %v4531_v53  ;;  %3097 = vmatprep.subr.bf16.mxu1 %v4536_v54  ;;  %v4627_v53 = vld [vmem:[%s6237_s1 + $0xb80] ss:$8 sps:$4 sm:$0xff]   ;;  %v4632_v54 = vld [vmem:[%s6237_s1 + $0x494] ss:$8 sps:$4 sm:$0xff]  }
  0xed   : > { %3398 = vmatprep.subr.bf16.mxu0 %v4539_v55  ;;  %v4635_v55 = vld [vmem:[%s6237_s1 + $0xb94] ss:$8 sps:$4 sm:$0xff]  }
  0xef   : > { %3098 = vmatpush1.bf16.msra.mxu1 %v4534_v56  ;;  %v4630_v56 = vld [vmem:[%s6237_s1 + $0x490] ss:$8 sps:$4 sm:$0xff]  }
  0xf0   : > { %3399 = vmatpush1.bf16.msra.mxu0 %v4537_v57  ;;  %3099 = vmatprep.subr.bf16.mxu1 %v4542_v58  ;;  %v4633_v57 = vld [vmem:[%s6237_s1 + $0xb90] ss:$8 sps:$4 sm:$0xff]   ;;  %v4638_v58 = vld [vmem:[%s6237_s1 + $0x4a4] ss:$8 sps:$4 sm:$0xff]  }
  0xf1   : > { %3400 = vmatprep.subr.bf16.mxu0 %v4545_v59  ;;  %v4641_v59 = vld [vmem:[%s6237_s1 + $0xba4] ss:$8 sps:$4 sm:$0xff]  }
  0xf3   : > { %3100 = vmatpush1.bf16.msra.mxu1 %v4540_v60  ;;  %v4636_v60 = vld [vmem:[%s6237_s1 + $0x4a0] ss:$8 sps:$4 sm:$0xff]  }
  0xf4   : > { %3401 = vmatpush1.bf16.msra.mxu0 %v4543_v61  ;;  %3101 = vmatprep.subr.bf16.mxu1 %v4548_v62  ;;  %v4639_v61 = vld [vmem:[%s6237_s1 + $0xba0] ss:$8 sps:$4 sm:$0xff]   ;;  %v4644_v62 = vld [vmem:[%s6237_s1 + $0x4b4] ss:$8 sps:$4 sm:$0xff]  }
  0xf5   : > { %3402 = vmatprep.subr.bf16.mxu0 %v4551_v63  ;;  %v4647_v63 = vld [vmem:[%s6237_s1 + $0xbb4] ss:$8 sps:$4 sm:$0xff]  }
  0xf7   : > { %3102 = vmatpush1.bf16.msra.mxu1 %v4546_v0  ;;  %v4642_v0 = vld [vmem:[%s6237_s1 + $0x4b0] ss:$8 sps:$4 sm:$0xff]  }
  0xf8   : > { %3403 = vmatpush1.bf16.msra.mxu0 %v4549_v1  ;;  %3103 = vmatprep.subr.bf16.mxu1 %v4554_v2  ;;  %v4645_v1 = vld [vmem:[%s6237_s1 + $0xbb0] ss:$8 sps:$4 sm:$0xff]   ;;  %v4650_v2 = vld [vmem:[%s6237_s1 + $0x4c4] ss:$8 sps:$4 sm:$0xff]  }
  0xf9   : > { %3404 = vmatprep.subr.bf16.mxu0 %v4557_v3  ;;  %v4653_v3 = vld [vmem:[%s6237_s1 + $0xbc4] ss:$8 sps:$4 sm:$0xff]  }
  0xfb   : > { %3104 = vmatpush1.bf16.msra.mxu1 %v4552_v4  ;;  %v4648_v4 = vld [vmem:[%s6237_s1 + $0x4c0] ss:$8 sps:$4 sm:$0xff]  }
  0xfc   : > { %3405 = vmatpush1.bf16.msra.mxu0 %v4555_v5  ;;  %3105 = vmatprep.subr.bf16.mxu1 %v4560_v6  ;;  %v4651_v5 = vld [vmem:[%s6237_s1 + $0xbc0] ss:$8 sps:$4 sm:$0xff]   ;;  %v4656_v6 = vld [vmem:[%s6237_s1 + $0x4d4] ss:$8 sps:$4 sm:$0xff]  }
  0xfd   : > { %3406 = vmatprep.subr.bf16.mxu0 %v4563_v7  ;;  %v4659_v7 = vld [vmem:[%s6237_s1 + $0xbd4] ss:$8 sps:$4 sm:$0xff]  }
  0xff   : > { %3106 = vmatpush1.bf16.msra.mxu1 %v4558_v8  ;;  %v4654_v8 = vld [vmem:[%s6237_s1 + $0x4d0] ss:$8 sps:$4 sm:$0xff]  }
 0x100   : > { %3407 = vmatpush1.bf16.msra.mxu0 %v4561_v9  ;;  %3107 = vmatprep.subr.bf16.mxu1 %v4566_v10  ;;  %v4657_v9 = vld [vmem:[%s6237_s1 + $0xbd0] ss:$8 sps:$4 sm:$0xff]   ;;  %v4662_v10 = vld [vmem:[%s6237_s1 + $0x4e4] ss:$8 sps:$4 sm:$0xff]  }
 0x101   : > { %3408 = vmatprep.subr.bf16.mxu0 %v4569_v11  ;;  %v4665_v11 = vld [vmem:[%s6237_s1 + $0xbe4] ss:$8 sps:$4 sm:$0xff]  }
 0x103   : > { %3108 = vmatpush1.bf16.msra.mxu1 %v4564_v12  ;;  %v4660_v12 = vld [vmem:[%s6237_s1 + $0x4e0] ss:$8 sps:$4 sm:$0xff]  }
 0x104   : > { %3409 = vmatpush1.bf16.msra.mxu0 %v4567_v13  ;;  %3120 = vmatprep.subr.bf16.mxu1 %v4575_v14  ;;  %v4663_v13 = vld [vmem:[%s6237_s1 + $0xbe0] ss:$8 sps:$4 sm:$0xff]   ;;  %v4668_v14 = vld [vmem:[%s6237_s1 + $0x4f4] ss:$8 sps:$4 sm:$0xff]  }
 0x105   : > { %3421 = vmatprep.subr.bf16.mxu0 %v4581_v15  ;;  %v4671_v15 = vld [vmem:[%s6237_s1 + $0xbf4] ss:$8 sps:$4 sm:$0xff]  }
 0x106   : > { %3110 = vmatmul.mubr.bf16.vlgmr.msra.gmra.mrb[0].mxu1 %v4570_v16  ;;  %v4666_v16 = vld [vmem:[%s6237_s1 + $0x4f0] ss:$8 sps:$4 sm:$0xff]  }
 0x107   : > { %3411 = vmatmul.mubr.bf16.vlgmr.msra.gmra.mrb[0].mxu0 %v4576_v18  ;;  %3121 = vmatpush1.bf16.msra.mxu1 %v4573_v17  ;;  %v4669_v17 = vld [vmem:[%s6237_s1 + $0xbf0] ss:$8 sps:$4 sm:$0xff]   ;;  %v4677_v18 = vld [vmem:[%s6237_s1 + $0x504] ss:$8 sps:$4 sm:$0xff]  }
 0x108   : > { %3422 = vmatpush1.bf16.msra.mxu0 %v4579_v19  ;;  %3122 = vmatprep.subr.bf16.mxu1 %v4584_v20  ;;  %v4683_v19 = vld [vmem:[%s6237_s1 + $0xc04] ss:$8 sps:$4 sm:$0xff]  }
 0x109   : > { %3423 = vmatprep.subr.bf16.mxu0 %v4587_v21  ;;  %3152 = vmatprep.mubr.bf16.mxu1 %v4674_v22  ;;  %v4672_v20 = vld [vmem:[%s5036_s13 + $0x20] ss:$108 sps:$4 sm:$0xff]   ;;  %v4678_v21 = vld [vmem:[%s5036_s13 + $0x58] ss:$108 sps:$4 sm:$0xff]  }
 0x10a   : > { %3453 = vmatprep.mubr.bf16.mxu0 %v4680_v23  ;;  %v4675_v22 = vld [vmem:[%s6237_s1 + $0x500] ss:$8 sps:$4 sm:$0xff]  }
 0x10b   : > { %3123 = vmatpush1.bf16.msra.mxu1 %v4582_v24  ;;  %v4681_v23 = vld [vmem:[%s6237_s1 + $0xc00] ss:$8 sps:$4 sm:$0xff]   ;;  %v4686_v24 = vld [vmem:[%s6237_s1 + $0x514] ss:$8 sps:$4 sm:$0xff]  }
 0x10c   : > { %3424 = vmatpush1.bf16.msra.mxu0 %v4585_v25  ;;  %3124 = vmatprep.subr.bf16.mxu1 %v4590_v26  ;;  %v4689_v25 = vld [vmem:[%s6237_s1 + $0xc14] ss:$8 sps:$4 sm:$0xff]   ;;  %v4776_v26 = vld [vmem:[%s5036_s13 + $0x2c] ss:$108 sps:$4 sm:$0xff]  }
 0x10d   : > { %3425 = vmatprep.subr.bf16.mxu0 %v4593_v27  ;;  %v4782_v27 = vld [vmem:[%s5036_s13 + $0x64] ss:$108 sps:$4 sm:$0xff]  }
 0x10f   : > { %3125 = vmatpush1.bf16.msra.mxu1 %v4588_v28  ;;  %v4684_v28 = vld [vmem:[%s6237_s1 + $0x510] ss:$8 sps:$4 sm:$0xff]  }
 0x110   : > { %3426 = vmatpush1.bf16.msra.mxu0 %v4591_v29  ;;  %3126 = vmatprep.subr.bf16.mxu1 %v4596_v30  ;;  %v4687_v29 = vld [vmem:[%s6237_s1 + $0xc10] ss:$8 sps:$4 sm:$0xff]   ;;  %v4692_v30 = vld [vmem:[%s6237_s1 + $0x524] ss:$8 sps:$4 sm:$0xff]  }
 0x111   : > { %3427 = vmatprep.subr.bf16.mxu0 %v4599_v31  ;;  %v4695_v31 = vld [vmem:[%s6237_s1 + $0xc24] ss:$8 sps:$4 sm:$0xff]  }
 0x113   : > { %3127 = vmatpush1.bf16.msra.mxu1 %v4594_v32  ;;  %v4690_v32 = vld [vmem:[%s6237_s1 + $0x520] ss:$8 sps:$4 sm:$0xff]  }
 0x114   : > { %3428 = vmatpush1.bf16.msra.mxu0 %v4597_v33  ;;  %3128 = vmatprep.subr.bf16.mxu1 %v4602_v34  ;;  %v4693_v33 = vld [vmem:[%s6237_s1 + $0xc20] ss:$8 sps:$4 sm:$0xff]   ;;  %v4698_v34 = vld [vmem:[%s6237_s1 + $0x534] ss:$8 sps:$4 sm:$0xff]  }
 0x115   : > { %3429 = vmatprep.subr.bf16.mxu0 %v4605_v35  ;;  %v4701_v35 = vld [vmem:[%s6237_s1 + $0xc34] ss:$8 sps:$4 sm:$0xff]  }
 0x117   : > { %3129 = vmatpush1.bf16.msra.mxu1 %v4600_v36  ;;  %v4696_v36 = vld [vmem:[%s6237_s1 + $0x530] ss:$8 sps:$4 sm:$0xff]  }
 0x118   : > { %3430 = vmatpush1.bf16.msra.mxu0 %v4603_v37  ;;  %3130 = vmatprep.subr.bf16.mxu1 %v4608_v38  ;;  %v4699_v37 = vld [vmem:[%s6237_s1 + $0xc30] ss:$8 sps:$4 sm:$0xff]   ;;  %v4704_v38 = vld [vmem:[%s6237_s1 + $0x544] ss:$8 sps:$4 sm:$0xff]  }
 0x119   : > { %3431 = vmatprep.subr.bf16.mxu0 %v4611_v39  ;;  %v4707_v39 = vld [vmem:[%s6237_s1 + $0xc44] ss:$8 sps:$4 sm:$0xff]  }
 0x11b   : > { %3131 = vmatpush1.bf16.msra.mxu1 %v4606_v40  ;;  %v4702_v40 = vld [vmem:[%s6237_s1 + $0x540] ss:$8 sps:$4 sm:$0xff]  }
 0x11c   : > { %3432 = vmatpush1.bf16.msra.mxu0 %v4609_v41  ;;  %3132 = vmatprep.subr.bf16.mxu1 %v4614_v42  ;;  %v4705_v41 = vld [vmem:[%s6237_s1 + $0xc40] ss:$8 sps:$4 sm:$0xff]   ;;  %v4710_v42 = vld [vmem:[%s6237_s1 + $0x554] ss:$8 sps:$4 sm:$0xff]  }
 0x11d   : > { %3433 = vmatprep.subr.bf16.mxu0 %v4617_v43  ;;  %v4713_v43 = vld [vmem:[%s6237_s1 + $0xc54] ss:$8 sps:$4 sm:$0xff]  }
 0x11f   : > { %3133 = vmatpush1.bf16.msra.mxu1 %v4612_v44  ;;  %v4708_v44 = vld [vmem:[%s6237_s1 + $0x550] ss:$8 sps:$4 sm:$0xff]  }
 0x120   : > { %3434 = vmatpush1.bf16.msra.mxu0 %v4615_v45  ;;  %3134 = vmatprep.subr.bf16.mxu1 %v4620_v46  ;;  %v4711_v45 = vld [vmem:[%s6237_s1 + $0xc50] ss:$8 sps:$4 sm:$0xff]   ;;  %v4716_v46 = vld [vmem:[%s6237_s1 + $0x564] ss:$8 sps:$4 sm:$0xff]  }
 0x121   : > { %3435 = vmatprep.subr.bf16.mxu0 %v4623_v47  ;;  %v4719_v47 = vld [vmem:[%s6237_s1 + $0xc64] ss:$8 sps:$4 sm:$0xff]  }
 0x123   : > { %3135 = vmatpush1.bf16.msra.mxu1 %v4618_v48  ;;  %v4714_v48 = vld [vmem:[%s6237_s1 + $0x560] ss:$8 sps:$4 sm:$0xff]  }
 0x124   : > { %3436 = vmatpush1.bf16.msra.mxu0 %v4621_v49  ;;  %3136 = vmatprep.subr.bf16.mxu1 %v4626_v50  ;;  %v4717_v49 = vld [vmem:[%s6237_s1 + $0xc60] ss:$8 sps:$4 sm:$0xff]   ;;  %v4722_v50 = vld [vmem:[%s6237_s1 + $0x574] ss:$8 sps:$4 sm:$0xff]  }
 0x125   : > { %3437 = vmatprep.subr.bf16.mxu0 %v4629_v51  ;;  %v4725_v51 = vld [vmem:[%s6237_s1 + $0xc74] ss:$8 sps:$4 sm:$0xff]  }
 0x127   : > { %3137 = vmatpush1.bf16.msra.mxu1 %v4624_v52  ;;  %v4720_v52 = vld [vmem:[%s6237_s1 + $0x570] ss:$8 sps:$4 sm:$0xff]  }
 0x128   : > { %3438 = vmatpush1.bf16.msra.mxu0 %v4627_v53  ;;  %3138 = vmatprep.subr.bf16.mxu1 %v4632_v54  ;;  %v4723_v53 = vld [vmem:[%s6237_s1 + $0xc70] ss:$8 sps:$4 sm:$0xff]   ;;  %v4728_v54 = vld [vmem:[%s6237_s1 + $0x584] ss:$8 sps:$4 sm:$0xff]  }
 0x129   : > { %3439 = vmatprep.subr.bf16.mxu0 %v4635_v55  ;;  %v4731_v55 = vld [vmem:[%s6237_s1 + $0xc84] ss:$8 sps:$4 sm:$0xff]  }
 0x12b   : > { %3139 = vmatpush1.bf16.msra.mxu1 %v4630_v56  ;;  %v4726_v56 = vld [vmem:[%s6237_s1 + $0x580] ss:$8 sps:$4 sm:$0xff]  }
 0x12c   : > { %3440 = vmatpush1.bf16.msra.mxu0 %v4633_v57  ;;  %3140 = vmatprep.subr.bf16.mxu1 %v4638_v58  ;;  %v4729_v57 = vld [vmem:[%s6237_s1 + $0xc80] ss:$8 sps:$4 sm:$0xff]   ;;  %v4734_v58 = vld [vmem:[%s6237_s1 + $0x594] ss:$8 sps:$4 sm:$0xff]  }
 0x12d   : > { %3441 = vmatprep.subr.bf16.mxu0 %v4641_v59  ;;  %v4737_v59 = vld [vmem:[%s6237_s1 + $0xc94] ss:$8 sps:$4 sm:$0xff]  }
 0x12f   : > { %3141 = vmatpush1.bf16.msra.mxu1 %v4636_v60  ;;  %v4732_v60 = vld [vmem:[%s6237_s1 + $0x590] ss:$8 sps:$4 sm:$0xff]  }
 0x130   : > { %3442 = vmatpush1.bf16.msra.mxu0 %v4639_v61  ;;  %3142 = vmatprep.subr.bf16.mxu1 %v4644_v62  ;;  %v4735_v61 = vld [vmem:[%s6237_s1 + $0xc90] ss:$8 sps:$4 sm:$0xff]   ;;  %v4740_v62 = vld [vmem:[%s6237_s1 + $0x5a4] ss:$8 sps:$4 sm:$0xff]  }
 0x131   : > { %3443 = vmatprep.subr.bf16.mxu0 %v4647_v63  ;;  %v4743_v63 = vld [vmem:[%s6237_s1 + $0xca4] ss:$8 sps:$4 sm:$0xff]  }
 0x133   : > { %3143 = vmatpush1.bf16.msra.mxu1 %v4642_v0  ;;  %v4738_v0 = vld [vmem:[%s6237_s1 + $0x5a0] ss:$8 sps:$4 sm:$0xff]  }
 0x134   : > { %3444 = vmatpush1.bf16.msra.mxu0 %v4645_v1  ;;  %3144 = vmatprep.subr.bf16.mxu1 %v4650_v2  ;;  %v4741_v1 = vld [vmem:[%s6237_s1 + $0xca0] ss:$8 sps:$4 sm:$0xff]   ;;  %v4746_v2 = vld [vmem:[%s6237_s1 + $0x5b4] ss:$8 sps:$4 sm:$0xff]  }
 0x135   : > { %3445 = vmatprep.subr.bf16.mxu0 %v4653_v3  ;;  %v4749_v3 = vld [vmem:[%s6237_s1 + $0xcb4] ss:$8 sps:$4 sm:$0xff]  }
 0x137   : > { %3145 = vmatpush1.bf16.msra.mxu1 %v4648_v4  ;;  %v4744_v4 = vld [vmem:[%s6237_s1 + $0x5b0] ss:$8 sps:$4 sm:$0xff]  }
 0x138   : > { %3446 = vmatpush1.bf16.msra.mxu0 %v4651_v5  ;;  %3146 = vmatprep.subr.bf16.mxu1 %v4656_v6  ;;  %v4747_v5 = vld [vmem:[%s6237_s1 + $0xcb0] ss:$8 sps:$4 sm:$0xff]   ;;  %v4752_v6 = vld [vmem:[%s6237_s1 + $0x5c4] ss:$8 sps:$4 sm:$0xff]  }
 0x139   : > { %3447 = vmatprep.subr.bf16.mxu0 %v4659_v7  ;;  %v4755_v7 = vld [vmem:[%s6237_s1 + $0xcc4] ss:$8 sps:$4 sm:$0xff]  }
 0x13b   : > { %3147 = vmatpush1.bf16.msra.mxu1 %v4654_v8  ;;  %v4750_v8 = vld [vmem:[%s6237_s1 + $0x5c0] ss:$8 sps:$4 sm:$0xff]  }
 0x13c   : > { %3448 = vmatpush1.bf16.msra.mxu0 %v4657_v9  ;;  %3148 = vmatprep.subr.bf16.mxu1 %v4662_v10  ;;  %v4753_v9 = vld [vmem:[%s6237_s1 + $0xcc0] ss:$8 sps:$4 sm:$0xff]   ;;  %v4758_v10 = vld [vmem:[%s6237_s1 + $0x5d4] ss:$8 sps:$4 sm:$0xff]  }
 0x13d   : > { %3449 = vmatprep.subr.bf16.mxu0 %v4665_v11  ;;  %v4761_v11 = vld [vmem:[%s6237_s1 + $0xcd4] ss:$8 sps:$4 sm:$0xff]  }
 0x13f   : > { %3149 = vmatpush1.bf16.msra.mxu1 %v4660_v12  ;;  %v4756_v12 = vld [vmem:[%s6237_s1 + $0x5d0] ss:$8 sps:$4 sm:$0xff]  }
 0x140   : > { %3450 = vmatpush1.bf16.msra.mxu0 %v4663_v13  ;;  %3150 = vmatprep.subr.bf16.mxu1 %v4668_v14  ;;  %v4759_v13 = vld [vmem:[%s6237_s1 + $0xcd0] ss:$8 sps:$4 sm:$0xff]   ;;  %v4764_v14 = vld [vmem:[%s6237_s1 + $0x5e4] ss:$8 sps:$4 sm:$0xff]  }
 0x141   : > { %3451 = vmatprep.subr.bf16.mxu0 %v4671_v15  ;;  %v4767_v15 = vld [vmem:[%s6237_s1 + $0xce4] ss:$8 sps:$4 sm:$0xff]  }
 0x143   : > { %3151 = vmatpush1.bf16.msra.mxu1 %v4666_v16  ;;  %v4762_v16 = vld [vmem:[%s6237_s1 + $0x5e0] ss:$8 sps:$4 sm:$0xff]  }
 0x144   : > { %3452 = vmatpush1.bf16.msra.mxu0 %v4669_v17  ;;  %3163 = vmatprep.subr.bf16.mxu1 %v4677_v18  ;;  %v4765_v17 = vld [vmem:[%s6237_s1 + $0xce0] ss:$8 sps:$4 sm:$0xff]   ;;  %v4770_v18 = vld [vmem:[%s6237_s1 + $0x5f4] ss:$8 sps:$4 sm:$0xff]  }
 0x145   : > { %3464 = vmatprep.subr.bf16.mxu0 %v4683_v19  ;;  %v4773_v19 = vld [vmem:[%s6237_s1 + $0xcf4] ss:$8 sps:$4 sm:$0xff]  }
 0x146   : > { %3153 = vmatmul.mubr.bf16.vlgmr.msra.gmra.mrb[0].mxu1 %v4672_v20  ;;  %v4768_v20 = vld [vmem:[%s6237_s1 + $0x5f0] ss:$8 sps:$4 sm:$0xff]  }
 0x147   : > { %3454 = vmatmul.mubr.bf16.vlgmr.msra.gmra.mrb[0].mxu0 %v4678_v21  ;;  %3164 = vmatpush1.bf16.msra.mxu1 %v4675_v22  ;;  %v4771_v21 = vld [vmem:[%s6237_s1 + $0xcf0] ss:$8 sps:$4 sm:$0xff]   ;;  %v4779_v22 = vld [vmem:[%s6237_s1 + $0x604] ss:$8 sps:$4 sm:$0xff]  }
 0x148   : > { %3465 = vmatpush1.bf16.msra.mxu0 %v4681_v23  ;;  %3165 = vmatprep.subr.bf16.mxu1 %v4686_v24  ;;  %v4785_v23 = vld [vmem:[%s6237_s1 + $0xd04] ss:$8 sps:$4 sm:$0xff]   ;;  %v4774_v24 = vld [vmem:[%s5036_s13 + $0x28] ss:$108 sps:$4 sm:$0xff]  }
 0x149   : > { %3466 = vmatprep.subr.bf16.mxu0 %v4689_v25  ;;  %3195 = vmatprep.mubr.bf16.mxu1 %v4776_v26  ;;  %v4780_v25 = vld [vmem:[%s5036_s13 + $0x60] ss:$108 sps:$4 sm:$0xff]  }
 0x14a   : > { %3496 = vmatprep.mubr.bf16.mxu0 %v4782_v27  ;;  %v4777_v26 = vld [vmem:[%s6237_s1 + $0x600] ss:$8 sps:$4 sm:$0xff]  }
 0x14b   : > { %3166 = vmatpush1.bf16.msra.mxu1 %v4684_v28  ;;  %v4783_v27 = vld [vmem:[%s6237_s1 + $0xd00] ss:$8 sps:$4 sm:$0xff]   ;;  %v4788_v28 = vld [vmem:[%s6237_s1 + $0x614] ss:$8 sps:$4 sm:$0xff]  }
 0x14c   : > { %3467 = vmatpush1.bf16.msra.mxu0 %v4687_v29  ;;  %3167 = vmatprep.subr.bf16.mxu1 %v4692_v30  ;;  %v4791_v29 = vld [vmem:[%s6237_s1 + $0xd14] ss:$8 sps:$4 sm:$0xff]  }
 0x14d   : > { %3468 = vmatprep.subr.bf16.mxu0 %v4695_v31  ;;  %v4855_v30 = vld [vmem:[%s5036_s13 + $0x34] ss:$108 sps:$4 sm:$0xff]   ;;  %v4786_v31 = vld [vmem:[%s6237_s1 + $0x610] ss:$8 sps:$4 sm:$0xff]  }
 0x14f   : > { %3168 = vmatpush1.bf16.msra.mxu1 %v4690_v32  ;;  %v4789_v32 = vld [vmem:[%s6237_s1 + $0xd10] ss:$8 sps:$4 sm:$0xff]  }
 0x150   : > { %3469 = vmatpush1.bf16.msra.mxu0 %v4693_v33  ;;  %3169 = vmatprep.subr.bf16.mxu1 %v4698_v34  ;;  %v4794_v33 = vld [vmem:[%s6237_s1 + $0x624] ss:$8 sps:$4 sm:$0xff]  }
 0x151   : > { %3470 = vmatprep.subr.bf16.mxu0 %v4701_v35  ;;  %v4797_v34 = vld [vmem:[%s6237_s1 + $0xd24] ss:$8 sps:$4 sm:$0xff]   ;;  %v4864_v35 = vmov 0  }
 0x153   : > { %3170 = vmatpush1.bf16.msra.mxu1 %v4696_v36  ;;  %v4792_v36 = vld [vmem:[%s6237_s1 + $0x620] ss:$8 sps:$4 sm:$0xff]  }
 0x154   : > { %3471 = vmatpush1.bf16.msra.mxu0 %v4699_v37  ;;  %3171 = vmatprep.subr.bf16.mxu1 %v4704_v38  ;;  %v4795_v37 = vld [vmem:[%s6237_s1 + $0xd20] ss:$8 sps:$4 sm:$0xff]   ;;  %v4800_v38 = vld [vmem:[%s6237_s1 + $0x634] ss:$8 sps:$4 sm:$0xff]  }
 0x155   : > { %3472 = vmatprep.subr.bf16.mxu0 %v4707_v39  ;;  %v4803_v39 = vld [vmem:[%s6237_s1 + $0xd34] ss:$8 sps:$4 sm:$0xff]  }
 0x157   : > { %3172 = vmatpush1.bf16.msra.mxu1 %v4702_v40  ;;  %v4798_v40 = vld [vmem:[%s6237_s1 + $0x630] ss:$8 sps:$4 sm:$0xff]  }
 0x158   : > { %3473 = vmatpush1.bf16.msra.mxu0 %v4705_v41  ;;  %3173 = vmatprep.subr.bf16.mxu1 %v4710_v42  ;;  %v4801_v41 = vld [vmem:[%s6237_s1 + $0xd30] ss:$8 sps:$4 sm:$0xff]   ;;  %v4806_v42 = vld [vmem:[%s6237_s1 + $0x644] ss:$8 sps:$4 sm:$0xff]  }
 0x159   : > { %3474 = vmatprep.subr.bf16.mxu0 %v4713_v43  ;;  %v4809_v43 = vld [vmem:[%s6237_s1 + $0xd44] ss:$8 sps:$4 sm:$0xff]  }
 0x15b   : > { %3174 = vmatpush1.bf16.msra.mxu1 %v4708_v44  ;;  %v4804_v44 = vld [vmem:[%s6237_s1 + $0x640] ss:$8 sps:$4 sm:$0xff]  }
 0x15c   : > { %3475 = vmatpush1.bf16.msra.mxu0 %v4711_v45  ;;  %3175 = vmatprep.subr.bf16.mxu1 %v4716_v46  ;;  %v4807_v45 = vld [vmem:[%s6237_s1 + $0xd40] ss:$8 sps:$4 sm:$0xff]   ;;  %v4812_v46 = vld [vmem:[%s6237_s1 + $0x654] ss:$8 sps:$4 sm:$0xff]  }
 0x15d   : > { %3476 = vmatprep.subr.bf16.mxu0 %v4719_v47  ;;  %v4815_v47 = vld [vmem:[%s6237_s1 + $0xd54] ss:$8 sps:$4 sm:$0xff]  }
 0x15f   : > { %3176 = vmatpush1.bf16.msra.mxu1 %v4714_v48  ;;  %v4810_v48 = vld [vmem:[%s6237_s1 + $0x650] ss:$8 sps:$4 sm:$0xff]  }
 0x160   : > { %3477 = vmatpush1.bf16.msra.mxu0 %v4717_v49  ;;  %3177 = vmatprep.subr.bf16.mxu1 %v4722_v50  ;;  %v4813_v49 = vld [vmem:[%s6237_s1 + $0xd50] ss:$8 sps:$4 sm:$0xff]   ;;  %v4818_v50 = vld [vmem:[%s6237_s1 + $0x664] ss:$8 sps:$4 sm:$0xff]  }
 0x161   : > { %3478 = vmatprep.subr.bf16.mxu0 %v4725_v51  ;;  %v4821_v51 = vld [vmem:[%s6237_s1 + $0xd64] ss:$8 sps:$4 sm:$0xff]  }
 0x163   : > { %3178 = vmatpush1.bf16.msra.mxu1 %v4720_v52  ;;  %v4816_v52 = vld [vmem:[%s6237_s1 + $0x660] ss:$8 sps:$4 sm:$0xff]  }
 0x164   : > { %3479 = vmatpush1.bf16.msra.mxu0 %v4723_v53  ;;  %3179 = vmatprep.subr.bf16.mxu1 %v4728_v54  ;;  %v4819_v53 = vld [vmem:[%s6237_s1 + $0xd60] ss:$8 sps:$4 sm:$0xff]   ;;  %v4824_v54 = vld [vmem:[%s6237_s1 + $0x674] ss:$8 sps:$4 sm:$0xff]  }
 0x165   : > { %3480 = vmatprep.subr.bf16.mxu0 %v4731_v55  ;;  %v4827_v55 = vld [vmem:[%s6237_s1 + $0xd74] ss:$8 sps:$4 sm:$0xff]  }
 0x167   : > { %3180 = vmatpush1.bf16.msra.mxu1 %v4726_v56  ;;  %v4822_v56 = vld [vmem:[%s6237_s1 + $0x670] ss:$8 sps:$4 sm:$0xff]  }
 0x168   : > { %3481 = vmatpush1.bf16.msra.mxu0 %v4729_v57  ;;  %3181 = vmatprep.subr.bf16.mxu1 %v4734_v58  ;;  %v4825_v57 = vld [vmem:[%s6237_s1 + $0xd70] ss:$8 sps:$4 sm:$0xff]   ;;  %v4830_v58 = vld [vmem:[%s6237_s1 + $0x684] ss:$8 sps:$4 sm:$0xff]  }
 0x169   : > { %3482 = vmatprep.subr.bf16.mxu0 %v4737_v59  ;;  %v4831_v59 = vld [vmem:[%s5036_s13 + $0x68] ss:$108 sps:$4 sm:$0xff]  }
 0x16b   : > { %3182 = vmatpush1.bf16.msra.mxu1 %v4732_v60  ;;  %v4828_v60 = vld [vmem:[%s6237_s1 + $0x680] ss:$8 sps:$4 sm:$0xff]  }
 0x16c   : > { %3483 = vmatpush1.bf16.msra.mxu0 %v4735_v61  ;;  %3183 = vmatprep.subr.bf16.mxu1 %v4740_v62  ;;  %v4834_v61 = vld [vmem:[%s6237_s1 + $0x694] ss:$8 sps:$4 sm:$0xff]   ;;  %v4832_v62 = vld [vmem:[%s6237_s1 + $0x690] ss:$8 sps:$4 sm:$0xff]  }
 0x16d   : > { %3484 = vmatprep.subr.bf16.mxu0 %v4743_v63  ;;  %v4837_v63 = vld [vmem:[%s6237_s1 + $0x6a4] ss:$8 sps:$4 sm:$0xff]  }
 0x16f   : > { %3184 = vmatpush1.bf16.msra.mxu1 %v4738_v0  ;;  %v4835_v0 = vld [vmem:[%s6237_s1 + $0x6a0] ss:$8 sps:$4 sm:$0xff]  }
 0x170   : > { %3485 = vmatpush1.bf16.msra.mxu0 %v4741_v1  ;;  %3185 = vmatprep.subr.bf16.mxu1 %v4746_v2  ;;  %v4840_v1 = vld [vmem:[%s6237_s1 + $0x6b4] ss:$8 sps:$4 sm:$0xff]   ;;  %v4838_v2 = vld [vmem:[%s6237_s1 + $0x6b0] ss:$8 sps:$4 sm:$0xff]  }
 0x171   : > { %3486 = vmatprep.subr.bf16.mxu0 %v4749_v3  ;;  %v4843_v3 = vld [vmem:[%s6237_s1 + $0x6c4] ss:$8 sps:$4 sm:$0xff]  }
 0x173   : > { %3186 = vmatpush1.bf16.msra.mxu1 %v4744_v4  ;;  %v4841_v4 = vld [vmem:[%s6237_s1 + $0x6c0] ss:$8 sps:$4 sm:$0xff]  }
 0x174   : > { %3487 = vmatpush1.bf16.msra.mxu0 %v4747_v5  ;;  %3187 = vmatprep.subr.bf16.mxu1 %v4752_v6  ;;  %v4846_v5 = vld [vmem:[%s6237_s1 + $0x6d4] ss:$8 sps:$4 sm:$0xff]   ;;  %v4844_v6 = vld [vmem:[%s6237_s1 + $0x6d0] ss:$8 sps:$4 sm:$0xff]  }
 0x175   : > { %3488 = vmatprep.subr.bf16.mxu0 %v4755_v7  ;;  %v4849_v7 = vld [vmem:[%s6237_s1 + $0x6e4] ss:$8 sps:$4 sm:$0xff]  }
 0x177   : > { %3188 = vmatpush1.bf16.msra.mxu1 %v4750_v8  ;;  %v4847_v8 = vld [vmem:[%s6237_s1 + $0x6e0] ss:$8 sps:$4 sm:$0xff]  }
 0x178   : > { %3489 = vmatpush1.bf16.msra.mxu0 %v4753_v9  ;;  %3189 = vmatprep.subr.bf16.mxu1 %v4758_v10  ;;  %v4852_v9 = vld [vmem:[%s6237_s1 + $0x6f4] ss:$8 sps:$4 sm:$0xff]   ;;  %v4850_v10 = vld [vmem:[%s6237_s1 + $0x6f0] ss:$8 sps:$4 sm:$0xff]  }
 0x179   : > { %3490 = vmatprep.subr.bf16.mxu0 %v4761_v11  ;;  %v4853_v11 = vld [vmem:[%s5036_s13 + $0x30] ss:$108 sps:$4 sm:$0xff]   ;;  %s4099_s13 = sshll.u32 %s6241_s24, 3 }
 0x17a   : > { %s177_s18 = scalar_lea.vmem %s6239_s3, %s4099_s13 }
 0x17b   : > { %3190 = vmatpush1.bf16.msra.mxu1 %v4756_v12 }
 0x17c   : > { %3491 = vmatpush1.bf16.msra.mxu0 %v4759_v13  ;;  %3191 = vmatprep.subr.bf16.mxu1 %v4764_v14 }
 0x17d   : > { %3492 = vmatprep.subr.bf16.mxu0 %v4767_v15 }
 0x17f   : > { %3192 = vmatpush1.bf16.msra.mxu1 %v4762_v16  ;;  %v642_v16 = vlaneseq }
 0x180   : > { %3493 = vmatpush1.bf16.msra.mxu0 %v4765_v17  ;;  %3193 = vmatprep.subr.bf16.mxu1 %v4770_v18 }
 0x181   : > { %3494 = vmatprep.subr.bf16.mxu0 %v4773_v19  ;;  %v643_v17 = vshrl.u32 %v642_v16, 7  ;;  %v640_v19 = vld [vmem:[%s6238_s2] sm:$0x3] }
 0x183   : > { %3194 = vmatpush1.bf16.msra.mxu1 %v4768_v20  ;;  %v644_v18 = vsub.s32 0, %v643_v17  ;;  %v648_v20 = vsub.s32 1, %v643_v17 }
 0x184   : > { %3495 = vmatpush1.bf16.msra.mxu0 %v4771_v21  ;;  %3206 = vmatprep.subr.bf16.mxu1 %v4779_v22 }
 0x185   : > { %3507 = vmatprep.subr.bf16.mxu0 %v4785_v23  ;;  %v645_v21 = vrot.slane %v640_v19, %v644_v18  ;;  %v649_v22 = vrot.slane %v640_v19, %v648_v20 }
 0x186   : > { %3196 = vmatmul.mubr.bf16.vlgmr.msra.gmra.mrb[0].mxu1 %v4774_v24 }
 0x187   : > { %3497 = vmatmul.mubr.bf16.vlgmr.msra.gmra.mrb[0].mxu0 %v4780_v25  ;;  %3207 = vmatpush1.bf16.msra.mxu1 %v4777_v26 }
 0x188   : > { %3508 = vmatpush1.bf16.msra.mxu0 %v4783_v27  ;;  %3208 = vmatprep.subr.bf16.mxu1 %v4788_v28 }
 0x189   : > { %3509 = vmatprep.subr.bf16.mxu0 %v4791_v29  ;;  %3539 = vmatprep.mubr.bf16.mxu0 %v4864_v35 }
 0x18a   : > { %3238 = vmatprep.mubr.bf16.mxu1 %v4855_v30 }
 0x18b   : > { %3209 = vmatpush1.bf16.msra.mxu1 %v4786_v31 }
 0x18c   : > { %3510 = vmatpush1.bf16.msra.mxu0 %v4789_v32  ;;  %3210 = vmatprep.subr.bf16.mxu1 %v4794_v33 }
 0x18d   : > { %3511 = vmatprep.subr.bf16.mxu0 %v4797_v34 }
 0x18f   : > { %3211 = vmatpush1.bf16.msra.mxu1 %v4792_v36 }
 0x190   : > { %3512 = vmatpush1.bf16.msra.mxu0 %v4795_v37  ;;  %3212 = vmatprep.subr.bf16.mxu1 %v4800_v38 }
 0x191   : > { %3513 = vmatprep.subr.bf16.mxu0 %v4803_v39 }
 0x193   : > { %3213 = vmatpush1.bf16.msra.mxu1 %v4798_v40 }
 0x194   : > { %3514 = vmatpush1.bf16.msra.mxu0 %v4801_v41  ;;  %3214 = vmatprep.subr.bf16.mxu1 %v4806_v42 }
 0x195   : > { %3515 = vmatprep.subr.bf16.mxu0 %v4809_v43 }
 0x197   : > { %3215 = vmatpush1.bf16.msra.mxu1 %v4804_v44 }
 0x198   : > { %3516 = vmatpush1.bf16.msra.mxu0 %v4807_v45  ;;  %3216 = vmatprep.subr.bf16.mxu1 %v4812_v46 }
 0x199   : > { %3517 = vmatprep.subr.bf16.mxu0 %v4815_v47 }
 0x19b   : > { %3217 = vmatpush1.bf16.msra.mxu1 %v4810_v48 }
 0x19c   : > { %3518 = vmatpush1.bf16.msra.mxu0 %v4813_v49  ;;  %3218 = vmatprep.subr.bf16.mxu1 %v4818_v50 }
 0x19d   : > { %3519 = vmatprep.subr.bf16.mxu0 %v4821_v51 }
 0x19f   : > { %3219 = vmatpush1.bf16.msra.mxu1 %v4816_v52 }
 0x1a0   : > { %3520 = vmatpush1.bf16.msra.mxu0 %v4819_v53  ;;  %3220 = vmatprep.subr.bf16.mxu1 %v4824_v54 }
 0x1a1   : > { %3521 = vmatprep.subr.bf16.mxu0 %v4827_v55 }
 0x1a3   : > { %3221 = vmatpush1.bf16.msra.mxu1 %v4822_v56 }
 0x1a4   : > { %3522 = vmatpush1.bf16.msra.mxu0 %v4825_v57  ;;  %3222 = vmatprep.subr.bf16.mxu1 %v4830_v58 }
 0x1a7   : > { %3540 = vmatmul.mubr.bf16.vlgmr.msra.gmra.mrb[0].mxu0 %v4831_v59  ;;  %3223 = vmatpush1.bf16.msra.mxu1 %v4828_v60 }
 0x1a8   : > { %3224 = vmatprep.subr.bf16.mxu1 %v4834_v61 }
 0x1ab   : > { %3225 = vmatpush1.bf16.msra.mxu1 %v4832_v62 }
 0x1ac   : > { %3226 = vmatprep.subr.bf16.mxu1 %v4837_v63 }
 0x1af   : > { %3227 = vmatpush1.bf16.msra.mxu1 %v4835_v0 }
 0x1b0   : > { %3228 = vmatprep.subr.bf16.mxu1 %v4840_v1 }
 0x1b3   : > { %3229 = vmatpush1.bf16.msra.mxu1 %v4838_v2 }
 0x1b4   : > { %3230 = vmatprep.subr.bf16.mxu1 %v4843_v3 }
 0x1b7   : > { %3231 = vmatpush1.bf16.msra.mxu1 %v4841_v4 }
 0x1b8   : > { %3232 = vmatprep.subr.bf16.mxu1 %v4846_v5 }
 0x1bb   : > { %3233 = vmatpush1.bf16.msra.mxu1 %v4844_v6 }
 0x1bc   : > { %3234 = vmatprep.subr.bf16.mxu1 %v4849_v7 }
 0x1bf   : > { %3235 = vmatpush1.bf16.msra.mxu1 %v4847_v8 }
 0x1c0   : > { %3236 = vmatprep.subr.bf16.mxu1 %v4852_v9 }
 0x1c3   : > { %3237 = vmatpush1.bf16.msra.mxu1 %v4850_v10 }
 0x1c6   : > { %3239 = vmatmul.mubr.bf16.vlgmr.msra.gmra.mrb[0].mxu1 %v4853_v11 }
 0x27a   : > { %v3541_v12 = vpop.f32.mrb[0].mxu0 }
 0x27b   : > { %v3543_v13 = vpop.f32.mrb[1].mxu0 }
 0x27c   : > { %v3545_v14 = vpop.f32.mrb[2].mxu0 }
 0x27d   : > { %v3547_v15 = vpop.f32.mrb[3].mxu0 }
 0x299   : > { %v3240_v23 = vpop.f32.mrb[0].mxu1 }
 0x29a   : > { %v4102_v24 = vadd.f32 %v3240_v23, %v645_v21  ;;  %v3242_v25 = vpop.f32.mrb[1].mxu1 }
 0x29b   : > { %v4104_v26 = vadd.f32 %v3242_v25, %v649_v22  ;;  %v3244_v27 = vpop.f32.mrb[2].mxu1 }
 0x29c   : > { %v4103_v28 = vadd.f32 %v4102_v24, %v3541_v12  ;;  %v4106_v29 = vadd.f32 %v3244_v27, %v645_v21  ;;  %v3246_v30 = vpop.f32.mrb[3].mxu1 }
 0x29d   : > { %v4105_v31 = vadd.f32 %v4104_v26, %v3543_v13  ;;  %v4108_v32 = vadd.f32 %v3246_v30, %v649_v22 }
 0x29e   : > { %v3550_v33 = vmax.f32 %v4103_v28, 0.0  ;;  %v4107_v34 = vadd.f32 %v4106_v29, %v3545_v14 }
 0x29f   : > { %v3551_v35 = vmax.f32 %v4105_v31, 0.0  ;;  %v4109_v36 = vadd.f32 %v4108_v32, %v3547_v15 }
 0x2a0   : > { %v3552_v37 = vmax.f32 %v4107_v34, 0.0 }
 0x2a1   : > { %v4100_v38 = vpack.c.bf16 %v3551_v35, %v3550_v33  ;;  %v3553_v39 = vmax.f32 %v4109_v36, 0.0 }
 0x2a3   : > { %3566 = vst [vmem:[%s177_s18] sm:$0xff] %v4100_v38  ;;  %v4101_v40 = vpack.c.bf16 %v3553_v39, %v3552_v37 }
 0x2a5   : > { %3567 = vst [vmem:[%s177_s18 + $0x8] sm:$0xff] %v4101_v40 }
 0x2a6 PF: > { %s13_s12 = sadd.s32 1, %s4862_s12  }
 0x2a7   : > { %p10_p4 = scmp.ge.s32.totalorder %s13_s12, 4  }
 0x2a9   :  { %12 = sbr.rel (!%p10_p4) target bundleno = 1 (0x1), region = 62 }

// kernel: alexnet_fc_forward.15
= control target key start
LH: loop header
LB: loop body
LE: loop exit
PB: predicated region body
PF: predicated region fallthrough
CT: control target
= control target key end

     0   :  { %s458_s6 = smov 0   ;;  %s460_s7 = smov 0   ;;  %s549_s0 = inlined_call_operand.vmem [shape: bf16[2,3,3,256], index: 0, kind: input, shape index: {}]   ;;  %s550_s1 = inlined_call_operand.vmem [shape: bf16[2,1,1,256], index: 1, kind: output, shape index: {}]  }
   0x1   :  { %s462_s8 = smov 0   ;;  %s464_s9 = smov 0  }
   0x2   :  { %s466_s10 = smov 0   ;;  %s468_s11 = smov 0  }
   0x3   :  { %s470_s12 = smov 0  }
   0x4 LB: > { %s20_s13 = sadd.s32 1, %s438_s10  ;;  %s23_s14 = sadd.s32 1, %s442_s11  ;;  %s446_s12 = sphi %s470_s12, %s11_s12   ;;  %s442_s11 = sphi %s468_s11, %s556_s11   ;;  %s438_s10 = sphi %s466_s10, %s555_s10   ;;  %s434_s9 = sphi %s464_s9, %s554_s9   ;;  %s430_s8 = sphi %s462_s8, %s553_s8   ;;  %s426_s7 = sphi %s460_s7, %s552_s7   ;;  %s422_s6 = sphi %s458_s6, %s551_s6  }
   0x5   : > { %p21_p0 = scmp.ge.s32.totalorder %s20_s13, 2  ;;  %p39_p1 = scmp.ne.s32.totalorder %s426_s7, %s422_s6 }
   0x6   : > { %p40_p2 = scmp.eq.s32.totalorder %s446_s12, 0  ;;  %s32_s18 = sadd.s32 1, %s426_s7 }
   0x7   : > { %s558_s13 = smov (%p21_p0, %s20_s13), 0  ;;  %s560_s14 = smov (!%p21_p0, %s23_s14), %s442_s11 }
   0x8   : > { %p41_p3 = por %p40_p2, %p39_p1  ;;  %p25_p4 = scmp.ge.s32.totalorder %s560_s14, 2 }
   0x9   : > { %s28_s15 = ssub.s32 %s438_s10, %s558_s13  ;;  %p321_p6 = scmp.ge.s32.totalorder %s446_s12, 4 }
   0xa   : > { %s562_s14 = smov (%p25_p4, %s560_s14), 0 }
   0xb   : > { %s27_s16 = ssub.s32 %s442_s11, %s562_s14  ;;  %93 = sbr.rel (%p321_p6) target bundleno = 27 (0x1b), region = 16 }
   0xc   : > { %s29_s17 = sor.u32 %s28_s15, %s27_s16 }
   0xd   : > { %p30_p5 = scmp.eq.s32.totalorder %s29_s17, 0 }
   0xf   : > { %s509_s19 = scalar_select %p30_p5, %s426_s7, %s32_s18  }
  0x12   : > { %96 = sbr.rel (!%p41_p3) target bundleno = 27 (0x1b), region = 20  ;;  %s98_s20 = sand.u32 (%p41_p3), 1, %s426_s7  }
  0x13   : > { %s334_s21 = smul.u32 (%p41_p3), 6, %s442_s11 }
  0x14   : > { %s333_s22 = smul.u32 (%p41_p3), 6, %s98_s20 }
  0x15   : > { %s102_s23 = sadd.s32 (%p41_p3), %s438_s10, %s334_s21 }
  0x16   : > { %s322_s24 = sshll.u32 (%p41_p3), %s102_s23, 1  ;;  %s100_s28 = scalar_lea.vmem (%p41_p3), [#allocation4], %s333_s22 }
  0x17   : > { %s104_s27 = scalar_lea.vmem (%p41_p3), %s549_s0, %s322_s24 }
  0x18   : > { %v120_v0 = vld [vmem:[%s104_s27] sm:$0x3] (%p41_p3)  ;;  %v122_v1 = vld [vmem:[%s104_s27 + $0x4] sm:$0x3] (%p41_p3)  ;;  %v124_v2 = vld [vmem:[%s104_s27 + $0x8] sm:$0x3] (%p41_p3) }
  0x19   : > { %121 = vst [vmem:[%s100_s28] sm:$0x3] %v120_v0  ;;  %123 = vst [vmem:[%s100_s28 + $0x2] sm:$0x3] %v122_v1 }
  0x1a   : > { %125 = vst [vmem:[%s100_s28 + $0x4] sm:$0x3] %v124_v2 }
  0x1b PF: > { %p323_p7 = scmp.ge.s32.totalorder %s446_s12, 1  ;;  %p145_p8 = scmp.lt.s32.totalorder %s446_s12, 5 }
  0x1d   : > { %p146_p9 = pnand %p323_p7, %p145_p8 }
  0x1e   : > { %s152_s29 = sand.u32 (!%p146_p9), 1, %s422_s6   ;;  %p173_p10 = scmp.lt.s32.totalorder (!%p146_p9), %s434_s9, 1  ;;  %vm230_vm0 = vcmask (!%p146_p9), 1040384   ;;  %vm231_vm1 = vsmask.f32 (!%p146_p9), 256 }
  0x1f   : > { %149 = sbr.rel (%p146_p9) target bundleno = 68 (0x44), region = 54  ;;  %p175_p11 = scmp.lt.s32.totalorder (!%p146_p9), %s430_s8, 1  ;;  %vm232_vm2 = vmand (!%p146_p9), %vm230_vm0, %vm231_vm1 }
  0x20   : > { %s335_s30 = smul.u32 (!%p146_p9), 6, %s152_s29 }
  0x22   : > { %s154_s2 = scalar_lea.vmem (!%p146_p9), [#allocation4], %s335_s30 }
  0x23   : > { %v180_v3 = vld [vmem:[%s154_s2] sm:$0x3] (!%p146_p9)  ;;  %v181_v4 = vld [vmem:[%s154_s2 + $0x2] sm:$0x3] (!%p146_p9)  ;;  %v182_v5 = vld [vmem:[%s154_s2 + $0x4] sm:$0x3] (!%p146_p9) }
  0x24   : > { %v183_v6 = vunpack.c.l.bf16 (!%p146_p9), %v180_v3  ;;  %v184_v7 = vunpack.c.l.bf16 (!%p146_p9), %v181_v4  ;;  %v185_v8 = vunpack.c.l.bf16 (!%p146_p9), %v182_v5 }
  0x26   : > { %v325_v9 = vrot.slane %v183_v6, 9  ;;  %v328_v10 = vrot.slane %v183_v6, 10  ;;  %v326_v11 = vrot.slane %v184_v7, 9  ;;  %v329_v12 = vrot.slane %v184_v7, 10  ;;  %s564_s9 = smov (!%p173_p10, %s434_s9), 1  ;;  %s566_s8 = smov (!%p175_p11, %s430_s8), 1 }
  0x27   : > { %v327_v13 = vrot.slane %v185_v8, 9  ;;  %v330_v14 = vrot.slane %v185_v8, 10  ;;  %s324_s3 = sshll.u32 %s564_s9, 1 }
  0x28   : > { %v198_v15 = vmax.f32 %v183_v6, %v325_v9  ;;  %v199_v16 = vmax.f32 %v184_v7, %v326_v11  ;;  %s178_s4 = sadd.s32 %s324_s3, %s566_s8 }
  0x29   : > { %v200_v17 = vmax.f32 %v185_v8, %v327_v13  ;;  %s179_s15 = scalar_lea.vmem %s550_s1, %s178_s4 }
  0x2a   : > { %v210_v18 = vmax.f32 %v198_v15, %v328_v10  ;;  %v211_v19 = vmax.f32 %v199_v16, %v329_v12  ;;  %v233_v28 = vld [vmem:[%s179_s15] sm:$0x1] }
  0x2b   : > { %v212_v20 = vmax.f32 %v200_v17, %v330_v14 }
  0x2c   : > { %213 = vst [vmem:[#allocation2] sm:$0x1] %v210_v18  ;;  %214 = vst [vmem:[#allocation2 + $0x1] sm:$0x1] %v211_v19 }
  0x2d   : > { %215 = vst [vmem:[#allocation2 + $0x2] sm:$0x1] %v212_v20 }
  0x33   : > { %v216_v21 = vld [vmem:[#allocation2] sm:$0x3]  }
  0x34   : > { %219 = vst [vmem:[#allocation3] sm:$0x3] %v216_v21   ;;  %v218_v22 = vld [vmem:[#allocation2 + $0x2] sm:$0x1] }
  0x35   : > { %221 = vst [vmem:[#allocation3 + $0x2] sm:$0x1] %v218_v22 }
  0x3b   : > { %v222_v23 = vld [vmem:[#allocation3] sm:$0x1]  ;;  %v224_v24 = vld [vmem:[#allocation3 + $0x1] sm:$0x1] }
  0x3c   : > { %v225_v25 = vmax.f32 %v222_v23, %v224_v24  ;;  %v227_v26 = vld [vmem:[#allocation3 + $0x2] sm:$0x1] }
  0x3e   : > { %v228_v27 = vmax.f32 %v225_v25, %v227_v26 }
  0x40   : > { %v229_v29 = vpack.c.bf16 %v228_v27, %v228_v27 }
  0x42   : > { %v234_v30 = vsel %vm232_vm2, %v229_v29, %v233_v28 }
  0x43   : > { %235 = vst [vmem:[%s179_s15] sm:$0x1] %v234_v30 }
  0x44 PF: > { %s11_s12 = sadd.s32 1, %s446_s12   ;;  %s551_s6 = smov %s426_s7 }
  0x45   : > { %p8_p12 = scmp.ge.s32.totalorder %s11_s12, 6   ;;  %s552_s7 = smov %s509_s19 }
  0x46   : > { %s553_s8 = smov %s438_s10  ;;  %s554_s9 = smov %s442_s11 }
  0x47   : > { %s555_s10 = smov %s558_s13  ;;  %s556_s11 = smov %s562_s14 }
  0x48   :  { %10 = sbr.rel (!%p8_p12) target bundleno = 4 (0x4), region = 95 }

// kernel: alexnet_fc_forward.14
= control target key start
LH: loop header
LB: loop body
LE: loop exit
PB: predicated region body
PF: predicated region fallthrough
CT: control target
= control target key end

     0   :  { %s3345_s12 = smov 0   ;;  %s4255_s0 = inlined_call_operand.vmem [shape: bf16[32,2304], index: 0, kind: input, shape index: {}]   ;;  %s4256_s1 = inlined_call_operand.vmem [shape: bf16[2304,256], index: 1, kind: input, shape index: {}]   ;;  %s4257_s2 = inlined_call_operand.vmem [shape: f32[1,256], index: 2, kind: input, shape index: {}]   ;;  %s4258_s3 = inlined_call_operand.vmem [shape: bf16[32,256], index: 3, kind: output, shape index: {}]  }
   0x1 LB: > { %s2490_s13 = sadd.s32 4294967295, %s3323_s12   ;;  %p2494_p0 = scmp.ge.s32.totalorder %s3323_s12, 1  ;;  %s3323_s12 = sphi %s3345_s12, %s13_s12  }
   0x2   : > { %p139_p1 = scmp.lt.s32.totalorder %s3323_s12, 3 }
   0x4   : > { %p140_p2 = pnand %p2494_p0, %p139_p1 }
   0x5   : > { %v2858_v0 = vld [vmem:[%s4256_s1 + $0x4] ss:$8 sps:$4 sm:$0xff] (!%p140_p2)   ;;  %v2862_v2 = vld [vmem:[%s4256_s1] ss:$8 sps:$4 sm:$0xff] (!%p140_p2)   ;;  %v2864_v4 = vld [vmem:[%s4256_s1 + $0x14] ss:$8 sps:$4 sm:$0xff] (!%p140_p2)  }
   0x6   : > { %143 = sbr.rel (%p140_p2) target bundleno = 549 (0x225), region = 32  ;;  %v2860_v1 = vld [vmem:[%s4256_s1 + $0x404] ss:$8 sps:$4 sm:$0xff] (!%p140_p2)   ;;  %2027 = vmatprep.subr.bf16.mxu1 (!%p140_p2), %v2858_v0  ;;  %v2863_v3 = vld [vmem:[%s4256_s1 + $0x400] ss:$8 sps:$4 sm:$0xff] (!%p140_p2)   ;;  %s2495_s24 = sshll.u32 (!%p140_p2), %s2490_s13, 1 }
   0x7   : > { %2199 = vmatprep.subr.bf16.mxu0 (!%p140_p2), %v2860_v1  ;;  %2028 = vmatpush1.bf16.msra.mxu1 (!%p140_p2), %v2862_v2  ;;  %v2866_v5 = vld [vmem:[%s4256_s1 + $0x414] ss:$8 sps:$4 sm:$0xff] (!%p140_p2)   ;;  %v2868_v6 = vld [vmem:[%s4256_s1 + $0x10] ss:$8 sps:$4 sm:$0xff] (!%p140_p2)   ;;  %v2870_v8 = vld [vmem:[%s4256_s1 + $0x24] ss:$8 sps:$4 sm:$0xff] (!%p140_p2)  }
   0x8   : > { %2200 = vmatpush1.bf16.msra.mxu0 (!%p140_p2), %v2863_v3  ;;  %2029 = vmatprep.subr.bf16.mxu1 (!%p140_p2), %v2864_v4  ;;  %v2869_v7 = vld [vmem:[%s4256_s1 + $0x410] ss:$8 sps:$4 sm:$0xff] (!%p140_p2)   ;;  %v2872_v9 = vld [vmem:[%s4256_s1 + $0x424] ss:$8 sps:$4 sm:$0xff] (!%p140_p2)   ;;  %v2874_v10 = vld [vmem:[%s4256_s1 + $0x20] ss:$8 sps:$4 sm:$0xff] (!%p140_p2)  }
   0x9   : > { %2201 = vmatprep.subr.bf16.mxu0 (!%p140_p2), %v2866_v5  ;;  %v2875_v11 = vld [vmem:[%s4256_s1 + $0x420] ss:$8 sps:$4 sm:$0xff] (!%p140_p2)   ;;  %v2876_v12 = vld [vmem:[%s4256_s1 + $0x34] ss:$8 sps:$4 sm:$0xff] (!%p140_p2)   ;;  %v2880_v14 = vld [vmem:[%s4256_s1 + $0x30] ss:$8 sps:$4 sm:$0xff] (!%p140_p2)  }
   0xa   : > { %v2878_v13 = vld [vmem:[%s4256_s1 + $0x434] ss:$8 sps:$4 sm:$0xff] (!%p140_p2)   ;;  %v2881_v15 = vld [vmem:[%s4256_s1 + $0x430] ss:$8 sps:$4 sm:$0xff] (!%p140_p2)   ;;  %v2882_v16 = vld [vmem:[%s4256_s1 + $0x44] ss:$8 sps:$4 sm:$0xff] (!%p140_p2)  }
   0xb   : > { %2030 = vmatpush1.bf16.msra.mxu1 (!%p140_p2), %v2868_v6  ;;  %v2884_v17 = vld [vmem:[%s4256_s1 + $0x444] ss:$8 sps:$4 sm:$0xff] (!%p140_p2)   ;;  %v2886_v18 = vld [vmem:[%s4256_s1 + $0x40] ss:$8 sps:$4 sm:$0xff] (!%p140_p2)   ;;  %v2888_v20 = vld [vmem:[%s4256_s1 + $0x54] ss:$8 sps:$4 sm:$0xff] (!%p140_p2)  }
   0xc   : > { %2202 = vmatpush1.bf16.msra.mxu0 (!%p140_p2), %v2869_v7  ;;  %2031 = vmatprep.subr.bf16.mxu1 (!%p140_p2), %v2870_v8  ;;  %v2887_v19 = vld [vmem:[%s4256_s1 + $0x440] ss:$8 sps:$4 sm:$0xff] (!%p140_p2)   ;;  %v2890_v21 = vld [vmem:[%s4256_s1 + $0x454] ss:$8 sps:$4 sm:$0xff] (!%p140_p2)   ;;  %v2892_v22 = vld [vmem:[%s4256_s1 + $0x50] ss:$8 sps:$4 sm:$0xff] (!%p140_p2)  }
   0xd   : > { %2203 = vmatprep.subr.bf16.mxu0 %v2872_v9  ;;  %v2893_v23 = vld [vmem:[%s4256_s1 + $0x450] ss:$8 sps:$4 sm:$0xff]   ;;  %v2894_v24 = vld [vmem:[%s4256_s1 + $0x64] ss:$8 sps:$4 sm:$0xff]   ;;  %v2898_v26 = vld [vmem:[%s4256_s1 + $0x60] ss:$8 sps:$4 sm:$0xff]  }
   0xe   : > { %v2896_v25 = vld [vmem:[%s4256_s1 + $0x464] ss:$8 sps:$4 sm:$0xff]   ;;  %v2899_v27 = vld [vmem:[%s4256_s1 + $0x460] ss:$8 sps:$4 sm:$0xff]   ;;  %v2900_v28 = vld [vmem:[%s4256_s1 + $0x74] ss:$8 sps:$4 sm:$0xff]  }
   0xf   : > { %2032 = vmatpush1.bf16.msra.mxu1 %v2874_v10  ;;  %v2902_v29 = vld [vmem:[%s4256_s1 + $0x474] ss:$8 sps:$4 sm:$0xff]   ;;  %v2904_v30 = vld [vmem:[%s4256_s1 + $0x70] ss:$8 sps:$4 sm:$0xff]   ;;  %v2906_v32 = vld [vmem:[%s4256_s1 + $0x84] ss:$8 sps:$4 sm:$0xff]  }
  0x10   : > { %2204 = vmatpush1.bf16.msra.mxu0 %v2875_v11  ;;  %2033 = vmatprep.subr.bf16.mxu1 %v2876_v12  ;;  %v2905_v31 = vld [vmem:[%s4256_s1 + $0x470] ss:$8 sps:$4 sm:$0xff]   ;;  %p166_p3 = scmp.lt.s32.totalorder %s2495_s24, 3  ;;  %v2908_v33 = vld [vmem:[%s4256_s1 + $0x484] ss:$8 sps:$4 sm:$0xff]  }
  0x11   : > { %2205 = vmatprep.subr.bf16.mxu0 %v2878_v13  ;;  %v2910_v34 = vld [vmem:[%s4256_s1 + $0x80] ss:$8 sps:$4 sm:$0xff]   ;;  %v2912_v36 = vld [vmem:[%s4256_s1 + $0x94] ss:$8 sps:$4 sm:$0xff]   ;;  %v2916_v38 = vld [vmem:[%s4256_s1 + $0x90] ss:$8 sps:$4 sm:$0xff]  }
  0x12   : > { %v2911_v35 = vld [vmem:[%s4256_s1 + $0x480] ss:$8 sps:$4 sm:$0xff]   ;;  %s4260_s24 = smov (!%p166_p3, %s2495_s24), 3  ;;  %v2914_v37 = vld [vmem:[%s4256_s1 + $0x494] ss:$8 sps:$4 sm:$0xff]  }
  0x13   : > { %2034 = vmatpush1.bf16.msra.mxu1 %v2880_v14  ;;  %v2917_v39 = vld [vmem:[%s4256_s1 + $0x490] ss:$8 sps:$4 sm:$0xff]   ;;  %v2918_v40 = vld [vmem:[%s4256_s1 + $0xa4] ss:$8 sps:$4 sm:$0xff]   ;;  %s2849_s21 = smul.u32 72, %s4260_s24 }
  0x14   : > { %2206 = vmatpush1.bf16.msra.mxu0 %v2881_v15  ;;  %2035 = vmatprep.subr.bf16.mxu1 %v2882_v16  ;;  %v2920_v41 = vld [vmem:[%s4256_s1 + $0x4a4] ss:$8 sps:$4 sm:$0xff]   ;;  %v2922_v42 = vld [vmem:[%s4256_s1 + $0xa0] ss:$8 sps:$4 sm:$0xff]   ;;  %v2924_v44 = vld [vmem:[%s4256_s1 + $0xb4] ss:$8 sps:$4 sm:$0xff]  }
  0x15   : > { %2207 = vmatprep.subr.bf16.mxu0 %v2884_v17  ;;  %v2923_v43 = vld [vmem:[%s4256_s1 + $0x4a0] ss:$8 sps:$4 sm:$0xff]   ;;  %s3496_s13 = scalar_lea.vmem %s4255_s0, %s2849_s21  ;;  %v2926_v45 = vld [vmem:[%s4256_s1 + $0x4b4] ss:$8 sps:$4 sm:$0xff]   ;;  %v2928_v46 = vld [vmem:[%s4256_s1 + $0xb0] ss:$8 sps:$4 sm:$0xff]  }
  0x16   : > { %v2929_v47 = vld [vmem:[%s4256_s1 + $0x4b0] ss:$8 sps:$4 sm:$0xff]   ;;  %v2956_v48 = vld [vmem:[%s3496_s13 + $0x4] ss:$72 sps:$4 sm:$0xff]   ;;  %v2934_v52 = vld [vmem:[%s4256_s1 + $0xc0] ss:$8 sps:$4 sm:$0xff]  }
  0x17   : > { %2036 = vmatpush1.bf16.msra.mxu1 %v2886_v18  ;;  %v2930_v49 = vld [vmem:[%s4256_s1 + $0xc4] ss:$8 sps:$4 sm:$0xff]   ;;  %2059 = vmatprep.mubr.bf16.mxu1 %v2956_v48  ;;  %v2935_v53 = vld [vmem:[%s4256_s1 + $0x4c0] ss:$8 sps:$4 sm:$0xff]   ;;  %v2936_v54 = vld [vmem:[%s4256_s1 + $0xd4] ss:$8 sps:$4 sm:$0xff]  }
  0x18   : > { %2208 = vmatpush1.bf16.msra.mxu0 %v2887_v19  ;;  %2037 = vmatprep.subr.bf16.mxu1 %v2888_v20  ;;  %v2932_v50 = vld [vmem:[%s4256_s1 + $0x4c4] ss:$8 sps:$4 sm:$0xff]   ;;  %v2938_v55 = vld [vmem:[%s4256_s1 + $0x4d4] ss:$8 sps:$4 sm:$0xff]   ;;  %v2940_v56 = vld [vmem:[%s4256_s1 + $0xd0] ss:$8 sps:$4 sm:$0xff]  }
  0x19   : > { %2209 = vmatprep.subr.bf16.mxu0 %v2890_v21  ;;  %v2962_v51 = vld [vmem:[%s3496_s13 + $0x24] ss:$72 sps:$4 sm:$0xff]   ;;  %v2941_v57 = vld [vmem:[%s4256_s1 + $0x4d0] ss:$8 sps:$4 sm:$0xff]   ;;  %v2946_v60 = vld [vmem:[%s4256_s1 + $0xe0] ss:$8 sps:$4 sm:$0xff]  }
  0x1a   : > { %2231 = vmatprep.mubr.bf16.mxu0 %v2962_v51  ;;  %v2942_v58 = vld [vmem:[%s4256_s1 + $0xe4] ss:$8 sps:$4 sm:$0xff]   ;;  %v2947_v61 = vld [vmem:[%s4256_s1 + $0x4e0] ss:$8 sps:$4 sm:$0xff]   ;;  %v2948_v62 = vld [vmem:[%s4256_s1 + $0xf4] ss:$8 sps:$4 sm:$0xff]  }
  0x1b   : > { %2038 = vmatpush1.bf16.msra.mxu1 %v2892_v22  ;;  %v2944_v59 = vld [vmem:[%s4256_s1 + $0x4e4] ss:$8 sps:$4 sm:$0xff]   ;;  %v2950_v63 = vld [vmem:[%s4256_s1 + $0x4f4] ss:$8 sps:$4 sm:$0xff]   ;;  %v2952_v0 = vld [vmem:[%s4256_s1 + $0xf0] ss:$8 sps:$4 sm:$0xff]  }
  0x1c   : > { %2210 = vmatpush1.bf16.msra.mxu0 %v2893_v23  ;;  %2039 = vmatprep.subr.bf16.mxu1 %v2894_v24  ;;  %v2953_v1 = vld [vmem:[%s4256_s1 + $0x4f0] ss:$8 sps:$4 sm:$0xff]   ;;  %v2959_v2 = vld [vmem:[%s4256_s1 + $0x104] ss:$8 sps:$4 sm:$0xff]   ;;  %v2954_v4 = vld [vmem:[%s3496_s13] ss:$72 sps:$4 sm:$0xff]  }
  0x1d   : > { %2211 = vmatprep.subr.bf16.mxu0 %v2896_v25  ;;  %v2965_v3 = vld [vmem:[%s4256_s1 + $0x504] ss:$8 sps:$4 sm:$0xff]   ;;  %v2957_v5 = vld [vmem:[%s4256_s1 + $0x100] ss:$8 sps:$4 sm:$0xff]   ;;  %v2968_v8 = vld [vmem:[%s4256_s1 + $0x114] ss:$8 sps:$4 sm:$0xff]  }
  0x1e   : > { %v2960_v6 = vld [vmem:[%s3496_s13 + $0x20] ss:$72 sps:$4 sm:$0xff]   ;;  %v2971_v9 = vld [vmem:[%s4256_s1 + $0x514] ss:$8 sps:$4 sm:$0xff]   ;;  %v2966_v10 = vld [vmem:[%s4256_s1 + $0x110] ss:$8 sps:$4 sm:$0xff]  }
  0x1f   : > { %2040 = vmatpush1.bf16.msra.mxu1 %v2898_v26  ;;  %v2963_v7 = vld [vmem:[%s4256_s1 + $0x500] ss:$8 sps:$4 sm:$0xff]   ;;  %v2969_v11 = vld [vmem:[%s4256_s1 + $0x510] ss:$8 sps:$4 sm:$0xff]   ;;  %v2974_v12 = vld [vmem:[%s4256_s1 + $0x124] ss:$8 sps:$4 sm:$0xff]  }
  0x20   : > { %2212 = vmatpush1.bf16.msra.mxu0 %v2899_v27  ;;  %2041 = vmatprep.subr.bf16.mxu1 %v2900_v28  ;;  %v2977_v13 = vld [vmem:[%s4256_s1 + $0x524] ss:$8 sps:$4 sm:$0xff]   ;;  %v2972_v14 = vld [vmem:[%s4256_s1 + $0x120] ss:$8 sps:$4 sm:$0xff]   ;;  %v2980_v16 = vld [vmem:[%s4256_s1 + $0x134] ss:$8 sps:$4 sm:$0xff]  }
  0x21   : > { %2213 = vmatprep.subr.bf16.mxu0 %v2902_v29  ;;  %v2975_v15 = vld [vmem:[%s4256_s1 + $0x520] ss:$8 sps:$4 sm:$0xff]   ;;  %v2983_v17 = vld [vmem:[%s4256_s1 + $0x534] ss:$8 sps:$4 sm:$0xff]   ;;  %v2978_v18 = vld [vmem:[%s4256_s1 + $0x130] ss:$8 sps:$4 sm:$0xff]  }
  0x22   : > { %v2981_v19 = vld [vmem:[%s4256_s1 + $0x530] ss:$8 sps:$4 sm:$0xff]   ;;  %v2986_v20 = vld [vmem:[%s4256_s1 + $0x144] ss:$8 sps:$4 sm:$0xff]   ;;  %v2984_v22 = vld [vmem:[%s4256_s1 + $0x140] ss:$8 sps:$4 sm:$0xff]  }
  0x23   : > { %2042 = vmatpush1.bf16.msra.mxu1 %v2904_v30  ;;  %v2989_v21 = vld [vmem:[%s4256_s1 + $0x544] ss:$8 sps:$4 sm:$0xff]   ;;  %v2987_v23 = vld [vmem:[%s4256_s1 + $0x540] ss:$8 sps:$4 sm:$0xff]   ;;  %v2992_v24 = vld [vmem:[%s4256_s1 + $0x154] ss:$8 sps:$4 sm:$0xff]  }
  0x24   : > { %2214 = vmatpush1.bf16.msra.mxu0 %v2905_v31  ;;  %2043 = vmatprep.subr.bf16.mxu1 %v2906_v32  ;;  %v2995_v25 = vld [vmem:[%s4256_s1 + $0x554] ss:$8 sps:$4 sm:$0xff]   ;;  %v2990_v26 = vld [vmem:[%s4256_s1 + $0x150] ss:$8 sps:$4 sm:$0xff]   ;;  %v2998_v28 = vld [vmem:[%s4256_s1 + $0x164] ss:$8 sps:$4 sm:$0xff]  }
  0x25   : > { %2215 = vmatprep.subr.bf16.mxu0 %v2908_v33  ;;  %v2993_v27 = vld [vmem:[%s4256_s1 + $0x550] ss:$8 sps:$4 sm:$0xff]   ;;  %v3001_v29 = vld [vmem:[%s4256_s1 + $0x564] ss:$8 sps:$4 sm:$0xff]   ;;  %v2996_v30 = vld [vmem:[%s4256_s1 + $0x160] ss:$8 sps:$4 sm:$0xff]  }
  0x26   : > { %v2999_v31 = vld [vmem:[%s4256_s1 + $0x560] ss:$8 sps:$4 sm:$0xff]   ;;  %v3004_v32 = vld [vmem:[%s4256_s1 + $0x174] ss:$8 sps:$4 sm:$0xff]  }
  0x27   : > { %2044 = vmatpush1.bf16.msra.mxu1 %v2910_v34  ;;  %v3007_v33 = vld [vmem:[%s4256_s1 + $0x574] ss:$8 sps:$4 sm:$0xff]   ;;  %v3020_v48 = vld [vmem:[%s4256_s1 + $0x1a0] ss:$8 sps:$4 sm:$0xff]  }
  0x28   : > { %2216 = vmatpush1.bf16.msra.mxu0 %v2911_v35  ;;  %2045 = vmatprep.subr.bf16.mxu1 %v2912_v36  ;;  %v3058_v34 = vld [vmem:[%s3496_s13 + $0xc] ss:$72 sps:$4 sm:$0xff]   ;;  %v3002_v35 = vld [vmem:[%s4256_s1 + $0x170] ss:$8 sps:$4 sm:$0xff]  }
  0x29   : > { %2217 = vmatprep.subr.bf16.mxu0 %v2914_v37  ;;  %v3005_v36 = vld [vmem:[%s4256_s1 + $0x570] ss:$8 sps:$4 sm:$0xff]   ;;  %v3064_v37 = vld [vmem:[%s3496_s13 + $0x2c] ss:$72 sps:$4 sm:$0xff]  }
  0x2a   : > { %v3031_v51 = vld [vmem:[%s4256_s1 + $0x5b4] ss:$8 sps:$4 sm:$0xff]  }
  0x2b   : > { %2046 = vmatpush1.bf16.msra.mxu1 %v2916_v38  ;;  %v3010_v38 = vld [vmem:[%s4256_s1 + $0x184] ss:$8 sps:$4 sm:$0xff]  }
  0x2c   : > { %2218 = vmatpush1.bf16.msra.mxu0 %v2917_v39  ;;  %2047 = vmatprep.subr.bf16.mxu1 %v2918_v40  ;;  %v3013_v39 = vld [vmem:[%s4256_s1 + $0x584] ss:$8 sps:$4 sm:$0xff]   ;;  %v3008_v40 = vld [vmem:[%s4256_s1 + $0x180] ss:$8 sps:$4 sm:$0xff]  }
  0x2d   : > { %2219 = vmatprep.subr.bf16.mxu0 %v2920_v41  ;;  %v3011_v41 = vld [vmem:[%s4256_s1 + $0x580] ss:$8 sps:$4 sm:$0xff]  }
  0x2f   : > { %2048 = vmatpush1.bf16.msra.mxu1 %v2922_v42  ;;  %v3016_v42 = vld [vmem:[%s4256_s1 + $0x194] ss:$8 sps:$4 sm:$0xff]  }
  0x30   : > { %2220 = vmatpush1.bf16.msra.mxu0 %v2923_v43  ;;  %2049 = vmatprep.subr.bf16.mxu1 %v2924_v44  ;;  %v3019_v43 = vld [vmem:[%s4256_s1 + $0x594] ss:$8 sps:$4 sm:$0xff]   ;;  %v3014_v44 = vld [vmem:[%s4256_s1 + $0x190] ss:$8 sps:$4 sm:$0xff]  }
  0x31   : > { %2221 = vmatprep.subr.bf16.mxu0 %v2926_v45  ;;  %v3017_v45 = vld [vmem:[%s4256_s1 + $0x590] ss:$8 sps:$4 sm:$0xff]  }
  0x33   : > { %2050 = vmatpush1.bf16.msra.mxu1 %v2928_v46  ;;  %v3022_v46 = vld [vmem:[%s4256_s1 + $0x1a4] ss:$8 sps:$4 sm:$0xff]  }
  0x34   : > { %2222 = vmatpush1.bf16.msra.mxu0 %v2929_v47  ;;  %2051 = vmatprep.subr.bf16.mxu1 %v2930_v49  ;;  %v3025_v47 = vld [vmem:[%s4256_s1 + $0x5a4] ss:$8 sps:$4 sm:$0xff]   ;;  %v3023_v49 = vld [vmem:[%s4256_s1 + $0x5a0] ss:$8 sps:$4 sm:$0xff]  }
  0x35   : > { %2223 = vmatprep.subr.bf16.mxu0 %v2932_v50  ;;  %v3028_v50 = vld [vmem:[%s4256_s1 + $0x1b4] ss:$8 sps:$4 sm:$0xff]  }
  0x37   : > { %2052 = vmatpush1.bf16.msra.mxu1 %v2934_v52  ;;  %v3026_v52 = vld [vmem:[%s4256_s1 + $0x1b0] ss:$8 sps:$4 sm:$0xff]  }
  0x38   : > { %2224 = vmatpush1.bf16.msra.mxu0 %v2935_v53  ;;  %2053 = vmatprep.subr.bf16.mxu1 %v2936_v54  ;;  %v3029_v53 = vld [vmem:[%s4256_s1 + $0x5b0] ss:$8 sps:$4 sm:$0xff]   ;;  %v3034_v54 = vld [vmem:[%s4256_s1 + $0x1c4] ss:$8 sps:$4 sm:$0xff]  }
  0x39   : > { %2225 = vmatprep.subr.bf16.mxu0 %v2938_v55  ;;  %v3037_v55 = vld [vmem:[%s4256_s1 + $0x5c4] ss:$8 sps:$4 sm:$0xff]  }
  0x3b   : > { %2054 = vmatpush1.bf16.msra.mxu1 %v2940_v56  ;;  %v3032_v56 = vld [vmem:[%s4256_s1 + $0x1c0] ss:$8 sps:$4 sm:$0xff]  }
  0x3c   : > { %2226 = vmatpush1.bf16.msra.mxu0 %v2941_v57  ;;  %2055 = vmatprep.subr.bf16.mxu1 %v2942_v58  ;;  %v3035_v57 = vld [vmem:[%s4256_s1 + $0x5c0] ss:$8 sps:$4 sm:$0xff]   ;;  %v3040_v58 = vld [vmem:[%s4256_s1 + $0x1d4] ss:$8 sps:$4 sm:$0xff]  }
  0x3d   : > { %2227 = vmatprep.subr.bf16.mxu0 %v2944_v59  ;;  %v3043_v59 = vld [vmem:[%s4256_s1 + $0x5d4] ss:$8 sps:$4 sm:$0xff]  }
  0x3f   : > { %2056 = vmatpush1.bf16.msra.mxu1 %v2946_v60  ;;  %v3038_v60 = vld [vmem:[%s4256_s1 + $0x1d0] ss:$8 sps:$4 sm:$0xff]  }
  0x40   : > { %2228 = vmatpush1.bf16.msra.mxu0 %v2947_v61  ;;  %2057 = vmatprep.subr.bf16.mxu1 %v2948_v62  ;;  %v3041_v61 = vld [vmem:[%s4256_s1 + $0x5d0] ss:$8 sps:$4 sm:$0xff]   ;;  %v3046_v62 = vld [vmem:[%s4256_s1 + $0x1e4] ss:$8 sps:$4 sm:$0xff]  }
  0x41   : > { %2229 = vmatprep.subr.bf16.mxu0 %v2950_v63  ;;  %v3049_v63 = vld [vmem:[%s4256_s1 + $0x5e4] ss:$8 sps:$4 sm:$0xff]  }
  0x43   : > { %2058 = vmatpush1.bf16.msra.mxu1 %v2952_v0  ;;  %v3044_v0 = vld [vmem:[%s4256_s1 + $0x1e0] ss:$8 sps:$4 sm:$0xff]  }
  0x44   : > { %2230 = vmatpush1.bf16.msra.mxu0 %v2953_v1  ;;  %2070 = vmatprep.subr.bf16.mxu1 %v2959_v2  ;;  %v3047_v1 = vld [vmem:[%s4256_s1 + $0x5e0] ss:$8 sps:$4 sm:$0xff]   ;;  %v3052_v2 = vld [vmem:[%s4256_s1 + $0x1f4] ss:$8 sps:$4 sm:$0xff]  }
  0x45   : > { %2242 = vmatprep.subr.bf16.mxu0 %v2965_v3  ;;  %v3055_v3 = vld [vmem:[%s4256_s1 + $0x5f4] ss:$8 sps:$4 sm:$0xff]  }
  0x46   : > { %2060 = vmatmul.mubr.bf16.vlgmr.msra.gmra.mrb[0].mxu1 %v2954_v4  ;;  %v3050_v4 = vld [vmem:[%s4256_s1 + $0x1f0] ss:$8 sps:$4 sm:$0xff]  }
  0x47   : > { %2232 = vmatmul.mubr.bf16.vlgmr.msra.gmra.mrb[0].mxu0 %v2960_v6  ;;  %2071 = vmatpush1.bf16.msra.mxu1 %v2957_v5  ;;  %v3053_v5 = vld [vmem:[%s4256_s1 + $0x5f0] ss:$8 sps:$4 sm:$0xff]   ;;  %v3061_v6 = vld [vmem:[%s4256_s1 + $0x204] ss:$8 sps:$4 sm:$0xff]  }
  0x48   : > { %2243 = vmatpush1.bf16.msra.mxu0 %v2963_v7  ;;  %2072 = vmatprep.subr.bf16.mxu1 %v2968_v8  ;;  %v3067_v7 = vld [vmem:[%s4256_s1 + $0x604] ss:$8 sps:$4 sm:$0xff]   ;;  %v3056_v8 = vld [vmem:[%s3496_s13 + $0x8] ss:$72 sps:$4 sm:$0xff]  }
  0x49   : > { %2244 = vmatprep.subr.bf16.mxu0 %v2971_v9  ;;  %2102 = vmatprep.mubr.bf16.mxu1 %v3058_v34  ;;  %v3059_v9 = vld [vmem:[%s4256_s1 + $0x200] ss:$8 sps:$4 sm:$0xff]   ;;  %v3100_v34 = vld [vmem:[%s4256_s1 + $0x264] ss:$8 sps:$4 sm:$0xff]  }
  0x4a   : > { %2274 = vmatprep.mubr.bf16.mxu0 %v3064_v37  ;;  %v3101_v37 = vld [vmem:[%s4256_s1 + $0x660] ss:$8 sps:$4 sm:$0xff]  }
  0x4b   : > { %2073 = vmatpush1.bf16.msra.mxu1 %v2966_v10  ;;  %v3062_v10 = vld [vmem:[%s3496_s13 + $0x28] ss:$72 sps:$4 sm:$0xff]  }
  0x4c   : > { %2245 = vmatpush1.bf16.msra.mxu0 %v2969_v11  ;;  %2074 = vmatprep.subr.bf16.mxu1 %v2974_v12  ;;  %v3065_v11 = vld [vmem:[%s4256_s1 + $0x600] ss:$8 sps:$4 sm:$0xff]   ;;  %v3070_v12 = vld [vmem:[%s4256_s1 + $0x214] ss:$8 sps:$4 sm:$0xff]  }
  0x4d   : > { %2246 = vmatprep.subr.bf16.mxu0 %v2977_v13  ;;  %v3073_v13 = vld [vmem:[%s4256_s1 + $0x614] ss:$8 sps:$4 sm:$0xff]  }
  0x4f   : > { %2075 = vmatpush1.bf16.msra.mxu1 %v2972_v14  ;;  %v3068_v14 = vld [vmem:[%s4256_s1 + $0x210] ss:$8 sps:$4 sm:$0xff]  }
  0x50   : > { %2247 = vmatpush1.bf16.msra.mxu0 %v2975_v15  ;;  %2076 = vmatprep.subr.bf16.mxu1 %v2980_v16  ;;  %v3071_v15 = vld [vmem:[%s4256_s1 + $0x610] ss:$8 sps:$4 sm:$0xff]   ;;  %v3076_v16 = vld [vmem:[%s4256_s1 + $0x224] ss:$8 sps:$4 sm:$0xff]  }
  0x51   : > { %2248 = vmatprep.subr.bf16.mxu0 %v2983_v17  ;;  %v3079_v17 = vld [vmem:[%s4256_s1 + $0x624] ss:$8 sps:$4 sm:$0xff]  }
  0x53   : > { %2077 = vmatpush1.bf16.msra.mxu1 %v2978_v18  ;;  %v3074_v18 = vld [vmem:[%s4256_s1 + $0x220] ss:$8 sps:$4 sm:$0xff]  }
  0x54   : > { %2249 = vmatpush1.bf16.msra.mxu0 %v2981_v19  ;;  %2078 = vmatprep.subr.bf16.mxu1 %v2986_v20  ;;  %v3160_v19 = vld [vmem:[%s3496_s13 + $0x14] ss:$72 sps:$4 sm:$0xff]   ;;  %v3077_v20 = vld [vmem:[%s4256_s1 + $0x620] ss:$8 sps:$4 sm:$0xff]  }
  0x55   : > { %2250 = vmatprep.subr.bf16.mxu0 %v2989_v21  ;;  %v3082_v21 = vld [vmem:[%s4256_s1 + $0x234] ss:$8 sps:$4 sm:$0xff]  }
  0x57   : > { %2079 = vmatpush1.bf16.msra.mxu1 %v2984_v22  ;;  %v3085_v22 = vld [vmem:[%s4256_s1 + $0x634] ss:$8 sps:$4 sm:$0xff]  }
  0x58   : > { %2251 = vmatpush1.bf16.msra.mxu0 %v2987_v23  ;;  %2080 = vmatprep.subr.bf16.mxu1 %v2992_v24  ;;  %v3166_v23 = vld [vmem:[%s3496_s13 + $0x34] ss:$72 sps:$4 sm:$0xff]   ;;  %v3080_v24 = vld [vmem:[%s4256_s1 + $0x230] ss:$8 sps:$4 sm:$0xff]  }
  0x59   : > { %2252 = vmatprep.subr.bf16.mxu0 %v2995_v25  ;;  %v3083_v25 = vld [vmem:[%s4256_s1 + $0x630] ss:$8 sps:$4 sm:$0xff]  }
  0x5b   : > { %2081 = vmatpush1.bf16.msra.mxu1 %v2990_v26  ;;  %v3088_v26 = vld [vmem:[%s4256_s1 + $0x244] ss:$8 sps:$4 sm:$0xff]  }
  0x5c   : > { %2253 = vmatpush1.bf16.msra.mxu0 %v2993_v27  ;;  %2082 = vmatprep.subr.bf16.mxu1 %v2998_v28  ;;  %v3091_v27 = vld [vmem:[%s4256_s1 + $0x644] ss:$8 sps:$4 sm:$0xff]   ;;  %v3086_v28 = vld [vmem:[%s4256_s1 + $0x240] ss:$8 sps:$4 sm:$0xff]  }
  0x5d   : > { %2254 = vmatprep.subr.bf16.mxu0 %v3001_v29  ;;  %v3089_v29 = vld [vmem:[%s4256_s1 + $0x640] ss:$8 sps:$4 sm:$0xff]  }
  0x5f   : > { %2083 = vmatpush1.bf16.msra.mxu1 %v2996_v30  ;;  %v3094_v30 = vld [vmem:[%s4256_s1 + $0x254] ss:$8 sps:$4 sm:$0xff]  }
  0x60   : > { %2255 = vmatpush1.bf16.msra.mxu0 %v2999_v31  ;;  %2084 = vmatprep.subr.bf16.mxu1 %v3004_v32  ;;  %v3097_v31 = vld [vmem:[%s4256_s1 + $0x654] ss:$8 sps:$4 sm:$0xff]   ;;  %v3092_v32 = vld [vmem:[%s4256_s1 + $0x250] ss:$8 sps:$4 sm:$0xff]  }
  0x61   : > { %2256 = vmatprep.subr.bf16.mxu0 %v3007_v33  ;;  %v3095_v33 = vld [vmem:[%s4256_s1 + $0x650] ss:$8 sps:$4 sm:$0xff]  }
  0x63   : > { %2085 = vmatpush1.bf16.msra.mxu1 %v3002_v35  ;;  %v3103_v35 = vld [vmem:[%s4256_s1 + $0x664] ss:$8 sps:$4 sm:$0xff]  }
  0x64   : > { %2257 = vmatpush1.bf16.msra.mxu0 %v3005_v36  ;;  %2086 = vmatprep.subr.bf16.mxu1 %v3010_v38  ;;  %v3098_v36 = vld [vmem:[%s4256_s1 + $0x260] ss:$8 sps:$4 sm:$0xff]   ;;  %v3106_v38 = vld [vmem:[%s4256_s1 + $0x274] ss:$8 sps:$4 sm:$0xff]  }
  0x65   : > { %2258 = vmatprep.subr.bf16.mxu0 %v3013_v39  ;;  %v3109_v39 = vld [vmem:[%s4256_s1 + $0x674] ss:$8 sps:$4 sm:$0xff]  }
  0x67   : > { %2087 = vmatpush1.bf16.msra.mxu1 %v3008_v40  ;;  %v3104_v40 = vld [vmem:[%s4256_s1 + $0x270] ss:$8 sps:$4 sm:$0xff]  }
  0x68   : > { %2259 = vmatpush1.bf16.msra.mxu0 %v3011_v41  ;;  %2088 = vmatprep.subr.bf16.mxu1 %v3016_v42  ;;  %v3107_v41 = vld [vmem:[%s4256_s1 + $0x670] ss:$8 sps:$4 sm:$0xff]   ;;  %v3112_v42 = vld [vmem:[%s4256_s1 + $0x284] ss:$8 sps:$4 sm:$0xff]  }
  0x69   : > { %2260 = vmatprep.subr.bf16.mxu0 %v3019_v43  ;;  %v3115_v43 = vld [vmem:[%s4256_s1 + $0x684] ss:$8 sps:$4 sm:$0xff]  }
  0x6b   : > { %2089 = vmatpush1.bf16.msra.mxu1 %v3014_v44  ;;  %v3110_v44 = vld [vmem:[%s4256_s1 + $0x280] ss:$8 sps:$4 sm:$0xff]  }
  0x6c   : > { %2261 = vmatpush1.bf16.msra.mxu0 %v3017_v45  ;;  %2090 = vmatprep.subr.bf16.mxu1 %v3022_v46  ;;  %v3113_v45 = vld [vmem:[%s4256_s1 + $0x680] ss:$8 sps:$4 sm:$0xff]   ;;  %v3118_v46 = vld [vmem:[%s4256_s1 + $0x294] ss:$8 sps:$4 sm:$0xff]  }
  0x6d   : > { %2262 = vmatprep.subr.bf16.mxu0 %v3025_v47  ;;  %v3121_v47 = vld [vmem:[%s4256_s1 + $0x694] ss:$8 sps:$4 sm:$0xff]  }
  0x6f   : > { %2091 = vmatpush1.bf16.msra.mxu1 %v3020_v48  ;;  %v3116_v48 = vld [vmem:[%s4256_s1 + $0x290] ss:$8 sps:$4 sm:$0xff]  }
  0x70   : > { %2263 = vmatpush1.bf16.msra.mxu0 %v3023_v49  ;;  %2092 = vmatprep.subr.bf16.mxu1 %v3028_v50  ;;  %v3119_v49 = vld [vmem:[%s4256_s1 + $0x690] ss:$8 sps:$4 sm:$0xff]   ;;  %v3124_v50 = vld [vmem:[%s4256_s1 + $0x2a4] ss:$8 sps:$4 sm:$0xff]  }
  0x71   : > { %2264 = vmatprep.subr.bf16.mxu0 %v3031_v51  ;;  %v3127_v51 = vld [vmem:[%s4256_s1 + $0x6a4] ss:$8 sps:$4 sm:$0xff]  }
  0x73   : > { %2093 = vmatpush1.bf16.msra.mxu1 %v3026_v52  ;;  %v3122_v52 = vld [vmem:[%s4256_s1 + $0x2a0] ss:$8 sps:$4 sm:$0xff]  }
  0x74   : > { %2265 = vmatpush1.bf16.msra.mxu0 %v3029_v53  ;;  %2094 = vmatprep.subr.bf16.mxu1 %v3034_v54  ;;  %v3125_v53 = vld [vmem:[%s4256_s1 + $0x6a0] ss:$8 sps:$4 sm:$0xff]   ;;  %v3130_v54 = vld [vmem:[%s4256_s1 + $0x2b4] ss:$8 sps:$4 sm:$0xff]  }
  0x75   : > { %2266 = vmatprep.subr.bf16.mxu0 %v3037_v55  ;;  %v3133_v55 = vld [vmem:[%s4256_s1 + $0x6b4] ss:$8 sps:$4 sm:$0xff]  }
  0x77   : > { %2095 = vmatpush1.bf16.msra.mxu1 %v3032_v56  ;;  %v3128_v56 = vld [vmem:[%s4256_s1 + $0x2b0] ss:$8 sps:$4 sm:$0xff]  }
  0x78   : > { %2267 = vmatpush1.bf16.msra.mxu0 %v3035_v57  ;;  %2096 = vmatprep.subr.bf16.mxu1 %v3040_v58  ;;  %v3131_v57 = vld [vmem:[%s4256_s1 + $0x6b0] ss:$8 sps:$4 sm:$0xff]   ;;  %v3136_v58 = vld [vmem:[%s4256_s1 + $0x2c4] ss:$8 sps:$4 sm:$0xff]  }
  0x79   : > { %2268 = vmatprep.subr.bf16.mxu0 %v3043_v59  ;;  %v3139_v59 = vld [vmem:[%s4256_s1 + $0x6c4] ss:$8 sps:$4 sm:$0xff]  }
  0x7b   : > { %2097 = vmatpush1.bf16.msra.mxu1 %v3038_v60  ;;  %v3134_v60 = vld [vmem:[%s4256_s1 + $0x2c0] ss:$8 sps:$4 sm:$0xff]  }
  0x7c   : > { %2269 = vmatpush1.bf16.msra.mxu0 %v3041_v61  ;;  %2098 = vmatprep.subr.bf16.mxu1 %v3046_v62  ;;  %v3137_v61 = vld [vmem:[%s4256_s1 + $0x6c0] ss:$8 sps:$4 sm:$0xff]   ;;  %v3142_v62 = vld [vmem:[%s4256_s1 + $0x2d4] ss:$8 sps:$4 sm:$0xff]  }
  0x7d   : > { %2270 = vmatprep.subr.bf16.mxu0 %v3049_v63  ;;  %v3145_v63 = vld [vmem:[%s4256_s1 + $0x6d4] ss:$8 sps:$4 sm:$0xff]  }
  0x7f   : > { %2099 = vmatpush1.bf16.msra.mxu1 %v3044_v0  ;;  %v3140_v0 = vld [vmem:[%s4256_s1 + $0x2d0] ss:$8 sps:$4 sm:$0xff]  }
  0x80   : > { %2271 = vmatpush1.bf16.msra.mxu0 %v3047_v1  ;;  %2100 = vmatprep.subr.bf16.mxu1 %v3052_v2  ;;  %v3143_v1 = vld [vmem:[%s4256_s1 + $0x6d0] ss:$8 sps:$4 sm:$0xff]   ;;  %v3148_v2 = vld [vmem:[%s4256_s1 + $0x2e4] ss:$8 sps:$4 sm:$0xff]  }
  0x81   : > { %2272 = vmatprep.subr.bf16.mxu0 %v3055_v3  ;;  %v3151_v3 = vld [vmem:[%s4256_s1 + $0x6e4] ss:$8 sps:$4 sm:$0xff]  }
  0x83   : > { %2101 = vmatpush1.bf16.msra.mxu1 %v3050_v4  ;;  %v3146_v4 = vld [vmem:[%s4256_s1 + $0x2e0] ss:$8 sps:$4 sm:$0xff]  }
  0x84   : > { %2273 = vmatpush1.bf16.msra.mxu0 %v3053_v5  ;;  %2113 = vmatprep.subr.bf16.mxu1 %v3061_v6  ;;  %v3149_v5 = vld [vmem:[%s4256_s1 + $0x6e0] ss:$8 sps:$4 sm:$0xff]   ;;  %v3154_v6 = vld [vmem:[%s4256_s1 + $0x2f4] ss:$8 sps:$4 sm:$0xff]  }
  0x85   : > { %2285 = vmatprep.subr.bf16.mxu0 %v3067_v7  ;;  %v3157_v7 = vld [vmem:[%s4256_s1 + $0x6f4] ss:$8 sps:$4 sm:$0xff]  }
  0x86   : > { %2103 = vmatmul.mubr.bf16.vlgmr.msra.gmra.mrb[0].mxu1 %v3056_v8  ;;  %v3152_v8 = vld [vmem:[%s4256_s1 + $0x2f0] ss:$8 sps:$4 sm:$0xff]  }
  0x87   : > { %2275 = vmatmul.mubr.bf16.vlgmr.msra.gmra.mrb[0].mxu0 %v3062_v10  ;;  %2114 = vmatpush1.bf16.msra.mxu1 %v3059_v9  ;;  %v3155_v9 = vld [vmem:[%s4256_s1 + $0x6f0] ss:$8 sps:$4 sm:$0xff]   ;;  %v3163_v10 = vld [vmem:[%s4256_s1 + $0x304] ss:$8 sps:$4 sm:$0xff]  }
  0x88   : > { %2286 = vmatpush1.bf16.msra.mxu0 %v3065_v11  ;;  %2115 = vmatprep.subr.bf16.mxu1 %v3070_v12  ;;  %v3169_v11 = vld [vmem:[%s4256_s1 + $0x704] ss:$8 sps:$4 sm:$0xff]   ;;  %v3158_v12 = vld [vmem:[%s3496_s13 + $0x10] ss:$72 sps:$4 sm:$0xff]  }
  0x89   : > { %2287 = vmatprep.subr.bf16.mxu0 %v3073_v13  ;;  %2145 = vmatprep.mubr.bf16.mxu1 %v3160_v19  ;;  %v3161_v13 = vld [vmem:[%s4256_s1 + $0x300] ss:$8 sps:$4 sm:$0xff]   ;;  %v3265_v19 = vld [vmem:[%s3496_s13 + $0x3c] ss:$72 sps:$4 sm:$0xff]  }
  0x8a   : > { %2317 = vmatprep.mubr.bf16.mxu0 %v3166_v23  ;;  %v3181_v23 = vld [vmem:[%s4256_s1 + $0x724] ss:$8 sps:$4 sm:$0xff]  }
  0x8b   : > { %2116 = vmatpush1.bf16.msra.mxu1 %v3068_v14  ;;  %v3164_v14 = vld [vmem:[%s3496_s13 + $0x30] ss:$72 sps:$4 sm:$0xff]  }
  0x8c   : > { %2288 = vmatpush1.bf16.msra.mxu0 %v3071_v15  ;;  %2117 = vmatprep.subr.bf16.mxu1 %v3076_v16  ;;  %v3167_v15 = vld [vmem:[%s4256_s1 + $0x700] ss:$8 sps:$4 sm:$0xff]   ;;  %v3172_v16 = vld [vmem:[%s4256_s1 + $0x314] ss:$8 sps:$4 sm:$0xff]  }
  0x8d   : > { %2289 = vmatprep.subr.bf16.mxu0 %v3079_v17  ;;  %v3175_v17 = vld [vmem:[%s4256_s1 + $0x714] ss:$8 sps:$4 sm:$0xff]  }
  0x8f   : > { %2118 = vmatpush1.bf16.msra.mxu1 %v3074_v18  ;;  %v3262_v18 = vld [vmem:[%s3496_s13 + $0x1c] ss:$72 sps:$4 sm:$0xff]  }
  0x90   : > { %2290 = vmatpush1.bf16.msra.mxu0 %v3077_v20  ;;  %2119 = vmatprep.subr.bf16.mxu1 %v3082_v21  ;;  %v3170_v20 = vld [vmem:[%s4256_s1 + $0x310] ss:$8 sps:$4 sm:$0xff]  }
  0x91   : > { %2291 = vmatprep.subr.bf16.mxu0 %v3085_v22  ;;  %v3173_v21 = vld [vmem:[%s4256_s1 + $0x710] ss:$8 sps:$4 sm:$0xff]   ;;  %v3178_v22 = vld [vmem:[%s4256_s1 + $0x324] ss:$8 sps:$4 sm:$0xff]  }
  0x93   : > { %2120 = vmatpush1.bf16.msra.mxu1 %v3080_v24  ;;  %v3176_v24 = vld [vmem:[%s4256_s1 + $0x320] ss:$8 sps:$4 sm:$0xff]  }
  0x94   : > { %2292 = vmatpush1.bf16.msra.mxu0 %v3083_v25  ;;  %2121 = vmatprep.subr.bf16.mxu1 %v3088_v26  ;;  %v3179_v25 = vld [vmem:[%s4256_s1 + $0x720] ss:$8 sps:$4 sm:$0xff]   ;;  %v3184_v26 = vld [vmem:[%s4256_s1 + $0x334] ss:$8 sps:$4 sm:$0xff]  }
  0x95   : > { %2293 = vmatprep.subr.bf16.mxu0 %v3091_v27  ;;  %v3187_v27 = vld [vmem:[%s4256_s1 + $0x734] ss:$8 sps:$4 sm:$0xff]  }
  0x97   : > { %2122 = vmatpush1.bf16.msra.mxu1 %v3086_v28  ;;  %v3182_v28 = vld [vmem:[%s4256_s1 + $0x330] ss:$8 sps:$4 sm:$0xff]  }
  0x98   : > { %2294 = vmatpush1.bf16.msra.mxu0 %v3089_v29  ;;  %2123 = vmatprep.subr.bf16.mxu1 %v3094_v30  ;;  %v3185_v29 = vld [vmem:[%s4256_s1 + $0x730] ss:$8 sps:$4 sm:$0xff]   ;;  %v3190_v30 = vld [vmem:[%s4256_s1 + $0x344] ss:$8 sps:$4 sm:$0xff]  }
  0x99   : > { %2295 = vmatprep.subr.bf16.mxu0 %v3097_v31  ;;  %v3193_v31 = vld [vmem:[%s4256_s1 + $0x744] ss:$8 sps:$4 sm:$0xff]  }
  0x9b   : > { %2124 = vmatpush1.bf16.msra.mxu1 %v3092_v32  ;;  %v3188_v32 = vld [vmem:[%s4256_s1 + $0x340] ss:$8 sps:$4 sm:$0xff]  }
  0x9c   : > { %2296 = vmatpush1.bf16.msra.mxu0 %v3095_v33  ;;  %2125 = vmatprep.subr.bf16.mxu1 %v3100_v34  ;;  %v3191_v33 = vld [vmem:[%s4256_s1 + $0x740] ss:$8 sps:$4 sm:$0xff]   ;;  %v3196_v34 = vld [vmem:[%s4256_s1 + $0x354] ss:$8 sps:$4 sm:$0xff]  }
  0x9d   : > { %2297 = vmatprep.subr.bf16.mxu0 %v3103_v35  ;;  %v3199_v35 = vld [vmem:[%s4256_s1 + $0x754] ss:$8 sps:$4 sm:$0xff]  }
  0x9f   : > { %2126 = vmatpush1.bf16.msra.mxu1 %v3098_v36  ;;  %v3194_v36 = vld [vmem:[%s4256_s1 + $0x350] ss:$8 sps:$4 sm:$0xff]  }
  0xa0   : > { %2298 = vmatpush1.bf16.msra.mxu0 %v3101_v37  ;;  %2127 = vmatprep.subr.bf16.mxu1 %v3106_v38  ;;  %v3197_v37 = vld [vmem:[%s4256_s1 + $0x750] ss:$8 sps:$4 sm:$0xff]   ;;  %v3202_v38 = vld [vmem:[%s4256_s1 + $0x364] ss:$8 sps:$4 sm:$0xff]  }
  0xa1   : > { %2299 = vmatprep.subr.bf16.mxu0 %v3109_v39  ;;  %v3205_v39 = vld [vmem:[%s4256_s1 + $0x764] ss:$8 sps:$4 sm:$0xff]  }
  0xa3   : > { %2128 = vmatpush1.bf16.msra.mxu1 %v3104_v40  ;;  %v3200_v40 = vld [vmem:[%s4256_s1 + $0x360] ss:$8 sps:$4 sm:$0xff]  }
  0xa4   : > { %2300 = vmatpush1.bf16.msra.mxu0 %v3107_v41  ;;  %2129 = vmatprep.subr.bf16.mxu1 %v3112_v42  ;;  %v3203_v41 = vld [vmem:[%s4256_s1 + $0x760] ss:$8 sps:$4 sm:$0xff]   ;;  %v3208_v42 = vld [vmem:[%s4256_s1 + $0x374] ss:$8 sps:$4 sm:$0xff]  }
  0xa5   : > { %2301 = vmatprep.subr.bf16.mxu0 %v3115_v43  ;;  %v3211_v43 = vld [vmem:[%s4256_s1 + $0x774] ss:$8 sps:$4 sm:$0xff]  }
  0xa7   : > { %2130 = vmatpush1.bf16.msra.mxu1 %v3110_v44  ;;  %v3206_v44 = vld [vmem:[%s4256_s1 + $0x370] ss:$8 sps:$4 sm:$0xff]  }
  0xa8   : > { %2302 = vmatpush1.bf16.msra.mxu0 %v3113_v45  ;;  %2131 = vmatprep.subr.bf16.mxu1 %v3118_v46  ;;  %v3209_v45 = vld [vmem:[%s4256_s1 + $0x770] ss:$8 sps:$4 sm:$0xff]   ;;  %v3214_v46 = vld [vmem:[%s4256_s1 + $0x384] ss:$8 sps:$4 sm:$0xff]  }
  0xa9   : > { %2303 = vmatprep.subr.bf16.mxu0 %v3121_v47  ;;  %v3217_v47 = vld [vmem:[%s4256_s1 + $0x784] ss:$8 sps:$4 sm:$0xff]  }
  0xab   : > { %2132 = vmatpush1.bf16.msra.mxu1 %v3116_v48  ;;  %v3212_v48 = vld [vmem:[%s4256_s1 + $0x380] ss:$8 sps:$4 sm:$0xff]  }
  0xac   : > { %2304 = vmatpush1.bf16.msra.mxu0 %v3119_v49  ;;  %2133 = vmatprep.subr.bf16.mxu1 %v3124_v50  ;;  %v3215_v49 = vld [vmem:[%s4256_s1 + $0x780] ss:$8 sps:$4 sm:$0xff]   ;;  %v3220_v50 = vld [vmem:[%s4256_s1 + $0x394] ss:$8 sps:$4 sm:$0xff]  }
  0xad   : > { %2305 = vmatprep.subr.bf16.mxu0 %v3127_v51  ;;  %v3223_v51 = vld [vmem:[%s4256_s1 + $0x794] ss:$8 sps:$4 sm:$0xff]  }
  0xaf   : > { %2134 = vmatpush1.bf16.msra.mxu1 %v3122_v52  ;;  %v3218_v52 = vld [vmem:[%s4256_s1 + $0x390] ss:$8 sps:$4 sm:$0xff]  }
  0xb0   : > { %2306 = vmatpush1.bf16.msra.mxu0 %v3125_v53  ;;  %2135 = vmatprep.subr.bf16.mxu1 %v3130_v54  ;;  %v3221_v53 = vld [vmem:[%s4256_s1 + $0x790] ss:$8 sps:$4 sm:$0xff]   ;;  %v3226_v54 = vld [vmem:[%s4256_s1 + $0x3a4] ss:$8 sps:$4 sm:$0xff]  }
  0xb1   : > { %2307 = vmatprep.subr.bf16.mxu0 %v3133_v55  ;;  %v3229_v55 = vld [vmem:[%s4256_s1 + $0x7a4] ss:$8 sps:$4 sm:$0xff]  }
  0xb3   : > { %2136 = vmatpush1.bf16.msra.mxu1 %v3128_v56  ;;  %v3224_v56 = vld [vmem:[%s4256_s1 + $0x3a0] ss:$8 sps:$4 sm:$0xff]  }
  0xb4   : > { %2308 = vmatpush1.bf16.msra.mxu0 %v3131_v57  ;;  %2137 = vmatprep.subr.bf16.mxu1 %v3136_v58  ;;  %v3227_v57 = vld [vmem:[%s4256_s1 + $0x7a0] ss:$8 sps:$4 sm:$0xff]   ;;  %v3232_v58 = vld [vmem:[%s4256_s1 + $0x3b4] ss:$8 sps:$4 sm:$0xff]  }
  0xb5   : > { %2309 = vmatprep.subr.bf16.mxu0 %v3139_v59  ;;  %v3235_v59 = vld [vmem:[%s4256_s1 + $0x7b4] ss:$8 sps:$4 sm:$0xff]  }
  0xb7   : > { %2138 = vmatpush1.bf16.msra.mxu1 %v3134_v60  ;;  %v3230_v60 = vld [vmem:[%s4256_s1 + $0x3b0] ss:$8 sps:$4 sm:$0xff]  }
  0xb8   : > { %2310 = vmatpush1.bf16.msra.mxu0 %v3137_v61  ;;  %2139 = vmatprep.subr.bf16.mxu1 %v3142_v62  ;;  %v3233_v61 = vld [vmem:[%s4256_s1 + $0x7b0] ss:$8 sps:$4 sm:$0xff]   ;;  %v3238_v62 = vld [vmem:[%s4256_s1 + $0x3c4] ss:$8 sps:$4 sm:$0xff]  }
  0xb9   : > { %2311 = vmatprep.subr.bf16.mxu0 %v3145_v63  ;;  %v3241_v63 = vld [vmem:[%s4256_s1 + $0x7c4] ss:$8 sps:$4 sm:$0xff]  }
  0xbb   : > { %2140 = vmatpush1.bf16.msra.mxu1 %v3140_v0  ;;  %v3236_v0 = vld [vmem:[%s4256_s1 + $0x3c0] ss:$8 sps:$4 sm:$0xff]  }
  0xbc   : > { %2312 = vmatpush1.bf16.msra.mxu0 %v3143_v1  ;;  %2141 = vmatprep.subr.bf16.mxu1 %v3148_v2  ;;  %v3239_v1 = vld [vmem:[%s4256_s1 + $0x7c0] ss:$8 sps:$4 sm:$0xff]   ;;  %v3244_v2 = vld [vmem:[%s4256_s1 + $0x3d4] ss:$8 sps:$4 sm:$0xff]  }
  0xbd   : > { %2313 = vmatprep.subr.bf16.mxu0 %v3151_v3  ;;  %v3247_v3 = vld [vmem:[%s4256_s1 + $0x7d4] ss:$8 sps:$4 sm:$0xff]  }
  0xbf   : > { %2142 = vmatpush1.bf16.msra.mxu1 %v3146_v4  ;;  %v3242_v4 = vld [vmem:[%s4256_s1 + $0x3d0] ss:$8 sps:$4 sm:$0xff]  }
  0xc0   : > { %2314 = vmatpush1.bf16.msra.mxu0 %v3149_v5  ;;  %2143 = vmatprep.subr.bf16.mxu1 %v3154_v6  ;;  %v3245_v5 = vld [vmem:[%s4256_s1 + $0x7d0] ss:$8 sps:$4 sm:$0xff]   ;;  %v3250_v6 = vld [vmem:[%s4256_s1 + $0x3e4] ss:$8 sps:$4 sm:$0xff]  }
  0xc1   : > { %2315 = vmatprep.subr.bf16.mxu0 %v3157_v7  ;;  %v3253_v7 = vld [vmem:[%s4256_s1 + $0x7e4] ss:$8 sps:$4 sm:$0xff]  }
  0xc3   : > { %2144 = vmatpush1.bf16.msra.mxu1 %v3152_v8  ;;  %v3248_v8 = vld [vmem:[%s4256_s1 + $0x3e0] ss:$8 sps:$4 sm:$0xff]  }
  0xc4   : > { %2316 = vmatpush1.bf16.msra.mxu0 %v3155_v9  ;;  %2156 = vmatprep.subr.bf16.mxu1 %v3163_v10  ;;  %v3251_v9 = vld [vmem:[%s4256_s1 + $0x7e0] ss:$8 sps:$4 sm:$0xff]   ;;  %v3256_v10 = vld [vmem:[%s4256_s1 + $0x3f4] ss:$8 sps:$4 sm:$0xff]  }
  0xc5   : > { %2328 = vmatprep.subr.bf16.mxu0 %v3169_v11  ;;  %v3259_v11 = vld [vmem:[%s4256_s1 + $0x7f4] ss:$8 sps:$4 sm:$0xff]  }
  0xc6   : > { %2146 = vmatmul.mubr.bf16.vlgmr.msra.gmra.mrb[0].mxu1 %v3158_v12  ;;  %v3254_v12 = vld [vmem:[%s4256_s1 + $0x3f0] ss:$8 sps:$4 sm:$0xff]  }
  0xc7   : > { %2318 = vmatmul.mubr.bf16.vlgmr.msra.gmra.mrb[0].mxu0 %v3164_v14  ;;  %2157 = vmatpush1.bf16.msra.mxu1 %v3161_v13  ;;  %v3257_v13 = vld [vmem:[%s4256_s1 + $0x7f0] ss:$8 sps:$4 sm:$0xff]   ;;  %v3268_v14 = vld [vmem:[%s4256_s1 + $0x804] ss:$8 sps:$4 sm:$0xff]  }
  0xc8   : > { %2329 = vmatpush1.bf16.msra.mxu0 %v3167_v15  ;;  %2158 = vmatprep.subr.bf16.mxu1 %v3172_v16  ;;  %v3260_v15 = vld [vmem:[%s3496_s13 + $0x18] ss:$72 sps:$4 sm:$0xff]  }
  0xc9   : > { %2330 = vmatprep.subr.bf16.mxu0 %v3175_v17  ;;  %2188 = vmatprep.mubr.bf16.mxu1 %v3262_v18  ;;  %v3263_v16 = vld [vmem:[%s3496_s13 + $0x38] ss:$72 sps:$4 sm:$0xff]   ;;  %v3316_v18 = vld [vmem:[%s3496_s13 + $0x44] ss:$72 sps:$4 sm:$0xff]  }
  0xca   : > { %2360 = vmatprep.mubr.bf16.mxu0 %v3265_v19  ;;  %v3266_v17 = vld [vmem:[%s4256_s1 + $0x800] ss:$8 sps:$4 sm:$0xff]   ;;  %v3271_v19 = vld [vmem:[%s4256_s1 + $0x814] ss:$8 sps:$4 sm:$0xff]  }
  0xcb   : > { %2159 = vmatpush1.bf16.msra.mxu1 %v3170_v20  ;;  %v3269_v20 = vld [vmem:[%s4256_s1 + $0x810] ss:$8 sps:$4 sm:$0xff]  }
  0xcc   : > { %2331 = vmatpush1.bf16.msra.mxu0 %v3173_v21  ;;  %2160 = vmatprep.subr.bf16.mxu1 %v3178_v22  ;;  %v3274_v21 = vld [vmem:[%s4256_s1 + $0x824] ss:$8 sps:$4 sm:$0xff]   ;;  %v3272_v22 = vld [vmem:[%s4256_s1 + $0x820] ss:$8 sps:$4 sm:$0xff]  }
  0xcd   : > { %2332 = vmatprep.subr.bf16.mxu0 %v3181_v23  ;;  %v3277_v23 = vld [vmem:[%s4256_s1 + $0x834] ss:$8 sps:$4 sm:$0xff]  }
  0xcf   : > { %2161 = vmatpush1.bf16.msra.mxu1 %v3176_v24  ;;  %v3275_v24 = vld [vmem:[%s4256_s1 + $0x830] ss:$8 sps:$4 sm:$0xff]  }
  0xd0   : > { %2333 = vmatpush1.bf16.msra.mxu0 %v3179_v25  ;;  %2162 = vmatprep.subr.bf16.mxu1 %v3184_v26  ;;  %v3280_v25 = vld [vmem:[%s4256_s1 + $0x844] ss:$8 sps:$4 sm:$0xff]   ;;  %v3278_v26 = vld [vmem:[%s4256_s1 + $0x840] ss:$8 sps:$4 sm:$0xff]  }
  0xd1   : > { %2334 = vmatprep.subr.bf16.mxu0 %v3187_v27  ;;  %v3283_v27 = vld [vmem:[%s4256_s1 + $0x854] ss:$8 sps:$4 sm:$0xff]  }
  0xd3   : > { %2163 = vmatpush1.bf16.msra.mxu1 %v3182_v28  ;;  %v3281_v28 = vld [vmem:[%s4256_s1 + $0x850] ss:$8 sps:$4 sm:$0xff]  }
  0xd4   : > { %2335 = vmatpush1.bf16.msra.mxu0 %v3185_v29  ;;  %2164 = vmatprep.subr.bf16.mxu1 %v3190_v30  ;;  %v3286_v29 = vld [vmem:[%s4256_s1 + $0x864] ss:$8 sps:$4 sm:$0xff]   ;;  %v3284_v30 = vld [vmem:[%s4256_s1 + $0x860] ss:$8 sps:$4 sm:$0xff]  }
  0xd5   : > { %2336 = vmatprep.subr.bf16.mxu0 %v3193_v31  ;;  %v3289_v31 = vld [vmem:[%s4256_s1 + $0x874] ss:$8 sps:$4 sm:$0xff]  }
  0xd7   : > { %2165 = vmatpush1.bf16.msra.mxu1 %v3188_v32  ;;  %v3287_v32 = vld [vmem:[%s4256_s1 + $0x870] ss:$8 sps:$4 sm:$0xff]  }
  0xd8   : > { %2337 = vmatpush1.bf16.msra.mxu0 %v3191_v33  ;;  %2166 = vmatprep.subr.bf16.mxu1 %v3196_v34  ;;  %v3292_v33 = vld [vmem:[%s4256_s1 + $0x884] ss:$8 sps:$4 sm:$0xff]   ;;  %v3290_v34 = vld [vmem:[%s4256_s1 + $0x880] ss:$8 sps:$4 sm:$0xff]  }
  0xd9   : > { %2338 = vmatprep.subr.bf16.mxu0 %v3199_v35  ;;  %v3295_v35 = vld [vmem:[%s4256_s1 + $0x894] ss:$8 sps:$4 sm:$0xff]  }
  0xdb   : > { %2167 = vmatpush1.bf16.msra.mxu1 %v3194_v36  ;;  %v3293_v36 = vld [vmem:[%s4256_s1 + $0x890] ss:$8 sps:$4 sm:$0xff]  }
  0xdc   : > { %2339 = vmatpush1.bf16.msra.mxu0 %v3197_v37  ;;  %2168 = vmatprep.subr.bf16.mxu1 %v3202_v38  ;;  %v3298_v37 = vld [vmem:[%s4256_s1 + $0x8a4] ss:$8 sps:$4 sm:$0xff]   ;;  %v3296_v38 = vld [vmem:[%s4256_s1 + $0x8a0] ss:$8 sps:$4 sm:$0xff]  }
  0xdd   : > { %2340 = vmatprep.subr.bf16.mxu0 %v3205_v39  ;;  %v3301_v39 = vld [vmem:[%s4256_s1 + $0x8b4] ss:$8 sps:$4 sm:$0xff]  }
  0xdf   : > { %2169 = vmatpush1.bf16.msra.mxu1 %v3200_v40  ;;  %v3299_v40 = vld [vmem:[%s4256_s1 + $0x8b0] ss:$8 sps:$4 sm:$0xff]  }
  0xe0   : > { %2341 = vmatpush1.bf16.msra.mxu0 %v3203_v41  ;;  %2170 = vmatprep.subr.bf16.mxu1 %v3208_v42  ;;  %v3304_v41 = vld [vmem:[%s4256_s1 + $0x8c4] ss:$8 sps:$4 sm:$0xff]   ;;  %v3302_v42 = vld [vmem:[%s4256_s1 + $0x8c0] ss:$8 sps:$4 sm:$0xff]  }
  0xe1   : > { %2342 = vmatprep.subr.bf16.mxu0 %v3211_v43  ;;  %v3307_v43 = vld [vmem:[%s4256_s1 + $0x8d4] ss:$8 sps:$4 sm:$0xff]  }
  0xe3   : > { %2171 = vmatpush1.bf16.msra.mxu1 %v3206_v44  ;;  %v3305_v44 = vld [vmem:[%s4256_s1 + $0x8d0] ss:$8 sps:$4 sm:$0xff]  }
  0xe4   : > { %2343 = vmatpush1.bf16.msra.mxu0 %v3209_v45  ;;  %2172 = vmatprep.subr.bf16.mxu1 %v3214_v46  ;;  %v3310_v45 = vld [vmem:[%s4256_s1 + $0x8e4] ss:$8 sps:$4 sm:$0xff]   ;;  %v3308_v46 = vld [vmem:[%s4256_s1 + $0x8e0] ss:$8 sps:$4 sm:$0xff]  }
  0xe5   : > { %2344 = vmatprep.subr.bf16.mxu0 %v3217_v47  ;;  %v3313_v47 = vld [vmem:[%s4256_s1 + $0x8f4] ss:$8 sps:$4 sm:$0xff]  }
  0xe7   : > { %2173 = vmatpush1.bf16.msra.mxu1 %v3212_v48  ;;  %v3311_v48 = vld [vmem:[%s4256_s1 + $0x8f0] ss:$8 sps:$4 sm:$0xff]  }
  0xe8   : > { %2345 = vmatpush1.bf16.msra.mxu0 %v3215_v49  ;;  %2174 = vmatprep.subr.bf16.mxu1 %v3220_v50  ;;  %v3314_v49 = vld [vmem:[%s3496_s13 + $0x40] ss:$72 sps:$4 sm:$0xff]   ;;  %s2810_s13 = sshll.u32 %s4260_s24, 3 }
  0xe9   : > { %2346 = vmatprep.subr.bf16.mxu0 %v3223_v51  ;;  %s177_s18 = scalar_lea.vmem %s4258_s3, %s2810_s13 }
  0xeb   : > { %2175 = vmatpush1.bf16.msra.mxu1 %v3218_v52 }
  0xec   : > { %2347 = vmatpush1.bf16.msra.mxu0 %v3221_v53  ;;  %2176 = vmatprep.subr.bf16.mxu1 %v3226_v54  ;;  %v487_v54 = vlaneseq }
  0xed   : > { %2348 = vmatprep.subr.bf16.mxu0 %v3229_v55 }
  0xee   : > { %v488_v55 = vshrl.u32 %v487_v54, 7 }
  0xef   : > { %2177 = vmatpush1.bf16.msra.mxu1 %v3224_v56 }
  0xf0   : > { %2349 = vmatpush1.bf16.msra.mxu0 %v3227_v57  ;;  %2178 = vmatprep.subr.bf16.mxu1 %v3232_v58  ;;  %v489_v56 = vsub.s32 0, %v488_v55  ;;  %v485_v57 = vld [vmem:[%s4257_s2] sm:$0x3]  ;;  %v493_v58 = vsub.s32 1, %v488_v55 }
  0xf1   : > { %2350 = vmatprep.subr.bf16.mxu0 %v3235_v59 }
  0xf2   : > { %v490_v59 = vrot.slane %v485_v57, %v489_v56 }
  0xf3   : > { %2179 = vmatpush1.bf16.msra.mxu1 %v3230_v60  ;;  %v494_v60 = vrot.slane %v485_v57, %v493_v58 }
  0xf4   : > { %2351 = vmatpush1.bf16.msra.mxu0 %v3233_v61  ;;  %2180 = vmatprep.subr.bf16.mxu1 %v3238_v62 }
  0xf5   : > { %2352 = vmatprep.subr.bf16.mxu0 %v3241_v63 }
  0xf7   : > { %2181 = vmatpush1.bf16.msra.mxu1 %v3236_v0 }
  0xf8   : > { %2353 = vmatpush1.bf16.msra.mxu0 %v3239_v1  ;;  %2182 = vmatprep.subr.bf16.mxu1 %v3244_v2 }
  0xf9   : > { %2354 = vmatprep.subr.bf16.mxu0 %v3247_v3 }
  0xfb   : > { %2183 = vmatpush1.bf16.msra.mxu1 %v3242_v4 }
  0xfc   : > { %2355 = vmatpush1.bf16.msra.mxu0 %v3245_v5  ;;  %2184 = vmatprep.subr.bf16.mxu1 %v3250_v6 }
  0xfd   : > { %2356 = vmatprep.subr.bf16.mxu0 %v3253_v7 }
  0xff   : > { %2185 = vmatpush1.bf16.msra.mxu1 %v3248_v8 }
 0x100   : > { %2357 = vmatpush1.bf16.msra.mxu0 %v3251_v9  ;;  %2186 = vmatprep.subr.bf16.mxu1 %v3256_v10 }
 0x101   : > { %2358 = vmatprep.subr.bf16.mxu0 %v3259_v11 }
 0x103   : > { %2187 = vmatpush1.bf16.msra.mxu1 %v3254_v12 }
 0x104   : > { %2359 = vmatpush1.bf16.msra.mxu0 %v3257_v13 }
 0x105   : > { %2371 = vmatprep.subr.bf16.mxu0 %v3268_v14 }
 0x106   : > { %2189 = vmatmul.mubr.bf16.vlgmr.msra.gmra.mrb[0].mxu1 %v3260_v15 }
 0x107   : > { %2361 = vmatmul.mubr.bf16.vlgmr.msra.gmra.mrb[0].mxu0 %v3263_v16 }
 0x108   : > { %2372 = vmatpush1.bf16.msra.mxu0 %v3266_v17  ;;  %2403 = vmatprep.mubr.bf16.mxu0 %v3316_v18 }
 0x109   : > { %2373 = vmatprep.subr.bf16.mxu0 %v3271_v19 }
 0x10c   : > { %2374 = vmatpush1.bf16.msra.mxu0 %v3269_v20 }
 0x10d   : > { %2375 = vmatprep.subr.bf16.mxu0 %v3274_v21 }
 0x110   : > { %2376 = vmatpush1.bf16.msra.mxu0 %v3272_v22 }
 0x111   : > { %2377 = vmatprep.subr.bf16.mxu0 %v3277_v23 }
 0x114   : > { %2378 = vmatpush1.bf16.msra.mxu0 %v3275_v24 }
 0x115   : > { %2379 = vmatprep.subr.bf16.mxu0 %v3280_v25 }
 0x118   : > { %2380 = vmatpush1.bf16.msra.mxu0 %v3278_v26 }
 0x119   : > { %2381 = vmatprep.subr.bf16.mxu0 %v3283_v27 }
 0x11c   : > { %2382 = vmatpush1.bf16.msra.mxu0 %v3281_v28 }
 0x11d   : > { %2383 = vmatprep.subr.bf16.mxu0 %v3286_v29 }
 0x120   : > { %2384 = vmatpush1.bf16.msra.mxu0 %v3284_v30 }
 0x121   : > { %2385 = vmatprep.subr.bf16.mxu0 %v3289_v31 }
 0x124   : > { %2386 = vmatpush1.bf16.msra.mxu0 %v3287_v32 }
 0x125   : > { %2387 = vmatprep.subr.bf16.mxu0 %v3292_v33 }
 0x128   : > { %2388 = vmatpush1.bf16.msra.mxu0 %v3290_v34 }
 0x129   : > { %2389 = vmatprep.subr.bf16.mxu0 %v3295_v35 }
 0x12c   : > { %2390 = vmatpush1.bf16.msra.mxu0 %v3293_v36 }
 0x12d   : > { %2391 = vmatprep.subr.bf16.mxu0 %v3298_v37 }
 0x130   : > { %2392 = vmatpush1.bf16.msra.mxu0 %v3296_v38 }
 0x131   : > { %2393 = vmatprep.subr.bf16.mxu0 %v3301_v39 }
 0x134   : > { %2394 = vmatpush1.bf16.msra.mxu0 %v3299_v40 }
 0x135   : > { %2395 = vmatprep.subr.bf16.mxu0 %v3304_v41 }
 0x138   : > { %2396 = vmatpush1.bf16.msra.mxu0 %v3302_v42 }
 0x139   : > { %2397 = vmatprep.subr.bf16.mxu0 %v3307_v43 }
 0x13c   : > { %2398 = vmatpush1.bf16.msra.mxu0 %v3305_v44 }
 0x13d   : > { %2399 = vmatprep.subr.bf16.mxu0 %v3310_v45 }
 0x140   : > { %2400 = vmatpush1.bf16.msra.mxu0 %v3308_v46 }
 0x141   : > { %2401 = vmatprep.subr.bf16.mxu0 %v3313_v47 }
 0x144   : > { %2402 = vmatpush1.bf16.msra.mxu0 %v3311_v48 }
 0x147   : > { %2404 = vmatmul.mubr.bf16.vlgmr.msra.gmra.mrb[0].mxu0 %v3314_v49 }
 0x1d9   : > { %v2190_v50 = vpop.f32.mrb[0].mxu1 }
 0x1da   : > { %v2192_v51 = vpop.f32.mrb[1].mxu1  ;;  %v2813_v61 = vadd.f32 %v2190_v50, %v490_v59 }
 0x1db   : > { %v2194_v52 = vpop.f32.mrb[2].mxu1  ;;  %v2815_v62 = vadd.f32 %v2192_v51, %v494_v60 }
 0x1dc   : > { %v2196_v53 = vpop.f32.mrb[3].mxu1  ;;  %v2817_v0 = vadd.f32 %v2194_v52, %v490_v59 }
 0x1dd   : > { %v2819_v3 = vadd.f32 %v2196_v53, %v494_v60 }
 0x21a   : > { %v2405_v63 = vpop.f32.mrb[0].mxu0 }
 0x21b   : > { %v2814_v1 = vadd.f32 %v2813_v61, %v2405_v63  ;;  %v2407_v2 = vpop.f32.mrb[1].mxu0 }
 0x21c   : > { %v2816_v4 = vadd.f32 %v2815_v62, %v2407_v2  ;;  %v2409_v5 = vpop.f32.mrb[2].mxu0 }
 0x21d   : > { %v2414_v6 = vmax.f32 %v2814_v1, 0.0  ;;  %v2818_v7 = vadd.f32 %v2817_v0, %v2409_v5  ;;  %v2411_v8 = vpop.f32.mrb[3].mxu0 }
 0x21e   : > { %v2415_v9 = vmax.f32 %v2816_v4, 0.0  ;;  %v2820_v10 = vadd.f32 %v2819_v3, %v2411_v8 }
 0x21f   : > { %v2416_v11 = vmax.f32 %v2818_v7, 0.0 }
 0x220   : > { %v2811_v12 = vpack.c.bf16 %v2415_v9, %v2414_v6  ;;  %v2417_v13 = vmax.f32 %v2820_v10, 0.0 }
 0x222   : > { %2430 = vst [vmem:[%s177_s18] sm:$0xff] %v2811_v12  ;;  %v2812_v14 = vpack.c.bf16 %v2417_v13, %v2416_v11 }
 0x224   : > { %2431 = vst [vmem:[%s177_s18 + $0x8] sm:$0xff] %v2812_v14 }
 0x225 PF: > { %s13_s12 = sadd.s32 1, %s3323_s12  }
 0x226   : > { %p10_p4 = scmp.ge.s32.totalorder %s13_s12, 4  }
 0x228   :  { %12 = sbr.rel (!%p10_p4) target bundleno = 1 (0x1), region = 62 }

</bundles_post_ra>
